<compile_context>
chip_gen: v7x
topology: tpu7x:2x2x1
jax: 0.10.0
libtpu: 0.0.40
codegen_flags: <defaults>
</compile_context>

<pallas_src>
import jax
import jax.numpy as jnp
import numpy as np
from jax.experimental import pallas as pl
from jax.experimental.pallas import tpu as pltpu

CLS_TOKEN_ID = 0  # roberta-base tokenizer.cls_token_id == 0 (hard-coded, no tokenizer dep)
NEG_BIG = -1e9    # bias for padded vocab columns (keeps them out of max/argmax)
# TODO(synk): PyTorch draws teacher-forcing decisions with python random.random()
# per step; replaced by a deterministic jax.random Bernoulli mask (tf_mask input).


def _lstm_step(x, h, c, wih, whh, b):
    """PyTorch LSTMCell semantics, gate order (i, f, g, o); b = b_ih + b_hh."""
    H = h.shape[-1]
    gates = (jnp.dot(x, wih, preferred_element_type=jnp.float32)
             + jnp.dot(h, whh, preferred_element_type=jnp.float32)
             + b)
    i = jax.nn.sigmoid(gates[:, 0 * H:1 * H])
    f = jax.nn.sigmoid(gates[:, 1 * H:2 * H])
    g = jnp.tanh(gates[:, 2 * H:3 * H])
    o = jax.nn.sigmoid(gates[:, 3 * H:4 * H])
    c_new = f * c + i * g
    h_new = o * jnp.tanh(c_new)
    return h_new, c_new


# --------------------------- fused seq2seq kernel --------------------------- #
def seq2seq_kernel(tf_ref,                      # SMEM scalar prefetch: (T,) int32 teacher-force flags
                   src_emb_ref, trg_emb_ref,
                   enc_wih_ref, enc_whh_ref, enc_b_ref,
                   dec_emb_ref, dec_wih_ref, dec_whh_ref, dec_b_ref,
                   wfc_ref, bfc_ref,
                   out_ref):
    S, B, E = src_emb_ref.shape
    T = trg_emb_ref.shape[0]
    H = enc_whh_ref.shape[0]
    Vp = wfc_ref.shape[1]

    enc_wih = enc_wih_ref[...]
    enc_whh = enc_whh_ref[...]
    enc_b = enc_b_ref[...]

    # ---- encoder: statically unrolled LSTM over the source sequence ----
    h = jnp.zeros((B, H), jnp.float32)
    c = jnp.zeros((B, H), jnp.float32)
    pos = jax.lax.broadcasted_iota(jnp.int32, (B, S, H), 1)
    enc = jnp.zeros((B, S, H), jnp.float32)          # encoder outputs, never leave the chip
    for s in range(S):
        h, c = _lstm_step(src_emb_ref[s], h, c, enc_wih, enc_whh, enc_b)
        enc = enc + jnp.where(pos == s, h[:, None, :], 0.0)

    # ---- decoder: statically unrolled attention-LSTM over target steps ----
    dec_emb = dec_emb_ref[...]                       # (Vp, E), zero rows past the real vocab
    dec_wih = dec_wih_ref[...]
    dec_whh = dec_whh_ref[...]
    dec_b = dec_b_ref[...]
    wfc_h = wfc_ref[0:H, :]                          # fc weight, hidden half   (H, Vp)
    wfc_c = wfc_ref[H:2 * H, :]                      # fc weight, context half  (H, Vp)
    bfc = bfc_ref[...]                               # (1, Vp); NEG_BIG on padded columns

    lane = jax.lax.broadcasted_iota(jnp.int32, (B, Vp), 1)
    # initial decoder input: <cls> embedding, broadcast over the batch
    x = jnp.broadcast_to(dec_emb[CLS_TOKEN_ID:CLS_TOKEN_ID + 1, :], (B, E))

    for t in range(T):
        h, c = _lstm_step(x, h, c, dec_wih, dec_whh, dec_b)

        # dot-product attention on the MXU (flash 'bqh,bkh->bqk' pattern, q-tile of 1)
        scores = jnp.einsum('bqh,bkh->bqk', h[:, None, :], enc,
                            preferred_element_type=jnp.float32)          # (B,1,S)
        scores = scores - jnp.max(scores, axis=-1, keepdims=True)
        e = jnp.exp(scores)
        attn = e / jnp.sum(e, axis=-1, keepdims=True)
        ctx = jnp.einsum('bqk,bkh->bqh', attn, enc,
                         preferred_element_type=jnp.float32)[:, 0, :]     # (B,H)

        # vocab projection over the lane-padded vocab (== [h;ctx] @ W_fc + b)
        logits = (jnp.dot(h, wfc_h, preferred_element_type=jnp.float32)
                  + jnp.dot(ctx, wfc_c, preferred_element_type=jnp.float32)
                  + bfc)                                                  # (B,Vp), lane-dense
        out_ref[t] = logits

        # greedy argmax (first max, like torch.argmax) -> one-hot -> embedding (MXU)
        m = jnp.max(logits, axis=-1, keepdims=True)
        first_max = jnp.min(jnp.where(logits == m, lane, Vp), axis=-1, keepdims=True)
        top1_oh = (lane == first_max).astype(jnp.float32)                 # (B,Vp)
        x_greedy = jnp.dot(top1_oh, dec_emb, preferred_element_type=jnp.float32)  # (B,E)

        tf = tf_ref[t]                                # per-step teacher-forcing flag (SMEM scalar)
        x = jnp.where(tf == 1, trg_emb_ref[t], x_greedy)


# --------------------------------- wrapper ---------------------------------- #
def improved_seq2seq_forward(params, src, trg, tf_mask):
    B, S = src.shape
    T = trg.shape[1]
    E = params['enc_emb'].shape[1]
    H = params['enc_whh'].shape[0]
    V = params['dec_fc_w'].shape[1]
    Vp = ((V + 127) // 128) * 128                     # lane-dense padded vocab

    # embedding gathers stay in XLA (glue); sequences go time-major
    src_emb = jnp.transpose(params['enc_emb'][src], (1, 0, 2)).astype(jnp.float32)  # (S,B,E)
    trg_emb = jnp.transpose(params['dec_emb'][trg], (1, 0, 2)).astype(jnp.float32)  # (T,B,E)

    # pad vocab-sized operands to Vp lanes; padded logits get a -1e9 bias so the
    # greedy argmax can never select them; padded embedding rows are zero.
    dec_emb_p = jnp.zeros((Vp, E), jnp.float32).at[:V, :].set(params['dec_emb'])
    wfc_p = jnp.zeros((2 * H, Vp), jnp.float32).at[:, :V].set(params['dec_fc_w'])
    bfc_p = jnp.full((1, Vp), NEG_BIG, jnp.float32).at[:, :V].set(params['dec_fc_b'])

    out_tbv = pl.pallas_call(
        seq2seq_kernel,
        out_shape=jax.ShapeDtypeStruct((T, B, Vp), jnp.float32),
        grid_spec=pltpu.PrefetchScalarGridSpec(
            num_scalar_prefetch=1,
            grid=(1,),
            in_specs=[
                pl.BlockSpec((S, B, E), lambda i, tf: (0, 0, 0)),
                pl.BlockSpec((T, B, E), lambda i, tf: (0, 0, 0)),
                pl.BlockSpec((E, 4 * H), lambda i, tf: (0, 0)),
                pl.BlockSpec((H, 4 * H), lambda i, tf: (0, 0)),
                pl.BlockSpec((1, 4 * H), lambda i, tf: (0, 0)),
                pl.BlockSpec((Vp, E), lambda i, tf: (0, 0)),
                pl.BlockSpec((E, 4 * H), lambda i, tf: (0, 0)),
                pl.BlockSpec((H, 4 * H), lambda i, tf: (0, 0)),
                pl.BlockSpec((1, 4 * H), lambda i, tf: (0, 0)),
                pl.BlockSpec((2 * H, Vp), lambda i, tf: (0, 0)),
                pl.BlockSpec((1, Vp), lambda i, tf: (0, 0)),
            ],
            out_specs=pl.BlockSpec((T, B, Vp), lambda i, tf: (0, 0, 0))),
        compiler_params=pltpu.CompilerParams(dimension_semantics=("arbitrary",)),
    )(tf_mask, src_emb, trg_emb,
      params['enc_wih'], params['enc_whh'], params['enc_b'],
      dec_emb_p, params['dec_wih'], params['dec_whh'], params['dec_b'],
      wfc_p, bfc_p)

    return jnp.transpose(out_tbv[:, :, :V], (1, 0, 2))        # (B, T, V)


# ---------------------------- pure-JAX reference ----------------------------- #
def reference_forward(params, src, trg, tf_mask):
    B, S = src.shape
    T = trg.shape[1]
    H = params['enc_whh'].shape[0]

    def lstm(x, h, c, wih, whh, b):
        g = x @ wih + h @ whh + b
        i = jax.nn.sigmoid(g[:, :H]); f = jax.nn.sigmoid(g[:, H:2 * H])
        gg = jnp.tanh(g[:, 2 * H:3 * H]); o = jax.nn.sigmoid(g[:, 3 * H:])
        c = f * c + i * gg
        return o * jnp.tanh(c), c

    h = jnp.zeros((B, H)); c = jnp.zeros((B, H))
    x_emb = params['enc_emb'][src]
    enc = []
    for s in range(S):
        h, c = lstm(x_emb[:, s], h, c, params['enc_wih'], params['enc_whh'], params['enc_b'])
        enc.append(h)
    enc = jnp.stack(enc, axis=1)

    outs = []
    dec_in = jnp.full((B,), CLS_TOKEN_ID, jnp.int32)
    for t in range(T):
        x = params['dec_emb'][dec_in]
        h, c = lstm(x, h, c, params['dec_wih'], params['dec_whh'], params['dec_b'])
        scores = jnp.einsum('bsh,bh->bs', enc, h)
        attn = jax.nn.softmax(scores, axis=-1)
        ctx = jnp.einsum('bs,bsh->bh', attn, enc)
        logits = jnp.concatenate([h, ctx], -1) @ params['dec_fc_w'] + params['dec_fc_b']
        outs.append(logits)
        top1 = jnp.argmax(logits, -1).astype(jnp.int32)
        dec_in = jnp.where(tf_mask[t] == 1, trg[:, t], top1)
    return jnp.stack(outs, axis=1)


if __name__ == "__main__":
    B, S, T = 8, 8, 8          # batch, src len, trg len
    E, H = 32, 32              # embedding, hidden
    V_SRC, V = 64, 64          # source vocab, target vocab (decoder.fc.out_features)

    key = jax.random.PRNGKey(0)
    ks = jax.random.split(key, 13)
    sc = 0.1
    params = {
        'enc_emb':  sc * jax.random.normal(ks[0], (V_SRC, E), jnp.float32),
        'enc_wih':  sc * jax.random.normal(ks[1], (E, 4 * H), jnp.float32),
        'enc_whh':  sc * jax.random.normal(ks[2], (H, 4 * H), jnp.float32),
        'enc_b':    sc * jax.random.normal(ks[3], (1, 4 * H), jnp.float32),
        'dec_emb':  sc * jax.random.normal(ks[4], (V, E), jnp.float32),
        'dec_wih':  sc * jax.random.normal(ks[5], (E, 4 * H), jnp.float32),
        'dec_whh':  sc * jax.random.normal(ks[6], (H, 4 * H), jnp.float32),
        'dec_b':    sc * jax.random.normal(ks[7], (1, 4 * H), jnp.float32),
        'dec_fc_w': sc * jax.random.normal(ks[8], (2 * H, V), jnp.float32),
        'dec_fc_b': sc * jax.random.normal(ks[9], (1, V), jnp.float32),
    }
    src = jax.random.randint(ks[10], (B, S), 0, V_SRC, jnp.int32)
    trg = jax.random.randint(ks[11], (B, T), 0, V, jnp.int32)
    # deterministic teacher-forcing decisions (ratio = 0.5)
    tf_mask = (jax.random.uniform(ks[12], (T,)) < 0.5).astype(jnp.int32)

    out = jax.jit(improved_seq2seq_forward)(params, src, trg, tf_mask)
    out = jax.block_until_ready(out)

    ref = reference_forward(params, src, trg, tf_mask)
    np.testing.assert_allclose(np.asarray(out), np.asarray(ref), rtol=2e-3, atol=2e-3)
    assert out.shape == (B, T, V) and out.dtype == jnp.float32

    print("KERNEL_OK")
</pallas_src>

<mosaic_0001>
module attributes {stable_mosaic.version = 11 : i64} {
  func.func @seq2seq_kernel(%arg0: i32, %arg1: memref<8xi32, #tpu.memory_space<smem>>, %arg2: memref<8x8x32xf32, #tpu.memory_space<vmem>>, %arg3: memref<8x8x32xf32, #tpu.memory_space<vmem>>, %arg4: memref<32x128xf32, #tpu.memory_space<vmem>>, %arg5: memref<32x128xf32, #tpu.memory_space<vmem>>, %arg6: memref<1x128xf32, #tpu.memory_space<vmem>>, %arg7: memref<128x32xf32, #tpu.memory_space<vmem>>, %arg8: memref<32x128xf32, #tpu.memory_space<vmem>>, %arg9: memref<32x128xf32, #tpu.memory_space<vmem>>, %arg10: memref<1x128xf32, #tpu.memory_space<vmem>>, %arg11: memref<64x128xf32, #tpu.memory_space<vmem>>, %arg12: memref<1x128xf32, #tpu.memory_space<vmem>>, %arg13: memref<8x8x128xf32, #tpu.memory_space<vmem>>) attributes {dimension_semantics = [#tpu.dimension_semantics<arbitrary>], iteration_bounds = array<i64: 1>, scalar_prefetch = 1 : i64, scratch_operands = 0 : i64, tpu.core_type = #tpu.core_type<tc>, window_params = [{pipeline_mode = #tpu.pipeline_mode<synchronous>, transform_indices = @transform_0, window_bounds = array<i64: 8, 8, 32>}, {pipeline_mode = #tpu.pipeline_mode<synchronous>, transform_indices = @transform_1, window_bounds = array<i64: 8, 8, 32>}, {pipeline_mode = #tpu.pipeline_mode<synchronous>, transform_indices = @transform_2, window_bounds = array<i64: 32, 128>}, {pipeline_mode = #tpu.pipeline_mode<synchronous>, transform_indices = @transform_3, window_bounds = array<i64: 32, 128>}, {pipeline_mode = #tpu.pipeline_mode<synchronous>, transform_indices = @transform_4, window_bounds = array<i64: 1, 128>}, {pipeline_mode = #tpu.pipeline_mode<synchronous>, transform_indices = @transform_5, window_bounds = array<i64: 128, 32>}, {pipeline_mode = #tpu.pipeline_mode<synchronous>, transform_indices = @transform_6, window_bounds = array<i64: 32, 128>}, {pipeline_mode = #tpu.pipeline_mode<synchronous>, transform_indices = @transform_7, window_bounds = array<i64: 32, 128>}, {pipeline_mode = #tpu.pipeline_mode<synchronous>, transform_indices = @transform_8, window_bounds = array<i64: 1, 128>}, {pipeline_mode = #tpu.pipeline_mode<synchronous>, transform_indices = @transform_9, window_bounds = array<i64: 64, 128>}, {pipeline_mode = #tpu.pipeline_mode<synchronous>, transform_indices = @transform_10, window_bounds = array<i64: 1, 128>}, {pipeline_mode = #tpu.pipeline_mode<synchronous>, transform_indices = @transform_11, window_bounds = array<i64: 8, 8, 128>}]} {
    %c0 = arith.constant 0 : index
    %c0_0 = arith.constant 0 : index
    %0 = vector.load %arg4[%c0, %c0_0] : memref<32x128xf32, #tpu.memory_space<vmem>>, vector<32x128xf32>
    %c0_1 = arith.constant 0 : index
    %c0_2 = arith.constant 0 : index
    %1 = vector.load %arg5[%c0_1, %c0_2] : memref<32x128xf32, #tpu.memory_space<vmem>>, vector<32x128xf32>
    %c0_3 = arith.constant 0 : index
    %c0_4 = arith.constant 0 : index
    %2 = vector.load %arg6[%c0_3, %c0_4] : memref<1x128xf32, #tpu.memory_space<vmem>>, vector<1x128xf32>
    %cst = arith.constant 0.000000e+00 : f32
    %3 = vector.broadcast %cst : f32 to vector<8x32xf32>
    %cst_5 = arith.constant 0.000000e+00 : f32
    %4 = vector.broadcast %cst_5 : f32 to vector<8x32xf32>
    %5 = tpu.iota {dimensions = array<i32: 1>} : vector<8x8x32xi32>
    %cst_6 = arith.constant 0.000000e+00 : f32
    %6 = vector.broadcast %cst_6 : f32 to vector<8x8x32xf32>
    %c0_7 = arith.constant 0 : index
    %c0_8 = arith.constant 0 : index
    %c0_9 = arith.constant 0 : index
    %7 = vector.load %arg2[%c0_7, %c0_8, %c0_9] : memref<8x8x32xf32, #tpu.memory_space<vmem>>, vector<1x8x32xf32>
    %8 = vector.shape_cast %7 : vector<1x8x32xf32> to vector<8x32xf32>
    %cst_10 = arith.constant dense<0.000000e+00> : vector<8x128xf32>
    %9 = tpu.matmul %8, %0, %cst_10 {dimension_numbers = #tpu.dot_dimension_numbers<[1], [0], [0], [1], [0, 0, 1, 1], [], []>} : vector<8x32xf32>, vector<32x128xf32>, vector<8x128xf32> -> vector<8x128xf32>
    %cst_11 = arith.constant dense<0.000000e+00> : vector<8x128xf32>
    %10 = tpu.matmul %3, %1, %cst_11 {dimension_numbers = #tpu.dot_dimension_numbers<[1], [0], [0], [1], [0, 0, 1, 1], [], []>} : vector<8x32xf32>, vector<32x128xf32>, vector<8x128xf32> -> vector<8x128xf32>
    %11 = arith.addf %9, %10 : vector<8x128xf32>
    %12 = vector.broadcast %2 : vector<1x128xf32> to vector<8x128xf32>
    %13 = arith.addf %11, %12 : vector<8x128xf32>
    %14 = vector.extract_strided_slice %13 {offsets = [0, 0], sizes = [8, 32], strides = [1, 1]} : vector<8x128xf32> to vector<8x32xf32>
    %15 = arith.negf %14 : vector<8x32xf32>
    %16 = math.exp %15 : vector<8x32xf32>
    %cst_12 = arith.constant 1.000000e+00 : f32
    %17 = vector.broadcast %cst_12 : f32 to vector<8x32xf32>
    %18 = arith.addf %17, %16 : vector<8x32xf32>
    %19 = arith.divf %17, %18 : vector<8x32xf32>
    %20 = vector.extract_strided_slice %13 {offsets = [0, 32], sizes = [8, 32], strides = [1, 1]} : vector<8x128xf32> to vector<8x32xf32>
    %21 = arith.negf %20 : vector<8x32xf32>
    %22 = math.exp %21 : vector<8x32xf32>
    %cst_13 = arith.constant 1.000000e+00 : f32
    %23 = vector.broadcast %cst_13 : f32 to vector<8x32xf32>
    %24 = arith.addf %23, %22 : vector<8x32xf32>
    %25 = arith.divf %23, %24 : vector<8x32xf32>
    %26 = vector.extract_strided_slice %13 {offsets = [0, 64], sizes = [8, 32], strides = [1, 1]} : vector<8x128xf32> to vector<8x32xf32>
    %27 = math.tanh %26 : vector<8x32xf32>
    %28 = vector.extract_strided_slice %13 {offsets = [0, 96], sizes = [8, 32], strides = [1, 1]} : vector<8x128xf32> to vector<8x32xf32>
    %29 = arith.negf %28 : vector<8x32xf32>
    %30 = math.exp %29 : vector<8x32xf32>
    %cst_14 = arith.constant 1.000000e+00 : f32
    %31 = vector.broadcast %cst_14 : f32 to vector<8x32xf32>
    %32 = arith.addf %31, %30 : vector<8x32xf32>
    %33 = arith.divf %31, %32 : vector<8x32xf32>
    %34 = arith.mulf %25, %4 : vector<8x32xf32>
    %35 = arith.mulf %19, %27 : vector<8x32xf32>
    %36 = arith.addf %34, %35 : vector<8x32xf32>
    %37 = math.tanh %36 : vector<8x32xf32>
    %38 = arith.mulf %33, %37 : vector<8x32xf32>
    %c0_i32 = arith.constant 0 : i32
    %39 = vector.broadcast %c0_i32 : i32 to vector<8x8x32xi32>
    %40 = arith.cmpi eq, %5, %39 : vector<8x8x32xi32>
    %41 = vector.shape_cast %38 : vector<8x32xf32> to vector<8x1x32xf32>
    %cst_15 = arith.constant 0.000000e+00 : f32
    %42 = vector.shape_cast %41 : vector<8x1x32xf32> to vector<8x1x32xf32>
    %43 = vector.broadcast %42 : vector<8x1x32xf32> to vector<8x8x32xf32>
    %44 = vector.broadcast %cst_15 : f32 to vector<8x8x32xf32>
    %45 = arith.select %40, %43, %44 : vector<8x8x32xi1>, vector<8x8x32xf32>
    %46 = arith.addf %6, %45 : vector<8x8x32xf32>
    %c1 = arith.constant 1 : index
    %c0_16 = arith.constant 0 : index
    %c0_17 = arith.constant 0 : index
    %47 = vector.load %arg2[%c1, %c0_16, %c0_17] : memref<8x8x32xf32, #tpu.memory_space<vmem>>, vector<1x8x32xf32>
    %48 = vector.shape_cast %47 : vector<1x8x32xf32> to vector<8x32xf32>
    %cst_18 = arith.constant dense<0.000000e+00> : vector<8x128xf32>
    %49 = tpu.matmul %48, %0, %cst_18 {dimension_numbers = #tpu.dot_dimension_numbers<[1], [0], [0], [1], [0, 0, 1, 1], [], []>} : vector<8x32xf32>, vector<32x128xf32>, vector<8x128xf32> -> vector<8x128xf32>
    %cst_19 = arith.constant dense<0.000000e+00> : vector<8x128xf32>
    %50 = tpu.matmul %38, %1, %cst_19 {dimension_numbers = #tpu.dot_dimension_numbers<[1], [0], [0], [1], [0, 0, 1, 1], [], []>} : vector<8x32xf32>, vector<32x128xf32>, vector<8x128xf32> -> vector<8x128xf32>
    %51 = arith.addf %49, %50 : vector<8x128xf32>
    %52 = vector.broadcast %2 : vector<1x128xf32> to vector<8x128xf32>
    %53 = arith.addf %51, %52 : vector<8x128xf32>
    %54 = vector.extract_strided_slice %53 {offsets = [0, 0], sizes = [8, 32], strides = [1, 1]} : vector<8x128xf32> to vector<8x32xf32>
    %55 = arith.negf %54 : vector<8x32xf32>
    %56 = math.exp %55 : vector<8x32xf32>
    %cst_20 = arith.constant 1.000000e+00 : f32
    %57 = vector.broadcast %cst_20 : f32 to vector<8x32xf32>
    %58 = arith.addf %57, %56 : vector<8x32xf32>
    %59 = arith.divf %57, %58 : vector<8x32xf32>
    %60 = vector.extract_strided_slice %53 {offsets = [0, 32], sizes = [8, 32], strides = [1, 1]} : vector<8x128xf32> to vector<8x32xf32>
    %61 = arith.negf %60 : vector<8x32xf32>
    %62 = math.exp %61 : vector<8x32xf32>
    %cst_21 = arith.constant 1.000000e+00 : f32
    %63 = vector.broadcast %cst_21 : f32 to vector<8x32xf32>
    %64 = arith.addf %63, %62 : vector<8x32xf32>
    %65 = arith.divf %63, %64 : vector<8x32xf32>
    %66 = vector.extract_strided_slice %53 {offsets = [0, 64], sizes = [8, 32], strides = [1, 1]} : vector<8x128xf32> to vector<8x32xf32>
    %67 = math.tanh %66 : vector<8x32xf32>
    %68 = vector.extract_strided_slice %53 {offsets = [0, 96], sizes = [8, 32], strides = [1, 1]} : vector<8x128xf32> to vector<8x32xf32>
    %69 = arith.negf %68 : vector<8x32xf32>
    %70 = math.exp %69 : vector<8x32xf32>
    %cst_22 = arith.constant 1.000000e+00 : f32
    %71 = vector.broadcast %cst_22 : f32 to vector<8x32xf32>
    %72 = arith.addf %71, %70 : vector<8x32xf32>
    %73 = arith.divf %71, %72 : vector<8x32xf32>
    %74 = arith.mulf %65, %36 : vector<8x32xf32>
    %75 = arith.mulf %59, %67 : vector<8x32xf32>
    %76 = arith.addf %74, %75 : vector<8x32xf32>
    %77 = math.tanh %76 : vector<8x32xf32>
    %78 = arith.mulf %73, %77 : vector<8x32xf32>
    %c1_i32 = arith.constant 1 : i32
    %79 = vector.broadcast %c1_i32 : i32 to vector<8x8x32xi32>
    %80 = arith.cmpi eq, %5, %79 : vector<8x8x32xi32>
    %81 = vector.shape_cast %78 : vector<8x32xf32> to vector<8x1x32xf32>
    %cst_23 = arith.constant 0.000000e+00 : f32
    %82 = vector.shape_cast %81 : vector<8x1x32xf32> to vector<8x1x32xf32>
    %83 = vector.broadcast %82 : vector<8x1x32xf32> to vector<8x8x32xf32>
    %84 = vector.broadcast %cst_23 : f32 to vector<8x8x32xf32>
    %85 = arith.select %80, %83, %84 : vector<8x8x32xi1>, vector<8x8x32xf32>
    %86 = arith.addf %46, %85 : vector<8x8x32xf32>
    %c2 = arith.constant 2 : index
    %c0_24 = arith.constant 0 : index
    %c0_25 = arith.constant 0 : index
    %87 = vector.load %arg2[%c2, %c0_24, %c0_25] : memref<8x8x32xf32, #tpu.memory_space<vmem>>, vector<1x8x32xf32>
    %88 = vector.shape_cast %87 : vector<1x8x32xf32> to vector<8x32xf32>
    %cst_26 = arith.constant dense<0.000000e+00> : vector<8x128xf32>
    %89 = tpu.matmul %88, %0, %cst_26 {dimension_numbers = #tpu.dot_dimension_numbers<[1], [0], [0], [1], [0, 0, 1, 1], [], []>} : vector<8x32xf32>, vector<32x128xf32>, vector<8x128xf32> -> vector<8x128xf32>
    %cst_27 = arith.constant dense<0.000000e+00> : vector<8x128xf32>
    %90 = tpu.matmul %78, %1, %cst_27 {dimension_numbers = #tpu.dot_dimension_numbers<[1], [0], [0], [1], [0, 0, 1, 1], [], []>} : vector<8x32xf32>, vector<32x128xf32>, vector<8x128xf32> -> vector<8x128xf32>
    %91 = arith.addf %89, %90 : vector<8x128xf32>
    %92 = vector.broadcast %2 : vector<1x128xf32> to vector<8x128xf32>
    %93 = arith.addf %91, %92 : vector<8x128xf32>
    %94 = vector.extract_strided_slice %93 {offsets = [0, 0], sizes = [8, 32], strides = [1, 1]} : vector<8x128xf32> to vector<8x32xf32>
    %95 = arith.negf %94 : vector<8x32xf32>
    %96 = math.exp %95 : vector<8x32xf32>
    %cst_28 = arith.constant 1.000000e+00 : f32
    %97 = vector.broadcast %cst_28 : f32 to vector<8x32xf32>
    %98 = arith.addf %97, %96 : vector<8x32xf32>
    %99 = arith.divf %97, %98 : vector<8x32xf32>
    %100 = vector.extract_strided_slice %93 {offsets = [0, 32], sizes = [8, 32], strides = [1, 1]} : vector<8x128xf32> to vector<8x32xf32>
    %101 = arith.negf %100 : vector<8x32xf32>
    %102 = math.exp %101 : vector<8x32xf32>
    %cst_29 = arith.constant 1.000000e+00 : f32
    %103 = vector.broadcast %cst_29 : f32 to vector<8x32xf32>
    %104 = arith.addf %103, %102 : vector<8x32xf32>
    %105 = arith.divf %103, %104 : vector<8x32xf32>
    %106 = vector.extract_strided_slice %93 {offsets = [0, 64], sizes = [8, 32], strides = [1, 1]} : vector<8x128xf32> to vector<8x32xf32>
    %107 = math.tanh %106 : vector<8x32xf32>
    %108 = vector.extract_strided_slice %93 {offsets = [0, 96], sizes = [8, 32], strides = [1, 1]} : vector<8x128xf32> to vector<8x32xf32>
    %109 = arith.negf %108 : vector<8x32xf32>
    %110 = math.exp %109 : vector<8x32xf32>
    %cst_30 = arith.constant 1.000000e+00 : f32
    %111 = vector.broadcast %cst_30 : f32 to vector<8x32xf32>
    %112 = arith.addf %111, %110 : vector<8x32xf32>
    %113 = arith.divf %111, %112 : vector<8x32xf32>
    %114 = arith.mulf %105, %76 : vector<8x32xf32>
    %115 = arith.mulf %99, %107 : vector<8x32xf32>
    %116 = arith.addf %114, %115 : vector<8x32xf32>
    %117 = math.tanh %116 : vector<8x32xf32>
    %118 = arith.mulf %113, %117 : vector<8x32xf32>
    %c2_i32 = arith.constant 2 : i32
    %119 = vector.broadcast %c2_i32 : i32 to vector<8x8x32xi32>
    %120 = arith.cmpi eq, %5, %119 : vector<8x8x32xi32>
    %121 = vector.shape_cast %118 : vector<8x32xf32> to vector<8x1x32xf32>
    %cst_31 = arith.constant 0.000000e+00 : f32
    %122 = vector.shape_cast %121 : vector<8x1x32xf32> to vector<8x1x32xf32>
    %123 = vector.broadcast %122 : vector<8x1x32xf32> to vector<8x8x32xf32>
    %124 = vector.broadcast %cst_31 : f32 to vector<8x8x32xf32>
    %125 = arith.select %120, %123, %124 : vector<8x8x32xi1>, vector<8x8x32xf32>
    %126 = arith.addf %86, %125 : vector<8x8x32xf32>
    %c3 = arith.constant 3 : index
    %c0_32 = arith.constant 0 : index
    %c0_33 = arith.constant 0 : index
    %127 = vector.load %arg2[%c3, %c0_32, %c0_33] : memref<8x8x32xf32, #tpu.memory_space<vmem>>, vector<1x8x32xf32>
    %128 = vector.shape_cast %127 : vector<1x8x32xf32> to vector<8x32xf32>
    %cst_34 = arith.constant dense<0.000000e+00> : vector<8x128xf32>
    %129 = tpu.matmul %128, %0, %cst_34 {dimension_numbers = #tpu.dot_dimension_numbers<[1], [0], [0], [1], [0, 0, 1, 1], [], []>} : vector<8x32xf32>, vector<32x128xf32>, vector<8x128xf32> -> vector<8x128xf32>
    %cst_35 = arith.constant dense<0.000000e+00> : vector<8x128xf32>
    %130 = tpu.matmul %118, %1, %cst_35 {dimension_numbers = #tpu.dot_dimension_numbers<[1], [0], [0], [1], [0, 0, 1, 1], [], []>} : vector<8x32xf32>, vector<32x128xf32>, vector<8x128xf32> -> vector<8x128xf32>
    %131 = arith.addf %129, %130 : vector<8x128xf32>
    %132 = vector.broadcast %2 : vector<1x128xf32> to vector<8x128xf32>
    %133 = arith.addf %131, %132 : vector<8x128xf32>
    %134 = vector.extract_strided_slice %133 {offsets = [0, 0], sizes = [8, 32], strides = [1, 1]} : vector<8x128xf32> to vector<8x32xf32>
    %135 = arith.negf %134 : vector<8x32xf32>
    %136 = math.exp %135 : vector<8x32xf32>
    %cst_36 = arith.constant 1.000000e+00 : f32
    %137 = vector.broadcast %cst_36 : f32 to vector<8x32xf32>
    %138 = arith.addf %137, %136 : vector<8x32xf32>
    %139 = arith.divf %137, %138 : vector<8x32xf32>
    %140 = vector.extract_strided_slice %133 {offsets = [0, 32], sizes = [8, 32], strides = [1, 1]} : vector<8x128xf32> to vector<8x32xf32>
    %141 = arith.negf %140 : vector<8x32xf32>
    %142 = math.exp %141 : vector<8x32xf32>
    %cst_37 = arith.constant 1.000000e+00 : f32
    %143 = vector.broadcast %cst_37 : f32 to vector<8x32xf32>
    %144 = arith.addf %143, %142 : vector<8x32xf32>
    %145 = arith.divf %143, %144 : vector<8x32xf32>
    %146 = vector.extract_strided_slice %133 {offsets = [0, 64], sizes = [8, 32], strides = [1, 1]} : vector<8x128xf32> to vector<8x32xf32>
    %147 = math.tanh %146 : vector<8x32xf32>
    %148 = vector.extract_strided_slice %133 {offsets = [0, 96], sizes = [8, 32], strides = [1, 1]} : vector<8x128xf32> to vector<8x32xf32>
    %149 = arith.negf %148 : vector<8x32xf32>
    %150 = math.exp %149 : vector<8x32xf32>
    %cst_38 = arith.constant 1.000000e+00 : f32
    %151 = vector.broadcast %cst_38 : f32 to vector<8x32xf32>
    %152 = arith.addf %151, %150 : vector<8x32xf32>
    %153 = arith.divf %151, %152 : vector<8x32xf32>
    %154 = arith.mulf %145, %116 : vector<8x32xf32>
    %155 = arith.mulf %139, %147 : vector<8x32xf32>
    %156 = arith.addf %154, %155 : vector<8x32xf32>
    %157 = math.tanh %156 : vector<8x32xf32>
    %158 = arith.mulf %153, %157 : vector<8x32xf32>
    %c3_i32 = arith.constant 3 : i32
    %159 = vector.broadcast %c3_i32 : i32 to vector<8x8x32xi32>
    %160 = arith.cmpi eq, %5, %159 : vector<8x8x32xi32>
    %161 = vector.shape_cast %158 : vector<8x32xf32> to vector<8x1x32xf32>
    %cst_39 = arith.constant 0.000000e+00 : f32
    %162 = vector.shape_cast %161 : vector<8x1x32xf32> to vector<8x1x32xf32>
    %163 = vector.broadcast %162 : vector<8x1x32xf32> to vector<8x8x32xf32>
    %164 = vector.broadcast %cst_39 : f32 to vector<8x8x32xf32>
    %165 = arith.select %160, %163, %164 : vector<8x8x32xi1>, vector<8x8x32xf32>
    %166 = arith.addf %126, %165 : vector<8x8x32xf32>
    %c4 = arith.constant 4 : index
    %c0_40 = arith.constant 0 : index
    %c0_41 = arith.constant 0 : index
    %167 = vector.load %arg2[%c4, %c0_40, %c0_41] : memref<8x8x32xf32, #tpu.memory_space<vmem>>, vector<1x8x32xf32>
    %168 = vector.shape_cast %167 : vector<1x8x32xf32> to vector<8x32xf32>
    %cst_42 = arith.constant dense<0.000000e+00> : vector<8x128xf32>
    %169 = tpu.matmul %168, %0, %cst_42 {dimension_numbers = #tpu.dot_dimension_numbers<[1], [0], [0], [1], [0, 0, 1, 1], [], []>} : vector<8x32xf32>, vector<32x128xf32>, vector<8x128xf32> -> vector<8x128xf32>
    %cst_43 = arith.constant dense<0.000000e+00> : vector<8x128xf32>
    %170 = tpu.matmul %158, %1, %cst_43 {dimension_numbers = #tpu.dot_dimension_numbers<[1], [0], [0], [1], [0, 0, 1, 1], [], []>} : vector<8x32xf32>, vector<32x128xf32>, vector<8x128xf32> -> vector<8x128xf32>
    %171 = arith.addf %169, %170 : vector<8x128xf32>
    %172 = vector.broadcast %2 : vector<1x128xf32> to vector<8x128xf32>
    %173 = arith.addf %171, %172 : vector<8x128xf32>
    %174 = vector.extract_strided_slice %173 {offsets = [0, 0], sizes = [8, 32], strides = [1, 1]} : vector<8x128xf32> to vector<8x32xf32>
    %175 = arith.negf %174 : vector<8x32xf32>
    %176 = math.exp %175 : vector<8x32xf32>
    %cst_44 = arith.constant 1.000000e+00 : f32
    %177 = vector.broadcast %cst_44 : f32 to vector<8x32xf32>
    %178 = arith.addf %177, %176 : vector<8x32xf32>
    %179 = arith.divf %177, %178 : vector<8x32xf32>
    %180 = vector.extract_strided_slice %173 {offsets = [0, 32], sizes = [8, 32], strides = [1, 1]} : vector<8x128xf32> to vector<8x32xf32>
    %181 = arith.negf %180 : vector<8x32xf32>
    %182 = math.exp %181 : vector<8x32xf32>
    %cst_45 = arith.constant 1.000000e+00 : f32
    %183 = vector.broadcast %cst_45 : f32 to vector<8x32xf32>
    %184 = arith.addf %183, %182 : vector<8x32xf32>
    %185 = arith.divf %183, %184 : vector<8x32xf32>
    %186 = vector.extract_strided_slice %173 {offsets = [0, 64], sizes = [8, 32], strides = [1, 1]} : vector<8x128xf32> to vector<8x32xf32>
    %187 = math.tanh %186 : vector<8x32xf32>
    %188 = vector.extract_strided_slice %173 {offsets = [0, 96], sizes = [8, 32], strides = [1, 1]} : vector<8x128xf32> to vector<8x32xf32>
    %189 = arith.negf %188 : vector<8x32xf32>
    %190 = math.exp %189 : vector<8x32xf32>
    %cst_46 = arith.constant 1.000000e+00 : f32
    %191 = vector.broadcast %cst_46 : f32 to vector<8x32xf32>
    %192 = arith.addf %191, %190 : vector<8x32xf32>
    %193 = arith.divf %191, %192 : vector<8x32xf32>
    %194 = arith.mulf %185, %156 : vector<8x32xf32>
    %195 = arith.mulf %179, %187 : vector<8x32xf32>
    %196 = arith.addf %194, %195 : vector<8x32xf32>
    %197 = math.tanh %196 : vector<8x32xf32>
    %198 = arith.mulf %193, %197 : vector<8x32xf32>
    %c4_i32 = arith.constant 4 : i32
    %199 = vector.broadcast %c4_i32 : i32 to vector<8x8x32xi32>
    %200 = arith.cmpi eq, %5, %199 : vector<8x8x32xi32>
    %201 = vector.shape_cast %198 : vector<8x32xf32> to vector<8x1x32xf32>
    %cst_47 = arith.constant 0.000000e+00 : f32
    %202 = vector.shape_cast %201 : vector<8x1x32xf32> to vector<8x1x32xf32>
    %203 = vector.broadcast %202 : vector<8x1x32xf32> to vector<8x8x32xf32>
    %204 = vector.broadcast %cst_47 : f32 to vector<8x8x32xf32>
    %205 = arith.select %200, %203, %204 : vector<8x8x32xi1>, vector<8x8x32xf32>
    %206 = arith.addf %166, %205 : vector<8x8x32xf32>
    %c5 = arith.constant 5 : index
    %c0_48 = arith.constant 0 : index
    %c0_49 = arith.constant 0 : index
    %207 = vector.load %arg2[%c5, %c0_48, %c0_49] : memref<8x8x32xf32, #tpu.memory_space<vmem>>, vector<1x8x32xf32>
    %208 = vector.shape_cast %207 : vector<1x8x32xf32> to vector<8x32xf32>
    %cst_50 = arith.constant dense<0.000000e+00> : vector<8x128xf32>
    %209 = tpu.matmul %208, %0, %cst_50 {dimension_numbers = #tpu.dot_dimension_numbers<[1], [0], [0], [1], [0, 0, 1, 1], [], []>} : vector<8x32xf32>, vector<32x128xf32>, vector<8x128xf32> -> vector<8x128xf32>
    %cst_51 = arith.constant dense<0.000000e+00> : vector<8x128xf32>
    %210 = tpu.matmul %198, %1, %cst_51 {dimension_numbers = #tpu.dot_dimension_numbers<[1], [0], [0], [1], [0, 0, 1, 1], [], []>} : vector<8x32xf32>, vector<32x128xf32>, vector<8x128xf32> -> vector<8x128xf32>
    %211 = arith.addf %209, %210 : vector<8x128xf32>
    %212 = vector.broadcast %2 : vector<1x128xf32> to vector<8x128xf32>
    %213 = arith.addf %211, %212 : vector<8x128xf32>
    %214 = vector.extract_strided_slice %213 {offsets = [0, 0], sizes = [8, 32], strides = [1, 1]} : vector<8x128xf32> to vector<8x32xf32>
    %215 = arith.negf %214 : vector<8x32xf32>
    %216 = math.exp %215 : vector<8x32xf32>
    %cst_52 = arith.constant 1.000000e+00 : f32
    %217 = vector.broadcast %cst_52 : f32 to vector<8x32xf32>
    %218 = arith.addf %217, %216 : vector<8x32xf32>
    %219 = arith.divf %217, %218 : vector<8x32xf32>
    %220 = vector.extract_strided_slice %213 {offsets = [0, 32], sizes = [8, 32], strides = [1, 1]} : vector<8x128xf32> to vector<8x32xf32>
    %221 = arith.negf %220 : vector<8x32xf32>
    %222 = math.exp %221 : vector<8x32xf32>
    %cst_53 = arith.constant 1.000000e+00 : f32
    %223 = vector.broadcast %cst_53 : f32 to vector<8x32xf32>
    %224 = arith.addf %223, %222 : vector<8x32xf32>
    %225 = arith.divf %223, %224 : vector<8x32xf32>
    %226 = vector.extract_strided_slice %213 {offsets = [0, 64], sizes = [8, 32], strides = [1, 1]} : vector<8x128xf32> to vector<8x32xf32>
    %227 = math.tanh %226 : vector<8x32xf32>
    %228 = vector.extract_strided_slice %213 {offsets = [0, 96], sizes = [8, 32], strides = [1, 1]} : vector<8x128xf32> to vector<8x32xf32>
    %229 = arith.negf %228 : vector<8x32xf32>
    %230 = math.exp %229 : vector<8x32xf32>
    %cst_54 = arith.constant 1.000000e+00 : f32
    %231 = vector.broadcast %cst_54 : f32 to vector<8x32xf32>
    %232 = arith.addf %231, %230 : vector<8x32xf32>
    %233 = arith.divf %231, %232 : vector<8x32xf32>
    %234 = arith.mulf %225, %196 : vector<8x32xf32>
    %235 = arith.mulf %219, %227 : vector<8x32xf32>
    %236 = arith.addf %234, %235 : vector<8x32xf32>
    %237 = math.tanh %236 : vector<8x32xf32>
    %238 = arith.mulf %233, %237 : vector<8x32xf32>
    %c5_i32 = arith.constant 5 : i32
    %239 = vector.broadcast %c5_i32 : i32 to vector<8x8x32xi32>
    %240 = arith.cmpi eq, %5, %239 : vector<8x8x32xi32>
    %241 = vector.shape_cast %238 : vector<8x32xf32> to vector<8x1x32xf32>
    %cst_55 = arith.constant 0.000000e+00 : f32
    %242 = vector.shape_cast %241 : vector<8x1x32xf32> to vector<8x1x32xf32>
    %243 = vector.broadcast %242 : vector<8x1x32xf32> to vector<8x8x32xf32>
    %244 = vector.broadcast %cst_55 : f32 to vector<8x8x32xf32>
    %245 = arith.select %240, %243, %244 : vector<8x8x32xi1>, vector<8x8x32xf32>
    %246 = arith.addf %206, %245 : vector<8x8x32xf32>
    %c6 = arith.constant 6 : index
    %c0_56 = arith.constant 0 : index
    %c0_57 = arith.constant 0 : index
    %247 = vector.load %arg2[%c6, %c0_56, %c0_57] : memref<8x8x32xf32, #tpu.memory_space<vmem>>, vector<1x8x32xf32>
    %248 = vector.shape_cast %247 : vector<1x8x32xf32> to vector<8x32xf32>
    %cst_58 = arith.constant dense<0.000000e+00> : vector<8x128xf32>
    %249 = tpu.matmul %248, %0, %cst_58 {dimension_numbers = #tpu.dot_dimension_numbers<[1], [0], [0], [1], [0, 0, 1, 1], [], []>} : vector<8x32xf32>, vector<32x128xf32>, vector<8x128xf32> -> vector<8x128xf32>
    %cst_59 = arith.constant dense<0.000000e+00> : vector<8x128xf32>
    %250 = tpu.matmul %238, %1, %cst_59 {dimension_numbers = #tpu.dot_dimension_numbers<[1], [0], [0], [1], [0, 0, 1, 1], [], []>} : vector<8x32xf32>, vector<32x128xf32>, vector<8x128xf32> -> vector<8x128xf32>
    %251 = arith.addf %249, %250 : vector<8x128xf32>
    %252 = vector.broadcast %2 : vector<1x128xf32> to vector<8x128xf32>
    %253 = arith.addf %251, %252 : vector<8x128xf32>
    %254 = vector.extract_strided_slice %253 {offsets = [0, 0], sizes = [8, 32], strides = [1, 1]} : vector<8x128xf32> to vector<8x32xf32>
    %255 = arith.negf %254 : vector<8x32xf32>
    %256 = math.exp %255 : vector<8x32xf32>
    %cst_60 = arith.constant 1.000000e+00 : f32
    %257 = vector.broadcast %cst_60 : f32 to vector<8x32xf32>
    %258 = arith.addf %257, %256 : vector<8x32xf32>
    %259 = arith.divf %257, %258 : vector<8x32xf32>
    %260 = vector.extract_strided_slice %253 {offsets = [0, 32], sizes = [8, 32], strides = [1, 1]} : vector<8x128xf32> to vector<8x32xf32>
    %261 = arith.negf %260 : vector<8x32xf32>
    %262 = math.exp %261 : vector<8x32xf32>
    %cst_61 = arith.constant 1.000000e+00 : f32
    %263 = vector.broadcast %cst_61 : f32 to vector<8x32xf32>
    %264 = arith.addf %263, %262 : vector<8x32xf32>
    %265 = arith.divf %263, %264 : vector<8x32xf32>
    %266 = vector.extract_strided_slice %253 {offsets = [0, 64], sizes = [8, 32], strides = [1, 1]} : vector<8x128xf32> to vector<8x32xf32>
    %267 = math.tanh %266 : vector<8x32xf32>
    %268 = vector.extract_strided_slice %253 {offsets = [0, 96], sizes = [8, 32], strides = [1, 1]} : vector<8x128xf32> to vector<8x32xf32>
    %269 = arith.negf %268 : vector<8x32xf32>
    %270 = math.exp %269 : vector<8x32xf32>
    %cst_62 = arith.constant 1.000000e+00 : f32
    %271 = vector.broadcast %cst_62 : f32 to vector<8x32xf32>
    %272 = arith.addf %271, %270 : vector<8x32xf32>
    %273 = arith.divf %271, %272 : vector<8x32xf32>
    %274 = arith.mulf %265, %236 : vector<8x32xf32>
    %275 = arith.mulf %259, %267 : vector<8x32xf32>
    %276 = arith.addf %274, %275 : vector<8x32xf32>
    %277 = math.tanh %276 : vector<8x32xf32>
    %278 = arith.mulf %273, %277 : vector<8x32xf32>
    %c6_i32 = arith.constant 6 : i32
    %279 = vector.broadcast %c6_i32 : i32 to vector<8x8x32xi32>
    %280 = arith.cmpi eq, %5, %279 : vector<8x8x32xi32>
    %281 = vector.shape_cast %278 : vector<8x32xf32> to vector<8x1x32xf32>
    %cst_63 = arith.constant 0.000000e+00 : f32
    %282 = vector.shape_cast %281 : vector<8x1x32xf32> to vector<8x1x32xf32>
    %283 = vector.broadcast %282 : vector<8x1x32xf32> to vector<8x8x32xf32>
    %284 = vector.broadcast %cst_63 : f32 to vector<8x8x32xf32>
    %285 = arith.select %280, %283, %284 : vector<8x8x32xi1>, vector<8x8x32xf32>
    %286 = arith.addf %246, %285 : vector<8x8x32xf32>
    %c7 = arith.constant 7 : index
    %c0_64 = arith.constant 0 : index
    %c0_65 = arith.constant 0 : index
    %287 = vector.load %arg2[%c7, %c0_64, %c0_65] : memref<8x8x32xf32, #tpu.memory_space<vmem>>, vector<1x8x32xf32>
    %288 = vector.shape_cast %287 : vector<1x8x32xf32> to vector<8x32xf32>
    %cst_66 = arith.constant dense<0.000000e+00> : vector<8x128xf32>
    %289 = tpu.matmul %288, %0, %cst_66 {dimension_numbers = #tpu.dot_dimension_numbers<[1], [0], [0], [1], [0, 0, 1, 1], [], []>} : vector<8x32xf32>, vector<32x128xf32>, vector<8x128xf32> -> vector<8x128xf32>
    %cst_67 = arith.constant dense<0.000000e+00> : vector<8x128xf32>
    %290 = tpu.matmul %278, %1, %cst_67 {dimension_numbers = #tpu.dot_dimension_numbers<[1], [0], [0], [1], [0, 0, 1, 1], [], []>} : vector<8x32xf32>, vector<32x128xf32>, vector<8x128xf32> -> vector<8x128xf32>
    %291 = arith.addf %289, %290 : vector<8x128xf32>
    %292 = vector.broadcast %2 : vector<1x128xf32> to vector<8x128xf32>
    %293 = arith.addf %291, %292 : vector<8x128xf32>
    %294 = vector.extract_strided_slice %293 {offsets = [0, 0], sizes = [8, 32], strides = [1, 1]} : vector<8x128xf32> to vector<8x32xf32>
    %295 = arith.negf %294 : vector<8x32xf32>
    %296 = math.exp %295 : vector<8x32xf32>
    %cst_68 = arith.constant 1.000000e+00 : f32
    %297 = vector.broadcast %cst_68 : f32 to vector<8x32xf32>
    %298 = arith.addf %297, %296 : vector<8x32xf32>
    %299 = arith.divf %297, %298 : vector<8x32xf32>
    %300 = vector.extract_strided_slice %293 {offsets = [0, 32], sizes = [8, 32], strides = [1, 1]} : vector<8x128xf32> to vector<8x32xf32>
    %301 = arith.negf %300 : vector<8x32xf32>
    %302 = math.exp %301 : vector<8x32xf32>
    %cst_69 = arith.constant 1.000000e+00 : f32
    %303 = vector.broadcast %cst_69 : f32 to vector<8x32xf32>
    %304 = arith.addf %303, %302 : vector<8x32xf32>
    %305 = arith.divf %303, %304 : vector<8x32xf32>
    %306 = vector.extract_strided_slice %293 {offsets = [0, 64], sizes = [8, 32], strides = [1, 1]} : vector<8x128xf32> to vector<8x32xf32>
    %307 = math.tanh %306 : vector<8x32xf32>
    %308 = vector.extract_strided_slice %293 {offsets = [0, 96], sizes = [8, 32], strides = [1, 1]} : vector<8x128xf32> to vector<8x32xf32>
    %309 = arith.negf %308 : vector<8x32xf32>
    %310 = math.exp %309 : vector<8x32xf32>
    %cst_70 = arith.constant 1.000000e+00 : f32
    %311 = vector.broadcast %cst_70 : f32 to vector<8x32xf32>
    %312 = arith.addf %311, %310 : vector<8x32xf32>
    %313 = arith.divf %311, %312 : vector<8x32xf32>
    %314 = arith.mulf %305, %276 : vector<8x32xf32>
    %315 = arith.mulf %299, %307 : vector<8x32xf32>
    %316 = arith.addf %314, %315 : vector<8x32xf32>
    %317 = math.tanh %316 : vector<8x32xf32>
    %318 = arith.mulf %313, %317 : vector<8x32xf32>
    %c7_i32 = arith.constant 7 : i32
    %319 = vector.broadcast %c7_i32 : i32 to vector<8x8x32xi32>
    %320 = arith.cmpi eq, %5, %319 : vector<8x8x32xi32>
    %321 = vector.shape_cast %318 : vector<8x32xf32> to vector<8x1x32xf32>
    %cst_71 = arith.constant 0.000000e+00 : f32
    %322 = vector.shape_cast %321 : vector<8x1x32xf32> to vector<8x1x32xf32>
    %323 = vector.broadcast %322 : vector<8x1x32xf32> to vector<8x8x32xf32>
    %324 = vector.broadcast %cst_71 : f32 to vector<8x8x32xf32>
    %325 = arith.select %320, %323, %324 : vector<8x8x32xi1>, vector<8x8x32xf32>
    %326 = arith.addf %286, %325 : vector<8x8x32xf32>
    %c0_72 = arith.constant 0 : index
    %c0_73 = arith.constant 0 : index
    %327 = vector.load %arg7[%c0_72, %c0_73] : memref<128x32xf32, #tpu.memory_space<vmem>>, vector<128x32xf32>
    %c0_74 = arith.constant 0 : index
    %c0_75 = arith.constant 0 : index
    %328 = vector.load %arg8[%c0_74, %c0_75] : memref<32x128xf32, #tpu.memory_space<vmem>>, vector<32x128xf32>
    %c0_76 = arith.constant 0 : index
    %c0_77 = arith.constant 0 : index
    %329 = vector.load %arg9[%c0_76, %c0_77] : memref<32x128xf32, #tpu.memory_space<vmem>>, vector<32x128xf32>
    %c0_78 = arith.constant 0 : index
    %c0_79 = arith.constant 0 : index
    %330 = vector.load %arg10[%c0_78, %c0_79] : memref<1x128xf32, #tpu.memory_space<vmem>>, vector<1x128xf32>
    %c0_80 = arith.constant 0 : index
    %c0_81 = arith.constant 0 : index
    %331 = vector.load %arg11[%c0_80, %c0_81] : memref<64x128xf32, #tpu.memory_space<vmem>>, vector<32x128xf32>
    %c32 = arith.constant 32 : index
    %c0_82 = arith.constant 0 : index
    %332 = vector.load %arg11[%c32, %c0_82] : memref<64x128xf32, #tpu.memory_space<vmem>>, vector<32x128xf32>
    %c0_83 = arith.constant 0 : index
    %c0_84 = arith.constant 0 : index
    %333 = vector.load %arg12[%c0_83, %c0_84] : memref<1x128xf32, #tpu.memory_space<vmem>>, vector<1x128xf32>
    %334 = tpu.iota {dimensions = array<i32: 1>} : vector<8x128xi32>
    %335 = vector.extract_strided_slice %327 {offsets = [0, 0], sizes = [1, 32], strides = [1, 1]} : vector<128x32xf32> to vector<1x32xf32>
    %336 = vector.shape_cast %335 : vector<1x32xf32> to vector<1x32xf32>
    %337 = vector.broadcast %336 : vector<1x32xf32> to vector<8x32xf32>
    %cst_85 = arith.constant dense<0.000000e+00> : vector<8x128xf32>
    %338 = tpu.matmul %337, %328, %cst_85 {dimension_numbers = #tpu.dot_dimension_numbers<[1], [0], [0], [1], [0, 0, 1, 1], [], []>} : vector<8x32xf32>, vector<32x128xf32>, vector<8x128xf32> -> vector<8x128xf32>
    %cst_86 = arith.constant dense<0.000000e+00> : vector<8x128xf32>
    %339 = tpu.matmul %318, %329, %cst_86 {dimension_numbers = #tpu.dot_dimension_numbers<[1], [0], [0], [1], [0, 0, 1, 1], [], []>} : vector<8x32xf32>, vector<32x128xf32>, vector<8x128xf32> -> vector<8x128xf32>
    %340 = arith.addf %338, %339 : vector<8x128xf32>
    %341 = vector.broadcast %330 : vector<1x128xf32> to vector<8x128xf32>
    %342 = arith.addf %340, %341 : vector<8x128xf32>
    %343 = vector.extract_strided_slice %342 {offsets = [0, 0], sizes = [8, 32], strides = [1, 1]} : vector<8x128xf32> to vector<8x32xf32>
    %344 = arith.negf %343 : vector<8x32xf32>
    %345 = math.exp %344 : vector<8x32xf32>
    %cst_87 = arith.constant 1.000000e+00 : f32
    %346 = vector.broadcast %cst_87 : f32 to vector<8x32xf32>
    %347 = arith.addf %346, %345 : vector<8x32xf32>
    %348 = arith.divf %346, %347 : vector<8x32xf32>
    %349 = vector.extract_strided_slice %342 {offsets = [0, 32], sizes = [8, 32], strides = [1, 1]} : vector<8x128xf32> to vector<8x32xf32>
    %350 = arith.negf %349 : vector<8x32xf32>
    %351 = math.exp %350 : vector<8x32xf32>
    %cst_88 = arith.constant 1.000000e+00 : f32
    %352 = vector.broadcast %cst_88 : f32 to vector<8x32xf32>
    %353 = arith.addf %352, %351 : vector<8x32xf32>
    %354 = arith.divf %352, %353 : vector<8x32xf32>
    %355 = vector.extract_strided_slice %342 {offsets = [0, 64], sizes = [8, 32], strides = [1, 1]} : vector<8x128xf32> to vector<8x32xf32>
    %356 = math.tanh %355 : vector<8x32xf32>
    %357 = vector.extract_strided_slice %342 {offsets = [0, 96], sizes = [8, 32], strides = [1, 1]} : vector<8x128xf32> to vector<8x32xf32>
    %358 = arith.negf %357 : vector<8x32xf32>
    %359 = math.exp %358 : vector<8x32xf32>
    %cst_89 = arith.constant 1.000000e+00 : f32
    %360 = vector.broadcast %cst_89 : f32 to vector<8x32xf32>
    %361 = arith.addf %360, %359 : vector<8x32xf32>
    %362 = arith.divf %360, %361 : vector<8x32xf32>
    %363 = arith.mulf %354, %316 : vector<8x32xf32>
    %364 = arith.mulf %348, %356 : vector<8x32xf32>
    %365 = arith.addf %363, %364 : vector<8x32xf32>
    %366 = math.tanh %365 : vector<8x32xf32>
    %367 = arith.mulf %362, %366 : vector<8x32xf32>
    %368 = vector.shape_cast %367 : vector<8x32xf32> to vector<8x1x32xf32>
    "tpu.trace_start"() <{level = 10 : i32, message = "bqh,bkh->bqk"}> : () -> ()
    %cst_90 = arith.constant dense<0.000000e+00> : vector<8x1x8xf32>
    %369 = tpu.matmul %368, %326, %cst_90 {dimension_numbers = #tpu.dot_dimension_numbers<[2], [2], [1], [1], [0, 0, 0, 1, 1, 1], [0], [0]>} : vector<8x1x32xf32>, vector<8x8x32xf32>, vector<8x1x8xf32> -> vector<8x1x8xf32>
    "tpu.trace_stop"() : () -> ()
    %cst_91 = arith.constant dense<0xFF800000> : vector<8x1xf32>
    %370 = vector.multi_reduction <maximumf>, %369, %cst_91 [2] : vector<8x1x8xf32> to vector<8x1xf32>
    %371 = vector.shape_cast %370 : vector<8x1xf32> to vector<8x1x1xf32>
    %372 = vector.broadcast %371 : vector<8x1x1xf32> to vector<8x1x8xf32>
    %373 = arith.subf %369, %372 : vector<8x1x8xf32>
    %374 = math.exp %373 : vector<8x1x8xf32>
    %cst_92 = arith.constant dense<0.000000e+00> : vector<8x1xf32>
    %375 = vector.multi_reduction <add>, %374, %cst_92 [2] : vector<8x1x8xf32> to vector<8x1xf32>
    %376 = vector.shape_cast %375 : vector<8x1xf32> to vector<8x1x1xf32>
    %377 = vector.broadcast %376 : vector<8x1x1xf32> to vector<8x1x8xf32>
    %378 = arith.divf %374, %377 : vector<8x1x8xf32>
    "tpu.trace_start"() <{level = 10 : i32, message = "bqk,bkh->bqh"}> : () -> ()
    %cst_93 = arith.constant dense<0.000000e+00> : vector<8x1x32xf32>
    %379 = tpu.matmul %378, %326, %cst_93 {dimension_numbers = #tpu.dot_dimension_numbers<[2], [1], [1], [2], [0, 0, 0, 1, 1, 2], [0], [0]>} : vector<8x1x8xf32>, vector<8x8x32xf32>, vector<8x1x32xf32> -> vector<8x1x32xf32>
    "tpu.trace_stop"() : () -> ()
    %380 = vector.shape_cast %379 : vector<8x1x32xf32> to vector<8x32xf32>
    %cst_94 = arith.constant dense<0.000000e+00> : vector<8x128xf32>
    %381 = tpu.matmul %367, %331, %cst_94 {dimension_numbers = #tpu.dot_dimension_numbers<[1], [0], [0], [1], [0, 0, 1, 1], [], []>} : vector<8x32xf32>, vector<32x128xf32>, vector<8x128xf32> -> vector<8x128xf32>
    %cst_95 = arith.constant dense<0.000000e+00> : vector<8x128xf32>
    %382 = tpu.matmul %380, %332, %cst_95 {dimension_numbers = #tpu.dot_dimension_numbers<[1], [0], [0], [1], [0, 0, 1, 1], [], []>} : vector<8x32xf32>, vector<32x128xf32>, vector<8x128xf32> -> vector<8x128xf32>
    %383 = arith.addf %381, %382 : vector<8x128xf32>
    %384 = vector.broadcast %333 : vector<1x128xf32> to vector<8x128xf32>
    %385 = arith.addf %383, %384 : vector<8x128xf32>
    %c0_96 = arith.constant 0 : index
    %c0_97 = arith.constant 0 : index
    %c0_98 = arith.constant 0 : index
    %386 = vector.load %arg13[%c0_96, %c0_97, %c0_98] : memref<8x8x128xf32, #tpu.memory_space<vmem>>, vector<1x8x128xf32>
    %387 = vector.shape_cast %386 : vector<1x8x128xf32> to vector<8x128xf32>
    %388 = vector.shape_cast %385 : vector<8x128xf32> to vector<1x8x128xf32>
    tpu.vector_store %arg13[%c0_96, %c0_97, %c0_98], %388 {strides = array<i32>} : memref<8x8x128xf32, #tpu.memory_space<vmem>>, vector<1x8x128xf32>,
    %cst_99 = arith.constant dense<0xFF800000> : vector<8xf32>
    %389 = vector.multi_reduction <maximumf>, %385, %cst_99 [1] : vector<8x128xf32> to vector<8xf32>
    %390 = vector.shape_cast %389 : vector<8xf32> to vector<8x1xf32>
    %391 = vector.broadcast %390 : vector<8x1xf32> to vector<8x128xf32>
    %392 = arith.cmpf oeq, %385, %391 : vector<8x128xf32>
    %c128_i32 = arith.constant 128 : i32
    %393 = vector.broadcast %c128_i32 : i32 to vector<8x128xi32>
    %394 = arith.select %392, %334, %393 : vector<8x128xi1>, vector<8x128xi32>
    %cst_100 = arith.constant dense<2147483647> : vector<8xi32>
    %395 = vector.multi_reduction <minsi>, %394, %cst_100 [1] : vector<8x128xi32> to vector<8xi32>
    %396 = vector.shape_cast %395 : vector<8xi32> to vector<8x1xi32>
    %397 = vector.broadcast %396 : vector<8x1xi32> to vector<8x128xi32>
    %398 = arith.cmpi eq, %334, %397 : vector<8x128xi32>
    %399 = arith.extui %398 : vector<8x128xi1> to vector<8x128xi32>
    %400 = arith.sitofp %399 : vector<8x128xi32> to vector<8x128xf32>
    %cst_101 = arith.constant dense<0.000000e+00> : vector<8x32xf32>
    %401 = tpu.matmul %400, %327, %cst_101 {dimension_numbers = #tpu.dot_dimension_numbers<[1], [0], [0], [1], [0, 0, 1, 1], [], []>} : vector<8x128xf32>, vector<128x32xf32>, vector<8x32xf32> -> vector<8x32xf32>
    %c0_102 = arith.constant 0 : index
    %402 = memref.load %arg1[%c0_102] : memref<8xi32, #tpu.memory_space<smem>>
    %c1_i32_103 = arith.constant 1 : i32
    %403 = arith.cmpi eq, %402, %c1_i32_103 : i32
    %c0_104 = arith.constant 0 : index
    %c0_105 = arith.constant 0 : index
    %c0_106 = arith.constant 0 : index
    %404 = vector.load %arg3[%c0_104, %c0_105, %c0_106] : memref<8x8x32xf32, #tpu.memory_space<vmem>>, vector<1x8x32xf32>
    %405 = vector.shape_cast %404 : vector<1x8x32xf32> to vector<8x32xf32>
    %406 = arith.select %403, %405, %401 : vector<8x32xf32>
    %cst_107 = arith.constant dense<0.000000e+00> : vector<8x128xf32>
    %407 = tpu.matmul %406, %328, %cst_107 {dimension_numbers = #tpu.dot_dimension_numbers<[1], [0], [0], [1], [0, 0, 1, 1], [], []>} : vector<8x32xf32>, vector<32x128xf32>, vector<8x128xf32> -> vector<8x128xf32>
    %cst_108 = arith.constant dense<0.000000e+00> : vector<8x128xf32>
    %408 = tpu.matmul %367, %329, %cst_108 {dimension_numbers = #tpu.dot_dimension_numbers<[1], [0], [0], [1], [0, 0, 1, 1], [], []>} : vector<8x32xf32>, vector<32x128xf32>, vector<8x128xf32> -> vector<8x128xf32>
    %409 = arith.addf %407, %408 : vector<8x128xf32>
    %410 = vector.broadcast %330 : vector<1x128xf32> to vector<8x128xf32>
    %411 = arith.addf %409, %410 : vector<8x128xf32>
    %412 = vector.extract_strided_slice %411 {offsets = [0, 0], sizes = [8, 32], strides = [1, 1]} : vector<8x128xf32> to vector<8x32xf32>
    %413 = arith.negf %412 : vector<8x32xf32>
    %414 = math.exp %413 : vector<8x32xf32>
    %cst_109 = arith.constant 1.000000e+00 : f32
    %415 = vector.broadcast %cst_109 : f32 to vector<8x32xf32>
    %416 = arith.addf %415, %414 : vector<8x32xf32>
    %417 = arith.divf %415, %416 : vector<8x32xf32>
    %418 = vector.extract_strided_slice %411 {offsets = [0, 32], sizes = [8, 32], strides = [1, 1]} : vector<8x128xf32> to vector<8x32xf32>
    %419 = arith.negf %418 : vector<8x32xf32>
    %420 = math.exp %419 : vector<8x32xf32>
    %cst_110 = arith.constant 1.000000e+00 : f32
    %421 = vector.broadcast %cst_110 : f32 to vector<8x32xf32>
    %422 = arith.addf %421, %420 : vector<8x32xf32>
    %423 = arith.divf %421, %422 : vector<8x32xf32>
    %424 = vector.extract_strided_slice %411 {offsets = [0, 64], sizes = [8, 32], strides = [1, 1]} : vector<8x128xf32> to vector<8x32xf32>
    %425 = math.tanh %424 : vector<8x32xf32>
    %426 = vector.extract_strided_slice %411 {offsets = [0, 96], sizes = [8, 32], strides = [1, 1]} : vector<8x128xf32> to vector<8x32xf32>
    %427 = arith.negf %426 : vector<8x32xf32>
    %428 = math.exp %427 : vector<8x32xf32>
    %cst_111 = arith.constant 1.000000e+00 : f32
    %429 = vector.broadcast %cst_111 : f32 to vector<8x32xf32>
    %430 = arith.addf %429, %428 : vector<8x32xf32>
    %431 = arith.divf %429, %430 : vector<8x32xf32>
    %432 = arith.mulf %423, %365 : vector<8x32xf32>
    %433 = arith.mulf %417, %425 : vector<8x32xf32>
    %434 = arith.addf %432, %433 : vector<8x32xf32>
    %435 = math.tanh %434 : vector<8x32xf32>
    %436 = arith.mulf %431, %435 : vector<8x32xf32>
    %437 = vector.shape_cast %436 : vector<8x32xf32> to vector<8x1x32xf32>
    "tpu.trace_start"() <{level = 10 : i32, message = "bqh,bkh->bqk"}> : () -> ()
    %cst_112 = arith.constant dense<0.000000e+00> : vector<8x1x8xf32>
    %438 = tpu.matmul %437, %326, %cst_112 {dimension_numbers = #tpu.dot_dimension_numbers<[2], [2], [1], [1], [0, 0, 0, 1, 1, 1], [0], [0]>} : vector<8x1x32xf32>, vector<8x8x32xf32>, vector<8x1x8xf32> -> vector<8x1x8xf32>
    "tpu.trace_stop"() : () -> ()
    %cst_113 = arith.constant dense<0xFF800000> : vector<8x1xf32>
    %439 = vector.multi_reduction <maximumf>, %438, %cst_113 [2] : vector<8x1x8xf32> to vector<8x1xf32>
    %440 = vector.shape_cast %439 : vector<8x1xf32> to vector<8x1x1xf32>
    %441 = vector.broadcast %440 : vector<8x1x1xf32> to vector<8x1x8xf32>
    %442 = arith.subf %438, %441 : vector<8x1x8xf32>
    %443 = math.exp %442 : vector<8x1x8xf32>
    %cst_114 = arith.constant dense<0.000000e+00> : vector<8x1xf32>
    %444 = vector.multi_reduction <add>, %443, %cst_114 [2] : vector<8x1x8xf32> to vector<8x1xf32>
    %445 = vector.shape_cast %444 : vector<8x1xf32> to vector<8x1x1xf32>
    %446 = vector.broadcast %445 : vector<8x1x1xf32> to vector<8x1x8xf32>
    %447 = arith.divf %443, %446 : vector<8x1x8xf32>
    "tpu.trace_start"() <{level = 10 : i32, message = "bqk,bkh->bqh"}> : () -> ()
    %cst_115 = arith.constant dense<0.000000e+00> : vector<8x1x32xf32>
    %448 = tpu.matmul %447, %326, %cst_115 {dimension_numbers = #tpu.dot_dimension_numbers<[2], [1], [1], [2], [0, 0, 0, 1, 1, 2], [0], [0]>} : vector<8x1x8xf32>, vector<8x8x32xf32>, vector<8x1x32xf32> -> vector<8x1x32xf32>
    "tpu.trace_stop"() : () -> ()
    %449 = vector.shape_cast %448 : vector<8x1x32xf32> to vector<8x32xf32>
    %cst_116 = arith.constant dense<0.000000e+00> : vector<8x128xf32>
    %450 = tpu.matmul %436, %331, %cst_116 {dimension_numbers = #tpu.dot_dimension_numbers<[1], [0], [0], [1], [0, 0, 1, 1], [], []>} : vector<8x32xf32>, vector<32x128xf32>, vector<8x128xf32> -> vector<8x128xf32>
    %cst_117 = arith.constant dense<0.000000e+00> : vector<8x128xf32>
    %451 = tpu.matmul %449, %332, %cst_117 {dimension_numbers = #tpu.dot_dimension_numbers<[1], [0], [0], [1], [0, 0, 1, 1], [], []>} : vector<8x32xf32>, vector<32x128xf32>, vector<8x128xf32> -> vector<8x128xf32>
    %452 = arith.addf %450, %451 : vector<8x128xf32>
    %453 = vector.broadcast %333 : vector<1x128xf32> to vector<8x128xf32>
    %454 = arith.addf %452, %453 : vector<8x128xf32>
    %c1_118 = arith.constant 1 : index
    %c0_119 = arith.constant 0 : index
    %c0_120 = arith.constant 0 : index
    %455 = vector.load %arg13[%c1_118, %c0_119, %c0_120] : memref<8x8x128xf32, #tpu.memory_space<vmem>>, vector<1x8x128xf32>
    %456 = vector.shape_cast %455 : vector<1x8x128xf32> to vector<8x128xf32>
    %457 = vector.shape_cast %454 : vector<8x128xf32> to vector<1x8x128xf32>
    tpu.vector_store %arg13[%c1_118, %c0_119, %c0_120], %457 {strides = array<i32>} : memref<8x8x128xf32, #tpu.memory_space<vmem>>, vector<1x8x128xf32>,
    %cst_121 = arith.constant dense<0xFF800000> : vector<8xf32>
    %458 = vector.multi_reduction <maximumf>, %454, %cst_121 [1] : vector<8x128xf32> to vector<8xf32>
    %459 = vector.shape_cast %458 : vector<8xf32> to vector<8x1xf32>
    %460 = vector.broadcast %459 : vector<8x1xf32> to vector<8x128xf32>
    %461 = arith.cmpf oeq, %454, %460 : vector<8x128xf32>
    %c128_i32_122 = arith.constant 128 : i32
    %462 = vector.broadcast %c128_i32_122 : i32 to vector<8x128xi32>
    %463 = arith.select %461, %334, %462 : vector<8x128xi1>, vector<8x128xi32>
    %cst_123 = arith.constant dense<2147483647> : vector<8xi32>
    %464 = vector.multi_reduction <minsi>, %463, %cst_123 [1] : vector<8x128xi32> to vector<8xi32>
    %465 = vector.shape_cast %464 : vector<8xi32> to vector<8x1xi32>
    %466 = vector.broadcast %465 : vector<8x1xi32> to vector<8x128xi32>
    %467 = arith.cmpi eq, %334, %466 : vector<8x128xi32>
    %468 = arith.extui %467 : vector<8x128xi1> to vector<8x128xi32>
    %469 = arith.sitofp %468 : vector<8x128xi32> to vector<8x128xf32>
    %cst_124 = arith.constant dense<0.000000e+00> : vector<8x32xf32>
    %470 = tpu.matmul %469, %327, %cst_124 {dimension_numbers = #tpu.dot_dimension_numbers<[1], [0], [0], [1], [0, 0, 1, 1], [], []>} : vector<8x128xf32>, vector<128x32xf32>, vector<8x32xf32> -> vector<8x32xf32>
    %c1_125 = arith.constant 1 : index
    %471 = memref.load %arg1[%c1_125] : memref<8xi32, #tpu.memory_space<smem>>
    %c1_i32_126 = arith.constant 1 : i32
    %472 = arith.cmpi eq, %471, %c1_i32_126 : i32
    %c1_127 = arith.constant 1 : index
    %c0_128 = arith.constant 0 : index
    %c0_129 = arith.constant 0 : index
    %473 = vector.load %arg3[%c1_127, %c0_128, %c0_129] : memref<8x8x32xf32, #tpu.memory_space<vmem>>, vector<1x8x32xf32>
    %474 = vector.shape_cast %473 : vector<1x8x32xf32> to vector<8x32xf32>
    %475 = arith.select %472, %474, %470 : vector<8x32xf32>
    %cst_130 = arith.constant dense<0.000000e+00> : vector<8x128xf32>
    %476 = tpu.matmul %475, %328, %cst_130 {dimension_numbers = #tpu.dot_dimension_numbers<[1], [0], [0], [1], [0, 0, 1, 1], [], []>} : vector<8x32xf32>, vector<32x128xf32>, vector<8x128xf32> -> vector<8x128xf32>
    %cst_131 = arith.constant dense<0.000000e+00> : vector<8x128xf32>
    %477 = tpu.matmul %436, %329, %cst_131 {dimension_numbers = #tpu.dot_dimension_numbers<[1], [0], [0], [1], [0, 0, 1, 1], [], []>} : vector<8x32xf32>, vector<32x128xf32>, vector<8x128xf32> -> vector<8x128xf32>
    %478 = arith.addf %476, %477 : vector<8x128xf32>
    %479 = vector.broadcast %330 : vector<1x128xf32> to vector<8x128xf32>
    %480 = arith.addf %478, %479 : vector<8x128xf32>
    %481 = vector.extract_strided_slice %480 {offsets = [0, 0], sizes = [8, 32], strides = [1, 1]} : vector<8x128xf32> to vector<8x32xf32>
    %482 = arith.negf %481 : vector<8x32xf32>
    %483 = math.exp %482 : vector<8x32xf32>
    %cst_132 = arith.constant 1.000000e+00 : f32
    %484 = vector.broadcast %cst_132 : f32 to vector<8x32xf32>
    %485 = arith.addf %484, %483 : vector<8x32xf32>
    %486 = arith.divf %484, %485 : vector<8x32xf32>
    %487 = vector.extract_strided_slice %480 {offsets = [0, 32], sizes = [8, 32], strides = [1, 1]} : vector<8x128xf32> to vector<8x32xf32>
    %488 = arith.negf %487 : vector<8x32xf32>
    %489 = math.exp %488 : vector<8x32xf32>
    %cst_133 = arith.constant 1.000000e+00 : f32
    %490 = vector.broadcast %cst_133 : f32 to vector<8x32xf32>
    %491 = arith.addf %490, %489 : vector<8x32xf32>
    %492 = arith.divf %490, %491 : vector<8x32xf32>
    %493 = vector.extract_strided_slice %480 {offsets = [0, 64], sizes = [8, 32], strides = [1, 1]} : vector<8x128xf32> to vector<8x32xf32>
    %494 = math.tanh %493 : vector<8x32xf32>
    %495 = vector.extract_strided_slice %480 {offsets = [0, 96], sizes = [8, 32], strides = [1, 1]} : vector<8x128xf32> to vector<8x32xf32>
    %496 = arith.negf %495 : vector<8x32xf32>
    %497 = math.exp %496 : vector<8x32xf32>
    %cst_134 = arith.constant 1.000000e+00 : f32
    %498 = vector.broadcast %cst_134 : f32 to vector<8x32xf32>
    %499 = arith.addf %498, %497 : vector<8x32xf32>
    %500 = arith.divf %498, %499 : vector<8x32xf32>
    %501 = arith.mulf %492, %434 : vector<8x32xf32>
    %502 = arith.mulf %486, %494 : vector<8x32xf32>
    %503 = arith.addf %501, %502 : vector<8x32xf32>
    %504 = math.tanh %503 : vector<8x32xf32>
    %505 = arith.mulf %500, %504 : vector<8x32xf32>
    %506 = vector.shape_cast %505 : vector<8x32xf32> to vector<8x1x32xf32>
    "tpu.trace_start"() <{level = 10 : i32, message = "bqh,bkh->bqk"}> : () -> ()
    %cst_135 = arith.constant dense<0.000000e+00> : vector<8x1x8xf32>
    %507 = tpu.matmul %506, %326, %cst_135 {dimension_numbers = #tpu.dot_dimension_numbers<[2], [2], [1], [1], [0, 0, 0, 1, 1, 1], [0], [0]>} : vector<8x1x32xf32>, vector<8x8x32xf32>, vector<8x1x8xf32> -> vector<8x1x8xf32>
    "tpu.trace_stop"() : () -> ()
    %cst_136 = arith.constant dense<0xFF800000> : vector<8x1xf32>
    %508 = vector.multi_reduction <maximumf>, %507, %cst_136 [2] : vector<8x1x8xf32> to vector<8x1xf32>
    %509 = vector.shape_cast %508 : vector<8x1xf32> to vector<8x1x1xf32>
    %510 = vector.broadcast %509 : vector<8x1x1xf32> to vector<8x1x8xf32>
    %511 = arith.subf %507, %510 : vector<8x1x8xf32>
    %512 = math.exp %511 : vector<8x1x8xf32>
    %cst_137 = arith.constant dense<0.000000e+00> : vector<8x1xf32>
    %513 = vector.multi_reduction <add>, %512, %cst_137 [2] : vector<8x1x8xf32> to vector<8x1xf32>
    %514 = vector.shape_cast %513 : vector<8x1xf32> to vector<8x1x1xf32>
    %515 = vector.broadcast %514 : vector<8x1x1xf32> to vector<8x1x8xf32>
    %516 = arith.divf %512, %515 : vector<8x1x8xf32>
    "tpu.trace_start"() <{level = 10 : i32, message = "bqk,bkh->bqh"}> : () -> ()
    %cst_138 = arith.constant dense<0.000000e+00> : vector<8x1x32xf32>
    %517 = tpu.matmul %516, %326, %cst_138 {dimension_numbers = #tpu.dot_dimension_numbers<[2], [1], [1], [2], [0, 0, 0, 1, 1, 2], [0], [0]>} : vector<8x1x8xf32>, vector<8x8x32xf32>, vector<8x1x32xf32> -> vector<8x1x32xf32>
    "tpu.trace_stop"() : () -> ()
    %518 = vector.shape_cast %517 : vector<8x1x32xf32> to vector<8x32xf32>
    %cst_139 = arith.constant dense<0.000000e+00> : vector<8x128xf32>
    %519 = tpu.matmul %505, %331, %cst_139 {dimension_numbers = #tpu.dot_dimension_numbers<[1], [0], [0], [1], [0, 0, 1, 1], [], []>} : vector<8x32xf32>, vector<32x128xf32>, vector<8x128xf32> -> vector<8x128xf32>
    %cst_140 = arith.constant dense<0.000000e+00> : vector<8x128xf32>
    %520 = tpu.matmul %518, %332, %cst_140 {dimension_numbers = #tpu.dot_dimension_numbers<[1], [0], [0], [1], [0, 0, 1, 1], [], []>} : vector<8x32xf32>, vector<32x128xf32>, vector<8x128xf32> -> vector<8x128xf32>
    %521 = arith.addf %519, %520 : vector<8x128xf32>
    %522 = vector.broadcast %333 : vector<1x128xf32> to vector<8x128xf32>
    %523 = arith.addf %521, %522 : vector<8x128xf32>
    %c2_141 = arith.constant 2 : index
    %c0_142 = arith.constant 0 : index
    %c0_143 = arith.constant 0 : index
    %524 = vector.load %arg13[%c2_141, %c0_142, %c0_143] : memref<8x8x128xf32, #tpu.memory_space<vmem>>, vector<1x8x128xf32>
    %525 = vector.shape_cast %524 : vector<1x8x128xf32> to vector<8x128xf32>
    %526 = vector.shape_cast %523 : vector<8x128xf32> to vector<1x8x128xf32>
    tpu.vector_store %arg13[%c2_141, %c0_142, %c0_143], %526 {strides = array<i32>} : memref<8x8x128xf32, #tpu.memory_space<vmem>>, vector<1x8x128xf32>,
    %cst_144 = arith.constant dense<0xFF800000> : vector<8xf32>
    %527 = vector.multi_reduction <maximumf>, %523, %cst_144 [1] : vector<8x128xf32> to vector<8xf32>
    %528 = vector.shape_cast %527 : vector<8xf32> to vector<8x1xf32>
    %529 = vector.broadcast %528 : vector<8x1xf32> to vector<8x128xf32>
    %530 = arith.cmpf oeq, %523, %529 : vector<8x128xf32>
    %c128_i32_145 = arith.constant 128 : i32
    %531 = vector.broadcast %c128_i32_145 : i32 to vector<8x128xi32>
    %532 = arith.select %530, %334, %531 : vector<8x128xi1>, vector<8x128xi32>
    %cst_146 = arith.constant dense<2147483647> : vector<8xi32>
    %533 = vector.multi_reduction <minsi>, %532, %cst_146 [1] : vector<8x128xi32> to vector<8xi32>
    %534 = vector.shape_cast %533 : vector<8xi32> to vector<8x1xi32>
    %535 = vector.broadcast %534 : vector<8x1xi32> to vector<8x128xi32>
    %536 = arith.cmpi eq, %334, %535 : vector<8x128xi32>
    %537 = arith.extui %536 : vector<8x128xi1> to vector<8x128xi32>
    %538 = arith.sitofp %537 : vector<8x128xi32> to vector<8x128xf32>
    %cst_147 = arith.constant dense<0.000000e+00> : vector<8x32xf32>
    %539 = tpu.matmul %538, %327, %cst_147 {dimension_numbers = #tpu.dot_dimension_numbers<[1], [0], [0], [1], [0, 0, 1, 1], [], []>} : vector<8x128xf32>, vector<128x32xf32>, vector<8x32xf32> -> vector<8x32xf32>
    %c2_148 = arith.constant 2 : index
    %540 = memref.load %arg1[%c2_148] : memref<8xi32, #tpu.memory_space<smem>>
    %c1_i32_149 = arith.constant 1 : i32
    %541 = arith.cmpi eq, %540, %c1_i32_149 : i32
    %c2_150 = arith.constant 2 : index
    %c0_151 = arith.constant 0 : index
    %c0_152 = arith.constant 0 : index
    %542 = vector.load %arg3[%c2_150, %c0_151, %c0_152] : memref<8x8x32xf32, #tpu.memory_space<vmem>>, vector<1x8x32xf32>
    %543 = vector.shape_cast %542 : vector<1x8x32xf32> to vector<8x32xf32>
    %544 = arith.select %541, %543, %539 : vector<8x32xf32>
    %cst_153 = arith.constant dense<0.000000e+00> : vector<8x128xf32>
    %545 = tpu.matmul %544, %328, %cst_153 {dimension_numbers = #tpu.dot_dimension_numbers<[1], [0], [0], [1], [0, 0, 1, 1], [], []>} : vector<8x32xf32>, vector<32x128xf32>, vector<8x128xf32> -> vector<8x128xf32>
    %cst_154 = arith.constant dense<0.000000e+00> : vector<8x128xf32>
    %546 = tpu.matmul %505, %329, %cst_154 {dimension_numbers = #tpu.dot_dimension_numbers<[1], [0], [0], [1], [0, 0, 1, 1], [], []>} : vector<8x32xf32>, vector<32x128xf32>, vector<8x128xf32> -> vector<8x128xf32>
    %547 = arith.addf %545, %546 : vector<8x128xf32>
    %548 = vector.broadcast %330 : vector<1x128xf32> to vector<8x128xf32>
    %549 = arith.addf %547, %548 : vector<8x128xf32>
    %550 = vector.extract_strided_slice %549 {offsets = [0, 0], sizes = [8, 32], strides = [1, 1]} : vector<8x128xf32> to vector<8x32xf32>
    %551 = arith.negf %550 : vector<8x32xf32>
    %552 = math.exp %551 : vector<8x32xf32>
    %cst_155 = arith.constant 1.000000e+00 : f32
    %553 = vector.broadcast %cst_155 : f32 to vector<8x32xf32>
    %554 = arith.addf %553, %552 : vector<8x32xf32>
    %555 = arith.divf %553, %554 : vector<8x32xf32>
    %556 = vector.extract_strided_slice %549 {offsets = [0, 32], sizes = [8, 32], strides = [1, 1]} : vector<8x128xf32> to vector<8x32xf32>
    %557 = arith.negf %556 : vector<8x32xf32>
    %558 = math.exp %557 : vector<8x32xf32>
    %cst_156 = arith.constant 1.000000e+00 : f32
    %559 = vector.broadcast %cst_156 : f32 to vector<8x32xf32>
    %560 = arith.addf %559, %558 : vector<8x32xf32>
    %561 = arith.divf %559, %560 : vector<8x32xf32>
    %562 = vector.extract_strided_slice %549 {offsets = [0, 64], sizes = [8, 32], strides = [1, 1]} : vector<8x128xf32> to vector<8x32xf32>
    %563 = math.tanh %562 : vector<8x32xf32>
    %564 = vector.extract_strided_slice %549 {offsets = [0, 96], sizes = [8, 32], strides = [1, 1]} : vector<8x128xf32> to vector<8x32xf32>
    %565 = arith.negf %564 : vector<8x32xf32>
    %566 = math.exp %565 : vector<8x32xf32>
    %cst_157 = arith.constant 1.000000e+00 : f32
    %567 = vector.broadcast %cst_157 : f32 to vector<8x32xf32>
    %568 = arith.addf %567, %566 : vector<8x32xf32>
    %569 = arith.divf %567, %568 : vector<8x32xf32>
    %570 = arith.mulf %561, %503 : vector<8x32xf32>
    %571 = arith.mulf %555, %563 : vector<8x32xf32>
    %572 = arith.addf %570, %571 : vector<8x32xf32>
    %573 = math.tanh %572 : vector<8x32xf32>
    %574 = arith.mulf %569, %573 : vector<8x32xf32>
    %575 = vector.shape_cast %574 : vector<8x32xf32> to vector<8x1x32xf32>
    "tpu.trace_start"() <{level = 10 : i32, message = "bqh,bkh->bqk"}> : () -> ()
    %cst_158 = arith.constant dense<0.000000e+00> : vector<8x1x8xf32>
    %576 = tpu.matmul %575, %326, %cst_158 {dimension_numbers = #tpu.dot_dimension_numbers<[2], [2], [1], [1], [0, 0, 0, 1, 1, 1], [0], [0]>} : vector<8x1x32xf32>, vector<8x8x32xf32>, vector<8x1x8xf32> -> vector<8x1x8xf32>
    "tpu.trace_stop"() : () -> ()
    %cst_159 = arith.constant dense<0xFF800000> : vector<8x1xf32>
    %577 = vector.multi_reduction <maximumf>, %576, %cst_159 [2] : vector<8x1x8xf32> to vector<8x1xf32>
    %578 = vector.shape_cast %577 : vector<8x1xf32> to vector<8x1x1xf32>
    %579 = vector.broadcast %578 : vector<8x1x1xf32> to vector<8x1x8xf32>
    %580 = arith.subf %576, %579 : vector<8x1x8xf32>
    %581 = math.exp %580 : vector<8x1x8xf32>
    %cst_160 = arith.constant dense<0.000000e+00> : vector<8x1xf32>
    %582 = vector.multi_reduction <add>, %581, %cst_160 [2] : vector<8x1x8xf32> to vector<8x1xf32>
    %583 = vector.shape_cast %582 : vector<8x1xf32> to vector<8x1x1xf32>
    %584 = vector.broadcast %583 : vector<8x1x1xf32> to vector<8x1x8xf32>
    %585 = arith.divf %581, %584 : vector<8x1x8xf32>
    "tpu.trace_start"() <{level = 10 : i32, message = "bqk,bkh->bqh"}> : () -> ()
    %cst_161 = arith.constant dense<0.000000e+00> : vector<8x1x32xf32>
    %586 = tpu.matmul %585, %326, %cst_161 {dimension_numbers = #tpu.dot_dimension_numbers<[2], [1], [1], [2], [0, 0, 0, 1, 1, 2], [0], [0]>} : vector<8x1x8xf32>, vector<8x8x32xf32>, vector<8x1x32xf32> -> vector<8x1x32xf32>
    "tpu.trace_stop"() : () -> ()
    %587 = vector.shape_cast %586 : vector<8x1x32xf32> to vector<8x32xf32>
    %cst_162 = arith.constant dense<0.000000e+00> : vector<8x128xf32>
    %588 = tpu.matmul %574, %331, %cst_162 {dimension_numbers = #tpu.dot_dimension_numbers<[1], [0], [0], [1], [0, 0, 1, 1], [], []>} : vector<8x32xf32>, vector<32x128xf32>, vector<8x128xf32> -> vector<8x128xf32>
    %cst_163 = arith.constant dense<0.000000e+00> : vector<8x128xf32>
    %589 = tpu.matmul %587, %332, %cst_163 {dimension_numbers = #tpu.dot_dimension_numbers<[1], [0], [0], [1], [0, 0, 1, 1], [], []>} : vector<8x32xf32>, vector<32x128xf32>, vector<8x128xf32> -> vector<8x128xf32>
    %590 = arith.addf %588, %589 : vector<8x128xf32>
    %591 = vector.broadcast %333 : vector<1x128xf32> to vector<8x128xf32>
    %592 = arith.addf %590, %591 : vector<8x128xf32>
    %c3_164 = arith.constant 3 : index
    %c0_165 = arith.constant 0 : index
    %c0_166 = arith.constant 0 : index
    %593 = vector.load %arg13[%c3_164, %c0_165, %c0_166] : memref<8x8x128xf32, #tpu.memory_space<vmem>>, vector<1x8x128xf32>
    %594 = vector.shape_cast %593 : vector<1x8x128xf32> to vector<8x128xf32>
    %595 = vector.shape_cast %592 : vector<8x128xf32> to vector<1x8x128xf32>
    tpu.vector_store %arg13[%c3_164, %c0_165, %c0_166], %595 {strides = array<i32>} : memref<8x8x128xf32, #tpu.memory_space<vmem>>, vector<1x8x128xf32>,
    %cst_167 = arith.constant dense<0xFF800000> : vector<8xf32>
    %596 = vector.multi_reduction <maximumf>, %592, %cst_167 [1] : vector<8x128xf32> to vector<8xf32>
    %597 = vector.shape_cast %596 : vector<8xf32> to vector<8x1xf32>
    %598 = vector.broadcast %597 : vector<8x1xf32> to vector<8x128xf32>
    %599 = arith.cmpf oeq, %592, %598 : vector<8x128xf32>
    %c128_i32_168 = arith.constant 128 : i32
    %600 = vector.broadcast %c128_i32_168 : i32 to vector<8x128xi32>
    %601 = arith.select %599, %334, %600 : vector<8x128xi1>, vector<8x128xi32>
    %cst_169 = arith.constant dense<2147483647> : vector<8xi32>
    %602 = vector.multi_reduction <minsi>, %601, %cst_169 [1] : vector<8x128xi32> to vector<8xi32>
    %603 = vector.shape_cast %602 : vector<8xi32> to vector<8x1xi32>
    %604 = vector.broadcast %603 : vector<8x1xi32> to vector<8x128xi32>
    %605 = arith.cmpi eq, %334, %604 : vector<8x128xi32>
    %606 = arith.extui %605 : vector<8x128xi1> to vector<8x128xi32>
    %607 = arith.sitofp %606 : vector<8x128xi32> to vector<8x128xf32>
    %cst_170 = arith.constant dense<0.000000e+00> : vector<8x32xf32>
    %608 = tpu.matmul %607, %327, %cst_170 {dimension_numbers = #tpu.dot_dimension_numbers<[1], [0], [0], [1], [0, 0, 1, 1], [], []>} : vector<8x128xf32>, vector<128x32xf32>, vector<8x32xf32> -> vector<8x32xf32>
    %c3_171 = arith.constant 3 : index
    %609 = memref.load %arg1[%c3_171] : memref<8xi32, #tpu.memory_space<smem>>
    %c1_i32_172 = arith.constant 1 : i32
    %610 = arith.cmpi eq, %609, %c1_i32_172 : i32
    %c3_173 = arith.constant 3 : index
    %c0_174 = arith.constant 0 : index
    %c0_175 = arith.constant 0 : index
    %611 = vector.load %arg3[%c3_173, %c0_174, %c0_175] : memref<8x8x32xf32, #tpu.memory_space<vmem>>, vector<1x8x32xf32>
    %612 = vector.shape_cast %611 : vector<1x8x32xf32> to vector<8x32xf32>
    %613 = arith.select %610, %612, %608 : vector<8x32xf32>
    %cst_176 = arith.constant dense<0.000000e+00> : vector<8x128xf32>
    %614 = tpu.matmul %613, %328, %cst_176 {dimension_numbers = #tpu.dot_dimension_numbers<[1], [0], [0], [1], [0, 0, 1, 1], [], []>} : vector<8x32xf32>, vector<32x128xf32>, vector<8x128xf32> -> vector<8x128xf32>
    %cst_177 = arith.constant dense<0.000000e+00> : vector<8x128xf32>
    %615 = tpu.matmul %574, %329, %cst_177 {dimension_numbers = #tpu.dot_dimension_numbers<[1], [0], [0], [1], [0, 0, 1, 1], [], []>} : vector<8x32xf32>, vector<32x128xf32>, vector<8x128xf32> -> vector<8x128xf32>
    %616 = arith.addf %614, %615 : vector<8x128xf32>
    %617 = vector.broadcast %330 : vector<1x128xf32> to vector<8x128xf32>
    %618 = arith.addf %616, %617 : vector<8x128xf32>
    %619 = vector.extract_strided_slice %618 {offsets = [0, 0], sizes = [8, 32], strides = [1, 1]} : vector<8x128xf32> to vector<8x32xf32>
    %620 = arith.negf %619 : vector<8x32xf32>
    %621 = math.exp %620 : vector<8x32xf32>
    %cst_178 = arith.constant 1.000000e+00 : f32
    %622 = vector.broadcast %cst_178 : f32 to vector<8x32xf32>
    %623 = arith.addf %622, %621 : vector<8x32xf32>
    %624 = arith.divf %622, %623 : vector<8x32xf32>
    %625 = vector.extract_strided_slice %618 {offsets = [0, 32], sizes = [8, 32], strides = [1, 1]} : vector<8x128xf32> to vector<8x32xf32>
    %626 = arith.negf %625 : vector<8x32xf32>
    %627 = math.exp %626 : vector<8x32xf32>
    %cst_179 = arith.constant 1.000000e+00 : f32
    %628 = vector.broadcast %cst_179 : f32 to vector<8x32xf32>
    %629 = arith.addf %628, %627 : vector<8x32xf32>
    %630 = arith.divf %628, %629 : vector<8x32xf32>
    %631 = vector.extract_strided_slice %618 {offsets = [0, 64], sizes = [8, 32], strides = [1, 1]} : vector<8x128xf32> to vector<8x32xf32>
    %632 = math.tanh %631 : vector<8x32xf32>
    %633 = vector.extract_strided_slice %618 {offsets = [0, 96], sizes = [8, 32], strides = [1, 1]} : vector<8x128xf32> to vector<8x32xf32>
    %634 = arith.negf %633 : vector<8x32xf32>
    %635 = math.exp %634 : vector<8x32xf32>
    %cst_180 = arith.constant 1.000000e+00 : f32
    %636 = vector.broadcast %cst_180 : f32 to vector<8x32xf32>
    %637 = arith.addf %636, %635 : vector<8x32xf32>
    %638 = arith.divf %636, %637 : vector<8x32xf32>
    %639 = arith.mulf %630, %572 : vector<8x32xf32>
    %640 = arith.mulf %624, %632 : vector<8x32xf32>
    %641 = arith.addf %639, %640 : vector<8x32xf32>
    %642 = math.tanh %641 : vector<8x32xf32>
    %643 = arith.mulf %638, %642 : vector<8x32xf32>
    %644 = vector.shape_cast %643 : vector<8x32xf32> to vector<8x1x32xf32>
    "tpu.trace_start"() <{level = 10 : i32, message = "bqh,bkh->bqk"}> : () -> ()
    %cst_181 = arith.constant dense<0.000000e+00> : vector<8x1x8xf32>
    %645 = tpu.matmul %644, %326, %cst_181 {dimension_numbers = #tpu.dot_dimension_numbers<[2], [2], [1], [1], [0, 0, 0, 1, 1, 1], [0], [0]>} : vector<8x1x32xf32>, vector<8x8x32xf32>, vector<8x1x8xf32> -> vector<8x1x8xf32>
    "tpu.trace_stop"() : () -> ()
    %cst_182 = arith.constant dense<0xFF800000> : vector<8x1xf32>
    %646 = vector.multi_reduction <maximumf>, %645, %cst_182 [2] : vector<8x1x8xf32> to vector<8x1xf32>
    %647 = vector.shape_cast %646 : vector<8x1xf32> to vector<8x1x1xf32>
    %648 = vector.broadcast %647 : vector<8x1x1xf32> to vector<8x1x8xf32>
    %649 = arith.subf %645, %648 : vector<8x1x8xf32>
    %650 = math.exp %649 : vector<8x1x8xf32>
    %cst_183 = arith.constant dense<0.000000e+00> : vector<8x1xf32>
    %651 = vector.multi_reduction <add>, %650, %cst_183 [2] : vector<8x1x8xf32> to vector<8x1xf32>
    %652 = vector.shape_cast %651 : vector<8x1xf32> to vector<8x1x1xf32>
    %653 = vector.broadcast %652 : vector<8x1x1xf32> to vector<8x1x8xf32>
    %654 = arith.divf %650, %653 : vector<8x1x8xf32>
    "tpu.trace_start"() <{level = 10 : i32, message = "bqk,bkh->bqh"}> : () -> ()
    %cst_184 = arith.constant dense<0.000000e+00> : vector<8x1x32xf32>
    %655 = tpu.matmul %654, %326, %cst_184 {dimension_numbers = #tpu.dot_dimension_numbers<[2], [1], [1], [2], [0, 0, 0, 1, 1, 2], [0], [0]>} : vector<8x1x8xf32>, vector<8x8x32xf32>, vector<8x1x32xf32> -> vector<8x1x32xf32>
    "tpu.trace_stop"() : () -> ()
    %656 = vector.shape_cast %655 : vector<8x1x32xf32> to vector<8x32xf32>
    %cst_185 = arith.constant dense<0.000000e+00> : vector<8x128xf32>
    %657 = tpu.matmul %643, %331, %cst_185 {dimension_numbers = #tpu.dot_dimension_numbers<[1], [0], [0], [1], [0, 0, 1, 1], [], []>} : vector<8x32xf32>, vector<32x128xf32>, vector<8x128xf32> -> vector<8x128xf32>
    %cst_186 = arith.constant dense<0.000000e+00> : vector<8x128xf32>
    %658 = tpu.matmul %656, %332, %cst_186 {dimension_numbers = #tpu.dot_dimension_numbers<[1], [0], [0], [1], [0, 0, 1, 1], [], []>} : vector<8x32xf32>, vector<32x128xf32>, vector<8x128xf32> -> vector<8x128xf32>
    %659 = arith.addf %657, %658 : vector<8x128xf32>
    %660 = vector.broadcast %333 : vector<1x128xf32> to vector<8x128xf32>
    %661 = arith.addf %659, %660 : vector<8x128xf32>
    %c4_187 = arith.constant 4 : index
    %c0_188 = arith.constant 0 : index
    %c0_189 = arith.constant 0 : index
    %662 = vector.load %arg13[%c4_187, %c0_188, %c0_189] : memref<8x8x128xf32, #tpu.memory_space<vmem>>, vector<1x8x128xf32>
    %663 = vector.shape_cast %662 : vector<1x8x128xf32> to vector<8x128xf32>
    %664 = vector.shape_cast %661 : vector<8x128xf32> to vector<1x8x128xf32>
    tpu.vector_store %arg13[%c4_187, %c0_188, %c0_189], %664 {strides = array<i32>} : memref<8x8x128xf32, #tpu.memory_space<vmem>>, vector<1x8x128xf32>,
    %cst_190 = arith.constant dense<0xFF800000> : vector<8xf32>
    %665 = vector.multi_reduction <maximumf>, %661, %cst_190 [1] : vector<8x128xf32> to vector<8xf32>
    %666 = vector.shape_cast %665 : vector<8xf32> to vector<8x1xf32>
    %667 = vector.broadcast %666 : vector<8x1xf32> to vector<8x128xf32>
    %668 = arith.cmpf oeq, %661, %667 : vector<8x128xf32>
    %c128_i32_191 = arith.constant 128 : i32
    %669 = vector.broadcast %c128_i32_191 : i32 to vector<8x128xi32>
    %670 = arith.select %668, %334, %669 : vector<8x128xi1>, vector<8x128xi32>
    %cst_192 = arith.constant dense<2147483647> : vector<8xi32>
    %671 = vector.multi_reduction <minsi>, %670, %cst_192 [1] : vector<8x128xi32> to vector<8xi32>
    %672 = vector.shape_cast %671 : vector<8xi32> to vector<8x1xi32>
    %673 = vector.broadcast %672 : vector<8x1xi32> to vector<8x128xi32>
    %674 = arith.cmpi eq, %334, %673 : vector<8x128xi32>
    %675 = arith.extui %674 : vector<8x128xi1> to vector<8x128xi32>
    %676 = arith.sitofp %675 : vector<8x128xi32> to vector<8x128xf32>
    %cst_193 = arith.constant dense<0.000000e+00> : vector<8x32xf32>
    %677 = tpu.matmul %676, %327, %cst_193 {dimension_numbers = #tpu.dot_dimension_numbers<[1], [0], [0], [1], [0, 0, 1, 1], [], []>} : vector<8x128xf32>, vector<128x32xf32>, vector<8x32xf32> -> vector<8x32xf32>
    %c4_194 = arith.constant 4 : index
    %678 = memref.load %arg1[%c4_194] : memref<8xi32, #tpu.memory_space<smem>>
    %c1_i32_195 = arith.constant 1 : i32
    %679 = arith.cmpi eq, %678, %c1_i32_195 : i32
    %c4_196 = arith.constant 4 : index
    %c0_197 = arith.constant 0 : index
    %c0_198 = arith.constant 0 : index
    %680 = vector.load %arg3[%c4_196, %c0_197, %c0_198] : memref<8x8x32xf32, #tpu.memory_space<vmem>>, vector<1x8x32xf32>
    %681 = vector.shape_cast %680 : vector<1x8x32xf32> to vector<8x32xf32>
    %682 = arith.select %679, %681, %677 : vector<8x32xf32>
    %cst_199 = arith.constant dense<0.000000e+00> : vector<8x128xf32>
    %683 = tpu.matmul %682, %328, %cst_199 {dimension_numbers = #tpu.dot_dimension_numbers<[1], [0], [0], [1], [0, 0, 1, 1], [], []>} : vector<8x32xf32>, vector<32x128xf32>, vector<8x128xf32> -> vector<8x128xf32>
    %cst_200 = arith.constant dense<0.000000e+00> : vector<8x128xf32>
    %684 = tpu.matmul %643, %329, %cst_200 {dimension_numbers = #tpu.dot_dimension_numbers<[1], [0], [0], [1], [0, 0, 1, 1], [], []>} : vector<8x32xf32>, vector<32x128xf32>, vector<8x128xf32> -> vector<8x128xf32>
    %685 = arith.addf %683, %684 : vector<8x128xf32>
    %686 = vector.broadcast %330 : vector<1x128xf32> to vector<8x128xf32>
    %687 = arith.addf %685, %686 : vector<8x128xf32>
    %688 = vector.extract_strided_slice %687 {offsets = [0, 0], sizes = [8, 32], strides = [1, 1]} : vector<8x128xf32> to vector<8x32xf32>
    %689 = arith.negf %688 : vector<8x32xf32>
    %690 = math.exp %689 : vector<8x32xf32>
    %cst_201 = arith.constant 1.000000e+00 : f32
    %691 = vector.broadcast %cst_201 : f32 to vector<8x32xf32>
    %692 = arith.addf %691, %690 : vector<8x32xf32>
    %693 = arith.divf %691, %692 : vector<8x32xf32>
    %694 = vector.extract_strided_slice %687 {offsets = [0, 32], sizes = [8, 32], strides = [1, 1]} : vector<8x128xf32> to vector<8x32xf32>
    %695 = arith.negf %694 : vector<8x32xf32>
    %696 = math.exp %695 : vector<8x32xf32>
    %cst_202 = arith.constant 1.000000e+00 : f32
    %697 = vector.broadcast %cst_202 : f32 to vector<8x32xf32>
    %698 = arith.addf %697, %696 : vector<8x32xf32>
    %699 = arith.divf %697, %698 : vector<8x32xf32>
    %700 = vector.extract_strided_slice %687 {offsets = [0, 64], sizes = [8, 32], strides = [1, 1]} : vector<8x128xf32> to vector<8x32xf32>
    %701 = math.tanh %700 : vector<8x32xf32>
    %702 = vector.extract_strided_slice %687 {offsets = [0, 96], sizes = [8, 32], strides = [1, 1]} : vector<8x128xf32> to vector<8x32xf32>
    %703 = arith.negf %702 : vector<8x32xf32>
    %704 = math.exp %703 : vector<8x32xf32>
    %cst_203 = arith.constant 1.000000e+00 : f32
    %705 = vector.broadcast %cst_203 : f32 to vector<8x32xf32>
    %706 = arith.addf %705, %704 : vector<8x32xf32>
    %707 = arith.divf %705, %706 : vector<8x32xf32>
    %708 = arith.mulf %699, %641 : vector<8x32xf32>
    %709 = arith.mulf %693, %701 : vector<8x32xf32>
    %710 = arith.addf %708, %709 : vector<8x32xf32>
    %711 = math.tanh %710 : vector<8x32xf32>
    %712 = arith.mulf %707, %711 : vector<8x32xf32>
    %713 = vector.shape_cast %712 : vector<8x32xf32> to vector<8x1x32xf32>
    "tpu.trace_start"() <{level = 10 : i32, message = "bqh,bkh->bqk"}> : () -> ()
    %cst_204 = arith.constant dense<0.000000e+00> : vector<8x1x8xf32>
    %714 = tpu.matmul %713, %326, %cst_204 {dimension_numbers = #tpu.dot_dimension_numbers<[2], [2], [1], [1], [0, 0, 0, 1, 1, 1], [0], [0]>} : vector<8x1x32xf32>, vector<8x8x32xf32>, vector<8x1x8xf32> -> vector<8x1x8xf32>
    "tpu.trace_stop"() : () -> ()
    %cst_205 = arith.constant dense<0xFF800000> : vector<8x1xf32>
    %715 = vector.multi_reduction <maximumf>, %714, %cst_205 [2] : vector<8x1x8xf32> to vector<8x1xf32>
    %716 = vector.shape_cast %715 : vector<8x1xf32> to vector<8x1x1xf32>
    %717 = vector.broadcast %716 : vector<8x1x1xf32> to vector<8x1x8xf32>
    %718 = arith.subf %714, %717 : vector<8x1x8xf32>
    %719 = math.exp %718 : vector<8x1x8xf32>
    %cst_206 = arith.constant dense<0.000000e+00> : vector<8x1xf32>
    %720 = vector.multi_reduction <add>, %719, %cst_206 [2] : vector<8x1x8xf32> to vector<8x1xf32>
    %721 = vector.shape_cast %720 : vector<8x1xf32> to vector<8x1x1xf32>
    %722 = vector.broadcast %721 : vector<8x1x1xf32> to vector<8x1x8xf32>
    %723 = arith.divf %719, %722 : vector<8x1x8xf32>
    "tpu.trace_start"() <{level = 10 : i32, message = "bqk,bkh->bqh"}> : () -> ()
    %cst_207 = arith.constant dense<0.000000e+00> : vector<8x1x32xf32>
    %724 = tpu.matmul %723, %326, %cst_207 {dimension_numbers = #tpu.dot_dimension_numbers<[2], [1], [1], [2], [0, 0, 0, 1, 1, 2], [0], [0]>} : vector<8x1x8xf32>, vector<8x8x32xf32>, vector<8x1x32xf32> -> vector<8x1x32xf32>
    "tpu.trace_stop"() : () -> ()
    %725 = vector.shape_cast %724 : vector<8x1x32xf32> to vector<8x32xf32>
    %cst_208 = arith.constant dense<0.000000e+00> : vector<8x128xf32>
    %726 = tpu.matmul %712, %331, %cst_208 {dimension_numbers = #tpu.dot_dimension_numbers<[1], [0], [0], [1], [0, 0, 1, 1], [], []>} : vector<8x32xf32>, vector<32x128xf32>, vector<8x128xf32> -> vector<8x128xf32>
    %cst_209 = arith.constant dense<0.000000e+00> : vector<8x128xf32>
    %727 = tpu.matmul %725, %332, %cst_209 {dimension_numbers = #tpu.dot_dimension_numbers<[1], [0], [0], [1], [0, 0, 1, 1], [], []>} : vector<8x32xf32>, vector<32x128xf32>, vector<8x128xf32> -> vector<8x128xf32>
    %728 = arith.addf %726, %727 : vector<8x128xf32>
    %729 = vector.broadcast %333 : vector<1x128xf32> to vector<8x128xf32>
    %730 = arith.addf %728, %729 : vector<8x128xf32>
    %c5_210 = arith.constant 5 : index
    %c0_211 = arith.constant 0 : index
    %c0_212 = arith.constant 0 : index
    %731 = vector.load %arg13[%c5_210, %c0_211, %c0_212] : memref<8x8x128xf32, #tpu.memory_space<vmem>>, vector<1x8x128xf32>
    %732 = vector.shape_cast %731 : vector<1x8x128xf32> to vector<8x128xf32>
    %733 = vector.shape_cast %730 : vector<8x128xf32> to vector<1x8x128xf32>
    tpu.vector_store %arg13[%c5_210, %c0_211, %c0_212], %733 {strides = array<i32>} : memref<8x8x128xf32, #tpu.memory_space<vmem>>, vector<1x8x128xf32>,
    %cst_213 = arith.constant dense<0xFF800000> : vector<8xf32>
    %734 = vector.multi_reduction <maximumf>, %730, %cst_213 [1] : vector<8x128xf32> to vector<8xf32>
    %735 = vector.shape_cast %734 : vector<8xf32> to vector<8x1xf32>
    %736 = vector.broadcast %735 : vector<8x1xf32> to vector<8x128xf32>
    %737 = arith.cmpf oeq, %730, %736 : vector<8x128xf32>
    %c128_i32_214 = arith.constant 128 : i32
    %738 = vector.broadcast %c128_i32_214 : i32 to vector<8x128xi32>
    %739 = arith.select %737, %334, %738 : vector<8x128xi1>, vector<8x128xi32>
    %cst_215 = arith.constant dense<2147483647> : vector<8xi32>
    %740 = vector.multi_reduction <minsi>, %739, %cst_215 [1] : vector<8x128xi32> to vector<8xi32>
    %741 = vector.shape_cast %740 : vector<8xi32> to vector<8x1xi32>
    %742 = vector.broadcast %741 : vector<8x1xi32> to vector<8x128xi32>
    %743 = arith.cmpi eq, %334, %742 : vector<8x128xi32>
    %744 = arith.extui %743 : vector<8x128xi1> to vector<8x128xi32>
    %745 = arith.sitofp %744 : vector<8x128xi32> to vector<8x128xf32>
    %cst_216 = arith.constant dense<0.000000e+00> : vector<8x32xf32>
    %746 = tpu.matmul %745, %327, %cst_216 {dimension_numbers = #tpu.dot_dimension_numbers<[1], [0], [0], [1], [0, 0, 1, 1], [], []>} : vector<8x128xf32>, vector<128x32xf32>, vector<8x32xf32> -> vector<8x32xf32>
    %c5_217 = arith.constant 5 : index
    %747 = memref.load %arg1[%c5_217] : memref<8xi32, #tpu.memory_space<smem>>
    %c1_i32_218 = arith.constant 1 : i32
    %748 = arith.cmpi eq, %747, %c1_i32_218 : i32
    %c5_219 = arith.constant 5 : index
    %c0_220 = arith.constant 0 : index
    %c0_221 = arith.constant 0 : index
    %749 = vector.load %arg3[%c5_219, %c0_220, %c0_221] : memref<8x8x32xf32, #tpu.memory_space<vmem>>, vector<1x8x32xf32>
    %750 = vector.shape_cast %749 : vector<1x8x32xf32> to vector<8x32xf32>
    %751 = arith.select %748, %750, %746 : vector<8x32xf32>
    %cst_222 = arith.constant dense<0.000000e+00> : vector<8x128xf32>
    %752 = tpu.matmul %751, %328, %cst_222 {dimension_numbers = #tpu.dot_dimension_numbers<[1], [0], [0], [1], [0, 0, 1, 1], [], []>} : vector<8x32xf32>, vector<32x128xf32>, vector<8x128xf32> -> vector<8x128xf32>
    %cst_223 = arith.constant dense<0.000000e+00> : vector<8x128xf32>
    %753 = tpu.matmul %712, %329, %cst_223 {dimension_numbers = #tpu.dot_dimension_numbers<[1], [0], [0], [1], [0, 0, 1, 1], [], []>} : vector<8x32xf32>, vector<32x128xf32>, vector<8x128xf32> -> vector<8x128xf32>
    %754 = arith.addf %752, %753 : vector<8x128xf32>
    %755 = vector.broadcast %330 : vector<1x128xf32> to vector<8x128xf32>
    %756 = arith.addf %754, %755 : vector<8x128xf32>
    %757 = vector.extract_strided_slice %756 {offsets = [0, 0], sizes = [8, 32], strides = [1, 1]} : vector<8x128xf32> to vector<8x32xf32>
    %758 = arith.negf %757 : vector<8x32xf32>
    %759 = math.exp %758 : vector<8x32xf32>
    %cst_224 = arith.constant 1.000000e+00 : f32
    %760 = vector.broadcast %cst_224 : f32 to vector<8x32xf32>
    %761 = arith.addf %760, %759 : vector<8x32xf32>
    %762 = arith.divf %760, %761 : vector<8x32xf32>
    %763 = vector.extract_strided_slice %756 {offsets = [0, 32], sizes = [8, 32], strides = [1, 1]} : vector<8x128xf32> to vector<8x32xf32>
    %764 = arith.negf %763 : vector<8x32xf32>
    %765 = math.exp %764 : vector<8x32xf32>
    %cst_225 = arith.constant 1.000000e+00 : f32
    %766 = vector.broadcast %cst_225 : f32 to vector<8x32xf32>
    %767 = arith.addf %766, %765 : vector<8x32xf32>
    %768 = arith.divf %766, %767 : vector<8x32xf32>
    %769 = vector.extract_strided_slice %756 {offsets = [0, 64], sizes = [8, 32], strides = [1, 1]} : vector<8x128xf32> to vector<8x32xf32>
    %770 = math.tanh %769 : vector<8x32xf32>
    %771 = vector.extract_strided_slice %756 {offsets = [0, 96], sizes = [8, 32], strides = [1, 1]} : vector<8x128xf32> to vector<8x32xf32>
    %772 = arith.negf %771 : vector<8x32xf32>
    %773 = math.exp %772 : vector<8x32xf32>
    %cst_226 = arith.constant 1.000000e+00 : f32
    %774 = vector.broadcast %cst_226 : f32 to vector<8x32xf32>
    %775 = arith.addf %774, %773 : vector<8x32xf32>
    %776 = arith.divf %774, %775 : vector<8x32xf32>
    %777 = arith.mulf %768, %710 : vector<8x32xf32>
    %778 = arith.mulf %762, %770 : vector<8x32xf32>
    %779 = arith.addf %777, %778 : vector<8x32xf32>
    %780 = math.tanh %779 : vector<8x32xf32>
    %781 = arith.mulf %776, %780 : vector<8x32xf32>
    %782 = vector.shape_cast %781 : vector<8x32xf32> to vector<8x1x32xf32>
    "tpu.trace_start"() <{level = 10 : i32, message = "bqh,bkh->bqk"}> : () -> ()
    %cst_227 = arith.constant dense<0.000000e+00> : vector<8x1x8xf32>
    %783 = tpu.matmul %782, %326, %cst_227 {dimension_numbers = #tpu.dot_dimension_numbers<[2], [2], [1], [1], [0, 0, 0, 1, 1, 1], [0], [0]>} : vector<8x1x32xf32>, vector<8x8x32xf32>, vector<8x1x8xf32> -> vector<8x1x8xf32>
    "tpu.trace_stop"() : () -> ()
    %cst_228 = arith.constant dense<0xFF800000> : vector<8x1xf32>
    %784 = vector.multi_reduction <maximumf>, %783, %cst_228 [2] : vector<8x1x8xf32> to vector<8x1xf32>
    %785 = vector.shape_cast %784 : vector<8x1xf32> to vector<8x1x1xf32>
    %786 = vector.broadcast %785 : vector<8x1x1xf32> to vector<8x1x8xf32>
    %787 = arith.subf %783, %786 : vector<8x1x8xf32>
    %788 = math.exp %787 : vector<8x1x8xf32>
    %cst_229 = arith.constant dense<0.000000e+00> : vector<8x1xf32>
    %789 = vector.multi_reduction <add>, %788, %cst_229 [2] : vector<8x1x8xf32> to vector<8x1xf32>
    %790 = vector.shape_cast %789 : vector<8x1xf32> to vector<8x1x1xf32>
    %791 = vector.broadcast %790 : vector<8x1x1xf32> to vector<8x1x8xf32>
    %792 = arith.divf %788, %791 : vector<8x1x8xf32>
    "tpu.trace_start"() <{level = 10 : i32, message = "bqk,bkh->bqh"}> : () -> ()
    %cst_230 = arith.constant dense<0.000000e+00> : vector<8x1x32xf32>
    %793 = tpu.matmul %792, %326, %cst_230 {dimension_numbers = #tpu.dot_dimension_numbers<[2], [1], [1], [2], [0, 0, 0, 1, 1, 2], [0], [0]>} : vector<8x1x8xf32>, vector<8x8x32xf32>, vector<8x1x32xf32> -> vector<8x1x32xf32>
    "tpu.trace_stop"() : () -> ()
    %794 = vector.shape_cast %793 : vector<8x1x32xf32> to vector<8x32xf32>
    %cst_231 = arith.constant dense<0.000000e+00> : vector<8x128xf32>
    %795 = tpu.matmul %781, %331, %cst_231 {dimension_numbers = #tpu.dot_dimension_numbers<[1], [0], [0], [1], [0, 0, 1, 1], [], []>} : vector<8x32xf32>, vector<32x128xf32>, vector<8x128xf32> -> vector<8x128xf32>
    %cst_232 = arith.constant dense<0.000000e+00> : vector<8x128xf32>
    %796 = tpu.matmul %794, %332, %cst_232 {dimension_numbers = #tpu.dot_dimension_numbers<[1], [0], [0], [1], [0, 0, 1, 1], [], []>} : vector<8x32xf32>, vector<32x128xf32>, vector<8x128xf32> -> vector<8x128xf32>
    %797 = arith.addf %795, %796 : vector<8x128xf32>
    %798 = vector.broadcast %333 : vector<1x128xf32> to vector<8x128xf32>
    %799 = arith.addf %797, %798 : vector<8x128xf32>
    %c6_233 = arith.constant 6 : index
    %c0_234 = arith.constant 0 : index
    %c0_235 = arith.constant 0 : index
    %800 = vector.load %arg13[%c6_233, %c0_234, %c0_235] : memref<8x8x128xf32, #tpu.memory_space<vmem>>, vector<1x8x128xf32>
    %801 = vector.shape_cast %800 : vector<1x8x128xf32> to vector<8x128xf32>
    %802 = vector.shape_cast %799 : vector<8x128xf32> to vector<1x8x128xf32>
    tpu.vector_store %arg13[%c6_233, %c0_234, %c0_235], %802 {strides = array<i32>} : memref<8x8x128xf32, #tpu.memory_space<vmem>>, vector<1x8x128xf32>,
    %cst_236 = arith.constant dense<0xFF800000> : vector<8xf32>
    %803 = vector.multi_reduction <maximumf>, %799, %cst_236 [1] : vector<8x128xf32> to vector<8xf32>
    %804 = vector.shape_cast %803 : vector<8xf32> to vector<8x1xf32>
    %805 = vector.broadcast %804 : vector<8x1xf32> to vector<8x128xf32>
    %806 = arith.cmpf oeq, %799, %805 : vector<8x128xf32>
    %c128_i32_237 = arith.constant 128 : i32
    %807 = vector.broadcast %c128_i32_237 : i32 to vector<8x128xi32>
    %808 = arith.select %806, %334, %807 : vector<8x128xi1>, vector<8x128xi32>
    %cst_238 = arith.constant dense<2147483647> : vector<8xi32>
    %809 = vector.multi_reduction <minsi>, %808, %cst_238 [1] : vector<8x128xi32> to vector<8xi32>
    %810 = vector.shape_cast %809 : vector<8xi32> to vector<8x1xi32>
    %811 = vector.broadcast %810 : vector<8x1xi32> to vector<8x128xi32>
    %812 = arith.cmpi eq, %334, %811 : vector<8x128xi32>
    %813 = arith.extui %812 : vector<8x128xi1> to vector<8x128xi32>
    %814 = arith.sitofp %813 : vector<8x128xi32> to vector<8x128xf32>
    %cst_239 = arith.constant dense<0.000000e+00> : vector<8x32xf32>
    %815 = tpu.matmul %814, %327, %cst_239 {dimension_numbers = #tpu.dot_dimension_numbers<[1], [0], [0], [1], [0, 0, 1, 1], [], []>} : vector<8x128xf32>, vector<128x32xf32>, vector<8x32xf32> -> vector<8x32xf32>
    %c6_240 = arith.constant 6 : index
    %816 = memref.load %arg1[%c6_240] : memref<8xi32, #tpu.memory_space<smem>>
    %c1_i32_241 = arith.constant 1 : i32
    %817 = arith.cmpi eq, %816, %c1_i32_241 : i32
    %c6_242 = arith.constant 6 : index
    %c0_243 = arith.constant 0 : index
    %c0_244 = arith.constant 0 : index
    %818 = vector.load %arg3[%c6_242, %c0_243, %c0_244] : memref<8x8x32xf32, #tpu.memory_space<vmem>>, vector<1x8x32xf32>
    %819 = vector.shape_cast %818 : vector<1x8x32xf32> to vector<8x32xf32>
    %820 = arith.select %817, %819, %815 : vector<8x32xf32>
    %cst_245 = arith.constant dense<0.000000e+00> : vector<8x128xf32>
    %821 = tpu.matmul %820, %328, %cst_245 {dimension_numbers = #tpu.dot_dimension_numbers<[1], [0], [0], [1], [0, 0, 1, 1], [], []>} : vector<8x32xf32>, vector<32x128xf32>, vector<8x128xf32> -> vector<8x128xf32>
    %cst_246 = arith.constant dense<0.000000e+00> : vector<8x128xf32>
    %822 = tpu.matmul %781, %329, %cst_246 {dimension_numbers = #tpu.dot_dimension_numbers<[1], [0], [0], [1], [0, 0, 1, 1], [], []>} : vector<8x32xf32>, vector<32x128xf32>, vector<8x128xf32> -> vector<8x128xf32>
    %823 = arith.addf %821, %822 : vector<8x128xf32>
    %824 = vector.broadcast %330 : vector<1x128xf32> to vector<8x128xf32>
    %825 = arith.addf %823, %824 : vector<8x128xf32>
    %826 = vector.extract_strided_slice %825 {offsets = [0, 0], sizes = [8, 32], strides = [1, 1]} : vector<8x128xf32> to vector<8x32xf32>
    %827 = arith.negf %826 : vector<8x32xf32>
    %828 = math.exp %827 : vector<8x32xf32>
    %cst_247 = arith.constant 1.000000e+00 : f32
    %829 = vector.broadcast %cst_247 : f32 to vector<8x32xf32>
    %830 = arith.addf %829, %828 : vector<8x32xf32>
    %831 = arith.divf %829, %830 : vector<8x32xf32>
    %832 = vector.extract_strided_slice %825 {offsets = [0, 32], sizes = [8, 32], strides = [1, 1]} : vector<8x128xf32> to vector<8x32xf32>
    %833 = arith.negf %832 : vector<8x32xf32>
    %834 = math.exp %833 : vector<8x32xf32>
    %cst_248 = arith.constant 1.000000e+00 : f32
    %835 = vector.broadcast %cst_248 : f32 to vector<8x32xf32>
    %836 = arith.addf %835, %834 : vector<8x32xf32>
    %837 = arith.divf %835, %836 : vector<8x32xf32>
    %838 = vector.extract_strided_slice %825 {offsets = [0, 64], sizes = [8, 32], strides = [1, 1]} : vector<8x128xf32> to vector<8x32xf32>
    %839 = math.tanh %838 : vector<8x32xf32>
    %840 = vector.extract_strided_slice %825 {offsets = [0, 96], sizes = [8, 32], strides = [1, 1]} : vector<8x128xf32> to vector<8x32xf32>
    %841 = arith.negf %840 : vector<8x32xf32>
    %842 = math.exp %841 : vector<8x32xf32>
    %cst_249 = arith.constant 1.000000e+00 : f32
    %843 = vector.broadcast %cst_249 : f32 to vector<8x32xf32>
    %844 = arith.addf %843, %842 : vector<8x32xf32>
    %845 = arith.divf %843, %844 : vector<8x32xf32>
    %846 = arith.mulf %837, %779 : vector<8x32xf32>
    %847 = arith.mulf %831, %839 : vector<8x32xf32>
    %848 = arith.addf %846, %847 : vector<8x32xf32>
    %849 = math.tanh %848 : vector<8x32xf32>
    %850 = arith.mulf %845, %849 : vector<8x32xf32>
    %851 = vector.shape_cast %850 : vector<8x32xf32> to vector<8x1x32xf32>
    "tpu.trace_start"() <{level = 10 : i32, message = "bqh,bkh->bqk"}> : () -> ()
    %cst_250 = arith.constant dense<0.000000e+00> : vector<8x1x8xf32>
    %852 = tpu.matmul %851, %326, %cst_250 {dimension_numbers = #tpu.dot_dimension_numbers<[2], [2], [1], [1], [0, 0, 0, 1, 1, 1], [0], [0]>} : vector<8x1x32xf32>, vector<8x8x32xf32>, vector<8x1x8xf32> -> vector<8x1x8xf32>
    "tpu.trace_stop"() : () -> ()
    %cst_251 = arith.constant dense<0xFF800000> : vector<8x1xf32>
    %853 = vector.multi_reduction <maximumf>, %852, %cst_251 [2] : vector<8x1x8xf32> to vector<8x1xf32>
    %854 = vector.shape_cast %853 : vector<8x1xf32> to vector<8x1x1xf32>
    %855 = vector.broadcast %854 : vector<8x1x1xf32> to vector<8x1x8xf32>
    %856 = arith.subf %852, %855 : vector<8x1x8xf32>
    %857 = math.exp %856 : vector<8x1x8xf32>
    %cst_252 = arith.constant dense<0.000000e+00> : vector<8x1xf32>
    %858 = vector.multi_reduction <add>, %857, %cst_252 [2] : vector<8x1x8xf32> to vector<8x1xf32>
    %859 = vector.shape_cast %858 : vector<8x1xf32> to vector<8x1x1xf32>
    %860 = vector.broadcast %859 : vector<8x1x1xf32> to vector<8x1x8xf32>
    %861 = arith.divf %857, %860 : vector<8x1x8xf32>
    "tpu.trace_start"() <{level = 10 : i32, message = "bqk,bkh->bqh"}> : () -> ()
    %cst_253 = arith.constant dense<0.000000e+00> : vector<8x1x32xf32>
    %862 = tpu.matmul %861, %326, %cst_253 {dimension_numbers = #tpu.dot_dimension_numbers<[2], [1], [1], [2], [0, 0, 0, 1, 1, 2], [0], [0]>} : vector<8x1x8xf32>, vector<8x8x32xf32>, vector<8x1x32xf32> -> vector<8x1x32xf32>
    "tpu.trace_stop"() : () -> ()
    %863 = vector.shape_cast %862 : vector<8x1x32xf32> to vector<8x32xf32>
    %cst_254 = arith.constant dense<0.000000e+00> : vector<8x128xf32>
    %864 = tpu.matmul %850, %331, %cst_254 {dimension_numbers = #tpu.dot_dimension_numbers<[1], [0], [0], [1], [0, 0, 1, 1], [], []>} : vector<8x32xf32>, vector<32x128xf32>, vector<8x128xf32> -> vector<8x128xf32>
    %cst_255 = arith.constant dense<0.000000e+00> : vector<8x128xf32>
    %865 = tpu.matmul %863, %332, %cst_255 {dimension_numbers = #tpu.dot_dimension_numbers<[1], [0], [0], [1], [0, 0, 1, 1], [], []>} : vector<8x32xf32>, vector<32x128xf32>, vector<8x128xf32> -> vector<8x128xf32>
    %866 = arith.addf %864, %865 : vector<8x128xf32>
    %867 = vector.broadcast %333 : vector<1x128xf32> to vector<8x128xf32>
    %868 = arith.addf %866, %867 : vector<8x128xf32>
    %c7_256 = arith.constant 7 : index
    %c0_257 = arith.constant 0 : index
    %c0_258 = arith.constant 0 : index
    %869 = vector.load %arg13[%c7_256, %c0_257, %c0_258] : memref<8x8x128xf32, #tpu.memory_space<vmem>>, vector<1x8x128xf32>
    %870 = vector.shape_cast %869 : vector<1x8x128xf32> to vector<8x128xf32>
    %871 = vector.shape_cast %868 : vector<8x128xf32> to vector<1x8x128xf32>
    tpu.vector_store %arg13[%c7_256, %c0_257, %c0_258], %871 {strides = array<i32>} : memref<8x8x128xf32, #tpu.memory_space<vmem>>, vector<1x8x128xf32>,
    return
  }
  func.func @transform_0(%arg0: i32, %arg1: memref<8xi32, #tpu.memory_space<smem>>) -> (i32, i32, i32) {
    %c0_i32 = arith.constant 0 : i32
    %c0_i32_0 = arith.constant 0 : i32
    %c0_i32_1 = arith.constant 0 : i32
    %c0_i32_2 = arith.constant 0 : i32
    return %c0_i32, %c0_i32_0, %c0_i32_1 : i32, i32, i32
  }
  func.func @transform_1(%arg0: i32, %arg1: memref<8xi32, #tpu.memory_space<smem>>) -> (i32, i32, i32) {
    %c0_i32 = arith.constant 0 : i32
    %c0_i32_0 = arith.constant 0 : i32
    %c0_i32_1 = arith.constant 0 : i32
    %c0_i32_2 = arith.constant 0 : i32
    return %c0_i32, %c0_i32_0, %c0_i32_1 : i32, i32, i32
  }
  func.func @transform_2(%arg0: i32, %arg1: memref<8xi32, #tpu.memory_space<smem>>) -> (i32, i32) {
    %c0_i32 = arith.constant 0 : i32
    %c0_i32_0 = arith.constant 0 : i32
    %c0_i32_1 = arith.constant 0 : i32
    return %c0_i32, %c0_i32_0 : i32, i32
  }
  func.func @transform_3(%arg0: i32, %arg1: memref<8xi32, #tpu.memory_space<smem>>) -> (i32, i32) {
    %c0_i32 = arith.constant 0 : i32
    %c0_i32_0 = arith.constant 0 : i32
    %c0_i32_1 = arith.constant 0 : i32
    return %c0_i32, %c0_i32_0 : i32, i32
  }
  func.func @transform_4(%arg0: i32, %arg1: memref<8xi32, #tpu.memory_space<smem>>) -> (i32, i32) {
    %c0_i32 = arith.constant 0 : i32
    %c0_i32_0 = arith.constant 0 : i32
    %c0_i32_1 = arith.constant 0 : i32
    return %c0_i32, %c0_i32_0 : i32, i32
  }
  func.func @transform_5(%arg0: i32, %arg1: memref<8xi32, #tpu.memory_space<smem>>) -> (i32, i32) {
    %c0_i32 = arith.constant 0 : i32
    %c0_i32_0 = arith.constant 0 : i32
    %c0_i32_1 = arith.constant 0 : i32
    return %c0_i32, %c0_i32_0 : i32, i32
  }
  func.func @transform_6(%arg0: i32, %arg1: memref<8xi32, #tpu.memory_space<smem>>) -> (i32, i32) {
    %c0_i32 = arith.constant 0 : i32
    %c0_i32_0 = arith.constant 0 : i32
    %c0_i32_1 = arith.constant 0 : i32
    return %c0_i32, %c0_i32_0 : i32, i32
  }
  func.func @transform_7(%arg0: i32, %arg1: memref<8xi32, #tpu.memory_space<smem>>) -> (i32, i32) {
    %c0_i32 = arith.constant 0 : i32
    %c0_i32_0 = arith.constant 0 : i32
    %c0_i32_1 = arith.constant 0 : i32
    return %c0_i32, %c0_i32_0 : i32, i32
  }
  func.func @transform_8(%arg0: i32, %arg1: memref<8xi32, #tpu.memory_space<smem>>) -> (i32, i32) {
    %c0_i32 = arith.constant 0 : i32
    %c0_i32_0 = arith.constant 0 : i32
    %c0_i32_1 = arith.constant 0 : i32
    return %c0_i32, %c0_i32_0 : i32, i32
  }
  func.func @transform_9(%arg0: i32, %arg1: memref<8xi32, #tpu.memory_space<smem>>) -> (i32, i32) {
    %c0_i32 = arith.constant 0 : i32
    %c0_i32_0 = arith.constant 0 : i32
    %c0_i32_1 = arith.constant 0 : i32
    return %c0_i32, %c0_i32_0 : i32, i32
  }
  func.func @transform_10(%arg0: i32, %arg1: memref<8xi32, #tpu.memory_space<smem>>) -> (i32, i32) {
    %c0_i32 = arith.constant 0 : i32
    %c0_i32_0 = arith.constant 0 : i32
    %c0_i32_1 = arith.constant 0 : i32
    return %c0_i32, %c0_i32_0 : i32, i32
  }
  func.func @transform_11(%arg0: i32, %arg1: memref<8xi32, #tpu.memory_space<smem>>) -> (i32, i32, i32) {
    %c0_i32 = arith.constant 0 : i32
    %c0_i32_0 = arith.constant 0 : i32
    %c0_i32_1 = arith.constant 0 : i32
    %c0_i32_2 = arith.constant 0 : i32
    return %c0_i32, %c0_i32_0, %c0_i32_1 : i32, i32, i32
  }
}

</mosaic_0001>

<bundles_post_ra>
// kernel: improved_seq2seq_forward.1
= control target key start
LH: loop header
LB: loop body
LE: loop exit
PB: predicated region body
PF: predicated region fallthrough
CT: control target
= control target key end

     0   :  { %s22339_s0 = inlined_call_operand.vmem [shape: s32[8], index: 0, kind: input, shape index: {}]   ;;  %s22340_s1 = inlined_call_operand.vmem [shape: f32[8,8,32], index: 1, kind: input, shape index: {}]   ;;  %s22341_s2 = inlined_call_operand.vmem [shape: f32[8,8,32], index: 2, kind: input, shape index: {}]   ;;  %s22342_s3 = inlined_call_operand.vmem [shape: f32[32,128], index: 3, kind: input, shape index: {}]   ;;  %s22343_s4 = inlined_call_operand.vmem [shape: f32[32,128], index: 4, kind: input, shape index: {}]   ;;  %s22344_s5 = inlined_call_operand.vmem [shape: f32[1,128], index: 5, kind: input, shape index: {}]   ;;  %s22345_s6 = inlined_call_operand.vmem [shape: f32[128,32], index: 6, kind: input, shape index: {}]   ;;  %s22346_s7 = inlined_call_operand.vmem [shape: f32[32,128], index: 7, kind: input, shape index: {}]   ;;  %s22347_s8 = inlined_call_operand.vmem [shape: f32[32,128], index: 8, kind: input, shape index: {}]   ;;  %s22348_s9 = inlined_call_operand.vmem [shape: f32[1,128], index: 9, kind: input, shape index: {}]   ;;  %s22349_s10 = inlined_call_operand.vmem [shape: f32[64,128], index: 10, kind: input, shape index: {}]   ;;  %s22350_s11 = inlined_call_operand.vmem [shape: f32[1,128], index: 11, kind: input, shape index: {}]   ;;  %s22351_s12 = inlined_call_operand.vmem [shape: f32[8,8,128], index: 12, kind: output, shape index: {}]  }
   0x1   :  { %s17_s23 = sshll.u32 %s22339_s0, 4  ;;  %s18_s23 = int_to_ptr.vmem [resolvable:$true] %s17_s23 }
   0x2   :  { %s19778_s24 = scalar_lea.vmem %s18_s23, 16  ;;  %p19783_p1 = scmp.lt.s32.totalorder %s18_s23, %s18_s23 }
   0x3   :  { %p19779_p0 = scmp.ne.s32.totalorder %s18_s23, %s19778_s24  ;;  %p19784_p2 = scmp.lt.s32.totalorder %s19778_s24, %s19778_s24 }
   0x5   :  { %p19785_p3 = por %p19784_p2, %p19783_p1 }
   0x7   :  { %p19786_p4 = pnand %p19785_p3, %p19779_p0 }
   0x9   :  { %19789 = shalt.err (!%p19786_p4)  }
   0xa   :  { %s19792_s25 = smov [#allocation3]  }
   0xb   :  { %20 = dma.vmem_to_smem %s18_s23, 16, %s19792_s25, [#allocation2] }
   0xc   :  { %19790 = dma.done.wait [#allocation2], 16 }
   0xd   :  { %19791 = vsyncadd [#allocation2], 4294967280 }
   0xe   :  { %22 = sfence }
   0xf   :  { %v49_v0 = vld [vmem:[%s22343_s4] sm:$0xff]  ;;  %v50_v1 = vld [vmem:[%s22343_s4 + $0x8] sm:$0xff]  ;;  %v19793_v3 = vmov 0.0|0.0   ;;  %v51_v6 = vld [vmem:[%s22343_s4 + $0x10] sm:$0xff]  ;;  %vm19794_vm0 = vmmov 0   ;;  %v19795_v11 = vmov 0.0   ;;  %v54_v34 = vlaneseq }
  0x10   :  { %v45_v2 = vld [vmem:[%s22342_s3] sm:$0xff]  ;;  %18923 = vmatprep.subr.bf16.mxu0 %v19793_v3  ;;  %18929 = vmatprep.subr.bf16.mxu1 %v19793_v3  ;;  %v19879_v4 = vpack.c.bf16 %v50_v1, %v49_v0  ;;  %v46_v5 = vld [vmem:[%s22342_s3 + $0x8] sm:$0xff]  ;;  %v52_v7 = vld [vmem:[%s22343_s4 + $0x18] sm:$0xff]  ;;  %vm57_vm1 = vcmask 261120   ;;  %s19796_s25 = smov 64   ;;  %s19797_s26 = smov 32  }
  0x11   :  { %v19890_v8 = vpack.c.bf16 %v46_v5, %v45_v2  ;;  %v47_v9 = vld [vmem:[%s22342_s3 + $0x10] sm:$0xff]  ;;  %v48_v10 = vld [vmem:[%s22342_s3 + $0x18] sm:$0xff]  ;;  %17518 = vmatprep.mubr.msk.f32.mxu0 %vm19794_vm0, %v19795_v11  ;;  %17529 = vmatprep.mubr.msk.f32.mxu1 %vm19794_vm0, %v19795_v11  ;;  %v19903_v12 = vpack.c.bf16 %v52_v7, %v51_v6  ;;  %v56_v14 = vld [vmem:[%s22340_s1] sm:$0xff]  ;;  %v19798_v35 = vmov 1966171168   ;;  %v19954_v37 = vshrl.u32 %v54_v34, 7 }
  0x12   :  { %18925 = vmatpush3.bf16.msra.mxu0 %v19879_v4  ;;  %v19907_v13 = vpack.c.bf16 %v48_v10, %v47_v9  ;;  %v19934_v16 = vld [vmem:[%s22344_s5] ss:$0 sm:$0xff]  ;;  %v16600_v33 = vld [vmem:[%s22340_s1 + $0x8] sm:$0xff]  ;;  %v239_v36 = vunpack.c.l.s4 %v19798_v35  ;;  %vm3241_vm10 = vcmask 57344   ;;  %vm3331_vm11 = vcmask 64512   ;;  %s16693_s24 = sld [smem:[#allocation3 + $0x1]] }
  0x13   :  { %18931 = vmatpush3.bf16.msra.mxu1 %v19890_v8  ;;  %18926 = vmatprep.subr.bf16.mxu0 %v19793_v3  ;;  %v19963_v46 = vsub.s32 0, %v19954_v37  ;;  %vm235_vm2 = vcmp.eq.s32.totalorder %v19954_v37, 0  ;;  %vm516_vm3 = vcmp.eq.s32.totalorder %v19954_v37, 1  ;;  %vm797_vm4 = vcmp.eq.s32.totalorder %v19954_v37, 2  ;;  %s16727_s16 = sld [smem:[#allocation3 + $0x2]]  ;;  %s16829_s14 = sld [smem:[#allocation3 + $0x5]] }
  0x14   :  { %18932 = vmatprep.subr.bf16.mxu1 %v19793_v3  ;;  %v240_v38 = vunpack.c.0.s8 %v239_v36  ;;  %vm1078_vm5 = vcmp.eq.s32.totalorder %v19954_v37, 3  ;;  %vm1359_vm6 = vcmp.eq.s32.totalorder %v19954_v37, 4  ;;  %vm1640_vm7 = vcmp.eq.s32.totalorder %v19954_v37, 5 }
  0x15   :  { %vm1921_vm8 = vcmp.eq.s32.totalorder %v19954_v37, 6  ;;  %vm2202_vm9 = vcmp.eq.s32.totalorder %v19954_v37, 7  ;;  %vm3932_vm12 = vcmask 1041409   ;;  %vm3935_vm13 = vcmask 1042434  }
  0x16   :  { %18928 = vmatpush3.bf16.msra.mxu0 %v19903_v12  ;;  %v19957_v39 = vsub.s32 %v240_v38, %v19954_v37  ;;  %vm3938_vm14 = vcmask 1043459   ;;  %vm3941_vm15 = vcmask 1044484  }
  0x17   :  { %18934 = vmatpush3.bf16.msra.mxu1 %v19907_v13  ;;  %18935 = vmatprep.subr.bf16.mxu0 %v19793_v3 }
  0x18   :  { %18941 = vmatprep.subr.bf16.mxu1 %v19793_v3  ;;  %p5981_p6 = scmp.eq.s32.totalorder %s16693_s24, 1 }
  0x19   :  { %17519 = vmatmul.mubr.f32.vlgmr.msra.gmra.mrb[0].mxu0 %v19795_v11  ;;  %p7765_p7 = scmp.eq.s32.totalorder %s16727_s16, 1  ;;  %p13117_p10 = scmp.eq.s32.totalorder %s16829_s14, 1 }
  0x1a   :  { %17530 = vmatmul.mubr.msk.f32.vlgmr.msra.gmra.mrb[0].mxu1 %vm57_vm1, %v56_v14  ;;  %18937 = vmatpush3.bf16.msra.mxu0 %v19879_v4  ;;  %s5984_s27 = scalar_select %p5981_p6, 1, 0 }
  0x1b   :  { %18943 = vmatpush3.bf16.msra.mxu1 %v19890_v8  ;;  %18938 = vmatprep.subr.bf16.mxu0 %v19793_v3  ;;  %s7768_s17 = scalar_select %p7765_p7, 1, 0 }
  0x1c   :  { %18944 = vmatprep.subr.bf16.mxu1 %v19793_v3  ;;  %17551 = vmatprep.mubr.msk.f32.mxu1 %vm19794_vm0, %v19795_v11  ;;  %s13120_s15 = scalar_select %p13117_p10, 1, 0 }
  0x1d   :  { %17540 = vmatprep.mubr.msk.f32.mxu0 %vm19794_vm0, %v19795_v11 }
  0x1e   :  { %18940 = vmatpush3.bf16.msra.mxu0 %v19903_v12 }
  0x1f   :  { %18946 = vmatpush3.bf16.msra.mxu1 %v19907_v13  ;;  %18947 = vmatprep.subr.bf16.mxu0 %v19793_v3 }
  0x20   :  { %18953 = vmatprep.subr.bf16.mxu1 %v19793_v3 }
  0x22   :  { %17552 = vmatmul.mubr.msk.f32.vlgmr.msra.gmra.mrb[2].mxu1 %vm57_vm1, %v16600_v33 }
  0x23   :  { %18955 = vmatpush3.bf16.msra.mxu1 %v19890_v8  ;;  %17573 = vmatprep.mubr.msk.f32.mxu1 %vm19794_vm0, %v19795_v11 }
  0x24   :  { %18956 = vmatprep.subr.bf16.mxu1 %v19793_v3 }
  0x27   :  { %18958 = vmatpush3.bf16.msra.mxu1 %v19907_v13 }
  0x28   :  { %18965 = vmatprep.subr.bf16.mxu1 %v19793_v3 }
  0xec   :  { %v127_v15 = vpop.f32.mrb[0].mxu0 }
  0xed   :  { %v200_v17 = vpop.f32.mrb[0].mxu1  ;;  %v17520_v18 = vpop.f32.mrb[1].mxu0 }
  0xee   :  { %v201_v19 = vadd.f32 %v200_v17, %v127_v15  ;;  %v17531_v20 = vpop.f32.mrb[1].mxu1 }
  0xf0   :  { %v210_v21 = vadd.f32 %v19934_v16, %v201_v19 }
  0xf2   :  { %19387 = vtanh.f32 %v210_v21  ;;  %v16599_v23 = vmul.f32 -1.442695, %v210_v21  ;;  %v16604_v21 = vld [vmem:[%s22340_s1 + $0x10] sm:$0xff] }
  0xf3   :  { %17574 = vmatmul.mubr.msk.f32.vlgmr.msra.gmra.mrb[4].mxu1 %vm57_vm1, %v16604_v21 }
  0xf4   :  { %19389 = vpow2.f32 %v16599_v23  ;;  %18967 = vmatpush3.bf16.msra.mxu1 %v19890_v8  ;;  %17595 = vmatprep.mubr.msk.f32.mxu1 %vm19794_vm0, %v19795_v11 }
  0xf5   :  { %v487_v60 = vpop.f32.mrb[2].mxu1  ;;  %18968 = vmatprep.subr.bf16.mxu1 %v19793_v3 }
  0xf6   :  { %v17553_v61 = vpop.f32.mrb[3].mxu1 }
  0xf8   :  { %18970 = vmatpush3.bf16.msra.mxu1 %v19907_v13 }
  0xf9   :  { %18977 = vmatprep.subr.bf16.mxu1 %v19793_v3 }
  0xfc   :  { %v19388_v22 = vpop.eup %19387 }
  0xfd   :  { %220 = vrot.lane.b32.xlu0 %v19388_v22, %s19796_s25 }
  0xfe   :  { %v19390_v24 = vpop.eup %19389 }
  0xff   :  { %v214_v25 = vadd.f32 1.0, %v19390_v24 }
 0x101   :  { %19391 = vrcp.f32 %v214_v25 }
 0x10b   :  { %v19392_v26 = vpop.eup %19391 }
 0x10c   :  { %v218_v29 = vmul.f32 0.0, %v19392_v26 }
 0x16f   :  { %v221_v27 = vpop.permute.xlu0 %220 }
 0x170   :  { %v223_v28 = vmul.f32 %v19392_v26, %v221_v27 }
 0x172   :  { %225 = vrot.lane.b32.xlu0 %v223_v28, %s19797_s26 }
 0x1e4   :  { %v226_v30 = vpop.permute.xlu0 %225 }
 0x1e5   :  { %v19939_v31 = vadd.f32 %v226_v30, %v218_v29 }
 0x1e7   :  { %19393 = vtanh.f32 %v19939_v31 }
 0x1f1   :  { %v19394_v32 = vpop.eup %19393 }
 0x1f2   :  { %231 = vrot.lane.b32.xlu1 %v19394_v32, %s19796_s25 }
 0x264   :  { %v232_v40 = vpop.permute.xlu1 %231 }
 0x265   :  { %v234_v41 = vmul.f32 %v19392_v26, %v232_v40 }
 0x267   :  { %v237_v42 = vcombine.high %v234_v41, %v234_v41  ;;  %v244_v43 = vrot.slane %v234_v41, %v19957_v39  ;;  %344 = vrot.lane.b32.xlu1 %v234_v41, %s19797_s26 }
 0x269   :  { %v251_v44 = vrot.slane %v237_v42, %v19957_v39  ;;  %v252_v45 = vcombine.high %v244_v43, %v244_v43  ;;  %v260_v22 = vrot.slane %v244_v43, %v19957_v39 }
 0x26b   :  { %v253_v47 = vcombine.high %v251_v44, %v251_v44  ;;  %v274_v48 = vrot.slane %v252_v45, %v19957_v39  ;;  %v267_v23 = vrot.slane %v251_v44, %v19957_v39  ;;  %v282_v24 = vcombine.high %v260_v22, %v260_v22 }
 0x26c   :  { %v289_v30 = vrot.slane %v260_v22, %v19963_v46 }
 0x26d   :  { %v281_v49 = vrot.slane %v253_v47, %v19957_v39  ;;  %v284_v50 = vcombine.high %v274_v48, %v274_v48  ;;  %v293_v51 = vrot.slane %v274_v48, %v19963_v46  ;;  %v283_v27 = vcombine.high %v267_v23, %v267_v23 }
 0x26e   :  { %v305_v32 = vrot.slane %v267_v23, %v19963_v46  ;;  %v326_v44 = vsel %vm235_vm2, %v289_v30, 0.0 }
 0x26f   :  { %v285_v52 = vcombine.high %v281_v49, %v281_v49  ;;  %v301_v53 = vrot.slane %v284_v50, %v19963_v46  ;;  %v309_v54 = vrot.slane %v281_v49, %v19963_v46  ;;  %v19973_v55 = vsel %vm235_vm2, %v293_v51, 0.0 }
 0x270   :  { %v313_v38 = vrot.slane %v283_v27, %v19963_v46  ;;  %v330_v47 = vsel %vm235_vm2, %v305_v32, 0.0 }
 0x271   :  { %v317_v56 = vrot.slane %v285_v52, %v19963_v46  ;;  %v19978_v57 = vsel %vm235_vm2, %v301_v53, 0.0  ;;  %v19982_v58 = vsel %vm235_vm2, %v309_v54, 0.0 }
 0x272   :  { %v332_v53 = vsel %vm235_vm2, %v313_v38, 0.0 }
 0x273   :  { %v19986_v59 = vsel %vm235_vm2, %v317_v56, 0.0 }
 0x2d9   :  { %v345_v62 = vpop.permute.xlu1 %344 }
 0x2da   :  { %17541 = vmatmul.mubr.msk.f32.vlgmr.msra.gmra.mrb[2].mxu0 %vm57_vm1, %v345_v62 }
 0x2db   :  { %18949 = vmatpush3.bf16.msra.mxu0 %v19879_v4  ;;  %17562 = vmatprep.mubr.msk.f32.mxu0 %vm19794_vm0, %v19795_v11 }
 0x2dc   :  { %18950 = vmatprep.subr.bf16.mxu0 %v19793_v3 }
 0x2df   :  { %18952 = vmatpush3.bf16.msra.mxu0 %v19903_v12 }
 0x2e0   :  { %18959 = vmatprep.subr.bf16.mxu0 %v19793_v3 }
 0x3ad   :  { %v414_v63 = vpop.f32.mrb[2].mxu0 }
 0x3ae   :  { %v488_v0 = vadd.f32 %v487_v60, %v414_v63  ;;  %v17542_v1 = vpop.f32.mrb[3].mxu0 }
 0x3b0   :  { %v491_v2 = vadd.f32 %v19934_v16, %v488_v0 }
 0x3b2   :  { %19395 = vtanh.f32 %v491_v2  ;;  %v16603_v6 = vmul.f32 -1.442695, %v491_v2 }
 0x3b4   :  { %19397 = vpow2.f32 %v16603_v6 }
 0x3bc   :  { %v19396_v5 = vpop.eup %19395 }
 0x3bd   :  { %501 = vrot.lane.b32.xlu0 %v19396_v5, %s19796_s25 }
 0x3be   :  { %v19398_v7 = vpop.eup %19397 }
 0x3bf   :  { %v495_v9 = vadd.f32 1.0, %v19398_v7 }
 0x3c1   :  { %19399 = vrcp.f32 %v495_v9 }
 0x3cb   :  { %v19400_v10 = vpop.eup %19399 }
 0x3cc   :  { %v499_v17 = vmul.f32 %v19400_v10, %v19939_v31  ;;  %v297_v31 = vrot.slane %v282_v24, %v19963_v46 }
 0x3ce   :  { %v328_v45 = vsel %vm235_vm2, %v297_v31, 0.0  ;;  %vm3944_vm2 = vcmask 1045509  }
 0x42f   :  { %v502_v14 = vpop.permute.xlu0 %501 }
 0x430   :  { %v504_v15 = vmul.f32 %v19400_v10, %v502_v14 }
 0x432   :  { %506 = vrot.lane.b32.xlu1 %v504_v15, %s19797_s26 }
 0x4a4   :  { %v507_v18 = vpop.permute.xlu1 %506 }
 0x4a5   :  { %v19999_v19 = vadd.f32 %v507_v18, %v499_v17 }
 0x4a7   :  { %19401 = vtanh.f32 %v19999_v19 }
 0x4b1   :  { %v19402_v20 = vpop.eup %19401 }
 0x4b2   :  { %512 = vrot.lane.b32.xlu0 %v19402_v20, %s19796_s25 }
 0x524   :  { %v513_v25 = vpop.permute.xlu0 %512 }
 0x525   :  { %v515_v26 = vmul.f32 %v19400_v10, %v513_v25 }
 0x527   :  { %v518_v28 = vcombine.high %v515_v26, %v515_v26  ;;  %v525_v29 = vrot.slane %v515_v26, %v19957_v39  ;;  %625 = vrot.lane.b32.xlu1 %v515_v26, %s19797_s26 }
 0x529   :  { %v532_v33 = vrot.slane %v518_v28, %v19957_v39  ;;  %v533_v35 = vcombine.high %v525_v29, %v525_v29  ;;  %v541_v36 = vrot.slane %v525_v29, %v19957_v39 }
 0x52b   :  { %v534_v40 = vcombine.high %v532_v33, %v532_v33  ;;  %v548_v41 = vrot.slane %v532_v33, %v19957_v39  ;;  %v555_v42 = vrot.slane %v533_v35, %v19957_v39  ;;  %v563_v43 = vcombine.high %v541_v36, %v541_v36 }
 0x52c   :  { %v570_v48 = vrot.slane %v541_v36, %v19963_v46 }
 0x52d   :  { %v562_v49 = vrot.slane %v534_v40, %v19957_v39  ;;  %v564_v50 = vcombine.high %v548_v41, %v548_v41  ;;  %v565_v51 = vcombine.high %v555_v42, %v555_v42  ;;  %v574_v52 = vrot.slane %v555_v42, %v19963_v46  ;;  %v16608_v42 = vld [vmem:[%s22340_s1 + $0x18] sm:$0xff] }
 0x52e   :  { %v578_v54 = vrot.slane %v563_v43, %v19963_v46  ;;  %v586_v56 = vrot.slane %v548_v41, %v19963_v46  ;;  %v607_v60 = vsel %vm516_vm3, %v570_v48, 0.0  ;;  %17596 = vmatmul.mubr.msk.f32.vlgmr.msra.gmra.mrb[6].mxu1 %vm57_vm1, %v16608_v42 }
 0x52f   :  { %v566_v61 = vcombine.high %v562_v49, %v562_v49  ;;  %v582_v62 = vrot.slane %v565_v51, %v19963_v46  ;;  %v590_v63 = vrot.slane %v562_v49, %v19963_v46  ;;  %v594_v0 = vrot.slane %v564_v50, %v19963_v46  ;;  %18979 = vmatpush3.bf16.msra.mxu1 %v19890_v8 }
 0x530   :  { %v608_v1 = vsel %vm516_vm3, %v574_v52, 0.0  ;;  %v609_v2 = vsel %vm516_vm3, %v578_v54, 0.0  ;;  %v611_v5 = vsel %vm516_vm3, %v586_v56, 0.0  ;;  %v20050_v6 = vadd.f32 %v607_v60, %v326_v44  ;;  %17617 = vmatprep.mubr.msk.f32.mxu1 %vm19794_vm0, %v19795_v11  ;;  %18980 = vmatprep.subr.bf16.mxu1 %v19793_v3 }
 0x531   :  { %v598_v7 = vrot.slane %v566_v61, %v19963_v46  ;;  %v610_v9 = vsel %vm516_vm3, %v582_v62, 0.0  ;;  %v612_v10 = vsel %vm516_vm3, %v590_v63, 0.0  ;;  %v613_v14 = vsel %vm516_vm3, %v594_v0, 0.0 }
 0x532   :  { %v20060_v15 = vadd.f32 %v608_v1, %v19973_v55  ;;  %v20062_v17 = vadd.f32 %v609_v2, %v328_v45  ;;  %v20064_v18 = vadd.f32 %v611_v5, %v330_v47  ;;  %v20066_v20 = vadd.f32 %v613_v14, %v332_v53  ;;  %v768_v55 = vpop.f32.mrb[4].mxu1 }
 0x533   :  { %v20069_v21 = vadd.f32 %v610_v9, %v19978_v57  ;;  %v20072_v22 = vadd.f32 %v612_v10, %v19982_v58  ;;  %v614_v23 = vsel %vm516_vm3, %v598_v7, 0.0  ;;  %v17575_v25 = vpop.f32.mrb[5].mxu1  ;;  %18982 = vmatpush3.bf16.msra.mxu1 %v19907_v13  ;;  %vm3947_vm3 = vcmask 1046534  }
 0x534   :  { %v20077_v24 = vadd.f32 %v614_v23, %v19986_v59  ;;  %18989 = vmatprep.subr.bf16.mxu1 %v19793_v3 }
 0x599   :  { %v626_v26 = vpop.permute.xlu1 %625 }
 0x59a   :  { %17563 = vmatmul.mubr.msk.f32.vlgmr.msra.gmra.mrb[4].mxu0 %vm57_vm1, %v626_v26 }
 0x59b   :  { %18961 = vmatpush3.bf16.msra.mxu0 %v19879_v4  ;;  %17584 = vmatprep.mubr.msk.f32.mxu0 %vm19794_vm0, %v19795_v11 }
 0x59c   :  { %18962 = vmatprep.subr.bf16.mxu0 %v19793_v3 }
 0x59f   :  { %18964 = vmatpush3.bf16.msra.mxu0 %v19903_v12 }
 0x5a0   :  { %18971 = vmatprep.subr.bf16.mxu0 %v19793_v3 }
 0x66d   :  { %v695_v57 = vpop.f32.mrb[4].mxu0 }
 0x66e   :  { %v769_v58 = vadd.f32 %v768_v55, %v695_v57  ;;  %v17564_v59 = vpop.f32.mrb[5].mxu0 }
 0x670   :  { %v772_v27 = vadd.f32 %v19934_v16, %v769_v58 }
 0x672   :  { %19403 = vtanh.f32 %v772_v27  ;;  %v16607_v29 = vmul.f32 -1.442695, %v772_v27 }
 0x674   :  { %19405 = vpow2.f32 %v16607_v29 }
 0x67c   :  { %v19404_v28 = vpop.eup %19403 }
 0x67d   :  { %782 = vrot.lane.b32.xlu0 %v19404_v28, %s19796_s25 }
 0x67e   :  { %v19406_v30 = vpop.eup %19405 }
 0x67f   :  { %v776_v31 = vadd.f32 1.0, %v19406_v30 }
 0x681   :  { %19407 = vrcp.f32 %v776_v31 }
 0x68b   :  { %v19408_v32 = vpop.eup %19407 }
 0x68c   :  { %v780_v36 = vmul.f32 %v19408_v32, %v19999_v19 }
 0x6ef   :  { %v783_v33 = vpop.permute.xlu0 %782 }
 0x6f0   :  { %v785_v35 = vmul.f32 %v19408_v32, %v783_v33 }
 0x6f2   :  { %787 = vrot.lane.b32.xlu1 %v785_v35, %s19797_s26 }
 0x764   :  { %v788_v38 = vpop.permute.xlu1 %787 }
 0x765   :  { %v20090_v40 = vadd.f32 %v788_v38, %v780_v36 }
 0x767   :  { %19409 = vtanh.f32 %v20090_v40 }
 0x771   :  { %v19410_v41 = vpop.eup %19409 }
 0x772   :  { %793 = vrot.lane.b32.xlu0 %v19410_v41, %s19796_s25 }
 0x7e4   :  { %v794_v19 = vpop.permute.xlu0 %793 }
 0x7e5   :  { %v796_v43 = vmul.f32 %v19408_v32, %v794_v19 }
 0x7e7   :  { %v799_v44 = vcombine.high %v796_v43, %v796_v43  ;;  %v806_v45 = vrot.slane %v796_v43, %v19957_v39  ;;  %906 = vrot.lane.b32.xlu1 %v796_v43, %s19797_s26 }
 0x7e9   :  { %v813_v47 = vrot.slane %v799_v44, %v19957_v39  ;;  %v814_v48 = vcombine.high %v806_v45, %v806_v45  ;;  %v822_v49 = vrot.slane %v806_v45, %v19957_v39 }
 0x7eb   :  { %v815_v50 = vcombine.high %v813_v47, %v813_v47  ;;  %v829_v51 = vrot.slane %v813_v47, %v19957_v39  ;;  %v836_v52 = vrot.slane %v814_v48, %v19957_v39  ;;  %v844_v53 = vcombine.high %v822_v49, %v822_v49  ;;  %v16612_v47 = vld [vmem:[%s22340_s1 + $0x20] sm:$0xff] }
 0x7ec   :  { %v851_v54 = vrot.slane %v822_v49, %v19963_v46  ;;  %17618 = vmatmul.mubr.msk.f32.vlgmr.msra.gmra.mrb[8].mxu1 %vm57_vm1, %v16612_v47 }
 0x7ed   :  { %v843_v56 = vrot.slane %v815_v50, %v19957_v39  ;;  %v845_v60 = vcombine.high %v829_v51, %v829_v51  ;;  %v846_v61 = vcombine.high %v836_v52, %v836_v52  ;;  %v855_v62 = vrot.slane %v836_v52, %v19963_v46  ;;  %18991 = vmatpush3.bf16.msra.mxu1 %v19890_v8 }
 0x7ee   :  { %v859_v63 = vrot.slane %v844_v53, %v19963_v46  ;;  %v867_v0 = vrot.slane %v829_v51, %v19963_v46  ;;  %v888_v1 = vsel %vm797_vm4, %v851_v54, 0.0  ;;  %17639 = vmatprep.mubr.msk.f32.mxu1 %vm19794_vm0, %v19795_v11  ;;  %18992 = vmatprep.subr.bf16.mxu1 %v19793_v3 }
 0x7ef   :  { %v847_v2 = vcombine.high %v843_v56, %v843_v56  ;;  %v863_v5 = vrot.slane %v846_v61, %v19963_v46  ;;  %v871_v7 = vrot.slane %v843_v56, %v19963_v46  ;;  %v875_v9 = vrot.slane %v845_v60, %v19963_v46 }
 0x7f0   :  { %v889_v10 = vsel %vm797_vm4, %v855_v62, 0.0  ;;  %v890_v14 = vsel %vm797_vm4, %v859_v63, 0.0  ;;  %v892_v23 = vsel %vm797_vm4, %v867_v0, 0.0  ;;  %v20128_v55 = vadd.f32 %v888_v1, %v20050_v6 }
 0x7f1   :  { %v879_v25 = vrot.slane %v847_v2, %v19963_v46  ;;  %v20132_v26 = vadd.f32 %v890_v14, %v20062_v17  ;;  %v20135_v57 = vadd.f32 %v892_v23, %v20064_v18  ;;  %v894_v58 = vsel %vm797_vm4, %v875_v9, 0.0  ;;  %18994 = vmatpush3.bf16.msra.mxu1 %v19907_v13 }
 0x7f2   :  { %v20140_v59 = vadd.f32 %v894_v58, %v20066_v20  ;;  %v20143_v27 = vadd.f32 %v889_v10, %v20060_v15  ;;  %v891_v6 = vsel %vm797_vm4, %v863_v5, 0.0  ;;  %v893_v28 = vsel %vm797_vm4, %v871_v7, 0.0  ;;  %v1049_v15 = vpop.f32.mrb[6].mxu1  ;;  %19001 = vmatprep.subr.bf16.mxu1 %v19793_v3 }
 0x7f3   :  { %v20150_v17 = vadd.f32 %v891_v6, %v20069_v21  ;;  %v20153_v18 = vadd.f32 %v893_v28, %v20072_v22  ;;  %v895_v29 = vsel %vm797_vm4, %v879_v25, 0.0  ;;  %v17597_v30 = vpop.f32.mrb[7].mxu1  ;;  %vm3950_vm4 = vcmask 1047559  }
 0x7f4   :  { %v20158_v20 = vadd.f32 %v895_v29, %v20077_v24 }
 0x859   :  { %v907_v31 = vpop.permute.xlu1 %906 }
 0x85a   :  { %17585 = vmatmul.mubr.msk.f32.vlgmr.msra.gmra.mrb[6].mxu0 %vm57_vm1, %v907_v31 }
 0x85b   :  { %18973 = vmatpush3.bf16.msra.mxu0 %v19879_v4  ;;  %17606 = vmatprep.mubr.msk.f32.mxu0 %vm19794_vm0, %v19795_v11 }
 0x85c   :  { %18974 = vmatprep.subr.bf16.mxu0 %v19793_v3 }
 0x85f   :  { %18976 = vmatpush3.bf16.msra.mxu0 %v19903_v12 }
 0x860   :  { %18983 = vmatprep.subr.bf16.mxu0 %v19793_v3 }
 0x92d   :  { %v976_v21 = vpop.f32.mrb[6].mxu0 }
 0x92e   :  { %v1050_v22 = vadd.f32 %v1049_v15, %v976_v21  ;;  %v17586_v24 = vpop.f32.mrb[7].mxu0 }
 0x930   :  { %v1053_v32 = vadd.f32 %v19934_v16, %v1050_v22 }
 0x932   :  { %19411 = vtanh.f32 %v1053_v32  ;;  %v16611_v35 = vmul.f32 -1.442695, %v1053_v32 }
 0x934   :  { %19413 = vpow2.f32 %v16611_v35  ;;  %v1330_v35 = vpop.f32.mrb[8].mxu1 }
 0x93c   :  { %v19412_v33 = vpop.eup %19411 }
 0x93d   :  { %1063 = vrot.lane.b32.xlu0 %v19412_v33, %s19796_s25 }
 0x93e   :  { %v19414_v36 = vpop.eup %19413 }
 0x93f   :  { %v1057_v38 = vadd.f32 1.0, %v19414_v36  ;;  %v17619_v36 = vpop.f32.mrb[9].mxu1 }
 0x941   :  { %19415 = vrcp.f32 %v1057_v38 }
 0x94b   :  { %v19416_v41 = vpop.eup %19415 }
 0x94c   :  { %v1061_v43 = vmul.f32 %v19416_v41, %v20090_v40 }
 0x9af   :  { %v1064_v42 = vpop.permute.xlu0 %1063 }
 0x9b0   :  { %v1066_v19 = vmul.f32 %v19416_v41, %v1064_v42 }
 0x9b2   :  { %1068 = vrot.lane.b32.xlu1 %v1066_v19, %s19797_s26 }
 0xa24   :  { %v1069_v44 = vpop.permute.xlu1 %1068 }
 0xa25   :  { %v20171_v45 = vadd.f32 %v1069_v44, %v1061_v43 }
 0xa27   :  { %19417 = vtanh.f32 %v20171_v45 }
 0xa31   :  { %v19418_v48 = vpop.eup %19417 }
 0xa32   :  { %1074 = vrot.lane.b32.xlu0 %v19418_v48, %s19796_s25 }
 0xaa4   :  { %v1075_v40 = vpop.permute.xlu0 %1074 }
 0xaa5   :  { %v1077_v49 = vmul.f32 %v19416_v41, %v1075_v40 }
 0xaa7   :  { %v1080_v50 = vcombine.high %v1077_v49, %v1077_v49  ;;  %v1087_v51 = vrot.slane %v1077_v49, %v19957_v39  ;;  %1187 = vrot.lane.b32.xlu1 %v1077_v49, %s19797_s26 }
 0xaa9   :  { %v1094_v52 = vrot.slane %v1080_v50, %v19957_v39  ;;  %v1095_v53 = vcombine.high %v1087_v51, %v1087_v51  ;;  %v1103_v54 = vrot.slane %v1087_v51, %v19957_v39 }
 0xaab   :  { %v1096_v56 = vcombine.high %v1094_v52, %v1094_v52  ;;  %v1110_v60 = vrot.slane %v1094_v52, %v19957_v39  ;;  %v1117_v61 = vrot.slane %v1095_v53, %v19957_v39  ;;  %v1125_v62 = vcombine.high %v1103_v54, %v1103_v54  ;;  %v16616_v52 = vld [vmem:[%s22340_s1 + $0x28] sm:$0xff] }
 0xaac   :  { %v1132_v63 = vrot.slane %v1103_v54, %v19963_v46  ;;  %17640 = vmatmul.mubr.msk.f32.vlgmr.msra.gmra.mrb[10].mxu1 %vm57_vm1, %v16616_v52 }
 0xaad   :  { %v1124_v0 = vrot.slane %v1096_v56, %v19957_v39  ;;  %v1126_v1 = vcombine.high %v1110_v60, %v1110_v60  ;;  %v1127_v2 = vcombine.high %v1117_v61, %v1117_v61  ;;  %v1136_v5 = vrot.slane %v1117_v61, %v19963_v46  ;;  %19003 = vmatpush3.bf16.msra.mxu1 %v19890_v8 }
 0xaae   :  { %v1140_v7 = vrot.slane %v1125_v62, %v19963_v46  ;;  %v1148_v9 = vrot.slane %v1110_v60, %v19963_v46  ;;  %v1169_v10 = vsel %vm1078_vm5, %v1132_v63, 0.0  ;;  %17661 = vmatprep.mubr.msk.f32.mxu1 %vm19794_vm0, %v19795_v11  ;;  %19004 = vmatprep.subr.bf16.mxu1 %v19793_v3 }
 0xaaf   :  { %v1128_v14 = vcombine.high %v1124_v0, %v1124_v0  ;;  %v1144_v23 = vrot.slane %v1127_v2, %v19963_v46  ;;  %v1152_v25 = vrot.slane %v1124_v0, %v19963_v46  ;;  %v1156_v58 = vrot.slane %v1126_v1, %v19963_v46 }
 0xab0   :  { %v20203_v6 = vadd.f32 %v1169_v10, %v20128_v55  ;;  %v1171_v28 = vsel %vm1078_vm5, %v1140_v7, 0.0  ;;  %v1173_v29 = vsel %vm1078_vm5, %v1148_v9, 0.0  ;;  %v1170_v15 = vsel %vm1078_vm5, %v1136_v5, 0.0 }
 0xab1   :  { %v20212_v30 = vadd.f32 %v1171_v28, %v20132_v26  ;;  %v20215_v31 = vadd.f32 %v1173_v29, %v20135_v57  ;;  %v1175_v21 = vsel %vm1078_vm5, %v1156_v58, 0.0  ;;  %v20220_v55 = vadd.f32 %v1170_v15, %v20143_v27  ;;  %19006 = vmatpush3.bf16.msra.mxu1 %v19907_v13 }
 0xab2   :  { %v20223_v22 = vadd.f32 %v1175_v21, %v20140_v59  ;;  %v1172_v24 = vsel %vm1078_vm5, %v1144_v23, 0.0  ;;  %v1174_v32 = vsel %vm1078_vm5, %v1152_v25, 0.0  ;;  %v1160_v26 = vrot.slane %v1128_v14, %v19963_v46  ;;  %19013 = vmatprep.subr.bf16.mxu1 %v19793_v3 }
 0xab3   :  { %v20231_v57 = vadd.f32 %v1172_v24, %v20150_v17  ;;  %v20234_v33 = vadd.f32 %v1174_v32, %v20153_v18 }
 0xab4   :  { %v1176_v27 = vsel %vm1078_vm5, %v1160_v26, 0.0 }
 0xab5   :  { %v20239_v59 = vadd.f32 %v1176_v27, %v20158_v20 }
 0xb19   :  { %v1188_v38 = vpop.permute.xlu1 %1187 }
 0xb1a   :  { %17607 = vmatmul.mubr.msk.f32.vlgmr.msra.gmra.mrb[8].mxu0 %vm57_vm1, %v1188_v38 }
 0xb1b   :  { %18985 = vmatpush3.bf16.msra.mxu0 %v19879_v4  ;;  %17628 = vmatprep.mubr.msk.f32.mxu0 %vm19794_vm0, %v19795_v11 }
 0xb1c   :  { %18986 = vmatprep.subr.bf16.mxu0 %v19793_v3 }
 0xb1f   :  { %18988 = vmatpush3.bf16.msra.mxu0 %v19903_v12 }
 0xb20   :  { %18995 = vmatprep.subr.bf16.mxu0 %v19793_v3 }
 0xbed   :  { %v1257_v17 = vpop.f32.mrb[8].mxu0 }
 0xbee   :  { %v1331_v18 = vadd.f32 %v1330_v35, %v1257_v17  ;;  %v17608_v20 = vpop.f32.mrb[9].mxu0 }
 0xbf0   :  { %v1334_v41 = vadd.f32 %v19934_v16, %v1331_v18 }
 0xbf2   :  { %19419 = vtanh.f32 %v1334_v41  ;;  %v16615_v19 = vmul.f32 -1.442695, %v1334_v41 }
 0xbf4   :  { %19421 = vpow2.f32 %v16615_v19  ;;  %v1611_v19 = vpop.f32.mrb[10].mxu1 }
 0xbfc   :  { %v19420_v42 = vpop.eup %19419 }
 0xbfd   :  { %1344 = vrot.lane.b32.xlu0 %v19420_v42, %s19796_s25 }
 0xbfe   :  { %v19422_v43 = vpop.eup %19421 }
 0xbff   :  { %v1338_v44 = vadd.f32 1.0, %v19422_v43  ;;  %v17641_v43 = vpop.f32.mrb[11].mxu1 }
 0xc01   :  { %19423 = vrcp.f32 %v1338_v44 }
 0xc0b   :  { %v19424_v47 = vpop.eup %19423 }
 0xc0c   :  { %v1342_v49 = vmul.f32 %v19424_v47, %v20171_v45 }
 0xc6f   :  { %v1345_v48 = vpop.permute.xlu0 %1344 }
 0xc70   :  { %v1347_v40 = vmul.f32 %v19424_v47, %v1345_v48 }
 0xc72   :  { %1349 = vrot.lane.b32.xlu1 %v1347_v40, %s19797_s26 }
 0xce4   :  { %v1350_v50 = vpop.permute.xlu1 %1349 }
 0xce5   :  { %v20252_v51 = vadd.f32 %v1350_v50, %v1342_v49 }
 0xce7   :  { %19425 = vtanh.f32 %v20252_v51 }
 0xcf1   :  { %v19426_v53 = vpop.eup %19425 }
 0xcf2   :  { %1355 = vrot.lane.b32.xlu0 %v19426_v53, %s19796_s25 }
 0xd64   :  { %v1356_v45 = vpop.permute.xlu0 %1355 }
 0xd65   :  { %v1358_v54 = vmul.f32 %v19424_v47, %v1356_v45 }
 0xd67   :  { %v1361_v56 = vcombine.high %v1358_v54, %v1358_v54  ;;  %v1368_v60 = vrot.slane %v1358_v54, %v19957_v39  ;;  %1468 = vrot.lane.b32.xlu1 %v1358_v54, %s19797_s26 }
 0xd69   :  { %v1375_v61 = vrot.slane %v1361_v56, %v19957_v39  ;;  %v1376_v62 = vcombine.high %v1368_v60, %v1368_v60  ;;  %v1384_v63 = vrot.slane %v1368_v60, %v19957_v39 }
 0xd6b   :  { %v1377_v0 = vcombine.high %v1375_v61, %v1375_v61  ;;  %v1391_v1 = vrot.slane %v1375_v61, %v19957_v39  ;;  %v1398_v2 = vrot.slane %v1376_v62, %v19957_v39  ;;  %v1406_v5 = vcombine.high %v1384_v63, %v1384_v63  ;;  %v16620_v61 = vld [vmem:[%s22340_s1 + $0x30] sm:$0xff] }
 0xd6c   :  { %v1413_v7 = vrot.slane %v1384_v63, %v19963_v46  ;;  %17662 = vmatmul.mubr.msk.f32.vlgmr.msra.gmra.mrb[12].mxu1 %vm57_vm1, %v16620_v61 }
 0xd6d   :  { %v1405_v9 = vrot.slane %v1377_v0, %v19957_v39  ;;  %v1407_v10 = vcombine.high %v1391_v1, %v1391_v1  ;;  %v1408_v14 = vcombine.high %v1398_v2, %v1398_v2  ;;  %v1417_v23 = vrot.slane %v1398_v2, %v19963_v46  ;;  %19015 = vmatpush3.bf16.msra.mxu1 %v19890_v8 }
 0xd6e   :  { %v1421_v25 = vrot.slane %v1406_v5, %v19963_v46  ;;  %v1429_v58 = vrot.slane %v1391_v1, %v19963_v46  ;;  %v1450_v28 = vsel %vm1359_vm6, %v1413_v7, 0.0  ;;  %17683 = vmatprep.mubr.msk.f32.mxu1 %vm19794_vm0, %v19795_v11  ;;  %19016 = vmatprep.subr.bf16.mxu1 %v19793_v3 }
 0xd6f   :  { %v1409_v29 = vcombine.high %v1405_v9, %v1405_v9  ;;  %v20281_v15 = vadd.f32 %v1450_v28, %v20203_v6  ;;  %v1437_v21 = vrot.slane %v1407_v10, %v19963_v46  ;;  %v1451_v24 = vsel %vm1359_vm6, %v1417_v23, 0.0 }
 0xd70   :  { %v1452_v32 = vsel %vm1359_vm6, %v1421_v25, 0.0  ;;  %v1454_v26 = vsel %vm1359_vm6, %v1429_v58, 0.0  ;;  %v20291_v27 = vadd.f32 %v1451_v24, %v20220_v55  ;;  %v1425_v35 = vrot.slane %v1408_v14, %v19963_v46 }
 0xd71   :  { %v20295_v36 = vadd.f32 %v1452_v32, %v20212_v30  ;;  %v20298_v6 = vadd.f32 %v1454_v26, %v20215_v31  ;;  %v1456_v38 = vsel %vm1359_vm6, %v1437_v21, 0.0  ;;  %v1433_v17 = vrot.slane %v1405_v9, %v19963_v46  ;;  %19018 = vmatpush3.bf16.msra.mxu1 %v19907_v13 }
 0xd72   :  { %v20304_v18 = vadd.f32 %v1456_v38, %v20223_v22  ;;  %v1453_v55 = vsel %vm1359_vm6, %v1425_v35, 0.0  ;;  %v1441_v20 = vrot.slane %v1409_v29, %v19963_v46  ;;  %19025 = vmatprep.subr.bf16.mxu1 %v19793_v3 }
 0xd73   :  { %v20310_v41 = vadd.f32 %v1453_v55, %v20231_v57  ;;  %v1455_v30 = vsel %vm1359_vm6, %v1433_v17, 0.0 }
 0xd74   :  { %v20315_v31 = vadd.f32 %v1455_v30, %v20234_v33  ;;  %v1457_v42 = vsel %vm1359_vm6, %v1441_v20, 0.0 }
 0xd75   :  { %v20320_v22 = vadd.f32 %v1457_v42, %v20239_v59 }
 0xdd9   :  { %v1469_v44 = vpop.permute.xlu1 %1468 }
 0xdda   :  { %17629 = vmatmul.mubr.msk.f32.vlgmr.msra.gmra.mrb[10].mxu0 %vm57_vm1, %v1469_v44 }
 0xddb   :  { %18997 = vmatpush3.bf16.msra.mxu0 %v19879_v4  ;;  %17650 = vmatprep.mubr.msk.f32.mxu0 %vm19794_vm0, %v19795_v11 }
 0xddc   :  { %18998 = vmatprep.subr.bf16.mxu0 %v19793_v3 }
 0xddf   :  { %19000 = vmatpush3.bf16.msra.mxu0 %v19903_v12 }
 0xde0   :  { %19007 = vmatprep.subr.bf16.mxu0 %v19793_v3 }
 0xead   :  { %v1538_v57 = vpop.f32.mrb[10].mxu0 }
 0xeae   :  { %v1612_v33 = vadd.f32 %v1611_v19, %v1538_v57  ;;  %v17630_v59 = vpop.f32.mrb[11].mxu0 }
 0xeb0   :  { %v1615_v47 = vadd.f32 %v19934_v16, %v1612_v33 }
 0xeb2   :  { %19427 = vtanh.f32 %v1615_v47  ;;  %v16619_v40 = vmul.f32 -1.442695, %v1615_v47 }
 0xeb4   :  { %19429 = vpow2.f32 %v16619_v40 }
 0xebc   :  { %v19428_v48 = vpop.eup %19427 }
 0xebd   :  { %1625 = vrot.lane.b32.xlu0 %v19428_v48, %s19796_s25 }
 0xebe   :  { %v19430_v49 = vpop.eup %19429 }
 0xebf   :  { %v1619_v50 = vadd.f32 1.0, %v19430_v49 }
 0xec1   :  { %19431 = vrcp.f32 %v1619_v50 }
 0xecb   :  { %v19432_v52 = vpop.eup %19431 }
 0xecc   :  { %v1623_v54 = vmul.f32 %v19432_v52, %v20252_v51 }
 0xf2f   :  { %v1626_v53 = vpop.permute.xlu0 %1625 }
 0xf30   :  { %v1628_v45 = vmul.f32 %v19432_v52, %v1626_v53 }
 0xf32   :  { %1630 = vrot.lane.b32.xlu1 %v1628_v45, %s19797_s26 }
 0xfa4   :  { %v1631_v56 = vpop.permute.xlu1 %1630 }
 0xfa5   :  { %v20333_v60 = vadd.f32 %v1631_v56, %v1623_v54 }
 0xfa7   :  { %19433 = vtanh.f32 %v20333_v60 }
 0xfb1   :  { %v19434_v62 = vpop.eup %19433 }
 0xfb2   :  { %1636 = vrot.lane.b32.xlu0 %v19434_v62, %s19796_s25 }
0x1024   :  { %v1637_v51 = vpop.permute.xlu0 %1636 }
0x1025   :  { %v1639_v63 = vmul.f32 %v19432_v52, %v1637_v51 }
0x1027   :  { %v1642_v0 = vcombine.high %v1639_v63, %v1639_v63  ;;  %v1649_v1 = vrot.slane %v1639_v63, %v19957_v39  ;;  %1749 = vrot.lane.b32.xlu1 %v1639_v63, %s19797_s26 }
0x1029   :  { %v1656_v8 = vrot.slane %v1642_v0, %v19957_v39  ;;  %v1657_v2 = vcombine.high %v1649_v1, %v1649_v1  ;;  %v1665_v5 = vrot.slane %v1649_v1, %v19957_v39 }
0x102b   :  { %v1658_v7 = vcombine.high %v1656_v8, %v1656_v8  ;;  %v1672_v9 = vrot.slane %v1656_v8, %v19957_v39  ;;  %v1679_v13 = vrot.slane %v1657_v2, %v19957_v39  ;;  %v1687_v10 = vcombine.high %v1665_v5, %v1665_v5 }
0x102c   :  { %v1694_v14 = vrot.slane %v1665_v5, %v19963_v46 }
0x102d   :  { %v1686_v23 = vrot.slane %v1658_v7, %v19957_v39  ;;  %v1688_v25 = vcombine.high %v1672_v9, %v1672_v9  ;;  %v1689_v58 = vcombine.high %v1679_v13, %v1679_v13  ;;  %v1702_v28 = vrot.slane %v1687_v10, %v19963_v46 }
0x102e   :  { %v1731_v29 = vsel %vm1640_vm7, %v1694_v14, 0.0  ;;  %v1710_v21 = vrot.slane %v1672_v9, %v19963_v46  ;;  %v1698_v24 = vrot.slane %v1679_v13, %v19963_v46 }
0x102f   :  { %v20362_v32 = vadd.f32 %v1731_v29, %v20281_v15  ;;  %v1733_v26 = vsel %vm1640_vm7, %v1702_v28, 0.0  ;;  %v1718_v35 = vrot.slane %v1688_v25, %v19963_v46  ;;  %v1706_v38 = vrot.slane %v1689_v58, %v19963_v46 }
0x1030   :  { %v20369_v17 = vadd.f32 %v1733_v26, %v20295_v36  ;;  %v1735_v55 = vsel %vm1640_vm7, %v1710_v21, 0.0  ;;  %v1732_v20 = vsel %vm1640_vm7, %v1698_v24, 0.0  ;;  %v1714_v30 = vrot.slane %v1686_v23, %v19963_v46 }
0x1031   :  { %v20377_v15 = vadd.f32 %v1735_v55, %v20298_v6  ;;  %v1737_v42 = vsel %vm1640_vm7, %v1718_v35, 0.0  ;;  %v20382_v19 = vadd.f32 %v1732_v20, %v20291_v27  ;;  %v1734_v36 = vsel %vm1640_vm7, %v1706_v38, 0.0 }
0x1032   :  { %v20387_v43 = vadd.f32 %v1737_v42, %v20304_v18  ;;  %v20390_v44 = vadd.f32 %v1734_v36, %v20310_v41  ;;  %v1736_v57 = vsel %vm1640_vm7, %v1714_v30, 0.0  ;;  %v1690_v6 = vcombine.high %v1686_v23, %v1686_v23  ;;  %v1892_v18 = vpop.f32.mrb[12].mxu1 }
0x1033   :  { %v20395_v33 = vadd.f32 %v1736_v57, %v20315_v31  ;;  %v17663_v48 = vpop.f32.mrb[13].mxu1 }
0x1034   :  { %v1722_v59 = vrot.slane %v1690_v6, %v19963_v46 }
0x1036   :  { %v1738_v27 = vsel %vm1640_vm7, %v1722_v59, 0.0 }
0x1037   :  { %v20401_v47 = vadd.f32 %v1738_v27, %v20320_v22 }
0x1099   :  { %v1750_v40 = vpop.permute.xlu1 %1749 }
0x109a   :  { %17651 = vmatmul.mubr.msk.f32.vlgmr.msra.gmra.mrb[12].mxu0 %vm57_vm1, %v1750_v40 }
0x109b   :  { %19009 = vmatpush3.bf16.msra.mxu0 %v19879_v4  ;;  %17672 = vmatprep.mubr.msk.f32.mxu0 %vm19794_vm0, %v19795_v11 }
0x109c   :  { %19010 = vmatprep.subr.bf16.mxu0 %v19793_v3 }
0x109f   :  { %19012 = vmatpush3.bf16.msra.mxu0 %v19903_v12 }
0x10a0   :  { %19019 = vmatprep.subr.bf16.mxu0 %v19793_v3 }
0x116d   :  { %v1819_v41 = vpop.f32.mrb[12].mxu0 }
0x116e   :  { %v1893_v31 = vadd.f32 %v1892_v18, %v1819_v41  ;;  %v17652_v22 = vpop.f32.mrb[13].mxu0 }
0x1170   :  { %v1896_v49 = vadd.f32 %v19934_v16, %v1893_v31  ;;  %v16624_v16 = vld [vmem:[%s22340_s1 + $0x38] sm:$0xff] }
0x1171   :  { %17684 = vmatmul.mubr.msk.f32.vlgmr.msra.gmra.mrb[14].mxu1 %vm57_vm1, %v16624_v16 }
0x1172   :  { %19435 = vtanh.f32 %v1896_v49  ;;  %v16623_v52 = vmul.f32 -1.442695, %v1896_v49  ;;  %17705 = vmatprep.mubr.msk.f32.mxu1 %vm19794_vm0, %v19795_v11 }
0x1174   :  { %19437 = vpow2.f32 %v16623_v52 }
0x117c   :  { %v19436_v50 = vpop.eup %19435 }
0x117d   :  { %1906 = vrot.lane.b32.xlu0 %v19436_v50, %s19796_s25 }
0x117e   :  { %v19438_v4 = vpop.eup %19437 }
0x117f   :  { %v1900_v53 = vadd.f32 1.0, %v19438_v4 }
0x1181   :  { %19439 = vrcp.f32 %v1900_v53 }
0x118b   :  { %v19440_v45 = vpop.eup %19439 }
0x118c   :  { %v1904_v12 = vmul.f32 %v19440_v45, %v20333_v60 }
0x11ef   :  { %v1907_v54 = vpop.permute.xlu0 %1906 }
0x11f0   :  { %v1909_v56 = vmul.f32 %v19440_v45, %v1907_v54 }
0x11f2   :  { %1911 = vrot.lane.b32.xlu1 %v1909_v56, %s19797_s26 }
0x1244   :  { %v2173_v41 = vpop.f32.mrb[14].mxu1 }
0x1245   :  { %v17685_v31 = vpop.f32.mrb[15].mxu1 }
0x1264   :  { %v1912_v61 = vpop.permute.xlu1 %1911 }
0x1265   :  { %v20414_v62 = vadd.f32 %v1912_v61, %v1904_v12 }
0x1267   :  { %19441 = vtanh.f32 %v20414_v62 }
0x1271   :  { %v19442_v51 = vpop.eup %19441 }
0x1272   :  { %1917 = vrot.lane.b32.xlu0 %v19442_v51, %s19796_s25 }
0x12e4   :  { %v1918_v63 = vpop.permute.xlu0 %1917 }
0x12e5   :  { %v1920_v0 = vmul.f32 %v19440_v45, %v1918_v63  ;;  %v2325_v63 = vld [vmem:[%s22346_s7] sm:$0xff] }
0x12e7   :  { %v1923_v60 = vcombine.high %v1920_v0, %v1920_v0  ;;  %v1930_v1 = vrot.slane %v1920_v0, %v19957_v39  ;;  %2030 = vrot.lane.b32.xlu1 %v1920_v0, %s19797_s26  ;;  %v2326_v0 = vld [vmem:[%s22346_s7 + $0x8] sm:$0xff] }
0x12e9   :  { %v1937_v8 = vrot.slane %v1923_v60, %v19957_v39  ;;  %v1938_v2 = vcombine.high %v1930_v1, %v1930_v1  ;;  %v1946_v5 = vrot.slane %v1930_v1, %v19957_v39  ;;  %v2329_v60 = vld [vmem:[%s22347_s8] sm:$0xff]  ;;  %v20501_v1 = vpack.c.bf16 %v2326_v0, %v2325_v63 }
0x12eb   :  { %v1939_v7 = vcombine.high %v1937_v8, %v1937_v8  ;;  %v1953_v9 = vrot.slane %v1937_v8, %v19957_v39  ;;  %v1960_v13 = vrot.slane %v1938_v2, %v19957_v39  ;;  %v1968_v10 = vcombine.high %v1946_v5, %v1946_v5  ;;  %v2327_v8 = vld [vmem:[%s22346_s7 + $0x10] sm:$0xff]  ;;  %v2328_v2 = vld [vmem:[%s22346_s7 + $0x18] sm:$0xff]  ;;  %19027 = vmatpush3.bf16.msra.mxu1 %v20501_v1 }
0x12ec   :  { %v1975_v14 = vrot.slane %v1946_v5, %v19963_v46  ;;  %19028 = vmatprep.subr.bf16.mxu1 %v19793_v3 }
0x12ed   :  { %v1983_v23 = vrot.slane %v1968_v10, %v19963_v46  ;;  %v1991_v25 = vrot.slane %v1953_v9, %v19963_v46  ;;  %v1969_v58 = vcombine.high %v1953_v9, %v1953_v9  ;;  %v1979_v28 = vrot.slane %v1960_v13, %v19963_v46  ;;  %v2332_v9 = vld [vmem:[%s22347_s8 + $0x18] sm:$0xff]  ;;  %v20526_v10 = vld [vmem:[%s22345_s6] sm:$0xff] }
0x12ee   :  { %v2012_v29 = vsel %vm1921_vm8, %v1975_v14, 0.0  ;;  %v1970_v21 = vcombine.high %v1960_v13, %v1960_v13  ;;  %v1967_v24 = vrot.slane %v1939_v7, %v19957_v39  ;;  %v2331_v7 = vld [vmem:[%s22347_s8 + $0x10] sm:$0xff]  ;;  %v20521_v13 = vpack.c.bf16 %v2328_v2, %v2327_v8 }
0x12ef   :  { %v20439_v26 = vadd.f32 %v2012_v29, %v20362_v32  ;;  %v2014_v35 = vsel %vm1921_vm8, %v1983_v23, 0.0  ;;  %v2016_v38 = vsel %vm1921_vm8, %v1991_v25, 0.0  ;;  %v1999_v55 = vrot.slane %v1969_v58, %v19963_v46 }
0x12f0   :  { %v20447_v20 = vadd.f32 %v2014_v35, %v20369_v17  ;;  %v20450_v30 = vadd.f32 %v2016_v38, %v20377_v15  ;;  %v2013_v42 = vsel %vm1921_vm8, %v1979_v28, 0.0  ;;  %v1987_v32 = vrot.slane %v1970_v21, %v19963_v46  ;;  %19030 = vmatpush3.bf16.msra.mxu1 %v20521_v13 }
0x12f1   :  { %v2018_v36 = vsel %vm1921_vm8, %v1999_v55, 0.0  ;;  %v20458_v57 = vadd.f32 %v2013_v42, %v20382_v19  ;;  %v1995_v6 = vrot.slane %v1967_v24, %v19963_v46  ;;  %v1971_v59 = vcombine.high %v1967_v24, %v1967_v24  ;;  %17713 = vmatprep.subr.mxu1 %v19795_v11 }
0x12f2   :  { %v20462_v17 = vadd.f32 %v2018_v36, %v20387_v43  ;;  %v2015_v15 = vsel %vm1921_vm8, %v1987_v32, 0.0  ;;  %v20530_v14 = vpack.c.bf16 %v2332_v9, %v2331_v7  ;;  %v2348_v25 = vrot.slane %v20526_v10, %v19963_v46 }
0x12f3   :  { %v20467_v27 = vadd.f32 %v2015_v15, %v20390_v44  ;;  %v2017_v18 = vsel %vm1921_vm8, %v1995_v6, 0.0  ;;  %v2003_v48 = vrot.slane %v1971_v59, %v19963_v46 }
0x12f4   :  { %v20473_v19 = vadd.f32 %v2017_v18, %v20395_v33  ;;  %v19771_v33 = vld [vmem:[%s22344_s5] ss:$0 sm:$0xff]  ;;  %17706 = vmatmul.mubr.msk.f32.vlgmr.msra.gmra.mrb[16].mxu1 %vm57_vm1, %v2348_v25 }
0x12f5   :  { %v2019_v40 = vsel %vm1921_vm8, %v2003_v48, 0.0  ;;  %17715 = vmatprep.mubr.msk.f32.mxu1 %vm19794_vm0, %v19795_v11 }
0x12f6   :  { %v20478_v43 = vadd.f32 %v2019_v40, %v20401_v47 }
0x1359   :  { %v2031_v22 = vpop.permute.xlu1 %2030 }
0x135a   :  { %17673 = vmatmul.mubr.msk.f32.vlgmr.msra.gmra.mrb[14].mxu0 %vm57_vm1, %v2031_v22 }
0x135b   :  { %17694 = vmatprep.mubr.msk.f32.mxu0 %vm19794_vm0, %v19795_v11 }
0x13c7   :  { %v2492_v0 = vpop.f32.mrb[16].mxu1 }
0x142d   :  { %v2100_v44 = vpop.f32.mrb[14].mxu0 }
0x142e   :  { %v2174_v49 = vadd.f32 %v2173_v41, %v2100_v44  ;;  %v17674_v50 = vpop.f32.mrb[15].mxu0 }
0x1430   :  { %v2177_v52 = vadd.f32 %v19771_v33, %v2174_v49 }
0x1432   :  { %19443 = vtanh.f32 %v2177_v52  ;;  %v16627_v47 = vmul.f32 -1.442695, %v2177_v52 }
0x1434   :  { %19445 = vpow2.f32 %v16627_v47 }
0x143c   :  { %v19444_v4 = vpop.eup %19443 }
0x143d   :  { %2187 = vrot.lane.b32.xlu0 %v19444_v4, %s19796_s25 }
0x143e   :  { %v19446_v53 = vpop.eup %19445 }
0x143f   :  { %v2181_v45 = vadd.f32 1.0, %v19446_v53 }
0x1441   :  { %19447 = vrcp.f32 %v2181_v45 }
0x144b   :  { %v19448_v54 = vpop.eup %19447 }
0x144c   :  { %v2185_v61 = vmul.f32 %v19448_v54, %v20414_v62  ;;  %v2330_v62 = vld [vmem:[%s22347_s8 + $0x8] sm:$0xff]  ;;  %s16761_s8 = sld [smem:[#allocation3 + $0x3]] }
0x144d   :  { %v20512_v5 = vpack.c.bf16 %v2330_v62, %v2329_v60  ;;  %v17707_v60 = vpop.f32.mrb[17].mxu1 }
0x144f   :  { %19021 = vmatpush3.bf16.msra.mxu0 %v20512_v5 }
0x1450   :  { %19022 = vmatprep.subr.bf16.mxu0 %v19793_v3 }
0x1452   :  { %p9549_p8 = scmp.eq.s32.totalorder %s16761_s8, 1 }
0x1453   :  { %19024 = vmatpush3.bf16.msra.mxu0 %v20530_v14 }
0x1454   :  { %17708 = vmatprep.subr.mxu0 %v19795_v11  ;;  %s9552_s21 = scalar_select %p9549_p8, 1, 0 }
0x14af   :  { %v2188_v56 = vpop.permute.xlu0 %2187 }
0x14b0   :  { %v2190_v12 = vmul.f32 %v19448_v54, %v2188_v56 }
0x14b2   :  { %2192 = vrot.lane.b32.xlu1 %v2190_v12, %s19797_s26 }
0x1524   :  { %v2193_v16 = vpop.permute.xlu1 %2192 }
0x1525   :  { %v20489_v51 = vadd.f32 %v2193_v16, %v2185_v61 }
0x1527   :  { %19449 = vtanh.f32 %v20489_v51 }
0x1531   :  { %v19450_v23 = vpop.eup %19449 }
0x1532   :  { %2198 = vrot.lane.b32.xlu0 %v19450_v23, %s19796_s25 }
0x15a4   :  { %v2199_v58 = vpop.permute.xlu0 %2198 }
0x15a5   :  { %v2201_v28 = vmul.f32 %v19448_v54, %v2199_v58 }
0x15a7   :  { %v2204_v29 = vcombine.high %v2201_v28, %v2201_v28  ;;  %v2211_v21 = vrot.slane %v2201_v28, %v19957_v39  ;;  %2349 = vrot.lane.b32.xlu1 %v2201_v28, %s19797_s26 }
0x15a9   :  { %v2218_v24 = vrot.slane %v2204_v29, %v19957_v39  ;;  %v2219_v35 = vcombine.high %v2211_v21, %v2211_v21  ;;  %v2227_v38 = vrot.slane %v2211_v21, %v19957_v39 }
0x15ab   :  { %v2220_v55 = vcombine.high %v2218_v24, %v2218_v24  ;;  %v2256_v42 = vrot.slane %v2227_v38, %v19963_v46  ;;  %v2249_v32 = vcombine.high %v2227_v38, %v2227_v38  ;;  %v2234_v36 = vrot.slane %v2218_v24, %v19957_v39 }
0x15ac   :  { %v2241_v6 = vrot.slane %v2219_v35, %v19957_v39 }
0x15ad   :  { %v2293_v59 = vsel %vm2202_vm9, %v2256_v42, 0.0  ;;  %v2264_v15 = vrot.slane %v2249_v32, %v19963_v46  ;;  %v2272_v18 = vrot.slane %v2234_v36, %v19963_v46  ;;  %v2250_v48 = vcombine.high %v2234_v36, %v2234_v36 }
0x15ae   :  { %v2301_v40 = vadd.f32 %v2293_v59, %v20439_v26  ;;  %v2260_v41 = vrot.slane %v2241_v6, %v19963_v46  ;;  %v2251_v31 = vcombine.high %v2241_v6, %v2241_v6  ;;  %v2248_v22 = vrot.slane %v2220_v55, %v19957_v39 }
0x15af   :  { %v2295_v44 = vsel %vm2202_vm9, %v2264_v15, 0.0  ;;  %v2297_v49 = vsel %vm2202_vm9, %v2272_v18, 0.0  ;;  %v2280_v50 = vrot.slane %v2250_v48, %v19963_v46 }
0x15b0   :  { %v2303_v33 = vadd.f32 %v2295_v44, %v20447_v20  ;;  %v2305_v52 = vadd.f32 %v2297_v49, %v20450_v30  ;;  %v2294_v26 = vsel %vm2202_vm9, %v2260_v41, 0.0  ;;  %v2268_v4 = vrot.slane %v2251_v31, %v19963_v46 }
0x15b1   :  { %v2299_v47 = vsel %vm2202_vm9, %v2280_v50, 0.0  ;;  %v2302_v53 = vadd.f32 %v2294_v26, %v20458_v57  ;;  %v2276_v45 = vrot.slane %v2248_v22, %v19963_v46  ;;  %v2252_v54 = vcombine.high %v2248_v22, %v2248_v22 }
0x15b2   :  { %v2307_v56 = vadd.f32 %v2299_v47, %v20462_v17  ;;  %v2296_v20 = vsel %vm2202_vm9, %v2268_v4, 0.0 }
0x15b3   :  { %v2304_v30 = vadd.f32 %v2296_v20, %v20467_v27  ;;  %v2298_v12 = vsel %vm2202_vm9, %v2276_v45, 0.0  ;;  %v2284_v61 = vrot.slane %v2252_v54, %v19963_v46  ;;  %v20589_v27 = vld [vmem:[%s22348_s9] ss:$0 sm:$0xff] }
0x15b4   :  { %v2306_v16 = vadd.f32 %v2298_v12, %v20473_v19 }
0x15b5   :  { %v2300_v57 = vsel %vm2202_vm9, %v2284_v61, 0.0 }
0x15b6   :  { %v2308_v63 = vadd.f32 %v2300_v57, %v20478_v43 }
0x1619   :  { %v2350_v17 = vpop.permute.xlu1 %2349 }
0x161a   :  { %17695 = vmatmul.mubr.msk.f32.vlgmr.msra.gmra.mrb[16].mxu0 %vm57_vm1, %v2350_v17 }
0x161b   :  { %17710 = vmatprep.mubr.msk.f32.mxu0 %vm19794_vm0, %v19795_v11 }
0x16ed   :  { %v2419_v62 = vpop.f32.mrb[16].mxu0 }
0x16ee   :  { %v2493_v19 = vadd.f32 %v2492_v0, %v2419_v62  ;;  %v17696_v8 = vpop.f32.mrb[17].mxu0 }
0x16f0   :  { %v2502_v37 = vadd.f32 %v20589_v27, %v2493_v19 }
0x16f2   :  { %19451 = vtanh.f32 %v2502_v37  ;;  %v16631_v2 = vmul.f32 -1.442695, %v2502_v37 }
0x16f4   :  { %19453 = vpow2.f32 %v16631_v2 }
0x16fc   :  { %v19452_v43 = vpop.eup %19451 }
0x16fd   :  { %2512 = vrot.lane.b32.xlu0 %v19452_v43, %s19796_s25 }
0x16fe   :  { %v19454_v7 = vpop.eup %19453 }
0x16ff   :  { %v2506_v9 = vadd.f32 1.0, %v19454_v7 }
0x1701   :  { %19455 = vrcp.f32 %v2506_v9 }
0x170b   :  { %v19456_v23 = vpop.eup %19455 }
0x170c   :  { %v2510_v28 = vmul.f32 %v19456_v23, %v20489_v51 }
0x176f   :  { %v2513_v25 = vpop.permute.xlu0 %2512 }
0x1770   :  { %v2515_v58 = vmul.f32 %v19456_v23, %v2513_v25 }
0x1772   :  { %2517 = vrot.lane.b32.xlu1 %v2515_v58, %s19797_s26 }
0x1776   :  { %2584 = vrot.lane.b32.xlu1 %v2301_v40, %s19797_s26 }
0x177a   :  { %2750 = vrot.lane.b32.xlu1 %v2303_v33, %s19797_s26 }
0x177e   :  { %2916 = vrot.lane.b32.xlu1 %v2305_v52, %s19797_s26 }
0x1782   :  { %3082 = vrot.lane.b32.xlu1 %v2307_v56, %s19797_s26 }
0x17e4   :  { %v2518_v29 = vpop.permute.xlu1 %2517 }
0x17e5   :  { %v20599_v21 = vadd.f32 %v2518_v29, %v2510_v28 }
0x17e7   :  { %19457 = vtanh.f32 %v20599_v21 }
0x17e8   :  { %v20602_v24 = vpop.permute.xlu1 %2584 }
0x17e9   :  { %17709 = vmatpush3.xpose.msk.msra.mxu0 %vm57_vm1, %v20602_v24 }
0x17ea   :  { %17718 = vmatprep.subr.mxu0 %v19795_v11 }
0x17ec   :  { %v20644_v45 = vpop.permute.xlu1 %2750 }
0x17f0   :  { %v20648_v56 = vpop.permute.xlu1 %2916 }
0x17f1   :  { %v19458_v35 = vpop.eup %19457 }
0x17f2   :  { %2523 = vrot.lane.b32.xlu0 %v19458_v35, %s19796_s25 }
0x17f6   :  { %2667 = vrot.lane.b32.xlu0 %v2302_v53, %s19797_s26 }
0x17fa   :  { %2833 = vrot.lane.b32.xlu0 %v2304_v30, %s19797_s26  ;;  %v20652_v30 = vpop.permute.xlu1 %3082 }
0x17fe   :  { %2999 = vrot.lane.b32.xlu0 %v2306_v16, %s19797_s26 }
0x1802   :  { %3165 = vrot.lane.b32.xlu0 %v2308_v63, %s19797_s26 }
0x1864   :  { %v2524_v51 = vpop.permute.xlu0 %2523 }
0x1865   :  { %v20612_v38 = vmul.f32 %v19456_v23, %v2524_v51 }
0x1867   :  { %v2528_v55 = vcombine.high %v20612_v38, %v20612_v38  ;;  %v2535_v42 = vrot.slane %v20612_v38, %v19957_v39 }
0x1868   :  { %v20618_v32 = vpop.permute.xlu0 %2667 }
0x1869   :  { %17714 = vmatpush3.xpose.msk.msra.mxu1 %vm57_vm1, %v20618_v32  ;;  %v2551_v36 = vrot.slane %v2535_v42, %v19957_v39  ;;  %v2543_v6 = vcombine.high %v2535_v42, %v2535_v42  ;;  %v2542_v59 = vrot.slane %v2528_v55, %v19957_v39 }
0x186a   :  { %17723 = vmatprep.subr.mxu1 %v19795_v11 }
0x186b   :  { %v2580_v15 = vrot.slane %v2551_v36, %v19963_v46  ;;  %v2565_v18 = vrot.slane %v2543_v6, %v19957_v39  ;;  %v2573_v48 = vcombine.high %v2551_v36, %v2551_v36  ;;  %v2544_v31 = vcombine.high %v2542_v59, %v2542_v59 }
0x186c   :  { %v2558_v44 = vrot.slane %v2542_v59, %v19957_v39  ;;  %v20646_v54 = vpop.permute.xlu0 %2833 }
0x186d   :  { %2581 = vrot.lane.b32.xlu1 %v2580_v15, %s19797_s26  ;;  %v2663_v40 = vrot.slane %v2565_v18, %v19963_v46  ;;  %v2575_v41 = vcombine.high %v2565_v18, %v2565_v18  ;;  %v2746_v22 = vrot.slane %v2573_v48, %v19963_v46  ;;  %v2572_v50 = vrot.slane %v2544_v31, %v19957_v39 }
0x186e   :  { %v2912_v33 = vrot.slane %v2558_v44, %v19963_v46  ;;  %v2574_v52 = vcombine.high %v2558_v44, %v2558_v44 }
0x186f   :  { %2664 = vrot.lane.b32.xlu0 %v2663_v40, %s19797_s26  ;;  %v2829_v49 = vrot.slane %v2575_v41, %v19963_v46  ;;  %v2995_v26 = vrot.slane %v2572_v50, %v19963_v46  ;;  %v2576_v4 = vcombine.high %v2572_v50, %v2572_v50 }
0x1870   :  { %v3078_v47 = vrot.slane %v2574_v52, %v19963_v46  ;;  %v20650_v20 = vpop.permute.xlu0 %2999 }
0x1871   :  { %2747 = vrot.lane.b32.xlu1 %v2746_v22, %s19797_s26  ;;  %v3161_v53 = vrot.slane %v2576_v4, %v19963_v46 }
0x1873   :  { %2830 = vrot.lane.b32.xlu0 %v2829_v49, %s19797_s26 }
0x1874   :  { %v20654_v12 = vpop.permute.xlu0 %3165 }
0x1875   :  { %2913 = vrot.lane.b32.xlu1 %v2912_v33, %s19797_s26 }
0x1877   :  { %2996 = vrot.lane.b32.xlu0 %v2995_v26, %s19797_s26 }
0x1879   :  { %3079 = vrot.lane.b32.xlu1 %v3078_v47, %s19797_s26 }
0x187b   :  { %3162 = vrot.lane.b32.xlu0 %v3161_v53, %s19797_s26 }
0x18df   :  { %v2582_v61 = vpop.permute.xlu1 %2581 }
0x18e0   :  { %17711 = vmatmul.mubr.msk.f32.vlgmr.msra.gmra.mrb[18].mxu0 %vm57_vm1, %v2582_v61 }
0x18e1   :  { %17719 = vmatpush3.xpose.msk.msra.mxu0 %vm57_vm1, %v20644_v45  ;;  %v2665_v16 = vpop.permute.xlu0 %2664  ;;  %17720 = vmatprep.mubr.msk.f32.mxu0 %vm19794_vm0, %v19795_v11 }
0x18e2   :  { %17716 = vmatmul.mubr.msk.f32.vlgmr.msra.gmra.mrb[18].mxu1 %vm57_vm1, %v2665_v16  ;;  %17728 = vmatprep.subr.mxu0 %v19795_v11 }
0x18e3   :  { %17724 = vmatpush3.xpose.msk.msra.mxu1 %vm57_vm1, %v20646_v54  ;;  %v2748_v57 = vpop.permute.xlu1 %2747  ;;  %17725 = vmatprep.mubr.msk.f32.mxu1 %vm19794_vm0, %v19795_v11 }
0x18e4   :  { %17721 = vmatmul.mubr.msk.f32.vlgmr.msra.gmra.mrb[20].mxu0 %vm57_vm1, %v2748_v57  ;;  %17733 = vmatprep.subr.mxu1 %v19795_v11 }
0x18e5   :  { %17729 = vmatpush3.xpose.msk.msra.mxu0 %vm57_vm1, %v20648_v56  ;;  %v2831_v63 = vpop.permute.xlu0 %2830  ;;  %17730 = vmatprep.mubr.msk.f32.mxu0 %vm19794_vm0, %v19795_v11 }
0x18e6   :  { %17726 = vmatmul.mubr.msk.f32.vlgmr.msra.gmra.mrb[20].mxu1 %vm57_vm1, %v2831_v63  ;;  %17738 = vmatprep.subr.mxu0 %v19795_v11 }
0x18e7   :  { %17734 = vmatpush3.xpose.msk.msra.mxu1 %vm57_vm1, %v20650_v20  ;;  %v2914_v0 = vpop.permute.xlu1 %2913  ;;  %17735 = vmatprep.mubr.msk.f32.mxu1 %vm19794_vm0, %v19795_v11 }
0x18e8   :  { %17731 = vmatmul.mubr.msk.f32.vlgmr.msra.gmra.mrb[22].mxu0 %vm57_vm1, %v2914_v0  ;;  %17743 = vmatprep.subr.mxu1 %v19795_v11 }
0x18e9   :  { %17739 = vmatpush3.xpose.msk.msra.mxu0 %vm57_vm1, %v20652_v30  ;;  %v2997_v60 = vpop.permute.xlu0 %2996  ;;  %17740 = vmatprep.mubr.msk.f32.mxu0 %vm19794_vm0, %v19795_v11 }
0x18ea   :  { %17736 = vmatmul.mubr.msk.f32.vlgmr.msra.gmra.mrb[22].mxu1 %vm57_vm1, %v2997_v60  ;;  %17748 = vmatprep.subr.mxu0 %v19795_v11 }
0x18eb   :  { %17744 = vmatpush3.xpose.msk.msra.mxu1 %vm57_vm1, %v20654_v12  ;;  %v3080_v17 = vpop.permute.xlu1 %3079  ;;  %17745 = vmatprep.mubr.msk.f32.mxu1 %vm19794_vm0, %v19795_v11 }
0x18ec   :  { %17741 = vmatmul.mubr.msk.f32.vlgmr.msra.gmra.mrb[24].mxu0 %vm57_vm1, %v3080_v17  ;;  %17753 = vmatprep.subr.mxu1 %v19795_v11 }
0x18ed   :  { %17749 = vmatpush3.msra.mxu0 %v20602_v24  ;;  %v3163_v62 = vpop.permute.xlu0 %3162  ;;  %17750 = vmatprep.mubr.msk.f32.mxu0 %vm19794_vm0, %v19795_v11 }
0x18ee   :  { %17746 = vmatmul.mubr.msk.f32.vlgmr.msra.gmra.mrb[24].mxu1 %vm57_vm1, %v3163_v62  ;;  %17758 = vmatprep.subr.mxu0 %v19795_v11 }
0x18ef   :  { %17754 = vmatpush3.msra.mxu1 %v20618_v32  ;;  %17755 = vmatprep.mubr.msk.f32.mxu1 %vm19794_vm0, %v19795_v11 }
0x18f0   :  { %17763 = vmatprep.subr.mxu1 %v19795_v11 }
0x19b3   :  { %v2656_v19 = vpop.f32.mrb[18].mxu0 }
0x19b4   :  { %v17712_v8 = vpop.f32.mrb[19].mxu0  ;;  %v3242_v37 = vsel %vm3241_vm10, %v2656_v19, -inf }
0x19b5   :  { %3243 = vmax.xlane.f32.xlu1 %v3242_v37  ;;  %v2739_v43 = vpop.f32.mrb[18].mxu1 }
0x19b6   :  { %v17717_v2 = vpop.f32.mrb[19].mxu1  ;;  %v3245_v7 = vsel %vm3241_vm10, %v2739_v43, -inf }
0x19b7   :  { %v2822_v9 = vpop.f32.mrb[20].mxu0  ;;  %3246 = vmax.xlane.f32.xlu0 %v3245_v7 }
0x19b8   :  { %v17722_v23 = vpop.f32.mrb[21].mxu0  ;;  %v3248_v28 = vsel %vm3241_vm10, %v2822_v9, -inf }
0x19b9   :  { %v2905_v25 = vpop.f32.mrb[20].mxu1 }
0x19ba   :  { %v17727_v58 = vpop.f32.mrb[21].mxu1  ;;  %v3251_v29 = vsel %vm3241_vm10, %v2905_v25, -inf }
0x19bb   :  { %v2988_v35 = vpop.f32.mrb[22].mxu0  ;;  %3249 = vmax.xlane.f32.xlu0 %v3248_v28  ;;  %3252 = vmax.xlane.f32.xlu1 %v3251_v29 }
0x19bc   :  { %v17732_v51 = vpop.f32.mrb[23].mxu0  ;;  %v3254_v36 = vsel %vm3241_vm10, %v2988_v35, -inf }
0x19bd   :  { %v3071_v55 = vpop.f32.mrb[22].mxu1 }
0x19be   :  { %v17737_v42 = vpop.f32.mrb[23].mxu1  ;;  %v3257_v6 = vsel %vm3241_vm10, %v3071_v55, -inf }
0x19bf   :  { %v3154_v59 = vpop.f32.mrb[24].mxu0  ;;  %3255 = vmax.xlane.f32.xlu0 %v3254_v36  ;;  %3258 = vmax.xlane.f32.xlu1 %v3257_v6 }
0x19c0   :  { %v17742_v15 = vpop.f32.mrb[25].mxu0  ;;  %v3260_v40 = vsel %vm3241_vm10, %v3154_v59, -inf }
0x19c1   :  { %v3237_v18 = vpop.f32.mrb[24].mxu1 }
0x19c2   :  { %v17747_v48 = vpop.f32.mrb[25].mxu1  ;;  %v3263_v41 = vsel %vm3241_vm10, %v3237_v18, -inf }
0x19c3   :  { %3261 = vmax.xlane.f32.xlu0 %v3260_v40  ;;  %3264 = vmax.xlane.f32.xlu1 %v3263_v41 }
0x1a42   :  { %v3244_v31 = vpop.xlane.xlu1 %3243 }
0x1a43   :  { %v3266_v22 = vsub.f32 %v2656_v19, %v3244_v31 }
0x1a44   :  { %v3247_v44 = vpop.xlane.xlu0 %3246 }
0x1a45   :  { %v3274_v49 = vmul.f32 1.442695, %v3266_v22  ;;  %v3267_v50 = vsub.f32 %v2739_v43, %v3247_v44 }
0x1a47   :  { %19459 = vpow2.f32 %v3274_v49  ;;  %v3276_v33 = vmul.f32 1.442695, %v3267_v50 }
0x1a48   :  { %v3250_v52 = vpop.xlane.xlu0 %3249  ;;  %v3253_v26 = vpop.xlane.xlu1 %3252 }
0x1a49   :  { %19461 = vpow2.f32 %v3276_v33  ;;  %v3268_v4 = vsub.f32 %v2822_v9, %v3250_v52  ;;  %v3269_v47 = vsub.f32 %v2905_v25, %v3253_v26 }
0x1a4b   :  { %v3278_v53 = vmul.f32 1.442695, %v3268_v4  ;;  %v3280_v61 = vmul.f32 1.442695, %v3269_v47 }
0x1a4c   :  { %v3256_v16 = vpop.xlane.xlu0 %3255  ;;  %v3259_v57 = vpop.xlane.xlu1 %3258 }
0x1a4d   :  { %19463 = vpow2.f32 %v3278_v53  ;;  %v3270_v63 = vsub.f32 %v2988_v35, %v3256_v16  ;;  %v3271_v0 = vsub.f32 %v3071_v55, %v3259_v57 }
0x1a4e   :  { %19465 = vpow2.f32 %v3280_v61 }
0x1a4f   :  { %v3282_v60 = vmul.f32 1.442695, %v3270_v63  ;;  %v3284_v17 = vmul.f32 1.442695, %v3271_v0 }
0x1a50   :  { %v3262_v62 = vpop.xlane.xlu0 %3261  ;;  %v3265_v19 = vpop.xlane.xlu1 %3264 }
0x1a51   :  { %v19460_v8 = vpop.eup %19459  ;;  %19467 = vpow2.f32 %v3282_v60  ;;  %v3272_v37 = vsub.f32 %v3154_v59, %v3262_v62  ;;  %v3273_v43 = vsub.f32 %v3237_v18, %v3265_v19  ;;  %v2334_v60 = vld [vmem:[%s22349_s10] sm:$0xff] }
0x1a52   :  { %19469 = vpow2.f32 %v3284_v17  ;;  %v3290_v2 = vsel %vm3241_vm10, %v19460_v8, 0.0  ;;  %v2335_v17 = vld [vmem:[%s22349_s10 + $0x8] sm:$0xff] }
0x1a53   :  { %v19462_v7 = vpop.eup %19461  ;;  %v3286_v9 = vmul.f32 1.442695, %v3272_v37  ;;  %v3288_v23 = vmul.f32 1.442695, %v3273_v43  ;;  %3291 = vadd.xlane.f32.xlu0 %v3290_v2  ;;  %v20755_v37 = vpack.c.bf16 %v2335_v17, %v2334_v60  ;;  %v2336_v2 = vld [vmem:[%s22349_s10 + $0x10] sm:$0xff] }
0x1a54   :  { %v3293_v25 = vsel %vm3241_vm10, %v19462_v7, 0.0 }
0x1a55   :  { %19471 = vpow2.f32 %v3286_v9  ;;  %3294 = vadd.xlane.f32.xlu1 %v3293_v25  ;;  %v2338_v25 = vld [vmem:[%s22349_s10 + $0x20] sm:$0xff] }
0x1a56   :  { %19473 = vpow2.f32 %v3288_v23 }
0x1a57   :  { %v19464_v58 = vpop.eup %19463 }
0x1a58   :  { %v19466_v28 = vpop.eup %19465  ;;  %v3296_v29 = vsel %vm3241_vm10, %v19464_v58, 0.0 }
0x1a59   :  { %3297 = vadd.xlane.f32.xlu0 %v3296_v29  ;;  %v3299_v35 = vsel %vm3241_vm10, %v19466_v28, 0.0  ;;  %v2340_v29 = vld [vmem:[%s22349_s10 + $0x30] sm:$0xff] }
0x1a5a   :  { %3300 = vadd.xlane.f32.xlu1 %v3299_v35  ;;  %v2341_v35 = vld [vmem:[%s22349_s10 + $0x38] sm:$0xff] }
0x1a5b   :  { %v19468_v51 = vpop.eup %19467 }
0x1a5c   :  { %v19470_v55 = vpop.eup %19469  ;;  %v3302_v42 = vsel %vm3241_vm10, %v19468_v51, 0.0 }
0x1a5d   :  { %3303 = vadd.xlane.f32.xlu0 %v3302_v42  ;;  %v3305_v36 = vsel %vm3241_vm10, %v19470_v55, 0.0 }
0x1a5e   :  { %3306 = vadd.xlane.f32.xlu1 %v3305_v36 }
0x1a5f   :  { %v19472_v6 = vpop.eup %19471 }
0x1a60   :  { %v20716_v59 = vpop.eup %19473  ;;  %v3308_v15 = vsel %vm3241_vm10, %v19472_v6, 0.0 }
0x1a61   :  { %3309 = vadd.xlane.f32.xlu0 %v3308_v15  ;;  %v3311_v18 = vsel %vm3241_vm10, %v20716_v59, 0.0 }
0x1a62   :  { %3312 = vadd.xlane.f32.xlu1 %v3311_v18 }
0x1a77   :  { %4024 = vrot.lane.b32.xlu0 %v20612_v38, %s19797_s26 }
0x1ae0   :  { %v3292_v48 = vpop.xlane.xlu0 %3291 }
0x1ae1   :  { %19475 = vrcp.f32 %v3292_v48 }
0x1ae2   :  { %v3295_v40 = vpop.xlane.xlu1 %3294 }
0x1ae3   :  { %19477 = vrcp.f32 %v3295_v40 }
0x1ae6   :  { %v3298_v41 = vpop.xlane.xlu0 %3297 }
0x1ae7   :  { %19479 = vrcp.f32 %v3298_v41  ;;  %v3301_v31 = vpop.xlane.xlu1 %3300 }
0x1ae8   :  { %19481 = vrcp.f32 %v3301_v31 }
0x1aea   :  { %v3304_v22 = vpop.xlane.xlu0 %3303 }
0x1aeb   :  { %v19476_v44 = vpop.eup %19475  ;;  %19483 = vrcp.f32 %v3304_v22  ;;  %v3307_v49 = vpop.xlane.xlu1 %3306 }
0x1aec   :  { %19485 = vrcp.f32 %v3307_v49  ;;  %v3315_v50 = vmul.f32 %v19476_v44, %v19460_v8 }
0x1aed   :  { %v19478_v33 = vpop.eup %19477 }
0x1aee   :  { %17751 = vmatmul.mubr.msk.f32.vlgmr.msra.gmra.mrb[26].mxu0 %vm3331_vm11, %v3315_v50  ;;  %v3310_v52 = vpop.xlane.xlu0 %3309  ;;  %v3317_v38 = vmul.f32 %v19478_v33, %v19462_v7  ;;  %v2337_v7 = vld [vmem:[%s22349_s10 + $0x18] sm:$0xff] }
0x1aef   :  { %17759 = vmatpush3.msra.mxu0 %v20644_v45  ;;  %19487 = vrcp.f32 %v3310_v52  ;;  %v3313_v26 = vpop.xlane.xlu1 %3312  ;;  %17760 = vmatprep.mubr.msk.f32.mxu0 %vm19794_vm0, %v19795_v11  ;;  %v20773_v9 = vpack.c.bf16 %v2337_v7, %v2336_v2 }
0x1af0   :  { %19489 = vrcp.f32 %v3313_v26  ;;  %17756 = vmatmul.mubr.msk.f32.vlgmr.msra.gmra.mrb[26].mxu1 %vm3331_vm11, %v3317_v38  ;;  %17768 = vmatprep.subr.mxu0 %v19795_v11 }
0x1af1   :  { %v19480_v4 = vpop.eup %19479  ;;  %17764 = vmatpush3.msra.mxu1 %v20646_v54  ;;  %17765 = vmatprep.mubr.msk.f32.mxu1 %vm19794_vm0, %v19795_v11 }
0x1af2   :  { %v19482_v47 = vpop.eup %19481  ;;  %17773 = vmatprep.subr.mxu1 %v19795_v11  ;;  %v3319_v53 = vmul.f32 %v19480_v4, %v19464_v58  ;;  %v4025_v23 = vpop.permute.xlu0 %4024  ;;  %v2339_v58 = vld [vmem:[%s22349_s10 + $0x28] sm:$0xff] }
0x1af3   :  { %v3321_v61 = vmul.f32 %v19482_v47, %v19466_v28  ;;  %v20800_v28 = vpack.c.bf16 %v2339_v58, %v2338_v25  ;;  %v2310_v47 = vld [vmem:[%s22345_s6 + $0x8] sm:$0xff] }
0x1af4   :  { %17761 = vmatmul.mubr.msk.f32.vlgmr.msra.gmra.mrb[28].mxu0 %vm3331_vm11, %v3319_v53  ;;  %v20823_v60 = vpack.c.bf16 %v2310_v47, %v20526_v10  ;;  %v2322_v47 = vld [vmem:[%s22345_s6 + $0x68] sm:$0xff] }
0x1af5   :  { %v19484_v16 = vpop.eup %19483  ;;  %17766 = vmatmul.mubr.msk.f32.vlgmr.msra.gmra.mrb[28].mxu1 %vm3331_vm11, %v3321_v61  ;;  %17769 = vmatpush3.msra.mxu0 %v20648_v56 }
0x1af6   :  { %v19486_v57 = vpop.eup %19485  ;;  %17774 = vmatpush3.msra.mxu1 %v20650_v20  ;;  %17770 = vmatprep.mubr.msk.f32.mxu0 %vm19794_vm0, %v19795_v11  ;;  %v3323_v63 = vmul.f32 %v19484_v16, %v19468_v51  ;;  %v20810_v51 = vpack.c.bf16 %v2341_v35, %v2340_v29 }
0x1af7   :  { %17775 = vmatprep.mubr.msk.f32.mxu1 %vm19794_vm0, %v19795_v11  ;;  %17778 = vmatprep.subr.mxu0 %v19795_v11  ;;  %v3325_v0 = vmul.f32 %v19486_v57, %v19470_v55 }
0x1af8   :  { %17783 = vmatprep.subr.mxu1 %v19795_v11  ;;  %17771 = vmatmul.mubr.msk.f32.vlgmr.msra.gmra.mrb[30].mxu0 %vm3331_vm11, %v3323_v63 }
0x1af9   :  { %v19488_v62 = vpop.eup %19487  ;;  %17776 = vmatmul.mubr.msk.f32.vlgmr.msra.gmra.mrb[30].mxu1 %vm3331_vm11, %v3325_v0  ;;  %17779 = vmatpush3.msra.mxu0 %v20652_v30 }
0x1afa   :  { %v19490_v19 = vpop.eup %19489  ;;  %17784 = vmatpush3.msra.mxu1 %v20654_v12  ;;  %17780 = vmatprep.mubr.msk.f32.mxu0 %vm19794_vm0, %v19795_v11  ;;  %v3327_v8 = vmul.f32 %v19488_v62, %v19472_v6 }
0x1afb   :  { %17785 = vmatprep.mubr.msk.f32.mxu1 %vm19794_vm0, %v19795_v11  ;;  %19037 = vmatprep.subr.bf16.mxu1 %v19793_v3  ;;  %v3329_v43 = vmul.f32 %v19490_v19, %v20716_v59 }
0x1afc   :  { %17781 = vmatmul.mubr.msk.f32.vlgmr.msra.gmra.mrb[32].mxu0 %vm3331_vm11, %v3327_v8  ;;  %19031 = vmatprep.subr.bf16.mxu0 %v19793_v3 }
0x1afd   :  { %17786 = vmatmul.mubr.msk.f32.vlgmr.msra.gmra.mrb[32].mxu1 %vm3331_vm11, %v3329_v43  ;;  %17796 = vmatprep.mubr.msk.f32.mxu0 %vm19794_vm0, %v19795_v11 }
0x1afe   :  { %19039 = vmatpush3.bf16.msra.mxu1 %v20755_v37  ;;  %17807 = vmatprep.mubr.msk.f32.mxu1 %vm19794_vm0, %v19795_v11 }
0x1aff   :  { %19040 = vmatprep.subr.bf16.mxu1 %v19793_v3  ;;  %19033 = vmatpush3.bf16.msra.mxu0 %v20800_v28 }
0x1b00   :  { %19034 = vmatprep.subr.bf16.mxu0 %v19793_v3 }
0x1b02   :  { %19042 = vmatpush3.bf16.msra.mxu1 %v20773_v9 }
0x1b03   :  { %19067 = vmatprep.subr.bf16.mxu1 %v19793_v3  ;;  %19036 = vmatpush3.bf16.msra.mxu0 %v20810_v51 }
0x1b04   :  { %19043 = vmatprep.subr.bf16.mxu0 %v19793_v3 }
0x1b05   :  { %17808 = vmatmul.mubr.msk.f32.vlgmr.msra.gmra.mrb[34].mxu1 %vm57_vm1, %v4025_v23 }
0x1b06   :  { %19069 = vmatpush3.bf16.msra.mxu1 %v20512_v5  ;;  %17853 = vmatprep.mubr.msk.f32.mxu1 %vm19794_vm0, %v19795_v11 }
0x1b07   :  { %19070 = vmatprep.subr.bf16.mxu1 %v19793_v3 }
0x1b0a   :  { %19072 = vmatpush3.bf16.msra.mxu1 %v20530_v14 }
0x1b0b   :  { %19073 = vmatprep.subr.bf16.mxu1 %v19793_v3 }
0x1b0d   :  { %17854 = vmatmul.mubr.msk.f32.vlgmr.msra.gmra.mrb[36].mxu1 %vm57_vm1, %v4025_v23  ;;  %v20837_v23 = vld [vmem:[%s22350_s11] ss:$0 sm:$0xff] }
0x1b0e   :  { %19075 = vmatpush3.bf16.msra.mxu1 %v20501_v1  ;;  %17864 = vmatprep.mubr.msk.f32.mxu1 %vm19794_vm0, %v19795_v11 }
0x1b0f   :  { %19076 = vmatprep.subr.bf16.mxu1 %v19793_v3 }
0x1b12   :  { %19078 = vmatpush3.bf16.msra.mxu1 %v20521_v13 }
0x1b13   :  { %17867 = vmatprep.subr.mxu1 %v19795_v11 }
0x1bc1   :  { %v3401_v55 = vpop.f32.mrb[26].mxu0 }
0x1bc2   :  { %v17752_v42 = vpop.f32.mrb[27].mxu0 }
0x1bc3   :  { %v3475_v36 = vpop.f32.mrb[26].mxu1 }
0x1bc4   :  { %v3931_v6 = vrot.slane %v3475_v36, 7  ;;  %v17757_v59 = vpop.f32.mrb[27].mxu1 }
0x1bc6   :  { %v3933_v15 = vsel %vm3932_vm12, %v3931_v6, %v3401_v55  ;;  %v20844_v55 = vand.u32 127, %v54_v34  ;;  %v2313_v34 = vld [vmem:[%s22345_s6 + $0x20] sm:$0xff] }
0x1bc7   :  { %v3549_v18 = vpop.f32.mrb[28].mxu0 }
0x1bc8   :  { %v3934_v48 = vrot.slane %v3549_v18, 6  ;;  %v3623_v40 = vpop.f32.mrb[28].mxu1  ;;  %v17762_v41 = vpop.f32.mrb[29].mxu0  ;;  %v2312_v18 = vld [vmem:[%s22345_s6 + $0x18] sm:$0xff] }
0x1bc9   :  { %v3937_v31 = vrot.slane %v3623_v40, 5  ;;  %v17767_v22 = vpop.f32.mrb[29].mxu1  ;;  %v2314_v40 = vld [vmem:[%s22345_s6 + $0x28] sm:$0xff] }
0x1bca   :  { %v3936_v44 = vsel %vm3935_vm13, %v3934_v48, %v3933_v15  ;;  %v2311_v15 = vld [vmem:[%s22345_s6 + $0x10] sm:$0xff]  ;;  %v20862_v41 = vpack.c.bf16 %v2314_v40, %v2313_v34  ;;  %v2316_v22 = vld [vmem:[%s22345_s6 + $0x38] sm:$0xff] }
0x1bcb   :  { %v3939_v49 = vsel %vm3938_vm14, %v3937_v31, %v3936_v44  ;;  %v3697_v50 = vpop.f32.mrb[30].mxu0  ;;  %v20856_v48 = vpack.c.bf16 %v2312_v18, %v2311_v15  ;;  %v2315_v31 = vld [vmem:[%s22345_s6 + $0x30] sm:$0xff] }
0x1bcc   :  { %v3940_v33 = vrot.slane %v3697_v50, 4  ;;  %v3771_v52 = vpop.f32.mrb[30].mxu1  ;;  %v17772_v38 = vpop.f32.mrb[31].mxu0  ;;  %v20872_v44 = vpack.c.bf16 %v2316_v22, %v2315_v31  ;;  %v2318_v50 = vld [vmem:[%s22345_s6 + $0x48] sm:$0xff] }
0x1bcd   :  { %v3943_v26 = vrot.slane %v3771_v52, 3  ;;  %v17777_v4 = vpop.f32.mrb[31].mxu1  ;;  %v2319_v52 = vld [vmem:[%s22345_s6 + $0x50] sm:$0xff]  ;;  %v2320_v38 = vld [vmem:[%s22345_s6 + $0x58] sm:$0xff] }
0x1bce   :  { %v3942_v53 = vsel %vm3941_vm15, %v3940_v33, %v3939_v49  ;;  %v2317_v49 = vld [vmem:[%s22345_s6 + $0x40] sm:$0xff] }
0x1bcf   :  { %v3945_v61 = vsel %vm3944_vm2, %v3943_v26, %v3942_v53  ;;  %v3845_v16 = vpop.f32.mrb[32].mxu0  ;;  %v20882_v33 = vpack.c.bf16 %v2318_v50, %v2317_v49  ;;  %v20892_v26 = vpack.c.bf16 %v2320_v38, %v2319_v52  ;;  %v2321_v4 = vld [vmem:[%s22345_s6 + $0x60] sm:$0xff] }
0x1bd0   :  { %v3946_v57 = vrot.slane %v3845_v16, 2  ;;  %v3919_v63 = vpop.f32.mrb[32].mxu1  ;;  %v17782_v0 = vpop.f32.mrb[33].mxu0  ;;  %v20902_v53 = vpack.c.bf16 %v2322_v47, %v2321_v4  ;;  %v2324_v16 = vld [vmem:[%s22345_s6 + $0x78] sm:$0xff] }
0x1bd1   :  { %v3949_v17 = vrot.slane %v3919_v63, 1  ;;  %v17787_v62 = vpop.f32.mrb[33].mxu1 }
0x1bd2   :  { %v3948_v19 = vsel %vm3947_vm3, %v3946_v57, %v3945_v61  ;;  %v2323_v61 = vld [vmem:[%s22345_s6 + $0x70] sm:$0xff]  ;;  %s4197_s6 = sld [smem:[#allocation3]] }
0x1bd3   :  { %v3951_v8 = vsel %vm3950_vm4, %v3949_v17, %v3948_v19  ;;  %v20912_v57 = vpack.c.bf16 %v2324_v16, %v2323_v61 }
0x1bd4   :  { %17797 = vmatmul.mubr.msk.f32.vlgmr.msra.gmra.mrb[34].mxu0 %vm57_vm1, %v3951_v8 }
0x1bd5   :  { %19045 = vmatpush3.bf16.msra.mxu0 %v20823_v60  ;;  %17842 = vmatprep.mubr.msk.f32.mxu0 %vm19794_vm0, %v19795_v11 }
0x1bd6   :  { %19046 = vmatprep.subr.bf16.mxu0 %v19793_v3 }
0x1bd8   :  { %v4094_v43 = vpop.f32.mrb[34].mxu1  ;;  %p4198_p5 = scmp.eq.s32.totalorder %s4197_s6, 1 }
0x1bd9   :  { %v17809_v2 = vpop.f32.mrb[35].mxu1  ;;  %19048 = vmatpush3.bf16.msra.mxu0 %v20856_v48 }
0x1bda   :  { %19049 = vmatprep.subr.bf16.mxu0 %v19793_v3  ;;  %s4200_s22 = scalar_select %p4198_p5, 1, 0 }
0x1bdd   :  { %19051 = vmatpush3.bf16.msra.mxu0 %v20862_v41 }
0x1bde   :  { %19052 = vmatprep.subr.bf16.mxu0 %v19793_v3 }
0x1be0   :  { %v20832_v7 = vpop.f32.mrb[36].mxu1 }
0x1be1   :  { %v17855_v10 = vpop.f32.mrb[37].mxu1  ;;  %19054 = vmatpush3.bf16.msra.mxu0 %v20872_v44 }
0x1be2   :  { %19055 = vmatprep.subr.bf16.mxu0 %v19793_v3 }
0x1be5   :  { %19057 = vmatpush3.bf16.msra.mxu0 %v20882_v33 }
0x1be6   :  { %19058 = vmatprep.subr.bf16.mxu0 %v19793_v3 }
0x1be9   :  { %19060 = vmatpush3.bf16.msra.mxu0 %v20892_v26 }
0x1bea   :  { %19061 = vmatprep.subr.bf16.mxu0 %v19793_v3 }
0x1bed   :  { %19063 = vmatpush3.bf16.msra.mxu0 %v20902_v53 }
0x1bee   :  { %19064 = vmatprep.subr.bf16.mxu0 %v19793_v3 }
0x1bf1   :  { %19066 = vmatpush3.bf16.msra.mxu0 %v20912_v57 }
0x1bf2   :  { %17887 = vmatprep.subr.mxu0 %v19795_v11 }
0x1ca7   :  { %v4020_v25 = vpop.f32.mrb[34].mxu0 }
0x1ca8   :  { %v4095_v58 = vadd.f32 %v4094_v43, %v4020_v25  ;;  %v17798_v29 = vpop.f32.mrb[35].mxu0  ;;  %v19799_v25 = vmov 1.0  }
0x1ca9   :  { %v4199_v29 = vld [vmem:[%s22341_s2] sm:$0xff] }
0x1caa   :  { %v4104_v35 = vadd.f32 %v20837_v23, %v4095_v58  ;;  %v4201_v58 = vstv %s4200_s22 }
0x1cab   :  { %vm4202_vm8 = vcmp.eq.s32.totalorder %v4201_v58, 1 }
0x1cac   :  { %4105 = vst [vmem:[%s22351_s12] sm:$0xff] %v4104_v35  ;;  %4106 = vmax.xlane.f32.xlu1 %v4104_v35 }
0x1d39   :  { %v4107_v42 = vpop.xlane.xlu1 %4106 }
0x1d3a   :  { %vm4108_vm5 = vcmp.eq.f32.partialorder %v4104_v35, %v4107_v42 }
0x1d3b   :  { %v4109_v36 = vsel %vm4108_vm5, %v20844_v55, 128 }
0x1d3c   :  { %v4111_v6 = vshra.s32 %v4109_v36, 16  ;;  %v4110_v63 = vand.u32 65535, %v4109_v36 }
0x1d3e   :  { %v4113_v59 = vcvt.s32.f32 %v4111_v6  ;;  %v4112_v17 = vcvt.s32.f32 %v4110_v63 }
0x1d40   :  { %4114 = vmin.xlane.f32.xlu1 %v4113_v59 }
0x1dcd   :  { %v4115_v0 = vpop.xlane.xlu1 %4114 }
0x1dce   :  { %vm4116_vm6 = vcmp.eq.f32.partialorder %v4113_v59, %v4115_v0  ;;  %v4121_v19 = vcvt.f32.s32 %v4115_v0 }
0x1dcf   :  { %v4117_v62 = vsel %vm4116_vm6, %v4112_v17, inf }
0x1dd0   :  { %4118 = vmin.xlane.f32.xlu1 %v4117_v62  ;;  %v4122_v43 = vshll.u32 %v4121_v19, 16 }
0x1e5d   :  { %v4119_v8 = vpop.xlane.xlu1 %4118 }
0x1e5e   :  { %v4120_v2 = vcvt.f32.s32 %v4119_v8 }
0x1e60   :  { %v4123_v10 = vadd.s32 %v4122_v43, %v4120_v2 }
0x1e62   :  { %vm4124_vm7 = vcmp.eq.s32.totalorder %v20844_v55, %v4123_v10 }
0x1e63   :  { %17843 = vmatmul.mubr.msk.f32.vlgmr.msra.gmra.mrb[36].mxu0 %vm4124_vm7, %v19799_v25 }
0x1e64   :  { %17888 = vmatpush3.xpose.msk.msra.mxu0 %vm57_vm1, %v20648_v56  ;;  %17889 = vmatprep.mubr.msk.f32.mxu0 %vm19794_vm0, %v19795_v11 }
0x1e65   :  { %17897 = vmatprep.subr.mxu0 %v19795_v11 }
0x1f36   :  { %v4193_v35 = vpop.f32.mrb[36].mxu0 }
0x1f37   :  { %v4203_v42 = vsel %vm4202_vm8, %v4199_v29, %v4193_v35  ;;  %v17844_v36 = vpop.f32.mrb[37].mxu0 }
0x1f38   :  { %17865 = vmatmul.mubr.msk.f32.vlgmr.msra.gmra.mrb[38].mxu1 %vm57_vm1, %v4203_v42 }
0x1f39   :  { %17868 = vmatpush3.xpose.msk.msra.mxu1 %vm57_vm1, %v20602_v24  ;;  %17869 = vmatprep.mubr.msk.f32.mxu1 %vm19794_vm0, %v19795_v11 }
0x1f3a   :  { %17872 = vmatprep.subr.mxu1 %v19795_v11 }
0x200b   :  { %v4343_v6 = vpop.f32.mrb[38].mxu1 }
0x200c   :  { %v4344_v59 = vadd.f32 %v4343_v6, %v20832_v7  ;;  %v17866_v15 = vpop.f32.mrb[39].mxu1 }
0x200e   :  { %v4347_v18 = vadd.f32 %v20589_v27, %v4344_v59 }
0x2010   :  { %19491 = vtanh.f32 %v4347_v18  ;;  %v16663_v40 = vmul.f32 -1.442695, %v4347_v18 }
0x2012   :  { %19493 = vpow2.f32 %v16663_v40 }
0x201a   :  { %v19492_v34 = vpop.eup %19491 }
0x201b   :  { %4357 = vrot.lane.b32.xlu1 %v19492_v34, %s19796_s25 }
0x201c   :  { %v19494_v31 = vpop.eup %19493 }
0x201d   :  { %v4351_v22 = vadd.f32 1.0, %v19494_v31 }
0x201f   :  { %19495 = vrcp.f32 %v4351_v22 }
0x2029   :  { %v19496_v49 = vpop.eup %19495 }
0x202a   :  { %v4355_v38 = vmul.f32 %v19496_v49, %v20599_v21 }
0x208d   :  { %v4358_v50 = vpop.permute.xlu1 %4357 }
0x208e   :  { %v4360_v52 = vmul.f32 %v19496_v49, %v4358_v50 }
0x2090   :  { %4362 = vrot.lane.b32.xlu0 %v4360_v52, %s19797_s26 }
0x2102   :  { %v4363_v7 = vpop.permute.xlu0 %4362 }
0x2103   :  { %v20938_v4 = vadd.f32 %v4363_v7, %v4355_v38 }
0x2105   :  { %19497 = vtanh.f32 %v20938_v4 }
0x210f   :  { %v19498_v27 = vpop.eup %19497 }
0x2110   :  { %4368 = vrot.lane.b32.xlu0 %v19498_v27, %s19796_s25 }
0x2182   :  { %v4369_v47 = vpop.permute.xlu0 %4368 }
0x2183   :  { %v20942_v61 = vmul.f32 %v19496_v49, %v4369_v47 }
0x2185   :  { %v4373_v16 = vcombine.high %v20942_v61, %v20942_v61  ;;  %v4380_v63 = vrot.slane %v20942_v61, %v19957_v39 }
0x2187   :  { %v4396_v0 = vrot.slane %v4380_v63, %v19957_v39  ;;  %v4388_v21 = vcombine.high %v4380_v63, %v4380_v63  ;;  %v4387_v17 = vrot.slane %v4373_v16, %v19957_v39 }
0x2189   :  { %v4425_v62 = vrot.slane %v4396_v0, %v19963_v46  ;;  %v4410_v19 = vrot.slane %v4388_v21, %v19957_v39  ;;  %v4418_v8 = vcombine.high %v4396_v0, %v4396_v0  ;;  %v4389_v10 = vcombine.high %v4387_v17, %v4387_v17 }
0x218a   :  { %v4403_v29 = vrot.slane %v4387_v17, %v19957_v39 }
0x218b   :  { %4426 = vrot.lane.b32.xlu0 %v4425_v62, %s19797_s26  ;;  %v4503_v43 = vrot.slane %v4410_v19, %v19963_v46  ;;  %v4420_v2 = vcombine.high %v4410_v19, %v4410_v19  ;;  %v4581_v58 = vrot.slane %v4418_v8, %v19963_v46  ;;  %v4417_v42 = vrot.slane %v4389_v10, %v19957_v39 }
0x218c   :  { %v4737_v36 = vrot.slane %v4403_v29, %v19963_v46  ;;  %v4419_v6 = vcombine.high %v4403_v29, %v4403_v29 }
0x218d   :  { %4504 = vrot.lane.b32.xlu1 %v4503_v43, %s19797_s26  ;;  %v4659_v35 = vrot.slane %v4420_v2, %v19963_v46  ;;  %v4815_v59 = vrot.slane %v4417_v42, %v19963_v46  ;;  %v4421_v15 = vcombine.high %v4417_v42, %v4417_v42 }
0x218e   :  { %v4893_v18 = vrot.slane %v4419_v6, %v19963_v46 }
0x218f   :  { %4582 = vrot.lane.b32.xlu0 %v4581_v58, %s19797_s26  ;;  %v4971_v34 = vrot.slane %v4421_v15, %v19963_v46 }
0x2191   :  { %4660 = vrot.lane.b32.xlu1 %v4659_v35, %s19797_s26 }
0x2193   :  { %4738 = vrot.lane.b32.xlu0 %v4737_v36, %s19797_s26 }
0x2195   :  { %4816 = vrot.lane.b32.xlu1 %v4815_v59, %s19797_s26 }
0x2197   :  { %4894 = vrot.lane.b32.xlu0 %v4893_v18, %s19797_s26 }
0x2199   :  { %4972 = vrot.lane.b32.xlu1 %v4971_v34, %s19797_s26 }
0x21fd   :  { %v4427_v40 = vpop.permute.xlu0 %4426 }
0x21fe   :  { %17870 = vmatmul.mubr.msk.f32.vlgmr.msra.gmra.mrb[40].mxu1 %vm57_vm1, %v4427_v40 }
0x21ff   :  { %17873 = vmatpush3.xpose.msk.msra.mxu1 %vm57_vm1, %v20618_v32  ;;  %v4505_v31 = vpop.permute.xlu1 %4504  ;;  %17874 = vmatprep.mubr.msk.f32.mxu1 %vm19794_vm0, %v19795_v11 }
0x2200   :  { %17877 = vmatprep.subr.mxu1 %v19795_v11 }
0x2201   :  { %v4583_v22 = vpop.permute.xlu0 %4582 }
0x2202   :  { %17875 = vmatmul.mubr.msk.f32.vlgmr.msra.gmra.mrb[42].mxu1 %vm57_vm1, %v4505_v31 }
0x2203   :  { %17878 = vmatpush3.xpose.msk.msra.mxu1 %vm57_vm1, %v20644_v45  ;;  %17879 = vmatprep.mubr.msk.f32.mxu1 %vm19794_vm0, %v19795_v11  ;;  %v4661_v49 = vpop.permute.xlu1 %4660 }
0x2204   :  { %17882 = vmatprep.subr.mxu1 %v19795_v11 }
0x2205   :  { %v4739_v50 = vpop.permute.xlu0 %4738 }
0x2206   :  { %17880 = vmatmul.mubr.msk.f32.vlgmr.msra.gmra.mrb[44].mxu1 %vm57_vm1, %v4583_v22  ;;  %17890 = vmatmul.mubr.msk.f32.vlgmr.msra.gmra.mrb[38].mxu0 %vm57_vm1, %v4739_v50 }
0x2207   :  { %17883 = vmatpush3.xpose.msk.msra.mxu1 %vm57_vm1, %v20646_v54  ;;  %17898 = vmatpush3.xpose.msk.msra.mxu0 %vm57_vm1, %v20652_v30  ;;  %v4817_v38 = vpop.permute.xlu1 %4816 }
0x2208   :  { %17884 = vmatprep.mubr.msk.f32.mxu1 %vm19794_vm0, %v19795_v11  ;;  %17892 = vmatprep.subr.mxu1 %v19795_v11 }
0x2209   :  { %17899 = vmatprep.mubr.msk.f32.mxu0 %vm19794_vm0, %v19795_v11  ;;  %17907 = vmatprep.subr.mxu0 %v19795_v11  ;;  %v4895_v52 = vpop.permute.xlu0 %4894 }
0x220a   :  { %17885 = vmatmul.mubr.msk.f32.vlgmr.msra.gmra.mrb[46].mxu1 %vm57_vm1, %v4661_v49  ;;  %17900 = vmatmul.mubr.msk.f32.vlgmr.msra.gmra.mrb[40].mxu0 %vm57_vm1, %v4895_v52 }
0x220b   :  { %17893 = vmatpush3.xpose.msk.msra.mxu1 %vm57_vm1, %v20650_v20  ;;  %17908 = vmatpush3.msra.mxu0 %v20602_v24  ;;  %v4973_v7 = vpop.permute.xlu1 %4972 }
0x220c   :  { %17894 = vmatprep.mubr.msk.f32.mxu1 %vm19794_vm0, %v19795_v11  ;;  %17902 = vmatprep.subr.mxu1 %v19795_v11 }
0x220d   :  { %17909 = vmatprep.mubr.msk.f32.mxu0 %vm19794_vm0, %v19795_v11  ;;  %17917 = vmatprep.subr.mxu0 %v19795_v11 }
0x220e   :  { %17895 = vmatmul.mubr.msk.f32.vlgmr.msra.gmra.mrb[48].mxu1 %vm57_vm1, %v4817_v38 }
0x220f   :  { %17903 = vmatpush3.xpose.msk.msra.mxu1 %vm57_vm1, %v20654_v12  ;;  %17904 = vmatprep.mubr.msk.f32.mxu1 %vm19794_vm0, %v19795_v11 }
0x2210   :  { %17912 = vmatprep.subr.mxu1 %v19795_v11 }
0x2212   :  { %17905 = vmatmul.mubr.msk.f32.vlgmr.msra.gmra.mrb[50].mxu1 %vm57_vm1, %v4973_v7 }
0x2213   :  { %17913 = vmatpush3.msra.mxu1 %v20618_v32  ;;  %17914 = vmatprep.mubr.msk.f32.mxu1 %vm19794_vm0, %v19795_v11 }
0x2214   :  { %17922 = vmatprep.subr.mxu1 %v19795_v11 }
0x22d1   :  { %v4496_v27 = vpop.f32.mrb[40].mxu1 }
0x22d2   :  { %v17871_v47 = vpop.f32.mrb[41].mxu1  ;;  %v5046_v16 = vsel %vm3241_vm10, %v4496_v27, -inf }
0x22d3   :  { %5047 = vmax.xlane.f32.xlu0 %v5046_v16 }
0x22d5   :  { %v4574_v63 = vpop.f32.mrb[42].mxu1 }
0x22d6   :  { %v17876_v0 = vpop.f32.mrb[43].mxu1  ;;  %v5049_v21 = vsel %vm3241_vm10, %v4574_v63, -inf }
0x22d7   :  { %5050 = vmax.xlane.f32.xlu1 %v5049_v21 }
0x22d9   :  { %v4652_v17 = vpop.f32.mrb[44].mxu1  ;;  %v4808_v62 = vpop.f32.mrb[38].mxu0 }
0x22da   :  { %v17881_v19 = vpop.f32.mrb[45].mxu1  ;;  %v17891_v8 = vpop.f32.mrb[39].mxu0  ;;  %v5058_v43 = vsel %vm3241_vm10, %v4808_v62, -inf  ;;  %v5052_v2 = vsel %vm3241_vm10, %v4652_v17, -inf }
0x22db   :  { %5059 = vmax.xlane.f32.xlu1 %v5058_v43  ;;  %5053 = vmax.xlane.f32.xlu0 %v5052_v2 }
0x22dd   :  { %v4730_v10 = vpop.f32.mrb[46].mxu1  ;;  %v4964_v58 = vpop.f32.mrb[40].mxu0 }
0x22de   :  { %v17886_v29 = vpop.f32.mrb[47].mxu1  ;;  %v17901_v35 = vpop.f32.mrb[41].mxu0  ;;  %v5064_v42 = vsel %vm3241_vm10, %v4964_v58, -inf  ;;  %v5055_v36 = vsel %vm3241_vm10, %v4730_v10, -inf }
0x22df   :  { %5065 = vmax.xlane.f32.xlu1 %v5064_v42  ;;  %5056 = vmax.xlane.f32.xlu0 %v5055_v36 }
0x22e1   :  { %v4886_v6 = vpop.f32.mrb[48].mxu1 }
0x22e2   :  { %v17896_v59 = vpop.f32.mrb[49].mxu1  ;;  %v5061_v15 = vsel %vm3241_vm10, %v4886_v6, -inf }
0x22e3   :  { %5062 = vmax.xlane.f32.xlu0 %v5061_v15 }
0x22e5   :  { %v5042_v18 = vpop.f32.mrb[50].mxu1 }
0x22e6   :  { %v17906_v34 = vpop.f32.mrb[51].mxu1  ;;  %v5067_v40 = vsel %vm3241_vm10, %v5042_v18, -inf }
0x22e7   :  { %5068 = vmax.xlane.f32.xlu0 %v5067_v40 }
0x2360   :  { %v5048_v31 = vpop.xlane.xlu0 %5047 }
0x2361   :  { %v5070_v22 = vsub.f32 %v4496_v27, %v5048_v31 }
0x2363   :  { %v5078_v49 = vmul.f32 1.442695, %v5070_v22 }
0x2364   :  { %v5051_v50 = vpop.xlane.xlu1 %5050 }
0x2365   :  { %19499 = vpow2.f32 %v5078_v49  ;;  %v5071_v52 = vsub.f32 %v4574_v63, %v5051_v50 }
0x2367   :  { %v5080_v38 = vmul.f32 1.442695, %v5071_v52 }
0x2368   :  { %v5060_v7 = vpop.xlane.xlu1 %5059  ;;  %v5054_v47 = vpop.xlane.xlu0 %5053 }
0x2369   :  { %19501 = vpow2.f32 %v5080_v38  ;;  %v5074_v16 = vsub.f32 %v4808_v62, %v5060_v7  ;;  %v5072_v0 = vsub.f32 %v4652_v17, %v5054_v47 }
0x236b   :  { %v5082_v21 = vmul.f32 1.442695, %v5072_v0  ;;  %v5086_v19 = vmul.f32 1.442695, %v5074_v16 }
0x236c   :  { %v5066_v8 = vpop.xlane.xlu1 %5065  ;;  %v5057_v43 = vpop.xlane.xlu0 %5056 }
0x236d   :  { %v5076_v2 = vsub.f32 %v4964_v58, %v5066_v8  ;;  %v5073_v29 = vsub.f32 %v4730_v10, %v5057_v43  ;;  %19503 = vpow2.f32 %v5082_v21 }
0x236e   :  { %19505 = vpow2.f32 %v5086_v19 }
0x236f   :  { %v19500_v35 = vpop.eup %19499  ;;  %v5084_v42 = vmul.f32 1.442695, %v5073_v29  ;;  %v5090_v27 = vmul.f32 1.442695, %v5076_v2 }
0x2370   :  { %v5063_v36 = vpop.xlane.xlu0 %5062  ;;  %v5094_v63 = vsel %vm3241_vm10, %v19500_v35, 0.0 }
0x2371   :  { %v5075_v59 = vsub.f32 %v4886_v6, %v5063_v36  ;;  %5095 = vadd.xlane.f32.xlu1 %v5094_v63  ;;  %19507 = vpow2.f32 %v5084_v42 }
0x2372   :  { %19509 = vpow2.f32 %v5090_v27 }
0x2373   :  { %v19502_v15 = vpop.eup %19501  ;;  %v5088_v62 = vmul.f32 1.442695, %v5075_v59 }
0x2374   :  { %v5069_v17 = vpop.xlane.xlu0 %5068  ;;  %v5097_v34 = vsel %vm3241_vm10, %v19502_v15, 0.0 }
0x2375   :  { %19511 = vpow2.f32 %v5088_v62  ;;  %v5077_v58 = vsub.f32 %v5042_v18, %v5069_v17  ;;  %5098 = vadd.xlane.f32.xlu0 %v5097_v34 }
0x2377   :  { %v5092_v10 = vmul.f32 1.442695, %v5077_v58  ;;  %v19504_v40 = vpop.eup %19503 }
0x2378   :  { %v5100_v31 = vsel %vm3241_vm10, %v19504_v40, 0.0  ;;  %v19506_v22 = vpop.eup %19505 }
0x2379   :  { %19513 = vpow2.f32 %v5092_v10  ;;  %5101 = vadd.xlane.f32.xlu1 %v5100_v31  ;;  %v5106_v6 = vsel %vm3241_vm10, %v19506_v22, 0.0 }
0x237b   :  { %v19508_v49 = vpop.eup %19507 }
0x237c   :  { %v5103_v50 = vsel %vm3241_vm10, %v19508_v49, 0.0  ;;  %v19510_v52 = vpop.eup %19509 }
0x237d   :  { %5107 = vadd.xlane.f32.xlu1 %v5106_v6  ;;  %5104 = vadd.xlane.f32.xlu0 %v5103_v50  ;;  %v5112_v18 = vsel %vm3241_vm10, %v19510_v52, 0.0 }
0x237f   :  { %v19512_v38 = vpop.eup %19511 }
0x2380   :  { %v5109_v7 = vsel %vm3241_vm10, %v19512_v38, 0.0 }
0x2381   :  { %5113 = vadd.xlane.f32.xlu1 %v5112_v18  ;;  %5110 = vadd.xlane.f32.xlu0 %v5109_v7 }
0x2383   :  { %v19514_v47 = vpop.eup %19513 }
0x2384   :  { %v5115_v16 = vsel %vm3241_vm10, %v19514_v47, 0.0 }
0x2385   :  { %5116 = vadd.xlane.f32.xlu0 %v5115_v16 }
0x2392   :  { %5812 = vrot.lane.b32.xlu1 %v20942_v61, %s19797_s26 }
0x23fe   :  { %v5096_v0 = vpop.xlane.xlu1 %5095 }
0x23ff   :  { %19515 = vrcp.f32 %v5096_v0 }
0x2402   :  { %v5099_v21 = vpop.xlane.xlu0 %5098 }
0x2403   :  { %19517 = vrcp.f32 %v5099_v21 }
0x2406   :  { %v5102_v19 = vpop.xlane.xlu1 %5101 }
0x2407   :  { %19519 = vrcp.f32 %v5102_v19 }
0x2409   :  { %v19516_v8 = vpop.eup %19515 }
0x240a   :  { %v5119_v43 = vmul.f32 %v19516_v8, %v19500_v35  ;;  %v5108_v2 = vpop.xlane.xlu1 %5107  ;;  %v5105_v29 = vpop.xlane.xlu0 %5104 }
0x240b   :  { %19521 = vrcp.f32 %v5108_v2 }
0x240c   :  { %17910 = vmatmul.mubr.msk.f32.vlgmr.msra.gmra.mrb[42].mxu0 %vm3331_vm11, %v5119_v43  ;;  %19523 = vrcp.f32 %v5105_v29 }
0x240d   :  { %v19518_v42 = vpop.eup %19517  ;;  %17918 = vmatpush3.msra.mxu0 %v20644_v45  ;;  %17919 = vmatprep.mubr.msk.f32.mxu0 %vm19794_vm0, %v19795_v11 }
0x240e   :  { %v5121_v61 = vmul.f32 %v19518_v42, %v19502_v15  ;;  %17927 = vmatprep.subr.mxu0 %v19795_v11  ;;  %v5114_v27 = vpop.xlane.xlu1 %5113  ;;  %v5111_v36 = vpop.xlane.xlu0 %5110 }
0x240f   :  { %19525 = vrcp.f32 %v5114_v27 }
0x2410   :  { %17915 = vmatmul.mubr.msk.f32.vlgmr.msra.gmra.mrb[52].mxu1 %vm3331_vm11, %v5121_v61  ;;  %19527 = vrcp.f32 %v5111_v36 }
0x2411   :  { %17923 = vmatpush3.msra.mxu1 %v20646_v54  ;;  %17924 = vmatprep.mubr.msk.f32.mxu1 %vm19794_vm0, %v19795_v11  ;;  %v19520_v35 = vpop.eup %19519 }
0x2412   :  { %17932 = vmatprep.subr.mxu1 %v19795_v11  ;;  %v5117_v63 = vpop.xlane.xlu0 %5116  ;;  %v5123_v59 = vmul.f32 %v19520_v35, %v19504_v40  ;;  %v5813_v6 = vpop.permute.xlu1 %5812 }
0x2413   :  { %19529 = vrcp.f32 %v5117_v63 }
0x2414   :  { %17920 = vmatmul.mubr.msk.f32.vlgmr.msra.gmra.mrb[44].mxu0 %vm3331_vm11, %v5123_v59 }
0x2415   :  { %v19522_v15 = vpop.eup %19521  ;;  %17928 = vmatpush3.msra.mxu0 %v20648_v56  ;;  %17929 = vmatprep.mubr.msk.f32.mxu0 %vm19794_vm0, %v19795_v11 }
0x2416   :  { %v19524_v62 = vpop.eup %19523  ;;  %17937 = vmatprep.subr.mxu0 %v19795_v11  ;;  %v5127_v17 = vmul.f32 %v19522_v15, %v19506_v22 }
0x2417   :  { %v5125_v34 = vmul.f32 %v19524_v62, %v19508_v49 }
0x2418   :  { %17930 = vmatmul.mubr.msk.f32.vlgmr.msra.gmra.mrb[46].mxu0 %vm3331_vm11, %v5127_v17 }
0x2419   :  { %v19526_v58 = vpop.eup %19525  ;;  %17925 = vmatmul.mubr.msk.f32.vlgmr.msra.gmra.mrb[54].mxu1 %vm3331_vm11, %v5125_v34  ;;  %17938 = vmatpush3.msra.mxu0 %v20652_v30 }
0x241a   :  { %v19528_v10 = vpop.eup %19527  ;;  %17933 = vmatpush3.msra.mxu1 %v20650_v20  ;;  %17934 = vmatprep.mubr.msk.f32.mxu1 %vm19794_vm0, %v19795_v11  ;;  %v5131_v40 = vmul.f32 %v19526_v58, %v19510_v52 }
0x241b   :  { %17939 = vmatprep.mubr.msk.f32.mxu0 %vm19794_vm0, %v19795_v11  ;;  %17942 = vmatprep.subr.mxu1 %v19795_v11  ;;  %v5129_v31 = vmul.f32 %v19528_v10, %v19512_v38 }
0x241c   :  { %17940 = vmatmul.mubr.msk.f32.vlgmr.msra.gmra.mrb[48].mxu0 %vm3331_vm11, %v5131_v40  ;;  %19079 = vmatprep.subr.bf16.mxu0 %v19793_v3 }
0x241d   :  { %v19530_v22 = vpop.eup %19529  ;;  %17935 = vmatmul.mubr.msk.f32.vlgmr.msra.gmra.mrb[56].mxu1 %vm3331_vm11, %v5129_v31  ;;  %19081 = vmatpush3.bf16.msra.mxu0 %v20800_v28 }
0x241e   :  { %17943 = vmatpush3.msra.mxu1 %v20654_v12  ;;  %17944 = vmatprep.mubr.msk.f32.mxu1 %vm19794_vm0, %v19795_v11  ;;  %v5133_v49 = vmul.f32 %v19530_v22, %v19514_v47 }
0x241f   :  { %19085 = vmatprep.subr.bf16.mxu1 %v19793_v3  ;;  %19082 = vmatprep.subr.bf16.mxu0 %v19793_v3 }
0x2420   :  { %17955 = vmatprep.mubr.msk.f32.mxu0 %vm19794_vm0, %v19795_v11 }
0x2421   :  { %17945 = vmatmul.mubr.msk.f32.vlgmr.msra.gmra.mrb[58].mxu1 %vm3331_vm11, %v5133_v49  ;;  %19084 = vmatpush3.bf16.msra.mxu0 %v20810_v51 }
0x2422   :  { %19087 = vmatpush3.bf16.msra.mxu1 %v20755_v37  ;;  %17966 = vmatprep.mubr.msk.f32.mxu1 %vm19794_vm0, %v19795_v11 }
0x2423   :  { %19088 = vmatprep.subr.bf16.mxu1 %v19793_v3  ;;  %19091 = vmatprep.subr.bf16.mxu0 %v19793_v3 }
0x2426   :  { %19090 = vmatpush3.bf16.msra.mxu1 %v20773_v9 }
0x2427   :  { %19115 = vmatprep.subr.bf16.mxu1 %v19793_v3 }
0x2429   :  { %17967 = vmatmul.mubr.msk.f32.vlgmr.msra.gmra.mrb[60].mxu1 %vm57_vm1, %v5813_v6 }
0x242a   :  { %19117 = vmatpush3.bf16.msra.mxu1 %v20512_v5  ;;  %18012 = vmatprep.mubr.msk.f32.mxu1 %vm19794_vm0, %v19795_v11 }
0x242b   :  { %19118 = vmatprep.subr.bf16.mxu1 %v19793_v3 }
0x242e   :  { %19120 = vmatpush3.bf16.msra.mxu1 %v20530_v14 }
0x242f   :  { %19121 = vmatprep.subr.bf16.mxu1 %v19793_v3 }
0x2431   :  { %18013 = vmatmul.mubr.msk.f32.vlgmr.msra.gmra.mrb[62].mxu1 %vm57_vm1, %v5813_v6 }
0x2432   :  { %19123 = vmatpush3.bf16.msra.mxu1 %v20501_v1  ;;  %18023 = vmatprep.mubr.msk.f32.mxu1 %vm19794_vm0, %v19795_v11 }
0x2433   :  { %19124 = vmatprep.subr.bf16.mxu1 %v19793_v3 }
0x2436   :  { %19126 = vmatpush3.bf16.msra.mxu1 %v20521_v13 }
0x2437   :  { %18026 = vmatprep.subr.mxu1 %v19795_v11 }
0x24df   :  { %v5203_v50 = vpop.f32.mrb[42].mxu0 }
0x24e0   :  { %v17911_v52 = vpop.f32.mrb[43].mxu0 }
0x24e3   :  { %v5276_v38 = vpop.f32.mrb[52].mxu1 }
0x24e4   :  { %v5726_v7 = vrot.slane %v5276_v38, 7  ;;  %v17916_v18 = vpop.f32.mrb[53].mxu1 }
0x24e6   :  { %v5727_v47 = vsel %vm3932_vm12, %v5726_v7, %v5203_v50 }
0x24e7   :  { %v5349_v16 = vpop.f32.mrb[44].mxu0 }
0x24e8   :  { %v5728_v0 = vrot.slane %v5349_v16, 6  ;;  %v17921_v21 = vpop.f32.mrb[45].mxu0 }
0x24ea   :  { %v5729_v19 = vsel %vm3935_vm13, %v5728_v0, %v5727_v47 }
0x24eb   :  { %v5495_v8 = vpop.f32.mrb[46].mxu0 }
0x24ec   :  { %v5422_v43 = vpop.f32.mrb[54].mxu1  ;;  %v5732_v2 = vrot.slane %v5495_v8, 4  ;;  %v17931_v29 = vpop.f32.mrb[47].mxu0 }
0x24ed   :  { %v5730_v42 = vrot.slane %v5422_v43, 5  ;;  %v17926_v61 = vpop.f32.mrb[55].mxu1 }
0x24ef   :  { %v5731_v27 = vsel %vm3938_vm14, %v5730_v42, %v5729_v19  ;;  %v5641_v36 = vpop.f32.mrb[48].mxu0 }
0x24f0   :  { %v5733_v35 = vsel %vm3941_vm15, %v5732_v2, %v5731_v27  ;;  %v5568_v63 = vpop.f32.mrb[56].mxu1  ;;  %v5736_v59 = vrot.slane %v5641_v36, 2  ;;  %v17941_v15 = vpop.f32.mrb[49].mxu0 }
0x24f1   :  { %v5734_v62 = vrot.slane %v5568_v63, 3  ;;  %v17936_v17 = vpop.f32.mrb[57].mxu1  ;;  %v16694_v63 = vld [vmem:[%s22341_s2 + $0x8] sm:$0xff] }
0x24f3   :  { %v5735_v34 = vsel %vm3944_vm2, %v5734_v62, %v5733_v35  ;;  %v5985_v35 = vstv %s5984_s27  ;;  %s16795_s27 = sld [smem:[#allocation3 + $0x4]] }
0x24f4   :  { %v5737_v58 = vsel %vm3947_vm3, %v5736_v59, %v5735_v34  ;;  %v5714_v10 = vpop.f32.mrb[58].mxu1  ;;  %vm5986_vm7 = vcmp.eq.s32.totalorder %v5985_v35, 1 }
0x24f5   :  { %v5738_v40 = vrot.slane %v5714_v10, 1  ;;  %v17946_v31 = vpop.f32.mrb[59].mxu1  ;;  %v21141_v10 = vld [vmem:[%s22348_s9] ss:$0 sm:$0xff] }
0x24f7   :  { %v5739_v22 = vsel %vm3950_vm4, %v5738_v40, %v5737_v58 }
0x24f8   :  { %17956 = vmatmul.mubr.msk.f32.vlgmr.msra.gmra.mrb[50].mxu0 %vm57_vm1, %v5739_v22 }
0x24f9   :  { %19093 = vmatpush3.bf16.msra.mxu0 %v20823_v60  ;;  %18001 = vmatprep.mubr.msk.f32.mxu0 %vm19794_vm0, %v19795_v11  ;;  %p11333_p9 = scmp.eq.s32.totalorder %s16795_s27, 1 }
0x24fa   :  { %19094 = vmatprep.subr.bf16.mxu0 %v19793_v3 }
0x24fb   :  { %s11336_s28 = scalar_select %p11333_p9, 1, 0 }
0x24fc   :  { %v5882_v49 = vpop.f32.mrb[60].mxu1 }
0x24fd   :  { %v17968_v6 = vpop.f32.mrb[61].mxu1  ;;  %19096 = vmatpush3.bf16.msra.mxu0 %v20856_v48 }
0x24fe   :  { %19097 = vmatprep.subr.bf16.mxu0 %v19793_v3 }
0x2501   :  { %19099 = vmatpush3.bf16.msra.mxu0 %v20862_v41 }
0x2502   :  { %19100 = vmatprep.subr.bf16.mxu0 %v19793_v3 }
0x2504   :  { %v6054_v50 = vpop.f32.mrb[62].mxu1 }
0x2505   :  { %v18014_v52 = vpop.f32.mrb[63].mxu1  ;;  %19102 = vmatpush3.bf16.msra.mxu0 %v20872_v44 }
0x2506   :  { %19103 = vmatprep.subr.bf16.mxu0 %v19793_v3 }
0x2509   :  { %19105 = vmatpush3.bf16.msra.mxu0 %v20882_v33 }
0x250a   :  { %19106 = vmatprep.subr.bf16.mxu0 %v19793_v3 }
0x250d   :  { %19108 = vmatpush3.bf16.msra.mxu0 %v20892_v26 }
0x250e   :  { %19109 = vmatprep.subr.bf16.mxu0 %v19793_v3 }
0x2511   :  { %19111 = vmatpush3.bf16.msra.mxu0 %v20902_v53 }
0x2512   :  { %19112 = vmatprep.subr.bf16.mxu0 %v19793_v3 }
0x2515   :  { %19114 = vmatpush3.bf16.msra.mxu0 %v20912_v57 }
0x2516   :  { %18046 = vmatprep.subr.mxu0 %v19795_v11 }
0x25cb   :  { %v5808_v38 = vpop.f32.mrb[50].mxu0 }
0x25cc   :  { %v5883_v7 = vadd.f32 %v5882_v49, %v5808_v38  ;;  %v17957_v18 = vpop.f32.mrb[51].mxu0 }
0x25ce   :  { %v5886_v47 = vadd.f32 %v20837_v23, %v5883_v7 }
0x25d0   :  { %16690 = vst [vmem:[%s22351_s12 + $0x8] sm:$0xff] %v5886_v47  ;;  %5889 = vmax.xlane.f32.xlu0 %v5886_v47 }
0x265d   :  { %v5890_v16 = vpop.xlane.xlu0 %5889 }
0x265e   :  { %vm5891_vm9 = vcmp.eq.f32.partialorder %v5886_v47, %v5890_v16 }
0x265f   :  { %v5892_v0 = vsel %vm5891_vm9, %v20844_v55, 128 }
0x2660   :  { %v5894_v21 = vshra.s32 %v5892_v0, 16  ;;  %v5893_v8 = vand.u32 65535, %v5892_v0 }
0x2662   :  { %v5896_v19 = vcvt.s32.f32 %v5894_v21  ;;  %v5895_v2 = vcvt.s32.f32 %v5893_v8 }
0x2664   :  { %5897 = vmin.xlane.f32.xlu0 %v5896_v19 }
0x26f1   :  { %v5898_v43 = vpop.xlane.xlu0 %5897 }
0x26f2   :  { %vm5899_vm5 = vcmp.eq.f32.partialorder %v5896_v19, %v5898_v43  ;;  %v5904_v42 = vcvt.f32.s32 %v5898_v43 }
0x26f3   :  { %v5900_v29 = vsel %vm5899_vm5, %v5895_v2, inf }
0x26f4   :  { %5901 = vmin.xlane.f32.xlu0 %v5900_v29  ;;  %v5905_v61 = vshll.u32 %v5904_v42, 16 }
0x2781   :  { %v5902_v23 = vpop.xlane.xlu0 %5901 }
0x2782   :  { %v5903_v27 = vcvt.f32.s32 %v5902_v23 }
0x2784   :  { %v5906_v36 = vadd.s32 %v5905_v61, %v5903_v27 }
0x2786   :  { %vm5907_vm6 = vcmp.eq.s32.totalorder %v20844_v55, %v5906_v36 }
0x2787   :  { %18002 = vmatmul.mubr.msk.f32.vlgmr.msra.gmra.mrb[52].mxu0 %vm5907_vm6, %v19799_v25 }
0x2788   :  { %18047 = vmatpush3.xpose.msk.msra.mxu0 %vm57_vm1, %v20648_v56  ;;  %18048 = vmatprep.mubr.msk.f32.mxu0 %vm19794_vm0, %v19795_v11 }
0x2789   :  { %18056 = vmatprep.subr.mxu0 %v19795_v11 }
0x285a   :  { %v5976_v59 = vpop.f32.mrb[52].mxu0 }
0x285b   :  { %v5987_v15 = vsel %vm5986_vm7, %v16694_v63, %v5976_v59  ;;  %v18003_v62 = vpop.f32.mrb[53].mxu0 }
0x285c   :  { %18024 = vmatmul.mubr.msk.f32.vlgmr.msra.gmra.mrb[64].mxu1 %vm57_vm1, %v5987_v15 }
0x285d   :  { %18027 = vmatpush3.xpose.msk.msra.mxu1 %vm57_vm1, %v20602_v24  ;;  %18028 = vmatprep.mubr.msk.f32.mxu1 %vm19794_vm0, %v19795_v11 }
0x285e   :  { %18031 = vmatprep.subr.mxu1 %v19795_v11 }
0x292f   :  { %v6127_v17 = vpop.f32.mrb[64].mxu1 }
0x2930   :  { %v6128_v34 = vadd.f32 %v6127_v17, %v6054_v50  ;;  %v18025_v58 = vpop.f32.mrb[65].mxu1 }
0x2932   :  { %v6131_v40 = vadd.f32 %v21141_v10, %v6128_v34 }
0x2934   :  { %19531 = vtanh.f32 %v6131_v40  ;;  %v16697_v22 = vmul.f32 -1.442695, %v6131_v40 }
0x2936   :  { %19533 = vpow2.f32 %v16697_v22 }
0x293e   :  { %v19532_v31 = vpop.eup %19531 }
0x293f   :  { %6141 = vrot.lane.b32.xlu0 %v19532_v31, %s19796_s25 }
0x2940   :  { %v19534_v49 = vpop.eup %19533 }
0x2941   :  { %v6135_v6 = vadd.f32 1.0, %v19534_v49 }
0x2943   :  { %19535 = vrcp.f32 %v6135_v6 }
0x294d   :  { %v19536_v52 = vpop.eup %19535 }
0x294e   :  { %v6139_v7 = vmul.f32 %v19536_v52, %v20938_v4 }
0x29b1   :  { %v6142_v38 = vpop.permute.xlu0 %6141 }
0x29b2   :  { %v6144_v50 = vmul.f32 %v19536_v52, %v6142_v38 }
0x29b4   :  { %6146 = vrot.lane.b32.xlu1 %v6144_v50, %s19797_s26 }
0x2a26   :  { %v6147_v18 = vpop.permute.xlu1 %6146 }
0x2a27   :  { %v21147_v47 = vadd.f32 %v6147_v18, %v6139_v7 }
0x2a29   :  { %19537 = vtanh.f32 %v21147_v47 }
0x2a33   :  { %v19538_v16 = vpop.eup %19537 }
0x2a34   :  { %6152 = vrot.lane.b32.xlu1 %v19538_v16, %s19796_s25 }
0x2aa6   :  { %v6153_v0 = vpop.permute.xlu1 %6152 }
0x2aa7   :  { %v21151_v21 = vmul.f32 %v19536_v52, %v6153_v0 }
0x2aa9   :  { %v6157_v19 = vcombine.high %v21151_v21, %v21151_v21  ;;  %v6164_v8 = vrot.slane %v21151_v21, %v19957_v39 }
0x2aab   :  { %v6171_v43 = vrot.slane %v6157_v19, %v19957_v39  ;;  %v6172_v4 = vcombine.high %v6164_v8, %v6164_v8  ;;  %v6180_v2 = vrot.slane %v6164_v8, %v19957_v39 }
0x2aad   :  { %v6173_v29 = vcombine.high %v6171_v43, %v6171_v43  ;;  %v6209_v42 = vrot.slane %v6180_v2, %v19963_v46  ;;  %v6194_v23 = vrot.slane %v6172_v4, %v19957_v39  ;;  %v6202_v35 = vcombine.high %v6180_v2, %v6180_v2 }
0x2aae   :  { %v6187_v62 = vrot.slane %v6171_v43, %v19957_v39 }
0x2aaf   :  { %6210 = vrot.lane.b32.xlu1 %v6209_v42, %s19797_s26  ;;  %v6204_v61 = vcombine.high %v6194_v23, %v6194_v23  ;;  %v6287_v27 = vrot.slane %v6194_v23, %v19963_v46  ;;  %v6201_v63 = vrot.slane %v6173_v29, %v19957_v39  ;;  %v6365_v59 = vrot.slane %v6202_v35, %v19963_v46 }
0x2ab0   :  { %v6521_v34 = vrot.slane %v6187_v62, %v19963_v46  ;;  %v6203_v40 = vcombine.high %v6187_v62, %v6187_v62 }
0x2ab1   :  { %v6443_v36 = vrot.slane %v6204_v61, %v19963_v46  ;;  %v6599_v15 = vrot.slane %v6201_v63, %v19963_v46  ;;  %v6205_v17 = vcombine.high %v6201_v63, %v6201_v63 }
0x2ab2   :  { %v6677_v31 = vrot.slane %v6203_v40, %v19963_v46 }
0x2ab3   :  { %6288 = vrot.lane.b32.xlu1 %v6287_v27, %s19797_s26  ;;  %6444 = vrot.lane.b32.xlu0 %v6443_v36, %s19797_s26  ;;  %v6755_v58 = vrot.slane %v6205_v17, %v19963_v46 }
0x2ab7   :  { %6366 = vrot.lane.b32.xlu1 %v6365_v59, %s19797_s26  ;;  %6600 = vrot.lane.b32.xlu0 %v6599_v15, %s19797_s26 }
0x2abb   :  { %6522 = vrot.lane.b32.xlu1 %v6521_v34, %s19797_s26  ;;  %6756 = vrot.lane.b32.xlu0 %v6755_v58, %s19797_s26 }
0x2abf   :  { %6678 = vrot.lane.b32.xlu1 %v6677_v31, %s19797_s26 }
0x2b21   :  { %v6211_v22 = vpop.permute.xlu1 %6210 }
0x2b22   :  { %18029 = vmatmul.mubr.msk.f32.vlgmr.msra.gmra.mrb[66].mxu1 %vm57_vm1, %v6211_v22 }
0x2b23   :  { %18032 = vmatpush3.xpose.msk.msra.mxu1 %vm57_vm1, %v20618_v32  ;;  %18033 = vmatprep.mubr.msk.f32.mxu1 %vm19794_vm0, %v19795_v11 }
0x2b24   :  { %18036 = vmatprep.subr.mxu1 %v19795_v11 }
0x2b25   :  { %v6289_v49 = vpop.permute.xlu1 %6288  ;;  %v6445_v6 = vpop.permute.xlu0 %6444 }
0x2b26   :  { %18034 = vmatmul.mubr.msk.f32.vlgmr.msra.gmra.mrb[68].mxu1 %vm57_vm1, %v6289_v49 }
0x2b27   :  { %18037 = vmatpush3.xpose.msk.msra.mxu1 %vm57_vm1, %v20644_v45  ;;  %18038 = vmatprep.mubr.msk.f32.mxu1 %vm19794_vm0, %v19795_v11 }
0x2b28   :  { %18041 = vmatprep.subr.mxu1 %v19795_v11 }
0x2b29   :  { %v6367_v52 = vpop.permute.xlu1 %6366  ;;  %v6601_v50 = vpop.permute.xlu0 %6600 }
0x2b2a   :  { %18039 = vmatmul.mubr.msk.f32.vlgmr.msra.gmra.mrb[70].mxu1 %vm57_vm1, %v6367_v52 }
0x2b2b   :  { %18042 = vmatpush3.xpose.msk.msra.mxu1 %vm57_vm1, %v20646_v54  ;;  %18043 = vmatprep.mubr.msk.f32.mxu1 %vm19794_vm0, %v19795_v11 }
0x2b2c   :  { %18051 = vmatprep.subr.mxu1 %v19795_v11 }
0x2b2d   :  { %v6523_v38 = vpop.permute.xlu1 %6522  ;;  %v6757_v18 = vpop.permute.xlu0 %6756 }
0x2b2e   :  { %18044 = vmatmul.mubr.msk.f32.vlgmr.msra.gmra.mrb[72].mxu1 %vm57_vm1, %v6445_v6  ;;  %18049 = vmatmul.mubr.msk.f32.vlgmr.msra.gmra.mrb[54].mxu0 %vm57_vm1, %v6523_v38 }
0x2b2f   :  { %18052 = vmatpush3.xpose.msk.msra.mxu1 %vm57_vm1, %v20650_v20  ;;  %18057 = vmatpush3.xpose.msk.msra.mxu0 %vm57_vm1, %v20652_v30 }
0x2b30   :  { %18053 = vmatprep.mubr.msk.f32.mxu1 %vm19794_vm0, %v19795_v11  ;;  %18058 = vmatprep.mubr.msk.f32.mxu0 %vm19794_vm0, %v19795_v11 }
0x2b31   :  { %18061 = vmatprep.subr.mxu1 %v19795_v11  ;;  %18066 = vmatprep.subr.mxu0 %v19795_v11  ;;  %v6679_v7 = vpop.permute.xlu1 %6678 }
0x2b32   :  { %18054 = vmatmul.mubr.msk.f32.vlgmr.msra.gmra.mrb[74].mxu1 %vm57_vm1, %v6601_v50  ;;  %18059 = vmatmul.mubr.msk.f32.vlgmr.msra.gmra.mrb[56].mxu0 %vm57_vm1, %v6679_v7 }
0x2b33   :  { %18062 = vmatpush3.xpose.msk.msra.mxu1 %vm57_vm1, %v20654_v12  ;;  %18067 = vmatpush3.msra.mxu0 %v20602_v24 }
0x2b34   :  { %18063 = vmatprep.mubr.msk.f32.mxu1 %vm19794_vm0, %v19795_v11  ;;  %18071 = vmatprep.subr.mxu1 %v19795_v11 }
0x2b35   :  { %18068 = vmatprep.mubr.msk.f32.mxu0 %vm19794_vm0, %v19795_v11  ;;  %18076 = vmatprep.subr.mxu0 %v19795_v11 }
0x2b36   :  { %18064 = vmatmul.mubr.msk.f32.vlgmr.msra.gmra.mrb[76].mxu1 %vm57_vm1, %v6757_v18 }
0x2b37   :  { %18072 = vmatpush3.msra.mxu1 %v20618_v32  ;;  %18073 = vmatprep.mubr.msk.f32.mxu1 %vm19794_vm0, %v19795_v11 }
0x2b38   :  { %18081 = vmatprep.subr.mxu1 %v19795_v11 }
0x2bf5   :  { %v6280_v16 = vpop.f32.mrb[66].mxu1 }
0x2bf6   :  { %v18030_v0 = vpop.f32.mrb[67].mxu1  ;;  %v6830_v19 = vsel %vm3241_vm10, %v6280_v16, -inf }
0x2bf7   :  { %6831 = vmax.xlane.f32.xlu1 %v6830_v19 }
0x2bf9   :  { %v6358_v8 = vpop.f32.mrb[68].mxu1 }
0x2bfa   :  { %v18035_v43 = vpop.f32.mrb[69].mxu1  ;;  %v6833_v4 = vsel %vm3241_vm10, %v6358_v8, -inf }
0x2bfb   :  { %6834 = vmax.xlane.f32.xlu0 %v6833_v4 }
0x2bfd   :  { %v6436_v2 = vpop.f32.mrb[70].mxu1 }
0x2bfe   :  { %v18040_v29 = vpop.f32.mrb[71].mxu1  ;;  %v6836_v42 = vsel %vm3241_vm10, %v6436_v2, -inf }
0x2bff   :  { %6837 = vmax.xlane.f32.xlu0 %v6836_v42 }
0x2c01   :  { %v6514_v23 = vpop.f32.mrb[72].mxu1  ;;  %v6592_v61 = vpop.f32.mrb[54].mxu0 }
0x2c02   :  { %v18045_v27 = vpop.f32.mrb[73].mxu1  ;;  %v18050_v36 = vpop.f32.mrb[55].mxu0  ;;  %v6842_v35 = vsel %vm3241_vm10, %v6592_v61, -inf  ;;  %v6839_v63 = vsel %vm3241_vm10, %v6514_v23, -inf }
0x2c03   :  { %6843 = vmax.xlane.f32.xlu0 %v6842_v35  ;;  %6840 = vmax.xlane.f32.xlu1 %v6839_v63 }
0x2c05   :  { %v6670_v59 = vpop.f32.mrb[74].mxu1  ;;  %v6748_v15 = vpop.f32.mrb[56].mxu0 }
0x2c06   :  { %v18055_v62 = vpop.f32.mrb[75].mxu1  ;;  %v18060_v17 = vpop.f32.mrb[57].mxu0  ;;  %v6848_v34 = vsel %vm3241_vm10, %v6748_v15, -inf  ;;  %v6845_v58 = vsel %vm3241_vm10, %v6670_v59, -inf }
0x2c07   :  { %6849 = vmax.xlane.f32.xlu0 %v6848_v34  ;;  %6846 = vmax.xlane.f32.xlu1 %v6845_v58 }
0x2c09   :  { %v6826_v40 = vpop.f32.mrb[76].mxu1 }
0x2c0a   :  { %v18065_v31 = vpop.f32.mrb[77].mxu1  ;;  %v6851_v22 = vsel %vm3241_vm10, %v6826_v40, -inf }
0x2c0b   :  { %6852 = vmax.xlane.f32.xlu1 %v6851_v22 }
0x2c84   :  { %v6832_v49 = vpop.xlane.xlu1 %6831 }
0x2c85   :  { %v6854_v6 = vsub.f32 %v6280_v16, %v6832_v49 }
0x2c87   :  { %v6862_v52 = vmul.f32 1.442695, %v6854_v6 }
0x2c88   :  { %v6835_v38 = vpop.xlane.xlu0 %6834 }
0x2c89   :  { %19539 = vpow2.f32 %v6862_v52  ;;  %v6855_v50 = vsub.f32 %v6358_v8, %v6835_v38 }
0x2c8b   :  { %v6864_v7 = vmul.f32 1.442695, %v6855_v50 }
0x2c8c   :  { %v6838_v18 = vpop.xlane.xlu0 %6837 }
0x2c8d   :  { %19541 = vpow2.f32 %v6864_v7  ;;  %v6856_v0 = vsub.f32 %v6436_v2, %v6838_v18 }
0x2c8f   :  { %v6866_v19 = vmul.f32 1.442695, %v6856_v0 }
0x2c90   :  { %v6844_v43 = vpop.xlane.xlu0 %6843  ;;  %v6841_v4 = vpop.xlane.xlu1 %6840 }
0x2c91   :  { %19543 = vpow2.f32 %v6866_v19  ;;  %v6858_v29 = vsub.f32 %v6592_v61, %v6844_v43  ;;  %v6857_v42 = vsub.f32 %v6514_v23, %v6841_v4 }
0x2c93   :  { %v19540_v27 = vpop.eup %19539  ;;  %v6870_v36 = vmul.f32 1.442695, %v6858_v29  ;;  %v6868_v35 = vmul.f32 1.442695, %v6857_v42 }
0x2c94   :  { %v6850_v63 = vpop.xlane.xlu0 %6849  ;;  %v6847_v62 = vpop.xlane.xlu1 %6846  ;;  %v6878_v16 = vsel %vm3241_vm10, %v19540_v27, 0.0 }
0x2c95   :  { %19545 = vpow2.f32 %v6870_v36  ;;  %v6860_v17 = vsub.f32 %v6748_v15, %v6850_v63  ;;  %v6859_v8 = vsub.f32 %v6670_v59, %v6847_v62  ;;  %6879 = vadd.xlane.f32.xlu0 %v6878_v16 }
0x2c96   :  { %19547 = vpow2.f32 %v6868_v35 }
0x2c97   :  { %v19542_v34 = vpop.eup %19541  ;;  %v6874_v2 = vmul.f32 1.442695, %v6860_v17  ;;  %v6872_v58 = vmul.f32 1.442695, %v6859_v8 }
0x2c98   :  { %v6853_v31 = vpop.xlane.xlu1 %6852  ;;  %v6881_v22 = vsel %vm3241_vm10, %v19542_v34, 0.0 }
0x2c99   :  { %19549 = vpow2.f32 %v6874_v2  ;;  %v6861_v23 = vsub.f32 %v6826_v40, %v6853_v31  ;;  %6882 = vadd.xlane.f32.xlu1 %v6881_v22 }
0x2c9a   :  { %19551 = vpow2.f32 %v6872_v58 }
0x2c9b   :  { %v19544_v61 = vpop.eup %19543  ;;  %v6876_v49 = vmul.f32 1.442695, %v6861_v23 }
0x2c9c   :  { %v6884_v6 = vsel %vm3241_vm10, %v19544_v61, 0.0 }
0x2c9d   :  { %19553 = vpow2.f32 %v6876_v49  ;;  %6885 = vadd.xlane.f32.xlu0 %v6884_v6 }
0x2c9f   :  { %v19546_v15 = vpop.eup %19545 }
0x2ca0   :  { %v19548_v59 = vpop.eup %19547  ;;  %v6890_v52 = vsel %vm3241_vm10, %v19546_v15, 0.0 }
0x2ca1   :  { %6891 = vadd.xlane.f32.xlu0 %v6890_v52  ;;  %v6887_v38 = vsel %vm3241_vm10, %v19548_v59, 0.0 }
0x2ca2   :  { %6888 = vadd.xlane.f32.xlu1 %v6887_v38 }
0x2ca3   :  { %v19550_v50 = vpop.eup %19549 }
0x2ca4   :  { %v19552_v7 = vpop.eup %19551  ;;  %v6896_v40 = vsel %vm3241_vm10, %v19550_v50, 0.0 }
0x2ca5   :  { %6897 = vadd.xlane.f32.xlu0 %v6896_v40  ;;  %v6893_v18 = vsel %vm3241_vm10, %v19552_v7, 0.0 }
0x2ca6   :  { %6894 = vadd.xlane.f32.xlu1 %v6893_v18 }
0x2ca7   :  { %v19554_v0 = vpop.eup %19553 }
0x2ca8   :  { %v6899_v19 = vsel %vm3241_vm10, %v19554_v0, 0.0 }
0x2caa   :  { %6900 = vadd.xlane.f32.xlu1 %v6899_v19 }
0x2cbb   :  { %7596 = vrot.lane.b32.xlu0 %v21151_v21, %s19797_s26 }
0x2d22   :  { %v6880_v43 = vpop.xlane.xlu0 %6879 }
0x2d23   :  { %19555 = vrcp.f32 %v6880_v43 }
0x2d26   :  { %v6883_v4 = vpop.xlane.xlu1 %6882 }
0x2d27   :  { %19557 = vrcp.f32 %v6883_v4 }
0x2d2a   :  { %v6886_v29 = vpop.xlane.xlu0 %6885 }
0x2d2b   :  { %19559 = vrcp.f32 %v6886_v29 }
0x2d2d   :  { %v19556_v42 = vpop.eup %19555 }
0x2d2e   :  { %v6892_v36 = vpop.xlane.xlu0 %6891  ;;  %v6903_v35 = vmul.f32 %v19556_v42, %v19540_v27 }
0x2d2f   :  { %19561 = vrcp.f32 %v6892_v36  ;;  %v6889_v63 = vpop.xlane.xlu1 %6888 }
0x2d30   :  { %19563 = vrcp.f32 %v6889_v63  ;;  %18069 = vmatmul.mubr.msk.f32.vlgmr.msra.gmra.mrb[58].mxu0 %vm3331_vm11, %v6903_v35 }
0x2d31   :  { %v19558_v62 = vpop.eup %19557  ;;  %18077 = vmatpush3.msra.mxu0 %v20644_v45  ;;  %18078 = vmatprep.mubr.msk.f32.mxu0 %vm19794_vm0, %v19795_v11 }
0x2d32   :  { %v6898_v21 = vpop.xlane.xlu0 %6897  ;;  %v6905_v16 = vmul.f32 %v19558_v62, %v19542_v34  ;;  %18086 = vmatprep.subr.mxu0 %v19795_v11 }
0x2d33   :  { %19565 = vrcp.f32 %v6898_v21  ;;  %v6895_v17 = vpop.xlane.xlu1 %6894 }
0x2d34   :  { %19567 = vrcp.f32 %v6895_v17  ;;  %18074 = vmatmul.mubr.msk.f32.vlgmr.msra.gmra.mrb[78].mxu1 %vm3331_vm11, %v6905_v16 }
0x2d35   :  { %v19560_v27 = vpop.eup %19559  ;;  %18082 = vmatpush3.msra.mxu1 %v20646_v54  ;;  %18083 = vmatprep.mubr.msk.f32.mxu1 %vm19794_vm0, %v19795_v11 }
0x2d36   :  { %v6907_v8 = vmul.f32 %v19560_v27, %v19544_v61  ;;  %18091 = vmatprep.subr.mxu1 %v19795_v11  ;;  %v7597_v52 = vpop.permute.xlu0 %7596 }
0x2d37   :  { %v6901_v2 = vpop.xlane.xlu1 %6900 }
0x2d38   :  { %19569 = vrcp.f32 %v6901_v2  ;;  %18079 = vmatmul.mubr.msk.f32.vlgmr.msra.gmra.mrb[60].mxu0 %vm3331_vm11, %v6907_v8 }
0x2d39   :  { %v19562_v34 = vpop.eup %19561  ;;  %18087 = vmatpush3.msra.mxu0 %v20648_v56  ;;  %18088 = vmatprep.mubr.msk.f32.mxu0 %vm19794_vm0, %v19795_v11 }
0x2d3a   :  { %v19564_v58 = vpop.eup %19563  ;;  %18096 = vmatprep.subr.mxu0 %v19795_v11  ;;  %v6911_v31 = vmul.f32 %v19562_v34, %v19546_v15 }
0x2d3b   :  { %v6909_v22 = vmul.f32 %v19564_v58, %v19548_v59 }
0x2d3c   :  { %18089 = vmatmul.mubr.msk.f32.vlgmr.msra.gmra.mrb[62].mxu0 %vm3331_vm11, %v6911_v31 }
0x2d3d   :  { %v19566_v23 = vpop.eup %19565  ;;  %18084 = vmatmul.mubr.msk.f32.vlgmr.msra.gmra.mrb[80].mxu1 %vm3331_vm11, %v6909_v22  ;;  %18097 = vmatpush3.msra.mxu0 %v20652_v30 }
0x2d3e   :  { %v19568_v61 = vpop.eup %19567  ;;  %18092 = vmatpush3.msra.mxu1 %v20650_v20  ;;  %18093 = vmatprep.mubr.msk.f32.mxu1 %vm19794_vm0, %v19795_v11  ;;  %v6915_v49 = vmul.f32 %v19566_v23, %v19550_v50 }
0x2d3f   :  { %18098 = vmatprep.mubr.msk.f32.mxu0 %vm19794_vm0, %v19795_v11  ;;  %18101 = vmatprep.subr.mxu1 %v19795_v11  ;;  %v6913_v6 = vmul.f32 %v19568_v61, %v19552_v7 }
0x2d40   :  { %18099 = vmatmul.mubr.msk.f32.vlgmr.msra.gmra.mrb[64].mxu0 %vm3331_vm11, %v6915_v49  ;;  %19127 = vmatprep.subr.bf16.mxu0 %v19793_v3 }
0x2d41   :  { %18094 = vmatmul.mubr.msk.f32.vlgmr.msra.gmra.mrb[82].mxu1 %vm3331_vm11, %v6913_v6  ;;  %19129 = vmatpush3.bf16.msra.mxu0 %v20800_v28 }
0x2d42   :  { %v19570_v15 = vpop.eup %19569  ;;  %18102 = vmatpush3.msra.mxu1 %v20654_v12  ;;  %18103 = vmatprep.mubr.msk.f32.mxu1 %vm19794_vm0, %v19795_v11 }
0x2d43   :  { %19133 = vmatprep.subr.bf16.mxu1 %v19793_v3  ;;  %v6917_v59 = vmul.f32 %v19570_v15, %v19554_v0  ;;  %19130 = vmatprep.subr.bf16.mxu0 %v19793_v3 }
0x2d44   :  { %18114 = vmatprep.mubr.msk.f32.mxu0 %vm19794_vm0, %v19795_v11 }
0x2d45   :  { %18104 = vmatmul.mubr.msk.f32.vlgmr.msra.gmra.mrb[84].mxu1 %vm3331_vm11, %v6917_v59  ;;  %19132 = vmatpush3.bf16.msra.mxu0 %v20810_v51 }
0x2d46   :  { %19135 = vmatpush3.bf16.msra.mxu1 %v20755_v37  ;;  %18125 = vmatprep.mubr.msk.f32.mxu1 %vm19794_vm0, %v19795_v11 }
0x2d47   :  { %19136 = vmatprep.subr.bf16.mxu1 %v19793_v3  ;;  %19139 = vmatprep.subr.bf16.mxu0 %v19793_v3 }
0x2d4a   :  { %19138 = vmatpush3.bf16.msra.mxu1 %v20773_v9 }
0x2d4b   :  { %19163 = vmatprep.subr.bf16.mxu1 %v19793_v3 }
0x2d4d   :  { %18126 = vmatmul.mubr.msk.f32.vlgmr.msra.gmra.mrb[86].mxu1 %vm57_vm1, %v7597_v52 }
0x2d4e   :  { %19165 = vmatpush3.bf16.msra.mxu1 %v20512_v5  ;;  %18171 = vmatprep.mubr.msk.f32.mxu1 %vm19794_vm0, %v19795_v11 }
0x2d4f   :  { %19166 = vmatprep.subr.bf16.mxu1 %v19793_v3 }
0x2d52   :  { %19168 = vmatpush3.bf16.msra.mxu1 %v20530_v14 }
0x2d53   :  { %19169 = vmatprep.subr.bf16.mxu1 %v19793_v3 }
0x2d55   :  { %18172 = vmatmul.mubr.msk.f32.vlgmr.msra.gmra.mrb[88].mxu1 %vm57_vm1, %v7597_v52 }
0x2d56   :  { %19171 = vmatpush3.bf16.msra.mxu1 %v20501_v1  ;;  %18182 = vmatprep.mubr.msk.f32.mxu1 %vm19794_vm0, %v19795_v11 }
0x2d57   :  { %19172 = vmatprep.subr.bf16.mxu1 %v19793_v3 }
0x2d5a   :  { %19174 = vmatpush3.bf16.msra.mxu1 %v20521_v13 }
0x2d5b   :  { %18185 = vmatprep.subr.mxu1 %v19795_v11 }
0x2e03   :  { %v6987_v38 = vpop.f32.mrb[58].mxu0 }
0x2e04   :  { %v18070_v50 = vpop.f32.mrb[59].mxu0 }
0x2e07   :  { %v7060_v7 = vpop.f32.mrb[78].mxu1 }
0x2e08   :  { %v7510_v40 = vrot.slane %v7060_v7, 7  ;;  %v18075_v18 = vpop.f32.mrb[79].mxu1 }
0x2e0a   :  { %v7511_v0 = vsel %vm3932_vm12, %v7510_v40, %v6987_v38 }
0x2e0b   :  { %v7133_v19 = vpop.f32.mrb[60].mxu0 }
0x2e0c   :  { %v7512_v43 = vrot.slane %v7133_v19, 6  ;;  %v18080_v4 = vpop.f32.mrb[61].mxu0 }
0x2e0e   :  { %v7513_v29 = vsel %vm3935_vm13, %v7512_v43, %v7511_v0  ;;  %v21329_v0 = vld [vmem:[%s22350_s11] ss:$0 sm:$0xff] }
0x2e0f   :  { %v7279_v42 = vpop.f32.mrb[62].mxu0 }
0x2e10   :  { %v7206_v36 = vpop.f32.mrb[80].mxu1  ;;  %v7516_v35 = vrot.slane %v7279_v42, 4  ;;  %v18090_v63 = vpop.f32.mrb[63].mxu0 }
0x2e11   :  { %v7514_v62 = vrot.slane %v7206_v36, 5  ;;  %v18085_v21 = vpop.f32.mrb[81].mxu1 }
0x2e13   :  { %v7515_v16 = vsel %vm3938_vm14, %v7514_v62, %v7513_v29  ;;  %v7425_v17 = vpop.f32.mrb[64].mxu0 }
0x2e14   :  { %v7517_v27 = vsel %vm3941_vm15, %v7516_v35, %v7515_v16  ;;  %v7352_v8 = vpop.f32.mrb[82].mxu1  ;;  %v7520_v2 = vrot.slane %v7425_v17, 2  ;;  %v18100_v34 = vpop.f32.mrb[65].mxu0 }
0x2e15   :  { %v7518_v58 = vrot.slane %v7352_v8, 3  ;;  %v18095_v31 = vpop.f32.mrb[83].mxu1  ;;  %v16728_v34 = vld [vmem:[%s22341_s2 + $0x10] sm:$0xff] }
0x2e17   :  { %v7519_v22 = vsel %vm3944_vm2, %v7518_v58, %v7517_v27 }
0x2e18   :  { %v7521_v23 = vsel %vm3947_vm3, %v7520_v2, %v7519_v22  ;;  %v7498_v61 = vpop.f32.mrb[84].mxu1  ;;  %v7769_v2 = vstv %s7768_s17 }
0x2e19   :  { %v7522_v49 = vrot.slane %v7498_v61, 1  ;;  %v18105_v6 = vpop.f32.mrb[85].mxu1  ;;  %vm7770_vm6 = vcmp.eq.s32.totalorder %v7769_v2, 1 }
0x2e1b   :  { %v7523_v15 = vsel %vm3950_vm4, %v7522_v49, %v7521_v23 }
0x2e1c   :  { %18115 = vmatmul.mubr.msk.f32.vlgmr.msra.gmra.mrb[66].mxu0 %vm57_vm1, %v7523_v15 }
0x2e1d   :  { %19141 = vmatpush3.bf16.msra.mxu0 %v20823_v60  ;;  %18160 = vmatprep.mubr.msk.f32.mxu0 %vm19794_vm0, %v19795_v11 }
0x2e1e   :  { %19142 = vmatprep.subr.bf16.mxu0 %v19793_v3 }
0x2e20   :  { %v7666_v59 = vpop.f32.mrb[86].mxu1 }
0x2e21   :  { %v18127_v52 = vpop.f32.mrb[87].mxu1  ;;  %19144 = vmatpush3.bf16.msra.mxu0 %v20856_v48 }
0x2e22   :  { %19145 = vmatprep.subr.bf16.mxu0 %v19793_v3 }
0x2e25   :  { %19147 = vmatpush3.bf16.msra.mxu0 %v20862_v41 }
0x2e26   :  { %19148 = vmatprep.subr.bf16.mxu0 %v19793_v3 }
0x2e28   :  { %v7838_v38 = vpop.f32.mrb[88].mxu1 }
0x2e29   :  { %v18173_v50 = vpop.f32.mrb[89].mxu1  ;;  %19150 = vmatpush3.bf16.msra.mxu0 %v20872_v44 }
0x2e2a   :  { %19151 = vmatprep.subr.bf16.mxu0 %v19793_v3 }
0x2e2d   :  { %19153 = vmatpush3.bf16.msra.mxu0 %v20882_v33 }
0x2e2e   :  { %19154 = vmatprep.subr.bf16.mxu0 %v19793_v3 }
0x2e31   :  { %19156 = vmatpush3.bf16.msra.mxu0 %v20892_v26 }
0x2e32   :  { %19157 = vmatprep.subr.bf16.mxu0 %v19793_v3 }
0x2e35   :  { %19159 = vmatpush3.bf16.msra.mxu0 %v20902_v53 }
0x2e36   :  { %19160 = vmatprep.subr.bf16.mxu0 %v19793_v3 }
0x2e39   :  { %19162 = vmatpush3.bf16.msra.mxu0 %v20912_v57 }
0x2e3a   :  { %18205 = vmatprep.subr.mxu0 %v19795_v11 }
0x2eef   :  { %v7592_v7 = vpop.f32.mrb[66].mxu0 }
0x2ef0   :  { %v7667_v40 = vadd.f32 %v7666_v59, %v7592_v7  ;;  %v18116_v18 = vpop.f32.mrb[67].mxu0 }
0x2ef2   :  { %v7670_v19 = vadd.f32 %v21329_v0, %v7667_v40 }
0x2ef4   :  { %16724 = vst [vmem:[%s22351_s12 + $0x10] sm:$0xff] %v7670_v19  ;;  %7673 = vmax.xlane.f32.xlu1 %v7670_v19 }
0x2f81   :  { %v7674_v43 = vpop.xlane.xlu1 %7673 }
0x2f82   :  { %vm7675_vm8 = vcmp.eq.f32.partialorder %v7670_v19, %v7674_v43 }
0x2f83   :  { %v7676_v4 = vsel %vm7675_vm8, %v20844_v55, 128 }
0x2f84   :  { %v7678_v29 = vshra.s32 %v7676_v4, 16  ;;  %v7677_v36 = vand.u32 65535, %v7676_v4 }
0x2f86   :  { %v7680_v42 = vcvt.s32.f32 %v7678_v29  ;;  %v7679_v63 = vcvt.s32.f32 %v7677_v36 }
0x2f88   :  { %7681 = vmin.xlane.f32.xlu1 %v7680_v42 }
0x3015   :  { %v7682_v35 = vpop.xlane.xlu1 %7681 }
0x3016   :  { %vm7683_vm9 = vcmp.eq.f32.partialorder %v7680_v42, %v7682_v35  ;;  %v7688_v21 = vcvt.f32.s32 %v7682_v35 }
0x3017   :  { %v7684_v62 = vsel %vm7683_vm9, %v7679_v63, inf }
0x3018   :  { %7685 = vmin.xlane.f32.xlu1 %v7684_v62  ;;  %v7689_v17 = vshll.u32 %v7688_v21, 16 }
0x30a5   :  { %v7686_v16 = vpop.xlane.xlu1 %7685 }
0x30a6   :  { %v7687_v27 = vcvt.f32.s32 %v7686_v16 }
0x30a8   :  { %v7690_v8 = vadd.s32 %v7689_v17, %v7687_v27 }
0x30aa   :  { %vm7691_vm5 = vcmp.eq.s32.totalorder %v20844_v55, %v7690_v8 }
0x30ab   :  { %18161 = vmatmul.mubr.msk.f32.vlgmr.msra.gmra.mrb[68].mxu0 %vm7691_vm5, %v19799_v25 }
0x30ac   :  { %18206 = vmatpush3.xpose.msk.msra.mxu0 %vm57_vm1, %v20648_v56  ;;  %18207 = vmatprep.mubr.msk.f32.mxu0 %vm19794_vm0, %v19795_v11 }
0x30ad   :  { %18215 = vmatprep.subr.mxu0 %v19795_v11 }
0x317e   :  { %v7760_v58 = vpop.f32.mrb[68].mxu0 }
0x317f   :  { %v7771_v31 = vsel %vm7770_vm6, %v16728_v34, %v7760_v58  ;;  %v18162_v22 = vpop.f32.mrb[69].mxu0 }
0x3180   :  { %18183 = vmatmul.mubr.msk.f32.vlgmr.msra.gmra.mrb[90].mxu1 %vm57_vm1, %v7771_v31 }
0x3181   :  { %18186 = vmatpush3.xpose.msk.msra.mxu1 %vm57_vm1, %v20602_v24  ;;  %18187 = vmatprep.mubr.msk.f32.mxu1 %vm19794_vm0, %v19795_v11 }
0x3182   :  { %18190 = vmatprep.subr.mxu1 %v19795_v11 }
0x3253   :  { %v7911_v23 = vpop.f32.mrb[90].mxu1 }
0x3254   :  { %v7912_v61 = vadd.f32 %v7911_v23, %v7838_v38  ;;  %v18184_v49 = vpop.f32.mrb[91].mxu1 }
0x3256   :  { %v7915_v6 = vadd.f32 %v21141_v10, %v7912_v61 }
0x3258   :  { %19571 = vtanh.f32 %v7915_v6  ;;  %v16731_v59 = vmul.f32 -1.442695, %v7915_v6 }
0x325a   :  { %19573 = vpow2.f32 %v16731_v59 }
0x3262   :  { %v19572_v15 = vpop.eup %19571 }
0x3263   :  { %7925 = vrot.lane.b32.xlu1 %v19572_v15, %s19796_s25 }
0x3264   :  { %v19574_v52 = vpop.eup %19573 }
0x3265   :  { %v7919_v50 = vadd.f32 1.0, %v19574_v52 }
0x3267   :  { %19575 = vrcp.f32 %v7919_v50 }
0x3271   :  { %v19576_v7 = vpop.eup %19575 }
0x3272   :  { %v7923_v19 = vmul.f32 %v19576_v7, %v21147_v47 }
0x32d5   :  { %v7926_v40 = vpop.permute.xlu1 %7925 }
0x32d6   :  { %v7928_v18 = vmul.f32 %v19576_v7, %v7926_v40 }
0x32d8   :  { %7930 = vrot.lane.b32.xlu0 %v7928_v18, %s19797_s26 }
0x334a   :  { %v7931_v38 = vpop.permute.xlu0 %7930 }
0x334b   :  { %v21356_v43 = vadd.f32 %v7931_v38, %v7923_v19 }
0x334d   :  { %19577 = vtanh.f32 %v21356_v43 }
0x3357   :  { %v19578_v10 = vpop.eup %19577 }
0x3358   :  { %7936 = vrot.lane.b32.xlu0 %v19578_v10, %s19796_s25 }
0x33ca   :  { %v7937_v4 = vpop.permute.xlu0 %7936 }
0x33cb   :  { %v21360_v29 = vmul.f32 %v19576_v7, %v7937_v4 }
0x33cd   :  { %v7941_v42 = vcombine.high %v21360_v29, %v21360_v29  ;;  %v7948_v36 = vrot.slane %v21360_v29, %v19957_v39 }
0x33cf   :  { %v7955_v35 = vrot.slane %v7941_v42, %v19957_v39  ;;  %v7956_v47 = vcombine.high %v7948_v36, %v7948_v36  ;;  %v7964_v63 = vrot.slane %v7948_v36, %v19957_v39 }
0x33d1   :  { %v7993_v62 = vrot.slane %v7964_v63, %v19963_v46  ;;  %v7978_v21 = vrot.slane %v7956_v47, %v19957_v39  ;;  %v7986_v16 = vcombine.high %v7964_v63, %v7964_v63  ;;  %v7957_v17 = vcombine.high %v7955_v35, %v7955_v35 }
0x33d2   :  { %v7971_v34 = vrot.slane %v7955_v35, %v19957_v39 }
0x33d3   :  { %7994 = vrot.lane.b32.xlu0 %v7993_v62, %s19797_s26  ;;  %v8071_v27 = vrot.slane %v7978_v21, %v19963_v46  ;;  %v7988_v8 = vcombine.high %v7978_v21, %v7978_v21  ;;  %v8149_v2 = vrot.slane %v7986_v16, %v19963_v46  ;;  %v7985_v31 = vrot.slane %v7957_v17, %v19957_v39 }
0x33d4   :  { %v8305_v22 = vrot.slane %v7971_v34, %v19963_v46  ;;  %v7987_v23 = vcombine.high %v7971_v34, %v7971_v34 }
0x33d5   :  { %8072 = vrot.lane.b32.xlu1 %v8071_v27, %s19797_s26  ;;  %v8227_v58 = vrot.slane %v7988_v8, %v19963_v46  ;;  %v8383_v61 = vrot.slane %v7985_v31, %v19963_v46  ;;  %v7989_v49 = vcombine.high %v7985_v31, %v7985_v31 }
0x33d6   :  { %v8461_v6 = vrot.slane %v7987_v23, %v19963_v46 }
0x33d7   :  { %8150 = vrot.lane.b32.xlu0 %v8149_v2, %s19797_s26  ;;  %v8539_v15 = vrot.slane %v7989_v49, %v19963_v46 }
0x33d9   :  { %8228 = vrot.lane.b32.xlu1 %v8227_v58, %s19797_s26 }
0x33db   :  { %8306 = vrot.lane.b32.xlu0 %v8305_v22, %s19797_s26 }
0x33dd   :  { %8384 = vrot.lane.b32.xlu1 %v8383_v61, %s19797_s26 }
0x33df   :  { %8462 = vrot.lane.b32.xlu0 %v8461_v6, %s19797_s26 }
0x33e1   :  { %8540 = vrot.lane.b32.xlu1 %v8539_v15, %s19797_s26 }
0x3445   :  { %v7995_v59 = vpop.permute.xlu0 %7994 }
0x3446   :  { %18188 = vmatmul.mubr.msk.f32.vlgmr.msra.gmra.mrb[92].mxu1 %vm57_vm1, %v7995_v59 }
0x3447   :  { %18191 = vmatpush3.xpose.msk.msra.mxu1 %vm57_vm1, %v20618_v32  ;;  %v8073_v52 = vpop.permute.xlu1 %8072  ;;  %18192 = vmatprep.mubr.msk.f32.mxu1 %vm19794_vm0, %v19795_v11 }
0x3448   :  { %18195 = vmatprep.subr.mxu1 %v19795_v11 }
0x3449   :  { %v8151_v50 = vpop.permute.xlu0 %8150 }
0x344a   :  { %18193 = vmatmul.mubr.msk.f32.vlgmr.msra.gmra.mrb[94].mxu1 %vm57_vm1, %v8073_v52 }
0x344b   :  { %18196 = vmatpush3.xpose.msk.msra.mxu1 %vm57_vm1, %v20644_v45  ;;  %18197 = vmatprep.mubr.msk.f32.mxu1 %vm19794_vm0, %v19795_v11  ;;  %v8229_v7 = vpop.permute.xlu1 %8228 }
0x344c   :  { %18200 = vmatprep.subr.mxu1 %v19795_v11 }
0x344d   :  { %v8307_v40 = vpop.permute.xlu0 %8306 }
0x344e   :  { %18198 = vmatmul.mubr.msk.f32.vlgmr.msra.gmra.mrb[96].mxu1 %vm57_vm1, %v8151_v50  ;;  %18208 = vmatmul.mubr.msk.f32.vlgmr.msra.gmra.mrb[70].mxu0 %vm57_vm1, %v8307_v40 }
0x344f   :  { %18201 = vmatpush3.xpose.msk.msra.mxu1 %vm57_vm1, %v20646_v54  ;;  %18216 = vmatpush3.xpose.msk.msra.mxu0 %vm57_vm1, %v20652_v30  ;;  %v8385_v19 = vpop.permute.xlu1 %8384 }
0x3450   :  { %18202 = vmatprep.mubr.msk.f32.mxu1 %vm19794_vm0, %v19795_v11  ;;  %18210 = vmatprep.subr.mxu1 %v19795_v11 }
0x3451   :  { %18217 = vmatprep.mubr.msk.f32.mxu0 %vm19794_vm0, %v19795_v11  ;;  %18225 = vmatprep.subr.mxu0 %v19795_v11  ;;  %v8463_v18 = vpop.permute.xlu0 %8462 }
0x3452   :  { %18203 = vmatmul.mubr.msk.f32.vlgmr.msra.gmra.mrb[98].mxu1 %vm57_vm1, %v8229_v7  ;;  %18218 = vmatmul.mubr.msk.f32.vlgmr.msra.gmra.mrb[72].mxu0 %vm57_vm1, %v8463_v18 }
0x3453   :  { %18211 = vmatpush3.xpose.msk.msra.mxu1 %vm57_vm1, %v20650_v20  ;;  %18226 = vmatpush3.msra.mxu0 %v20602_v24  ;;  %v8541_v38 = vpop.permute.xlu1 %8540 }
0x3454   :  { %18212 = vmatprep.mubr.msk.f32.mxu1 %vm19794_vm0, %v19795_v11  ;;  %18220 = vmatprep.subr.mxu1 %v19795_v11 }
0x3455   :  { %18227 = vmatprep.mubr.msk.f32.mxu0 %vm19794_vm0, %v19795_v11  ;;  %18235 = vmatprep.subr.mxu0 %v19795_v11 }
0x3456   :  { %18213 = vmatmul.mubr.msk.f32.vlgmr.msra.gmra.mrb[100].mxu1 %vm57_vm1, %v8385_v19 }
0x3457   :  { %18221 = vmatpush3.xpose.msk.msra.mxu1 %vm57_vm1, %v20654_v12  ;;  %18222 = vmatprep.mubr.msk.f32.mxu1 %vm19794_vm0, %v19795_v11 }
0x3458   :  { %18230 = vmatprep.subr.mxu1 %v19795_v11 }
0x345a   :  { %18223 = vmatmul.mubr.msk.f32.vlgmr.msra.gmra.mrb[102].mxu1 %vm57_vm1, %v8541_v38 }
0x345b   :  { %18231 = vmatpush3.msra.mxu1 %v20618_v32  ;;  %18232 = vmatprep.mubr.msk.f32.mxu1 %vm19794_vm0, %v19795_v11 }
0x345c   :  { %18240 = vmatprep.subr.mxu1 %v19795_v11 }
0x3519   :  { %v8064_v10 = vpop.f32.mrb[92].mxu1 }
0x351a   :  { %v18189_v4 = vpop.f32.mrb[93].mxu1  ;;  %v8614_v42 = vsel %vm3241_vm10, %v8064_v10, -inf }
0x351b   :  { %8615 = vmax.xlane.f32.xlu0 %v8614_v42 }
0x351d   :  { %v8142_v36 = vpop.f32.mrb[94].mxu1 }
0x351e   :  { %v18194_v35 = vpop.f32.mrb[95].mxu1  ;;  %v8617_v47 = vsel %vm3241_vm10, %v8142_v36, -inf }
0x351f   :  { %8618 = vmax.xlane.f32.xlu1 %v8617_v47 }
0x3521   :  { %v8220_v63 = vpop.f32.mrb[96].mxu1  ;;  %v8376_v62 = vpop.f32.mrb[70].mxu0 }
0x3522   :  { %v18199_v21 = vpop.f32.mrb[97].mxu1  ;;  %v18209_v16 = vpop.f32.mrb[71].mxu0  ;;  %v8626_v17 = vsel %vm3241_vm10, %v8376_v62, -inf  ;;  %v8620_v27 = vsel %vm3241_vm10, %v8220_v63, -inf }
0x3523   :  { %8627 = vmax.xlane.f32.xlu1 %v8626_v17  ;;  %8621 = vmax.xlane.f32.xlu0 %v8620_v27 }
0x3525   :  { %v8298_v8 = vpop.f32.mrb[98].mxu1  ;;  %v8532_v2 = vpop.f32.mrb[72].mxu0 }
0x3526   :  { %v18204_v34 = vpop.f32.mrb[99].mxu1  ;;  %v18219_v58 = vpop.f32.mrb[73].mxu0  ;;  %v8632_v31 = vsel %vm3241_vm10, %v8532_v2, -inf  ;;  %v8623_v22 = vsel %vm3241_vm10, %v8298_v8, -inf }
0x3527   :  { %8633 = vmax.xlane.f32.xlu1 %v8632_v31  ;;  %8624 = vmax.xlane.f32.xlu0 %v8623_v22 }
0x3529   :  { %v8454_v23 = vpop.f32.mrb[100].mxu1 }
0x352a   :  { %v18214_v61 = vpop.f32.mrb[101].mxu1  ;;  %v8629_v49 = vsel %vm3241_vm10, %v8454_v23, -inf }
0x352b   :  { %8630 = vmax.xlane.f32.xlu0 %v8629_v49 }
0x352d   :  { %v8610_v6 = vpop.f32.mrb[102].mxu1 }
0x352e   :  { %v18224_v15 = vpop.f32.mrb[103].mxu1  ;;  %v8635_v59 = vsel %vm3241_vm10, %v8610_v6, -inf }
0x352f   :  { %8636 = vmax.xlane.f32.xlu0 %v8635_v59 }
0x35a8   :  { %v8616_v52 = vpop.xlane.xlu0 %8615 }
0x35a9   :  { %v8638_v50 = vsub.f32 %v8064_v10, %v8616_v52 }
0x35ab   :  { %v8646_v7 = vmul.f32 1.442695, %v8638_v50 }
0x35ac   :  { %v8619_v40 = vpop.xlane.xlu1 %8618 }
0x35ad   :  { %19579 = vpow2.f32 %v8646_v7  ;;  %v8639_v18 = vsub.f32 %v8142_v36, %v8619_v40 }
0x35af   :  { %v8648_v19 = vmul.f32 1.442695, %v8639_v18 }
0x35b0   :  { %v8628_v38 = vpop.xlane.xlu1 %8627  ;;  %v8622_v4 = vpop.xlane.xlu0 %8621 }
0x35b1   :  { %19581 = vpow2.f32 %v8648_v19  ;;  %v8642_v42 = vsub.f32 %v8376_v62, %v8628_v38  ;;  %v8640_v35 = vsub.f32 %v8220_v63, %v8622_v4 }
0x35b3   :  { %v8650_v47 = vmul.f32 1.442695, %v8640_v35  ;;  %v8654_v21 = vmul.f32 1.442695, %v8642_v42 }
0x35b4   :  { %v8634_v16 = vpop.xlane.xlu1 %8633  ;;  %v8625_v17 = vpop.xlane.xlu0 %8624 }
0x35b5   :  { %v8644_v27 = vsub.f32 %v8532_v2, %v8634_v16  ;;  %v8641_v34 = vsub.f32 %v8298_v8, %v8625_v17  ;;  %19583 = vpow2.f32 %v8650_v47 }
0x35b6   :  { %19585 = vpow2.f32 %v8654_v21 }
0x35b7   :  { %v19580_v58 = vpop.eup %19579  ;;  %v8652_v31 = vmul.f32 1.442695, %v8641_v34  ;;  %v8658_v10 = vmul.f32 1.442695, %v8644_v27 }
0x35b8   :  { %v8631_v22 = vpop.xlane.xlu0 %8630  ;;  %v8662_v36 = vsel %vm3241_vm10, %v19580_v58, 0.0 }
0x35b9   :  { %v8643_v61 = vsub.f32 %v8454_v23, %v8631_v22  ;;  %8663 = vadd.xlane.f32.xlu1 %v8662_v36  ;;  %19587 = vpow2.f32 %v8652_v31 }
0x35ba   :  { %19589 = vpow2.f32 %v8658_v10 }
0x35bb   :  { %v19582_v49 = vpop.eup %19581  ;;  %v8656_v62 = vmul.f32 1.442695, %v8643_v61 }
0x35bc   :  { %v8637_v63 = vpop.xlane.xlu0 %8636  ;;  %v8665_v15 = vsel %vm3241_vm10, %v19582_v49, 0.0 }
0x35bd   :  { %19591 = vpow2.f32 %v8656_v62  ;;  %v8645_v2 = vsub.f32 %v8610_v6, %v8637_v63  ;;  %8666 = vadd.xlane.f32.xlu0 %v8665_v15 }
0x35bf   :  { %v8660_v8 = vmul.f32 1.442695, %v8645_v2  ;;  %v19584_v59 = vpop.eup %19583 }
0x35c0   :  { %v8668_v52 = vsel %vm3241_vm10, %v19584_v59, 0.0  ;;  %v19586_v50 = vpop.eup %19585 }
0x35c1   :  { %19593 = vpow2.f32 %v8660_v8  ;;  %8669 = vadd.xlane.f32.xlu1 %v8668_v52  ;;  %v8674_v23 = vsel %vm3241_vm10, %v19586_v50, 0.0 }
0x35c3   :  { %v19588_v7 = vpop.eup %19587 }
0x35c4   :  { %v8671_v40 = vsel %vm3241_vm10, %v19588_v7, 0.0  ;;  %v19590_v18 = vpop.eup %19589 }
0x35c5   :  { %8675 = vadd.xlane.f32.xlu1 %v8674_v23  ;;  %8672 = vadd.xlane.f32.xlu0 %v8671_v40  ;;  %v8680_v6 = vsel %vm3241_vm10, %v19590_v18, 0.0 }
0x35c7   :  { %v19592_v19 = vpop.eup %19591 }
0x35c8   :  { %v8677_v38 = vsel %vm3241_vm10, %v19592_v19, 0.0 }
0x35c9   :  { %8681 = vadd.xlane.f32.xlu1 %v8680_v6  ;;  %8678 = vadd.xlane.f32.xlu0 %v8677_v38 }
0x35cb   :  { %v19594_v4 = vpop.eup %19593 }
0x35cc   :  { %v8683_v42 = vsel %vm3241_vm10, %v19594_v4, 0.0 }
0x35cd   :  { %8684 = vadd.xlane.f32.xlu0 %v8683_v42 }
0x35da   :  { %9380 = vrot.lane.b32.xlu1 %v21360_v29, %s19797_s26 }
0x3646   :  { %v8664_v35 = vpop.xlane.xlu1 %8663 }
0x3647   :  { %19595 = vrcp.f32 %v8664_v35 }
0x364a   :  { %v8667_v47 = vpop.xlane.xlu0 %8666 }
0x364b   :  { %19597 = vrcp.f32 %v8667_v47 }
0x364e   :  { %v8670_v21 = vpop.xlane.xlu1 %8669 }
0x364f   :  { %19599 = vrcp.f32 %v8670_v21 }
0x3651   :  { %v19596_v16 = vpop.eup %19595 }
0x3652   :  { %v8687_v17 = vmul.f32 %v19596_v16, %v19580_v58  ;;  %v8676_v27 = vpop.xlane.xlu1 %8675  ;;  %v8673_v34 = vpop.xlane.xlu0 %8672 }
0x3653   :  { %19601 = vrcp.f32 %v8676_v27 }
0x3654   :  { %18228 = vmatmul.mubr.msk.f32.vlgmr.msra.gmra.mrb[74].mxu0 %vm3331_vm11, %v8687_v17  ;;  %19603 = vrcp.f32 %v8673_v34 }
0x3655   :  { %v19598_v31 = vpop.eup %19597  ;;  %18236 = vmatpush3.msra.mxu0 %v20644_v45  ;;  %18237 = vmatprep.mubr.msk.f32.mxu0 %vm19794_vm0, %v19795_v11 }
0x3656   :  { %v8689_v29 = vmul.f32 %v19598_v31, %v19582_v49  ;;  %18245 = vmatprep.subr.mxu0 %v19795_v11  ;;  %v8682_v10 = vpop.xlane.xlu1 %8681  ;;  %v8679_v22 = vpop.xlane.xlu0 %8678 }
0x3657   :  { %19605 = vrcp.f32 %v8682_v10 }
0x3658   :  { %18233 = vmatmul.mubr.msk.f32.vlgmr.msra.gmra.mrb[104].mxu1 %vm3331_vm11, %v8689_v29  ;;  %19607 = vrcp.f32 %v8679_v22 }
0x3659   :  { %18241 = vmatpush3.msra.mxu1 %v20646_v54  ;;  %18242 = vmatprep.mubr.msk.f32.mxu1 %vm19794_vm0, %v19795_v11  ;;  %v19600_v58 = vpop.eup %19599 }
0x365a   :  { %18250 = vmatprep.subr.mxu1 %v19795_v11  ;;  %v8685_v36 = vpop.xlane.xlu0 %8684  ;;  %v8691_v61 = vmul.f32 %v19600_v58, %v19584_v59  ;;  %v9381_v23 = vpop.permute.xlu1 %9380 }
0x365b   :  { %19609 = vrcp.f32 %v8685_v36 }
0x365c   :  { %18238 = vmatmul.mubr.msk.f32.vlgmr.msra.gmra.mrb[76].mxu0 %vm3331_vm11, %v8691_v61 }
0x365d   :  { %v19602_v49 = vpop.eup %19601  ;;  %18246 = vmatpush3.msra.mxu0 %v20648_v56  ;;  %18247 = vmatprep.mubr.msk.f32.mxu0 %vm19794_vm0, %v19795_v11 }
0x365e   :  { %v19604_v62 = vpop.eup %19603  ;;  %18255 = vmatprep.subr.mxu0 %v19795_v11  ;;  %v8695_v63 = vmul.f32 %v19602_v49, %v19586_v50 }
0x365f   :  { %v8693_v15 = vmul.f32 %v19604_v62, %v19588_v7 }
0x3660   :  { %18248 = vmatmul.mubr.msk.f32.vlgmr.msra.gmra.mrb[78].mxu0 %vm3331_vm11, %v8695_v63 }
0x3661   :  { %v19606_v2 = vpop.eup %19605  ;;  %18243 = vmatmul.mubr.msk.f32.vlgmr.msra.gmra.mrb[106].mxu1 %vm3331_vm11, %v8693_v15  ;;  %18256 = vmatpush3.msra.mxu0 %v20652_v30 }
0x3662   :  { %v19608_v8 = vpop.eup %19607  ;;  %18251 = vmatpush3.msra.mxu1 %v20650_v20  ;;  %18252 = vmatprep.mubr.msk.f32.mxu1 %vm19794_vm0, %v19795_v11  ;;  %v8699_v59 = vmul.f32 %v19606_v2, %v19590_v18 }
0x3663   :  { %18257 = vmatprep.mubr.msk.f32.mxu0 %vm19794_vm0, %v19795_v11  ;;  %18260 = vmatprep.subr.mxu1 %v19795_v11  ;;  %v8697_v52 = vmul.f32 %v19608_v8, %v19592_v19 }
0x3664   :  { %18258 = vmatmul.mubr.msk.f32.vlgmr.msra.gmra.mrb[80].mxu0 %vm3331_vm11, %v8699_v59  ;;  %19175 = vmatprep.subr.bf16.mxu0 %v19793_v3 }
0x3665   :  { %v19610_v50 = vpop.eup %19609  ;;  %18253 = vmatmul.mubr.msk.f32.vlgmr.msra.gmra.mrb[108].mxu1 %vm3331_vm11, %v8697_v52  ;;  %19177 = vmatpush3.bf16.msra.mxu0 %v20800_v28 }
0x3666   :  { %18261 = vmatpush3.msra.mxu1 %v20654_v12  ;;  %18262 = vmatprep.mubr.msk.f32.mxu1 %vm19794_vm0, %v19795_v11  ;;  %v8701_v7 = vmul.f32 %v19610_v50, %v19594_v4 }
0x3667   :  { %19181 = vmatprep.subr.bf16.mxu1 %v19793_v3  ;;  %19178 = vmatprep.subr.bf16.mxu0 %v19793_v3 }
0x3668   :  { %18273 = vmatprep.mubr.msk.f32.mxu0 %vm19794_vm0, %v19795_v11 }
0x3669   :  { %18263 = vmatmul.mubr.msk.f32.vlgmr.msra.gmra.mrb[110].mxu1 %vm3331_vm11, %v8701_v7  ;;  %19180 = vmatpush3.bf16.msra.mxu0 %v20810_v51 }
0x366a   :  { %19183 = vmatpush3.bf16.msra.mxu1 %v20755_v37  ;;  %18284 = vmatprep.mubr.msk.f32.mxu1 %vm19794_vm0, %v19795_v11 }
0x366b   :  { %19184 = vmatprep.subr.bf16.mxu1 %v19793_v3  ;;  %19187 = vmatprep.subr.bf16.mxu0 %v19793_v3 }
0x366e   :  { %19186 = vmatpush3.bf16.msra.mxu1 %v20773_v9 }
0x366f   :  { %19211 = vmatprep.subr.bf16.mxu1 %v19793_v3 }
0x3671   :  { %18285 = vmatmul.mubr.msk.f32.vlgmr.msra.gmra.mrb[112].mxu1 %vm57_vm1, %v9381_v23 }
0x3672   :  { %19213 = vmatpush3.bf16.msra.mxu1 %v20512_v5  ;;  %18330 = vmatprep.mubr.msk.f32.mxu1 %vm19794_vm0, %v19795_v11 }
0x3673   :  { %19214 = vmatprep.subr.bf16.mxu1 %v19793_v3 }
0x3676   :  { %19216 = vmatpush3.bf16.msra.mxu1 %v20530_v14 }
0x3677   :  { %19217 = vmatprep.subr.bf16.mxu1 %v19793_v3 }
0x3679   :  { %18331 = vmatmul.mubr.msk.f32.vlgmr.msra.gmra.mrb[114].mxu1 %vm57_vm1, %v9381_v23 }
0x367a   :  { %19219 = vmatpush3.bf16.msra.mxu1 %v20501_v1  ;;  %18341 = vmatprep.mubr.msk.f32.mxu1 %vm19794_vm0, %v19795_v11 }
0x367b   :  { %19220 = vmatprep.subr.bf16.mxu1 %v19793_v3 }
0x367e   :  { %19222 = vmatpush3.bf16.msra.mxu1 %v20521_v13 }
0x367f   :  { %18344 = vmatprep.subr.mxu1 %v19795_v11 }
0x3727   :  { %v8771_v40 = vpop.f32.mrb[74].mxu0 }
0x3728   :  { %v18229_v18 = vpop.f32.mrb[75].mxu0 }
0x372b   :  { %v8844_v19 = vpop.f32.mrb[104].mxu1 }
0x372c   :  { %v9294_v38 = vrot.slane %v8844_v19, 7  ;;  %v18234_v6 = vpop.f32.mrb[105].mxu1 }
0x372e   :  { %v9295_v4 = vsel %vm3932_vm12, %v9294_v38, %v8771_v40 }
0x372f   :  { %v8917_v42 = vpop.f32.mrb[76].mxu0 }
0x3730   :  { %v9296_v35 = vrot.slane %v8917_v42, 6  ;;  %v18239_v47 = vpop.f32.mrb[77].mxu0 }
0x3732   :  { %v9297_v21 = vsel %vm3935_vm13, %v9296_v35, %v9295_v4 }
0x3733   :  { %v9063_v16 = vpop.f32.mrb[78].mxu0 }
0x3734   :  { %v8990_v17 = vpop.f32.mrb[106].mxu1  ;;  %v9300_v27 = vrot.slane %v9063_v16, 4  ;;  %v18249_v34 = vpop.f32.mrb[79].mxu0 }
0x3735   :  { %v9298_v31 = vrot.slane %v8990_v17, 5  ;;  %v18244_v29 = vpop.f32.mrb[107].mxu1 }
0x3737   :  { %v9299_v10 = vsel %vm3938_vm14, %v9298_v31, %v9297_v21  ;;  %v9209_v22 = vpop.f32.mrb[80].mxu0 }
0x3738   :  { %v9301_v58 = vsel %vm3941_vm15, %v9300_v27, %v9299_v10  ;;  %v9136_v36 = vpop.f32.mrb[108].mxu1  ;;  %v9304_v61 = vrot.slane %v9209_v22, 2  ;;  %v18259_v49 = vpop.f32.mrb[81].mxu0 }
0x3739   :  { %v9302_v62 = vrot.slane %v9136_v36, 3  ;;  %v18254_v63 = vpop.f32.mrb[109].mxu1  ;;  %v16762_v36 = vld [vmem:[%s22341_s2 + $0x18] sm:$0xff] }
0x373b   :  { %v9303_v15 = vsel %vm3944_vm2, %v9302_v62, %v9301_v58  ;;  %v9553_v58 = vstv %s9552_s21 }
0x373c   :  { %v9305_v2 = vsel %vm3947_vm3, %v9304_v61, %v9303_v15  ;;  %v9282_v8 = vpop.f32.mrb[110].mxu1  ;;  %vm9554_vm5 = vcmp.eq.s32.totalorder %v9553_v58, 1 }
0x373d   :  { %v9306_v59 = vrot.slane %v9282_v8, 1  ;;  %v18264_v52 = vpop.f32.mrb[111].mxu1  ;;  %v21559_v8 = vld [vmem:[%s22348_s9] ss:$0 sm:$0xff] }
0x373f   :  { %v9307_v50 = vsel %vm3950_vm4, %v9306_v59, %v9305_v2 }
0x3740   :  { %18274 = vmatmul.mubr.msk.f32.vlgmr.msra.gmra.mrb[82].mxu0 %vm57_vm1, %v9307_v50 }
0x3741   :  { %19189 = vmatpush3.bf16.msra.mxu0 %v20823_v60  ;;  %18319 = vmatprep.mubr.msk.f32.mxu0 %vm19794_vm0, %v19795_v11 }
0x3742   :  { %19190 = vmatprep.subr.bf16.mxu0 %v19793_v3 }
0x3744   :  { %v9450_v7 = vpop.f32.mrb[112].mxu1 }
0x3745   :  { %v18286_v23 = vpop.f32.mrb[113].mxu1  ;;  %19192 = vmatpush3.bf16.msra.mxu0 %v20856_v48 }
0x3746   :  { %19193 = vmatprep.subr.bf16.mxu0 %v19793_v3 }
0x3749   :  { %19195 = vmatpush3.bf16.msra.mxu0 %v20862_v41 }
0x374a   :  { %19196 = vmatprep.subr.bf16.mxu0 %v19793_v3 }
0x374c   :  { %v9622_v40 = vpop.f32.mrb[114].mxu1 }
0x374d   :  { %v18332_v18 = vpop.f32.mrb[115].mxu1  ;;  %19198 = vmatpush3.bf16.msra.mxu0 %v20872_v44 }
0x374e   :  { %19199 = vmatprep.subr.bf16.mxu0 %v19793_v3 }
0x3751   :  { %19201 = vmatpush3.bf16.msra.mxu0 %v20882_v33 }
0x3752   :  { %19202 = vmatprep.subr.bf16.mxu0 %v19793_v3 }
0x3755   :  { %19204 = vmatpush3.bf16.msra.mxu0 %v20892_v26 }
0x3756   :  { %19205 = vmatprep.subr.bf16.mxu0 %v19793_v3 }
0x3759   :  { %19207 = vmatpush3.bf16.msra.mxu0 %v20902_v53 }
0x375a   :  { %19208 = vmatprep.subr.bf16.mxu0 %v19793_v3 }
0x375d   :  { %19210 = vmatpush3.bf16.msra.mxu0 %v20912_v57 }
0x375e   :  { %18364 = vmatprep.subr.mxu0 %v19795_v11 }
0x3813   :  { %v9376_v19 = vpop.f32.mrb[82].mxu0 }
0x3814   :  { %v9451_v38 = vadd.f32 %v9450_v7, %v9376_v19  ;;  %v18275_v6 = vpop.f32.mrb[83].mxu0 }
0x3816   :  { %v9454_v4 = vadd.f32 %v21329_v0, %v9451_v38 }
0x3818   :  { %16758 = vst [vmem:[%s22351_s12 + $0x18] sm:$0xff] %v9454_v4  ;;  %9457 = vmax.xlane.f32.xlu0 %v9454_v4 }
0x38a5   :  { %v9458_v42 = vpop.xlane.xlu0 %9457 }
0x38a6   :  { %vm9459_vm7 = vcmp.eq.f32.partialorder %v9454_v4, %v9458_v42 }
0x38a7   :  { %v9460_v35 = vsel %vm9459_vm7, %v20844_v55, 128 }
0x38a8   :  { %v9462_v47 = vshra.s32 %v9460_v35, 16  ;;  %v9461_v16 = vand.u32 65535, %v9460_v35 }
0x38aa   :  { %v9464_v21 = vcvt.s32.f32 %v9462_v47  ;;  %v9463_v27 = vcvt.s32.f32 %v9461_v16 }
0x38ac   :  { %9465 = vmin.xlane.f32.xlu0 %v9464_v21 }
0x3939   :  { %v9466_v17 = vpop.xlane.xlu0 %9465 }
0x393a   :  { %vm9467_vm8 = vcmp.eq.f32.partialorder %v9464_v21, %v9466_v17  ;;  %v9472_v31 = vcvt.f32.s32 %v9466_v17 }
0x393b   :  { %v9468_v34 = vsel %vm9467_vm8, %v9463_v27, inf }
0x393c   :  { %9469 = vmin.xlane.f32.xlu0 %v9468_v34  ;;  %v9473_v29 = vshll.u32 %v9472_v31, 16 }
0x39c9   :  { %v9470_v0 = vpop.xlane.xlu0 %9469 }
0x39ca   :  { %v9471_v10 = vcvt.f32.s32 %v9470_v0 }
0x39cc   :  { %v9474_v22 = vadd.s32 %v9473_v29, %v9471_v10 }
0x39ce   :  { %vm9475_vm9 = vcmp.eq.s32.totalorder %v20844_v55, %v9474_v22 }
0x39cf   :  { %18320 = vmatmul.mubr.msk.f32.vlgmr.msra.gmra.mrb[84].mxu0 %vm9475_vm9, %v19799_v25 }
0x39d0   :  { %18365 = vmatpush3.xpose.msk.msra.mxu0 %vm57_vm1, %v20648_v56  ;;  %18366 = vmatprep.mubr.msk.f32.mxu0 %vm19794_vm0, %v19795_v11 }
0x39d1   :  { %18374 = vmatprep.subr.mxu0 %v19795_v11 }
0x3aa2   :  { %v9544_v61 = vpop.f32.mrb[84].mxu0 }
0x3aa3   :  { %v9555_v49 = vsel %vm9554_vm5, %v16762_v36, %v9544_v61  ;;  %v18321_v62 = vpop.f32.mrb[85].mxu0 }
0x3aa4   :  { %18342 = vmatmul.mubr.msk.f32.vlgmr.msra.gmra.mrb[116].mxu1 %vm57_vm1, %v9555_v49 }
0x3aa5   :  { %18345 = vmatpush3.xpose.msk.msra.mxu1 %vm57_vm1, %v20602_v24  ;;  %18346 = vmatprep.mubr.msk.f32.mxu1 %vm19794_vm0, %v19795_v11 }
0x3aa6   :  { %18349 = vmatprep.subr.mxu1 %v19795_v11 }
0x3b77   :  { %v9695_v63 = vpop.f32.mrb[116].mxu1 }
0x3b78   :  { %v9696_v15 = vadd.f32 %v9695_v63, %v9622_v40  ;;  %v18343_v2 = vpop.f32.mrb[117].mxu1 }
0x3b7a   :  { %v9699_v59 = vadd.f32 %v21559_v8, %v9696_v15 }
0x3b7c   :  { %19611 = vtanh.f32 %v9699_v59  ;;  %v16765_v50 = vmul.f32 -1.442695, %v9699_v59 }
0x3b7e   :  { %19613 = vpow2.f32 %v16765_v50 }
0x3b86   :  { %v19612_v52 = vpop.eup %19611 }
0x3b87   :  { %9709 = vrot.lane.b32.xlu0 %v19612_v52, %s19796_s25 }
0x3b88   :  { %v19614_v7 = vpop.eup %19613 }
0x3b89   :  { %v9703_v23 = vadd.f32 1.0, %v19614_v7 }
0x3b8b   :  { %19615 = vrcp.f32 %v9703_v23 }
0x3b95   :  { %v19616_v18 = vpop.eup %19615 }
0x3b96   :  { %v9707_v38 = vmul.f32 %v19616_v18, %v21356_v43 }
0x3bf9   :  { %v9710_v19 = vpop.permute.xlu0 %9709 }
0x3bfa   :  { %v9712_v40 = vmul.f32 %v19616_v18, %v9710_v19 }
0x3bfc   :  { %9714 = vrot.lane.b32.xlu1 %v9712_v40, %s19797_s26 }
0x3c6e   :  { %v9715_v6 = vpop.permute.xlu1 %9714 }
0x3c6f   :  { %v21565_v4 = vadd.f32 %v9715_v6, %v9707_v38 }
0x3c71   :  { %19617 = vtanh.f32 %v21565_v4 }
0x3c7b   :  { %v19618_v42 = vpop.eup %19617 }
0x3c7c   :  { %9720 = vrot.lane.b32.xlu1 %v19618_v42, %s19796_s25 }
0x3cee   :  { %v9721_v35 = vpop.permute.xlu1 %9720 }
0x3cef   :  { %v21569_v47 = vmul.f32 %v19616_v18, %v9721_v35 }
0x3cf1   :  { %v9725_v21 = vcombine.high %v21569_v47, %v21569_v47  ;;  %v9732_v16 = vrot.slane %v21569_v47, %v19957_v39 }
0x3cf3   :  { %v9739_v17 = vrot.slane %v9725_v21, %v19957_v39  ;;  %v9740_v43 = vcombine.high %v9732_v16, %v9732_v16  ;;  %v9748_v27 = vrot.slane %v9732_v16, %v19957_v39 }
0x3cf5   :  { %v9741_v34 = vcombine.high %v9739_v17, %v9739_v17  ;;  %v9777_v31 = vrot.slane %v9748_v27, %v19963_v46  ;;  %v9762_v0 = vrot.slane %v9740_v43, %v19957_v39  ;;  %v9770_v58 = vcombine.high %v9748_v27, %v9748_v27 }
0x3cf6   :  { %v9755_v62 = vrot.slane %v9739_v17, %v19957_v39 }
0x3cf7   :  { %9778 = vrot.lane.b32.xlu1 %v9777_v31, %s19797_s26  ;;  %v9772_v29 = vcombine.high %v9762_v0, %v9762_v0  ;;  %v9855_v10 = vrot.slane %v9762_v0, %v19963_v46  ;;  %v9769_v36 = vrot.slane %v9741_v34, %v19957_v39  ;;  %v9933_v61 = vrot.slane %v9770_v58, %v19963_v46 }
0x3cf8   :  { %v10089_v15 = vrot.slane %v9755_v62, %v19963_v46  ;;  %v9771_v59 = vcombine.high %v9755_v62, %v9755_v62 }
0x3cf9   :  { %v10011_v22 = vrot.slane %v9772_v29, %v19963_v46  ;;  %v10167_v49 = vrot.slane %v9769_v36, %v19963_v46  ;;  %v9773_v63 = vcombine.high %v9769_v36, %v9769_v36 }
0x3cfa   :  { %v10245_v52 = vrot.slane %v9771_v59, %v19963_v46 }
0x3cfb   :  { %9856 = vrot.lane.b32.xlu1 %v9855_v10, %s19797_s26  ;;  %10012 = vrot.lane.b32.xlu0 %v10011_v22, %s19797_s26  ;;  %v10323_v2 = vrot.slane %v9773_v63, %v19963_v46 }
0x3cff   :  { %9934 = vrot.lane.b32.xlu1 %v9933_v61, %s19797_s26  ;;  %10168 = vrot.lane.b32.xlu0 %v10167_v49, %s19797_s26 }
0x3d03   :  { %10090 = vrot.lane.b32.xlu1 %v10089_v15, %s19797_s26  ;;  %10324 = vrot.lane.b32.xlu0 %v10323_v2, %s19797_s26 }
0x3d07   :  { %10246 = vrot.lane.b32.xlu1 %v10245_v52, %s19797_s26 }
0x3d69   :  { %v9779_v50 = vpop.permute.xlu1 %9778 }
0x3d6a   :  { %18347 = vmatmul.mubr.msk.f32.vlgmr.msra.gmra.mrb[118].mxu1 %vm57_vm1, %v9779_v50 }
0x3d6b   :  { %18350 = vmatpush3.xpose.msk.msra.mxu1 %vm57_vm1, %v20618_v32  ;;  %18351 = vmatprep.mubr.msk.f32.mxu1 %vm19794_vm0, %v19795_v11 }
0x3d6c   :  { %18354 = vmatprep.subr.mxu1 %v19795_v11 }
0x3d6d   :  { %v9857_v7 = vpop.permute.xlu1 %9856  ;;  %v10013_v23 = vpop.permute.xlu0 %10012 }
0x3d6e   :  { %18352 = vmatmul.mubr.msk.f32.vlgmr.msra.gmra.mrb[120].mxu1 %vm57_vm1, %v9857_v7 }
0x3d6f   :  { %18355 = vmatpush3.xpose.msk.msra.mxu1 %vm57_vm1, %v20644_v45  ;;  %18356 = vmatprep.mubr.msk.f32.mxu1 %vm19794_vm0, %v19795_v11 }
0x3d70   :  { %18359 = vmatprep.subr.mxu1 %v19795_v11 }
0x3d71   :  { %v9935_v18 = vpop.permute.xlu1 %9934  ;;  %v10169_v40 = vpop.permute.xlu0 %10168 }
0x3d72   :  { %18357 = vmatmul.mubr.msk.f32.vlgmr.msra.gmra.mrb[122].mxu1 %vm57_vm1, %v9935_v18 }
0x3d73   :  { %18360 = vmatpush3.xpose.msk.msra.mxu1 %vm57_vm1, %v20646_v54  ;;  %18361 = vmatprep.mubr.msk.f32.mxu1 %vm19794_vm0, %v19795_v11 }
0x3d74   :  { %18369 = vmatprep.subr.mxu1 %v19795_v11 }
0x3d75   :  { %v10091_v19 = vpop.permute.xlu1 %10090  ;;  %v10325_v6 = vpop.permute.xlu0 %10324 }
0x3d76   :  { %18362 = vmatmul.mubr.msk.f32.vlgmr.msra.gmra.mrb[124].mxu1 %vm57_vm1, %v10013_v23  ;;  %18367 = vmatmul.mubr.msk.f32.vlgmr.msra.gmra.mrb[86].mxu0 %vm57_vm1, %v10091_v19 }
0x3d77   :  { %18370 = vmatpush3.xpose.msk.msra.mxu1 %vm57_vm1, %v20650_v20  ;;  %18375 = vmatpush3.xpose.msk.msra.mxu0 %vm57_vm1, %v20652_v30 }
0x3d78   :  { %18371 = vmatprep.mubr.msk.f32.mxu1 %vm19794_vm0, %v19795_v11  ;;  %18376 = vmatprep.mubr.msk.f32.mxu0 %vm19794_vm0, %v19795_v11 }
0x3d79   :  { %18379 = vmatprep.subr.mxu1 %v19795_v11  ;;  %18384 = vmatprep.subr.mxu0 %v19795_v11  ;;  %v10247_v38 = vpop.permute.xlu1 %10246 }
0x3d7a   :  { %18372 = vmatmul.mubr.msk.f32.vlgmr.msra.gmra.mrb[126].mxu1 %vm57_vm1, %v10169_v40  ;;  %18377 = vmatmul.mubr.msk.f32.vlgmr.msra.gmra.mrb[88].mxu0 %vm57_vm1, %v10247_v38 }
0x3d7b   :  { %18380 = vmatpush3.xpose.msk.msra.mxu1 %vm57_vm1, %v20654_v12  ;;  %18385 = vmatpush3.msra.mxu0 %v20602_v24 }
0x3d7c   :  { %18381 = vmatprep.mubr.msk.f32.mxu1 %vm19794_vm0, %v19795_v11  ;;  %18389 = vmatprep.subr.mxu1 %v19795_v11 }
0x3d7d   :  { %18386 = vmatprep.mubr.msk.f32.mxu0 %vm19794_vm0, %v19795_v11  ;;  %18394 = vmatprep.subr.mxu0 %v19795_v11 }
0x3d7e   :  { %18382 = vmatmul.mubr.msk.f32.vlgmr.msra.gmra.mrb[128].mxu1 %vm57_vm1, %v10325_v6 }
0x3d7f   :  { %18390 = vmatpush3.msra.mxu1 %v20618_v32  ;;  %18391 = vmatprep.mubr.msk.f32.mxu1 %vm19794_vm0, %v19795_v11 }
0x3d80   :  { %18399 = vmatprep.subr.mxu1 %v19795_v11 }
0x3e3d   :  { %v9848_v42 = vpop.f32.mrb[118].mxu1 }
0x3e3e   :  { %v18348_v35 = vpop.f32.mrb[119].mxu1  ;;  %v10398_v21 = vsel %vm3241_vm10, %v9848_v42, -inf }
0x3e3f   :  { %10399 = vmax.xlane.f32.xlu1 %v10398_v21 }
0x3e41   :  { %v9926_v16 = vpop.f32.mrb[120].mxu1 }
0x3e42   :  { %v18353_v17 = vpop.f32.mrb[121].mxu1  ;;  %v10401_v43 = vsel %vm3241_vm10, %v9926_v16, -inf }
0x3e43   :  { %10402 = vmax.xlane.f32.xlu0 %v10401_v43 }
0x3e45   :  { %v10004_v27 = vpop.f32.mrb[122].mxu1 }
0x3e46   :  { %v18358_v34 = vpop.f32.mrb[123].mxu1  ;;  %v10404_v31 = vsel %vm3241_vm10, %v10004_v27, -inf }
0x3e47   :  { %10405 = vmax.xlane.f32.xlu0 %v10404_v31 }
0x3e49   :  { %v10082_v0 = vpop.f32.mrb[124].mxu1  ;;  %v10160_v29 = vpop.f32.mrb[86].mxu0 }
0x3e4a   :  { %v18363_v10 = vpop.f32.mrb[125].mxu1  ;;  %v18368_v22 = vpop.f32.mrb[87].mxu0  ;;  %v10410_v58 = vsel %vm3241_vm10, %v10160_v29, -inf  ;;  %v10407_v36 = vsel %vm3241_vm10, %v10082_v0, -inf }
0x3e4b   :  { %10411 = vmax.xlane.f32.xlu0 %v10410_v58  ;;  %10408 = vmax.xlane.f32.xlu1 %v10407_v36 }
0x3e4d   :  { %v10238_v61 = vpop.f32.mrb[126].mxu1  ;;  %v10316_v49 = vpop.f32.mrb[88].mxu0 }
0x3e4e   :  { %v18373_v62 = vpop.f32.mrb[127].mxu1  ;;  %v18378_v63 = vpop.f32.mrb[89].mxu0  ;;  %v10416_v15 = vsel %vm3241_vm10, %v10316_v49, -inf  ;;  %v10413_v2 = vsel %vm3241_vm10, %v10238_v61, -inf }
0x3e4f   :  { %10417 = vmax.xlane.f32.xlu0 %v10416_v15  ;;  %10414 = vmax.xlane.f32.xlu1 %v10413_v2 }
0x3e51   :  { %v10394_v59 = vpop.f32.mrb[128].mxu1 }
0x3e52   :  { %v18383_v52 = vpop.f32.mrb[129].mxu1  ;;  %v10419_v50 = vsel %vm3241_vm10, %v10394_v59, -inf }
0x3e53   :  { %10420 = vmax.xlane.f32.xlu1 %v10419_v50 }
0x3ecc   :  { %v10400_v7 = vpop.xlane.xlu1 %10399 }
0x3ecd   :  { %v10422_v23 = vsub.f32 %v9848_v42, %v10400_v7 }
0x3ecf   :  { %v10430_v18 = vmul.f32 1.442695, %v10422_v23 }
0x3ed0   :  { %v10403_v19 = vpop.xlane.xlu0 %10402 }
0x3ed1   :  { %19619 = vpow2.f32 %v10430_v18  ;;  %v10423_v40 = vsub.f32 %v9926_v16, %v10403_v19 }
0x3ed3   :  { %v10432_v38 = vmul.f32 1.442695, %v10423_v40 }
0x3ed4   :  { %v10406_v6 = vpop.xlane.xlu0 %10405 }
0x3ed5   :  { %19621 = vpow2.f32 %v10432_v38  ;;  %v10424_v35 = vsub.f32 %v10004_v27, %v10406_v6 }
0x3ed7   :  { %v10434_v21 = vmul.f32 1.442695, %v10424_v35 }
0x3ed8   :  { %v10412_v17 = vpop.xlane.xlu0 %10411  ;;  %v10409_v43 = vpop.xlane.xlu1 %10408 }
0x3ed9   :  { %19623 = vpow2.f32 %v10434_v21  ;;  %v10426_v34 = vsub.f32 %v10160_v29, %v10412_v17  ;;  %v10425_v31 = vsub.f32 %v10082_v0, %v10409_v43 }
0x3edb   :  { %v19620_v10 = vpop.eup %19619  ;;  %v10438_v22 = vmul.f32 1.442695, %v10426_v34  ;;  %v10436_v58 = vmul.f32 1.442695, %v10425_v31 }
0x3edc   :  { %v10418_v36 = vpop.xlane.xlu0 %10417  ;;  %v10415_v62 = vpop.xlane.xlu1 %10414  ;;  %v10446_v42 = vsel %vm3241_vm10, %v19620_v10, 0.0 }
0x3edd   :  { %19625 = vpow2.f32 %v10438_v22  ;;  %v10428_v63 = vsub.f32 %v10316_v49, %v10418_v36  ;;  %v10427_v16 = vsub.f32 %v10238_v61, %v10415_v62  ;;  %10447 = vadd.xlane.f32.xlu0 %v10446_v42 }
0x3ede   :  { %19627 = vpow2.f32 %v10436_v58 }
0x3edf   :  { %v19622_v15 = vpop.eup %19621  ;;  %v10442_v27 = vmul.f32 1.442695, %v10428_v63  ;;  %v10440_v2 = vmul.f32 1.442695, %v10427_v16 }
0x3ee0   :  { %v10421_v52 = vpop.xlane.xlu1 %10420  ;;  %v10449_v50 = vsel %vm3241_vm10, %v19622_v15, 0.0 }
0x3ee1   :  { %19629 = vpow2.f32 %v10442_v27  ;;  %v10429_v0 = vsub.f32 %v10394_v59, %v10421_v52  ;;  %10450 = vadd.xlane.f32.xlu1 %v10449_v50 }
0x3ee2   :  { %19631 = vpow2.f32 %v10440_v2 }
0x3ee3   :  { %v19624_v29 = vpop.eup %19623  ;;  %v10444_v7 = vmul.f32 1.442695, %v10429_v0 }
0x3ee4   :  { %v10452_v23 = vsel %vm3241_vm10, %v19624_v29, 0.0 }
0x3ee5   :  { %19633 = vpow2.f32 %v10444_v7  ;;  %10453 = vadd.xlane.f32.xlu0 %v10452_v23 }
0x3ee7   :  { %v19626_v49 = vpop.eup %19625 }
0x3ee8   :  { %v19628_v61 = vpop.eup %19627  ;;  %v10458_v18 = vsel %vm3241_vm10, %v19626_v49, 0.0 }
0x3ee9   :  { %10459 = vadd.xlane.f32.xlu0 %v10458_v18  ;;  %v10455_v19 = vsel %vm3241_vm10, %v19628_v61, 0.0 }
0x3eea   :  { %10456 = vadd.xlane.f32.xlu1 %v10455_v19 }
0x3eeb   :  { %v19630_v40 = vpop.eup %19629 }
0x3eec   :  { %v19632_v38 = vpop.eup %19631  ;;  %v10464_v59 = vsel %vm3241_vm10, %v19630_v40, 0.0 }
0x3eed   :  { %10465 = vadd.xlane.f32.xlu0 %v10464_v59  ;;  %v10461_v6 = vsel %vm3241_vm10, %v19632_v38, 0.0 }
0x3eee   :  { %10462 = vadd.xlane.f32.xlu1 %v10461_v6 }
0x3eef   :  { %v19634_v35 = vpop.eup %19633 }
0x3ef0   :  { %v10467_v21 = vsel %vm3241_vm10, %v19634_v35, 0.0 }
0x3ef2   :  { %10468 = vadd.xlane.f32.xlu1 %v10467_v21 }
0x3f03   :  { %11164 = vrot.lane.b32.xlu0 %v21569_v47, %s19797_s26 }
0x3f6a   :  { %v10448_v17 = vpop.xlane.xlu0 %10447 }
0x3f6b   :  { %19635 = vrcp.f32 %v10448_v17 }
0x3f6e   :  { %v10451_v43 = vpop.xlane.xlu1 %10450 }
0x3f6f   :  { %19637 = vrcp.f32 %v10451_v43 }
0x3f72   :  { %v10454_v34 = vpop.xlane.xlu0 %10453 }
0x3f73   :  { %19639 = vrcp.f32 %v10454_v34 }
0x3f75   :  { %v19636_v31 = vpop.eup %19635 }
0x3f76   :  { %v10460_v22 = vpop.xlane.xlu0 %10459  ;;  %v10471_v58 = vmul.f32 %v19636_v31, %v19620_v10 }
0x3f77   :  { %19641 = vrcp.f32 %v10460_v22  ;;  %v10457_v36 = vpop.xlane.xlu1 %10456 }
0x3f78   :  { %19643 = vrcp.f32 %v10457_v36  ;;  %18387 = vmatmul.mubr.msk.f32.vlgmr.msra.gmra.mrb[90].mxu0 %vm3331_vm11, %v10471_v58 }
0x3f79   :  { %v19638_v62 = vpop.eup %19637  ;;  %18395 = vmatpush3.msra.mxu0 %v20644_v45  ;;  %18396 = vmatprep.mubr.msk.f32.mxu0 %vm19794_vm0, %v19795_v11 }
0x3f7a   :  { %v10466_v47 = vpop.xlane.xlu0 %10465  ;;  %v10473_v42 = vmul.f32 %v19638_v62, %v19622_v15  ;;  %18404 = vmatprep.subr.mxu0 %v19795_v11 }
0x3f7b   :  { %19645 = vrcp.f32 %v10466_v47  ;;  %v10463_v63 = vpop.xlane.xlu1 %10462 }
0x3f7c   :  { %19647 = vrcp.f32 %v10463_v63  ;;  %18392 = vmatmul.mubr.msk.f32.vlgmr.msra.gmra.mrb[130].mxu1 %vm3331_vm11, %v10473_v42 }
0x3f7d   :  { %v19640_v10 = vpop.eup %19639  ;;  %18400 = vmatpush3.msra.mxu1 %v20646_v54  ;;  %18401 = vmatprep.mubr.msk.f32.mxu1 %vm19794_vm0, %v19795_v11 }
0x3f7e   :  { %v10475_v16 = vmul.f32 %v19640_v10, %v19624_v29  ;;  %18409 = vmatprep.subr.mxu1 %v19795_v11  ;;  %v11165_v18 = vpop.permute.xlu0 %11164 }
0x3f7f   :  { %v10469_v27 = vpop.xlane.xlu1 %10468 }
0x3f80   :  { %19649 = vrcp.f32 %v10469_v27  ;;  %18397 = vmatmul.mubr.msk.f32.vlgmr.msra.gmra.mrb[92].mxu0 %vm3331_vm11, %v10475_v16 }
0x3f81   :  { %v19642_v15 = vpop.eup %19641  ;;  %18405 = vmatpush3.msra.mxu0 %v20648_v56  ;;  %18406 = vmatprep.mubr.msk.f32.mxu0 %vm19794_vm0, %v19795_v11 }
0x3f82   :  { %v19644_v2 = vpop.eup %19643  ;;  %v10479_v52 = vmul.f32 %v19642_v15, %v19626_v49  ;;  %18414 = vmatprep.subr.mxu0 %v19795_v11 }
0x3f83   :  { %v10477_v50 = vmul.f32 %v19644_v2, %v19628_v61 }
0x3f84   :  { %18407 = vmatmul.mubr.msk.f32.vlgmr.msra.gmra.mrb[94].mxu0 %vm3331_vm11, %v10479_v52 }
0x3f85   :  { %v19646_v0 = vpop.eup %19645  ;;  %18402 = vmatmul.mubr.msk.f32.vlgmr.msra.gmra.mrb[132].mxu1 %vm3331_vm11, %v10477_v50  ;;  %18415 = vmatpush3.msra.mxu0 %v20652_v30 }
0x3f86   :  { %v19648_v29 = vpop.eup %19647  ;;  %v10483_v7 = vmul.f32 %v19646_v0, %v19630_v40  ;;  %18410 = vmatpush3.msra.mxu1 %v20650_v20  ;;  %18411 = vmatprep.mubr.msk.f32.mxu1 %vm19794_vm0, %v19795_v11 }
0x3f87   :  { %v10481_v23 = vmul.f32 %v19648_v29, %v19632_v38  ;;  %18416 = vmatprep.mubr.msk.f32.mxu0 %vm19794_vm0, %v19795_v11  ;;  %18419 = vmatprep.subr.mxu1 %v19795_v11 }
0x3f88   :  { %18417 = vmatmul.mubr.msk.f32.vlgmr.msra.gmra.mrb[96].mxu0 %vm3331_vm11, %v10483_v7  ;;  %19223 = vmatprep.subr.bf16.mxu0 %v19793_v3 }
0x3f89   :  { %18412 = vmatmul.mubr.msk.f32.vlgmr.msra.gmra.mrb[134].mxu1 %vm3331_vm11, %v10481_v23  ;;  %19225 = vmatpush3.bf16.msra.mxu0 %v20800_v28 }
0x3f8a   :  { %v19650_v49 = vpop.eup %19649  ;;  %18420 = vmatpush3.msra.mxu1 %v20654_v12  ;;  %18421 = vmatprep.mubr.msk.f32.mxu1 %vm19794_vm0, %v19795_v11 }
0x3f8b   :  { %v10485_v61 = vmul.f32 %v19650_v49, %v19634_v35  ;;  %19229 = vmatprep.subr.bf16.mxu1 %v19793_v3  ;;  %19226 = vmatprep.subr.bf16.mxu0 %v19793_v3 }
0x3f8c   :  { %18432 = vmatprep.mubr.msk.f32.mxu0 %vm19794_vm0, %v19795_v11 }
0x3f8d   :  { %18422 = vmatmul.mubr.msk.f32.vlgmr.msra.gmra.mrb[136].mxu1 %vm3331_vm11, %v10485_v61  ;;  %19228 = vmatpush3.bf16.msra.mxu0 %v20810_v51 }
0x3f8e   :  { %19231 = vmatpush3.bf16.msra.mxu1 %v20755_v37  ;;  %18443 = vmatprep.mubr.msk.f32.mxu1 %vm19794_vm0, %v19795_v11 }
0x3f8f   :  { %19232 = vmatprep.subr.bf16.mxu1 %v19793_v3  ;;  %19235 = vmatprep.subr.bf16.mxu0 %v19793_v3 }
0x3f92   :  { %19234 = vmatpush3.bf16.msra.mxu1 %v20773_v9 }
0x3f93   :  { %19259 = vmatprep.subr.bf16.mxu1 %v19793_v3 }
0x3f95   :  { %18444 = vmatmul.mubr.msk.f32.vlgmr.msra.gmra.mrb[138].mxu1 %vm57_vm1, %v11165_v18 }
0x3f96   :  { %19261 = vmatpush3.bf16.msra.mxu1 %v20512_v5  ;;  %18489 = vmatprep.mubr.msk.f32.mxu1 %vm19794_vm0, %v19795_v11 }
0x3f97   :  { %19262 = vmatprep.subr.bf16.mxu1 %v19793_v3 }
0x3f9a   :  { %19264 = vmatpush3.bf16.msra.mxu1 %v20530_v14 }
0x3f9b   :  { %19265 = vmatprep.subr.bf16.mxu1 %v19793_v3 }
0x3f9d   :  { %18490 = vmatmul.mubr.msk.f32.vlgmr.msra.gmra.mrb[140].mxu1 %vm57_vm1, %v11165_v18 }
0x3f9e   :  { %19267 = vmatpush3.bf16.msra.mxu1 %v20501_v1  ;;  %18500 = vmatprep.mubr.msk.f32.mxu1 %vm19794_vm0, %v19795_v11 }
0x3f9f   :  { %19268 = vmatprep.subr.bf16.mxu1 %v19793_v3 }
0x3fa2   :  { %19270 = vmatpush3.bf16.msra.mxu1 %v20521_v13 }
0x3fa3   :  { %18503 = vmatprep.subr.mxu1 %v19795_v11 }
0x404b   :  { %v10555_v19 = vpop.f32.mrb[90].mxu0 }
0x404c   :  { %v18388_v40 = vpop.f32.mrb[91].mxu0 }
0x404f   :  { %v10628_v38 = vpop.f32.mrb[130].mxu1 }
0x4050   :  { %v11078_v59 = vrot.slane %v10628_v38, 7  ;;  %v18393_v6 = vpop.f32.mrb[131].mxu1 }
0x4052   :  { %v11079_v35 = vsel %vm3932_vm12, %v11078_v59, %v10555_v19 }
0x4053   :  { %v10701_v21 = vpop.f32.mrb[92].mxu0 }
0x4054   :  { %v11080_v17 = vrot.slane %v10701_v21, 6  ;;  %v18398_v43 = vpop.f32.mrb[93].mxu0 }
0x4056   :  { %v11081_v34 = vsel %vm3935_vm13, %v11080_v17, %v11079_v35  ;;  %v21747_v35 = vld [vmem:[%s22350_s11] ss:$0 sm:$0xff] }
0x4057   :  { %v10847_v31 = vpop.f32.mrb[94].mxu0 }
0x4058   :  { %v10774_v22 = vpop.f32.mrb[132].mxu1  ;;  %v11084_v58 = vrot.slane %v10847_v31, 4  ;;  %v18408_v36 = vpop.f32.mrb[95].mxu0 }
0x4059   :  { %v11082_v62 = vrot.slane %v10774_v22, 5  ;;  %v18403_v47 = vpop.f32.mrb[133].mxu1 }
0x405b   :  { %v11083_v42 = vsel %vm3938_vm14, %v11082_v62, %v11081_v34  ;;  %v10993_v63 = vpop.f32.mrb[96].mxu0 }
0x405c   :  { %v11085_v10 = vsel %vm3941_vm15, %v11084_v58, %v11083_v42  ;;  %v10920_v16 = vpop.f32.mrb[134].mxu1  ;;  %v11088_v27 = vrot.slane %v10993_v63, 2  ;;  %v18418_v15 = vpop.f32.mrb[97].mxu0 }
0x405d   :  { %v11086_v2 = vrot.slane %v10920_v16, 3  ;;  %v18413_v52 = vpop.f32.mrb[135].mxu1  ;;  %v16796_v15 = vld [vmem:[%s22341_s2 + $0x20] sm:$0xff] }
0x405f   :  { %v11087_v50 = vsel %vm3944_vm2, %v11086_v2, %v11085_v10 }
0x4060   :  { %v11089_v0 = vsel %vm3947_vm3, %v11088_v27, %v11087_v50  ;;  %v11066_v29 = vpop.f32.mrb[136].mxu1  ;;  %v11337_v27 = vstv %s11336_s28 }
0x4061   :  { %v11090_v7 = vrot.slane %v11066_v29, 1  ;;  %v18423_v23 = vpop.f32.mrb[137].mxu1  ;;  %vm11338_vm9 = vcmp.eq.s32.totalorder %v11337_v27, 1 }
0x4063   :  { %v11091_v49 = vsel %vm3950_vm4, %v11090_v7, %v11089_v0 }
0x4064   :  { %18433 = vmatmul.mubr.msk.f32.vlgmr.msra.gmra.mrb[98].mxu0 %vm57_vm1, %v11091_v49 }
0x4065   :  { %19237 = vmatpush3.bf16.msra.mxu0 %v20823_v60  ;;  %18478 = vmatprep.mubr.msk.f32.mxu0 %vm19794_vm0, %v19795_v11 }
0x4066   :  { %19238 = vmatprep.subr.bf16.mxu0 %v19793_v3 }
0x4068   :  { %v11234_v61 = vpop.f32.mrb[138].mxu1 }
0x4069   :  { %v18445_v18 = vpop.f32.mrb[139].mxu1  ;;  %19240 = vmatpush3.bf16.msra.mxu0 %v20856_v48 }
0x406a   :  { %19241 = vmatprep.subr.bf16.mxu0 %v19793_v3 }
0x406d   :  { %19243 = vmatpush3.bf16.msra.mxu0 %v20862_v41 }
0x406e   :  { %19244 = vmatprep.subr.bf16.mxu0 %v19793_v3 }
0x4070   :  { %v11406_v19 = vpop.f32.mrb[140].mxu1 }
0x4071   :  { %v18491_v40 = vpop.f32.mrb[141].mxu1  ;;  %19246 = vmatpush3.bf16.msra.mxu0 %v20872_v44 }
0x4072   :  { %19247 = vmatprep.subr.bf16.mxu0 %v19793_v3 }
0x4075   :  { %19249 = vmatpush3.bf16.msra.mxu0 %v20882_v33 }
0x4076   :  { %19250 = vmatprep.subr.bf16.mxu0 %v19793_v3 }
0x4079   :  { %19252 = vmatpush3.bf16.msra.mxu0 %v20892_v26 }
0x407a   :  { %19253 = vmatprep.subr.bf16.mxu0 %v19793_v3 }
0x407d   :  { %19255 = vmatpush3.bf16.msra.mxu0 %v20902_v53 }
0x407e   :  { %19256 = vmatprep.subr.bf16.mxu0 %v19793_v3 }
0x4081   :  { %19258 = vmatpush3.bf16.msra.mxu0 %v20912_v57 }
0x4082   :  { %18523 = vmatprep.subr.mxu0 %v19795_v11 }
0x4137   :  { %v11160_v38 = vpop.f32.mrb[98].mxu0 }
0x4138   :  { %v11235_v59 = vadd.f32 %v11234_v61, %v11160_v38  ;;  %v18434_v6 = vpop.f32.mrb[99].mxu0 }
0x413a   :  { %v11238_v21 = vadd.f32 %v21747_v35, %v11235_v59 }
0x413c   :  { %16792 = vst [vmem:[%s22351_s12 + $0x20] sm:$0xff] %v11238_v21  ;;  %11241 = vmax.xlane.f32.xlu1 %v11238_v21 }
0x41c9   :  { %v11242_v17 = vpop.xlane.xlu1 %11241 }
0x41ca   :  { %vm11243_vm6 = vcmp.eq.f32.partialorder %v11238_v21, %v11242_v17 }
0x41cb   :  { %v11244_v43 = vsel %vm11243_vm6, %v20844_v55, 128 }
0x41cc   :  { %v11246_v34 = vshra.s32 %v11244_v43, 16  ;;  %v11245_v22 = vand.u32 65535, %v11244_v43 }
0x41ce   :  { %v11248_v31 = vcvt.s32.f32 %v11246_v34  ;;  %v11247_v58 = vcvt.s32.f32 %v11245_v22 }
0x41d0   :  { %11249 = vmin.xlane.f32.xlu1 %v11248_v31 }
0x425d   :  { %v11250_v36 = vpop.xlane.xlu1 %11249 }
0x425e   :  { %vm11251_vm7 = vcmp.eq.f32.partialorder %v11248_v31, %v11250_v36  ;;  %v11256_v47 = vcvt.f32.s32 %v11250_v36 }
0x425f   :  { %v11252_v62 = vsel %vm11251_vm7, %v11247_v58, inf }
0x4260   :  { %11253 = vmin.xlane.f32.xlu1 %v11252_v62  ;;  %v11257_v63 = vshll.u32 %v11256_v47, 16 }
0x42ed   :  { %v11254_v42 = vpop.xlane.xlu1 %11253 }
0x42ee   :  { %v11255_v10 = vcvt.f32.s32 %v11254_v42 }
0x42f0   :  { %v11258_v16 = vadd.s32 %v11257_v63, %v11255_v10 }
0x42f2   :  { %vm11259_vm8 = vcmp.eq.s32.totalorder %v20844_v55, %v11258_v16 }
0x42f3   :  { %18479 = vmatmul.mubr.msk.f32.vlgmr.msra.gmra.mrb[100].mxu0 %vm11259_vm8, %v19799_v25 }
0x42f4   :  { %18524 = vmatpush3.xpose.msk.msra.mxu0 %vm57_vm1, %v20648_v56  ;;  %18525 = vmatprep.mubr.msk.f32.mxu0 %vm19794_vm0, %v19795_v11 }
0x42f5   :  { %18533 = vmatprep.subr.mxu0 %v19795_v11 }
0x43c6   :  { %v11328_v2 = vpop.f32.mrb[100].mxu0 }
0x43c7   :  { %v11339_v52 = vsel %vm11338_vm9, %v16796_v15, %v11328_v2  ;;  %v18480_v50 = vpop.f32.mrb[101].mxu0 }
0x43c8   :  { %18501 = vmatmul.mubr.msk.f32.vlgmr.msra.gmra.mrb[142].mxu1 %vm57_vm1, %v11339_v52 }
0x43c9   :  { %18504 = vmatpush3.xpose.msk.msra.mxu1 %vm57_vm1, %v20602_v24  ;;  %18505 = vmatprep.mubr.msk.f32.mxu1 %vm19794_vm0, %v19795_v11 }
0x43ca   :  { %18508 = vmatprep.subr.mxu1 %v19795_v11 }
0x449b   :  { %v11479_v0 = vpop.f32.mrb[142].mxu1 }
0x449c   :  { %v11480_v29 = vadd.f32 %v11479_v0, %v11406_v19  ;;  %v18502_v7 = vpop.f32.mrb[143].mxu1 }
0x449e   :  { %v11483_v23 = vadd.f32 %v21559_v8, %v11480_v29 }
0x44a0   :  { %19651 = vtanh.f32 %v11483_v23  ;;  %v16799_v61 = vmul.f32 -1.442695, %v11483_v23 }
0x44a2   :  { %19653 = vpow2.f32 %v16799_v61 }
0x44aa   :  { %v19652_v49 = vpop.eup %19651 }
0x44ab   :  { %11493 = vrot.lane.b32.xlu1 %v19652_v49, %s19796_s25 }
0x44ac   :  { %v19654_v18 = vpop.eup %19653 }
0x44ad   :  { %v11487_v40 = vadd.f32 1.0, %v19654_v18 }
0x44af   :  { %19655 = vrcp.f32 %v11487_v40 }
0x44b9   :  { %v19656_v38 = vpop.eup %19655 }
0x44ba   :  { %v11491_v21 = vmul.f32 %v19656_v38, %v21565_v4 }
0x451d   :  { %v11494_v59 = vpop.permute.xlu1 %11493 }
0x451e   :  { %v11496_v6 = vmul.f32 %v19656_v38, %v11494_v59 }
0x4520   :  { %11498 = vrot.lane.b32.xlu0 %v11496_v6, %s19797_s26 }
0x4592   :  { %v11499_v19 = vpop.permute.xlu0 %11498 }
0x4593   :  { %v21774_v17 = vadd.f32 %v11499_v19, %v11491_v21 }
0x4595   :  { %19657 = vtanh.f32 %v21774_v17 }
0x459f   :  { %v19658_v8 = vpop.eup %19657 }
0x45a0   :  { %11504 = vrot.lane.b32.xlu0 %v19658_v8, %s19796_s25 }
0x4612   :  { %v11505_v43 = vpop.permute.xlu0 %11504 }
0x4613   :  { %v21778_v34 = vmul.f32 %v19656_v38, %v11505_v43 }
0x4615   :  { %v11509_v31 = vcombine.high %v21778_v34, %v21778_v34  ;;  %v11516_v22 = vrot.slane %v21778_v34, %v19957_v39 }
0x4617   :  { %v11523_v58 = vrot.slane %v11509_v31, %v19957_v39  ;;  %v11524_v4 = vcombine.high %v11516_v22, %v11516_v22  ;;  %v11532_v36 = vrot.slane %v11516_v22, %v19957_v39 }
0x4619   :  { %v11546_v62 = vrot.slane %v11524_v4, %v19957_v39  ;;  %v11554_v47 = vcombine.high %v11532_v36, %v11532_v36  ;;  %v11561_v42 = vrot.slane %v11532_v36, %v19963_v46  ;;  %v11525_v63 = vcombine.high %v11523_v58, %v11523_v58 }
0x461a   :  { %v11539_v27 = vrot.slane %v11523_v58, %v19957_v39 }
0x461b   :  { %v11639_v10 = vrot.slane %v11546_v62, %v19963_v46  ;;  %v11556_v16 = vcombine.high %v11546_v62, %v11546_v62  ;;  %11562 = vrot.lane.b32.xlu0 %v11561_v42, %s19797_s26  ;;  %v11717_v15 = vrot.slane %v11554_v47, %v19963_v46  ;;  %v11553_v52 = vrot.slane %v11525_v63, %v19957_v39 }
0x461c   :  { %v11873_v50 = vrot.slane %v11539_v27, %v19963_v46  ;;  %v11555_v0 = vcombine.high %v11539_v27, %v11539_v27 }
0x461d   :  { %11640 = vrot.lane.b32.xlu1 %v11639_v10, %s19797_s26  ;;  %v11795_v2 = vrot.slane %v11556_v16, %v19963_v46  ;;  %v11951_v29 = vrot.slane %v11553_v52, %v19963_v46  ;;  %v11557_v7 = vcombine.high %v11553_v52, %v11553_v52 }
0x461e   :  { %v12029_v23 = vrot.slane %v11555_v0, %v19963_v46 }
0x461f   :  { %11718 = vrot.lane.b32.xlu0 %v11717_v15, %s19797_s26  ;;  %v12107_v49 = vrot.slane %v11557_v7, %v19963_v46 }
0x4621   :  { %11796 = vrot.lane.b32.xlu1 %v11795_v2, %s19797_s26 }
0x4623   :  { %11874 = vrot.lane.b32.xlu0 %v11873_v50, %s19797_s26 }
0x4625   :  { %11952 = vrot.lane.b32.xlu1 %v11951_v29, %s19797_s26 }
0x4627   :  { %12030 = vrot.lane.b32.xlu0 %v12029_v23, %s19797_s26 }
0x4629   :  { %12108 = vrot.lane.b32.xlu1 %v12107_v49, %s19797_s26 }
0x468d   :  { %v11563_v61 = vpop.permute.xlu0 %11562 }
0x468e   :  { %18506 = vmatmul.mubr.msk.f32.vlgmr.msra.gmra.mrb[144].mxu1 %vm57_vm1, %v11563_v61 }
0x468f   :  { %18509 = vmatpush3.xpose.msk.msra.mxu1 %vm57_vm1, %v20618_v32  ;;  %v11641_v18 = vpop.permute.xlu1 %11640  ;;  %18510 = vmatprep.mubr.msk.f32.mxu1 %vm19794_vm0, %v19795_v11 }
0x4690   :  { %18513 = vmatprep.subr.mxu1 %v19795_v11 }
0x4691   :  { %v11719_v40 = vpop.permute.xlu0 %11718 }
0x4692   :  { %18511 = vmatmul.mubr.msk.f32.vlgmr.msra.gmra.mrb[146].mxu1 %vm57_vm1, %v11641_v18 }
0x4693   :  { %18514 = vmatpush3.xpose.msk.msra.mxu1 %vm57_vm1, %v20644_v45  ;;  %18515 = vmatprep.mubr.msk.f32.mxu1 %vm19794_vm0, %v19795_v11  ;;  %v11797_v38 = vpop.permute.xlu1 %11796 }
0x4694   :  { %18518 = vmatprep.subr.mxu1 %v19795_v11 }
0x4695   :  { %v11875_v59 = vpop.permute.xlu0 %11874 }
0x4696   :  { %18516 = vmatmul.mubr.msk.f32.vlgmr.msra.gmra.mrb[148].mxu1 %vm57_vm1, %v11719_v40  ;;  %18526 = vmatmul.mubr.msk.f32.vlgmr.msra.gmra.mrb[102].mxu0 %vm57_vm1, %v11875_v59 }
0x4697   :  { %18519 = vmatpush3.xpose.msk.msra.mxu1 %vm57_vm1, %v20646_v54  ;;  %18534 = vmatpush3.xpose.msk.msra.mxu0 %vm57_vm1, %v20652_v30  ;;  %v11953_v21 = vpop.permute.xlu1 %11952 }
0x4698   :  { %18520 = vmatprep.mubr.msk.f32.mxu1 %vm19794_vm0, %v19795_v11  ;;  %18528 = vmatprep.subr.mxu1 %v19795_v11 }
0x4699   :  { %18535 = vmatprep.mubr.msk.f32.mxu0 %vm19794_vm0, %v19795_v11  ;;  %18543 = vmatprep.subr.mxu0 %v19795_v11  ;;  %v12031_v6 = vpop.permute.xlu0 %12030 }
0x469a   :  { %18521 = vmatmul.mubr.msk.f32.vlgmr.msra.gmra.mrb[150].mxu1 %vm57_vm1, %v11797_v38  ;;  %18536 = vmatmul.mubr.msk.f32.vlgmr.msra.gmra.mrb[104].mxu0 %vm57_vm1, %v12031_v6 }
0x469b   :  { %18529 = vmatpush3.xpose.msk.msra.mxu1 %vm57_vm1, %v20650_v20  ;;  %18544 = vmatpush3.msra.mxu0 %v20602_v24  ;;  %v12109_v19 = vpop.permute.xlu1 %12108 }
0x469c   :  { %18530 = vmatprep.mubr.msk.f32.mxu1 %vm19794_vm0, %v19795_v11  ;;  %18538 = vmatprep.subr.mxu1 %v19795_v11 }
0x469d   :  { %18545 = vmatprep.mubr.msk.f32.mxu0 %vm19794_vm0, %v19795_v11  ;;  %18553 = vmatprep.subr.mxu0 %v19795_v11 }
0x469e   :  { %18531 = vmatmul.mubr.msk.f32.vlgmr.msra.gmra.mrb[152].mxu1 %vm57_vm1, %v11953_v21 }
0x469f   :  { %18539 = vmatpush3.xpose.msk.msra.mxu1 %vm57_vm1, %v20654_v12  ;;  %18540 = vmatprep.mubr.msk.f32.mxu1 %vm19794_vm0, %v19795_v11 }
0x46a0   :  { %18548 = vmatprep.subr.mxu1 %v19795_v11 }
0x46a2   :  { %18541 = vmatmul.mubr.msk.f32.vlgmr.msra.gmra.mrb[154].mxu1 %vm57_vm1, %v12109_v19 }
0x46a3   :  { %18549 = vmatpush3.msra.mxu1 %v20618_v32  ;;  %18550 = vmatprep.mubr.msk.f32.mxu1 %vm19794_vm0, %v19795_v11 }
0x46a4   :  { %18558 = vmatprep.subr.mxu1 %v19795_v11 }
0x4761   :  { %v11632_v8 = vpop.f32.mrb[144].mxu1 }
0x4762   :  { %v18507_v43 = vpop.f32.mrb[145].mxu1  ;;  %v12182_v31 = vsel %vm3241_vm10, %v11632_v8, -inf }
0x4763   :  { %12183 = vmax.xlane.f32.xlu0 %v12182_v31 }
0x4765   :  { %v11710_v22 = vpop.f32.mrb[146].mxu1 }
0x4766   :  { %v18512_v58 = vpop.f32.mrb[147].mxu1  ;;  %v12185_v4 = vsel %vm3241_vm10, %v11710_v22, -inf }
0x4767   :  { %12186 = vmax.xlane.f32.xlu1 %v12185_v4 }
0x4769   :  { %v11788_v36 = vpop.f32.mrb[148].mxu1  ;;  %v11944_v62 = vpop.f32.mrb[102].mxu0 }
0x476a   :  { %v18517_v47 = vpop.f32.mrb[149].mxu1  ;;  %v18527_v42 = vpop.f32.mrb[103].mxu0  ;;  %v12194_v63 = vsel %vm3241_vm10, %v11944_v62, -inf  ;;  %v12188_v10 = vsel %vm3241_vm10, %v11788_v36, -inf }
0x476b   :  { %12195 = vmax.xlane.f32.xlu1 %v12194_v63  ;;  %12189 = vmax.xlane.f32.xlu0 %v12188_v10 }
0x476d   :  { %v11866_v16 = vpop.f32.mrb[150].mxu1  ;;  %v12100_v27 = vpop.f32.mrb[104].mxu0 }
0x476e   :  { %v18522_v15 = vpop.f32.mrb[151].mxu1  ;;  %v18537_v2 = vpop.f32.mrb[105].mxu0  ;;  %v12200_v52 = vsel %vm3241_vm10, %v12100_v27, -inf  ;;  %v12191_v50 = vsel %vm3241_vm10, %v11866_v16, -inf }
0x476f   :  { %12201 = vmax.xlane.f32.xlu1 %v12200_v52  ;;  %12192 = vmax.xlane.f32.xlu0 %v12191_v50 }
0x4771   :  { %v12022_v0 = vpop.f32.mrb[152].mxu1 }
0x4772   :  { %v18532_v29 = vpop.f32.mrb[153].mxu1  ;;  %v12197_v7 = vsel %vm3241_vm10, %v12022_v0, -inf }
0x4773   :  { %12198 = vmax.xlane.f32.xlu0 %v12197_v7 }
0x4775   :  { %v12178_v23 = vpop.f32.mrb[154].mxu1 }
0x4776   :  { %v18542_v49 = vpop.f32.mrb[155].mxu1  ;;  %v12203_v61 = vsel %vm3241_vm10, %v12178_v23, -inf }
0x4777   :  { %12204 = vmax.xlane.f32.xlu0 %v12203_v61 }
0x47f0   :  { %v12184_v18 = vpop.xlane.xlu0 %12183 }
0x47f1   :  { %v12206_v40 = vsub.f32 %v11632_v8, %v12184_v18 }
0x47f3   :  { %v12214_v38 = vmul.f32 1.442695, %v12206_v40 }
0x47f4   :  { %v12187_v59 = vpop.xlane.xlu1 %12186 }
0x47f5   :  { %19659 = vpow2.f32 %v12214_v38  ;;  %v12207_v6 = vsub.f32 %v11710_v22, %v12187_v59 }
0x47f7   :  { %v12216_v21 = vmul.f32 1.442695, %v12207_v6 }
0x47f8   :  { %v12196_v19 = vpop.xlane.xlu1 %12195  ;;  %v12190_v43 = vpop.xlane.xlu0 %12189 }
0x47f9   :  { %19661 = vpow2.f32 %v12216_v21  ;;  %v12210_v31 = vsub.f32 %v11944_v62, %v12196_v19  ;;  %v12208_v58 = vsub.f32 %v11788_v36, %v12190_v43 }
0x47fb   :  { %v12218_v4 = vmul.f32 1.442695, %v12208_v58  ;;  %v12222_v47 = vmul.f32 1.442695, %v12210_v31 }
0x47fc   :  { %v12202_v42 = vpop.xlane.xlu1 %12201  ;;  %v12193_v63 = vpop.xlane.xlu0 %12192 }
0x47fd   :  { %v12212_v10 = vsub.f32 %v12100_v27, %v12202_v42  ;;  %v12209_v15 = vsub.f32 %v11866_v16, %v12193_v63  ;;  %19663 = vpow2.f32 %v12218_v4 }
0x47fe   :  { %19665 = vpow2.f32 %v12222_v47 }
0x47ff   :  { %v19660_v2 = vpop.eup %19659  ;;  %v12220_v52 = vmul.f32 1.442695, %v12209_v15  ;;  %v12226_v8 = vmul.f32 1.442695, %v12212_v10 }
0x4800   :  { %v12199_v50 = vpop.xlane.xlu0 %12198  ;;  %v12230_v22 = vsel %vm3241_vm10, %v19660_v2, 0.0 }
0x4801   :  { %v12211_v29 = vsub.f32 %v12022_v0, %v12199_v50  ;;  %12231 = vadd.xlane.f32.xlu1 %v12230_v22  ;;  %19667 = vpow2.f32 %v12220_v52 }
0x4802   :  { %19669 = vpow2.f32 %v12226_v8 }
0x4803   :  { %v19662_v7 = vpop.eup %19661  ;;  %v12224_v62 = vmul.f32 1.442695, %v12211_v29 }
0x4804   :  { %v12205_v36 = vpop.xlane.xlu0 %12204  ;;  %v12233_v49 = vsel %vm3241_vm10, %v19662_v7, 0.0 }
0x4805   :  { %19671 = vpow2.f32 %v12224_v62  ;;  %v12213_v27 = vsub.f32 %v12178_v23, %v12205_v36  ;;  %12234 = vadd.xlane.f32.xlu0 %v12233_v49 }
0x4807   :  { %v12228_v16 = vmul.f32 1.442695, %v12213_v27  ;;  %v19664_v61 = vpop.eup %19663 }
0x4808   :  { %v12236_v18 = vsel %vm3241_vm10, %v19664_v61, 0.0  ;;  %v19666_v40 = vpop.eup %19665 }
0x4809   :  { %19673 = vpow2.f32 %v12228_v16  ;;  %12237 = vadd.xlane.f32.xlu1 %v12236_v18  ;;  %v12242_v0 = vsel %vm3241_vm10, %v19666_v40, 0.0 }
0x480b   :  { %v19668_v38 = vpop.eup %19667 }
0x480c   :  { %v12239_v59 = vsel %vm3241_vm10, %v19668_v38, 0.0  ;;  %v19670_v6 = vpop.eup %19669 }
0x480d   :  { %12243 = vadd.xlane.f32.xlu1 %v12242_v0  ;;  %12240 = vadd.xlane.f32.xlu0 %v12239_v59  ;;  %v12248_v23 = vsel %vm3241_vm10, %v19670_v6, 0.0 }
0x480f   :  { %v19672_v21 = vpop.eup %19671 }
0x4810   :  { %v12245_v19 = vsel %vm3241_vm10, %v19672_v21, 0.0 }
0x4811   :  { %12249 = vadd.xlane.f32.xlu1 %v12248_v23  ;;  %12246 = vadd.xlane.f32.xlu0 %v12245_v19 }
0x4813   :  { %v19674_v43 = vpop.eup %19673 }
0x4814   :  { %v12251_v31 = vsel %vm3241_vm10, %v19674_v43, 0.0 }
0x4815   :  { %12252 = vadd.xlane.f32.xlu0 %v12251_v31 }
0x4822   :  { %12948 = vrot.lane.b32.xlu1 %v21778_v34, %s19797_s26 }
0x488e   :  { %v12232_v58 = vpop.xlane.xlu1 %12231 }
0x488f   :  { %19675 = vrcp.f32 %v12232_v58 }
0x4892   :  { %v12235_v4 = vpop.xlane.xlu0 %12234 }
0x4893   :  { %19677 = vrcp.f32 %v12235_v4 }
0x4896   :  { %v12238_v47 = vpop.xlane.xlu1 %12237 }
0x4897   :  { %19679 = vrcp.f32 %v12238_v47 }
0x4899   :  { %v19676_v42 = vpop.eup %19675 }
0x489a   :  { %v12255_v63 = vmul.f32 %v19676_v42, %v19660_v2  ;;  %v12244_v10 = vpop.xlane.xlu1 %12243  ;;  %v12241_v15 = vpop.xlane.xlu0 %12240 }
0x489b   :  { %19681 = vrcp.f32 %v12244_v10 }
0x489c   :  { %18546 = vmatmul.mubr.msk.f32.vlgmr.msra.gmra.mrb[106].mxu0 %vm3331_vm11, %v12255_v63  ;;  %19683 = vrcp.f32 %v12241_v15 }
0x489d   :  { %v19678_v52 = vpop.eup %19677  ;;  %18554 = vmatpush3.msra.mxu0 %v20644_v45  ;;  %18555 = vmatprep.mubr.msk.f32.mxu0 %vm19794_vm0, %v19795_v11 }
0x489e   :  { %v12257_v34 = vmul.f32 %v19678_v52, %v19662_v7  ;;  %18563 = vmatprep.subr.mxu0 %v19795_v11  ;;  %v12250_v8 = vpop.xlane.xlu1 %12249  ;;  %v12247_v50 = vpop.xlane.xlu0 %12246 }
0x489f   :  { %19685 = vrcp.f32 %v12250_v8 }
0x48a0   :  { %18551 = vmatmul.mubr.msk.f32.vlgmr.msra.gmra.mrb[156].mxu1 %vm3331_vm11, %v12257_v34  ;;  %19687 = vrcp.f32 %v12247_v50 }
0x48a1   :  { %18559 = vmatpush3.msra.mxu1 %v20646_v54  ;;  %18560 = vmatprep.mubr.msk.f32.mxu1 %vm19794_vm0, %v19795_v11  ;;  %v19680_v2 = vpop.eup %19679 }
0x48a2   :  { %18568 = vmatprep.subr.mxu1 %v19795_v11  ;;  %v12259_v22 = vmul.f32 %v19680_v2, %v19664_v61  ;;  %v12253_v29 = vpop.xlane.xlu0 %12252  ;;  %v12949_v0 = vpop.permute.xlu1 %12948 }
0x48a3   :  { %19689 = vrcp.f32 %v12253_v29 }
0x48a4   :  { %18556 = vmatmul.mubr.msk.f32.vlgmr.msra.gmra.mrb[108].mxu0 %vm3331_vm11, %v12259_v22 }
0x48a5   :  { %v19682_v7 = vpop.eup %19681  ;;  %18564 = vmatpush3.msra.mxu0 %v20648_v56  ;;  %18565 = vmatprep.mubr.msk.f32.mxu0 %vm19794_vm0, %v19795_v11 }
0x48a6   :  { %v19684_v62 = vpop.eup %19683  ;;  %v12263_v36 = vmul.f32 %v19682_v7, %v19666_v40  ;;  %18573 = vmatprep.subr.mxu0 %v19795_v11 }
0x48a7   :  { %v12261_v49 = vmul.f32 %v19684_v62, %v19668_v38 }
0x48a8   :  { %18566 = vmatmul.mubr.msk.f32.vlgmr.msra.gmra.mrb[110].mxu0 %vm3331_vm11, %v12263_v36 }
0x48a9   :  { %v19686_v27 = vpop.eup %19685  ;;  %18561 = vmatmul.mubr.msk.f32.vlgmr.msra.gmra.mrb[158].mxu1 %vm3331_vm11, %v12261_v49  ;;  %18574 = vmatpush3.msra.mxu0 %v20652_v30 }
0x48aa   :  { %v19688_v16 = vpop.eup %19687  ;;  %v12267_v61 = vmul.f32 %v19686_v27, %v19670_v6  ;;  %18569 = vmatpush3.msra.mxu1 %v20650_v20  ;;  %18570 = vmatprep.mubr.msk.f32.mxu1 %vm19794_vm0, %v19795_v11 }
0x48ab   :  { %v12265_v18 = vmul.f32 %v19688_v16, %v19672_v21  ;;  %18575 = vmatprep.mubr.msk.f32.mxu0 %vm19794_vm0, %v19795_v11  ;;  %18578 = vmatprep.subr.mxu1 %v19795_v11 }
0x48ac   :  { %18576 = vmatmul.mubr.msk.f32.vlgmr.msra.gmra.mrb[112].mxu0 %vm3331_vm11, %v12267_v61  ;;  %19271 = vmatprep.subr.bf16.mxu0 %v19793_v3 }
0x48ad   :  { %v19690_v40 = vpop.eup %19689  ;;  %18571 = vmatmul.mubr.msk.f32.vlgmr.msra.gmra.mrb[160].mxu1 %vm3331_vm11, %v12265_v18  ;;  %19273 = vmatpush3.bf16.msra.mxu0 %v20800_v28 }
0x48ae   :  { %v12269_v38 = vmul.f32 %v19690_v40, %v19674_v43  ;;  %18579 = vmatpush3.msra.mxu1 %v20654_v12  ;;  %18580 = vmatprep.mubr.msk.f32.mxu1 %vm19794_vm0, %v19795_v11 }
0x48af   :  { %19277 = vmatprep.subr.bf16.mxu1 %v19793_v3  ;;  %19274 = vmatprep.subr.bf16.mxu0 %v19793_v3 }
0x48b0   :  { %18591 = vmatprep.mubr.msk.f32.mxu0 %vm19794_vm0, %v19795_v11 }
0x48b1   :  { %18581 = vmatmul.mubr.msk.f32.vlgmr.msra.gmra.mrb[162].mxu1 %vm3331_vm11, %v12269_v38  ;;  %19276 = vmatpush3.bf16.msra.mxu0 %v20810_v51 }
0x48b2   :  { %19279 = vmatpush3.bf16.msra.mxu1 %v20755_v37  ;;  %18602 = vmatprep.mubr.msk.f32.mxu1 %vm19794_vm0, %v19795_v11 }
0x48b3   :  { %19280 = vmatprep.subr.bf16.mxu1 %v19793_v3  ;;  %19283 = vmatprep.subr.bf16.mxu0 %v19793_v3 }
0x48b6   :  { %19282 = vmatpush3.bf16.msra.mxu1 %v20773_v9 }
0x48b7   :  { %19307 = vmatprep.subr.bf16.mxu1 %v19793_v3 }
0x48b9   :  { %18603 = vmatmul.mubr.msk.f32.vlgmr.msra.gmra.mrb[164].mxu1 %vm57_vm1, %v12949_v0 }
0x48ba   :  { %19309 = vmatpush3.bf16.msra.mxu1 %v20512_v5  ;;  %18648 = vmatprep.mubr.msk.f32.mxu1 %vm19794_vm0, %v19795_v11 }
0x48bb   :  { %19310 = vmatprep.subr.bf16.mxu1 %v19793_v3 }
0x48be   :  { %19312 = vmatpush3.bf16.msra.mxu1 %v20530_v14 }
0x48bf   :  { %19313 = vmatprep.subr.bf16.mxu1 %v19793_v3 }
0x48c1   :  { %18649 = vmatmul.mubr.msk.f32.vlgmr.msra.gmra.mrb[166].mxu1 %vm57_vm1, %v12949_v0 }
0x48c2   :  { %19315 = vmatpush3.bf16.msra.mxu1 %v20501_v1  ;;  %18659 = vmatprep.mubr.msk.f32.mxu1 %vm19794_vm0, %v19795_v11 }
0x48c3   :  { %19316 = vmatprep.subr.bf16.mxu1 %v19793_v3 }
0x48c6   :  { %19318 = vmatpush3.bf16.msra.mxu1 %v20521_v13 }
0x48c7   :  { %18662 = vmatprep.subr.mxu1 %v19795_v11 }
0x496f   :  { %v12339_v59 = vpop.f32.mrb[106].mxu0 }
0x4970   :  { %v18547_v6 = vpop.f32.mrb[107].mxu0 }
0x4973   :  { %v12412_v21 = vpop.f32.mrb[156].mxu1 }
0x4974   :  { %v12862_v19 = vrot.slane %v12412_v21, 7  ;;  %v18552_v23 = vpop.f32.mrb[157].mxu1 }
0x4976   :  { %v12863_v43 = vsel %vm3932_vm12, %v12862_v19, %v12339_v59 }
0x4977   :  { %v12485_v31 = vpop.f32.mrb[108].mxu0 }
0x4978   :  { %v12864_v58 = vrot.slane %v12485_v31, 6  ;;  %v18557_v4 = vpop.f32.mrb[109].mxu0 }
0x497a   :  { %v12865_v47 = vsel %vm3935_vm13, %v12864_v58, %v12863_v43 }
0x497b   :  { %v12631_v42 = vpop.f32.mrb[110].mxu0 }
0x497c   :  { %v12558_v63 = vpop.f32.mrb[158].mxu1  ;;  %v12868_v10 = vrot.slane %v12631_v42, 4  ;;  %v18567_v15 = vpop.f32.mrb[111].mxu0 }
0x497d   :  { %v12866_v52 = vrot.slane %v12558_v63, 5  ;;  %v18562_v34 = vpop.f32.mrb[159].mxu1 }
0x497f   :  { %v12867_v8 = vsel %vm3938_vm14, %v12866_v52, %v12865_v47  ;;  %v12777_v50 = vpop.f32.mrb[112].mxu0 }
0x4980   :  { %v12869_v2 = vsel %vm3941_vm15, %v12868_v10, %v12867_v8  ;;  %v12704_v22 = vpop.f32.mrb[160].mxu1  ;;  %v12872_v29 = vrot.slane %v12777_v50, 2  ;;  %v18577_v7 = vpop.f32.mrb[113].mxu0 }
0x4981   :  { %v12870_v62 = vrot.slane %v12704_v22, 3  ;;  %v18572_v36 = vpop.f32.mrb[161].mxu1  ;;  %v16830_v22 = vld [vmem:[%s22341_s2 + $0x28] sm:$0xff] }
0x4983   :  { %v12871_v49 = vsel %vm3944_vm2, %v12870_v62, %v12869_v2  ;;  %v13121_v2 = vstv %s13120_s15 }
0x4984   :  { %v12873_v27 = vsel %vm3947_vm3, %v12872_v29, %v12871_v49  ;;  %v12850_v16 = vpop.f32.mrb[162].mxu1  ;;  %vm13122_vm8 = vcmp.eq.s32.totalorder %v13121_v2, 1 }
0x4985   :  { %v12874_v61 = vrot.slane %v12850_v16, 1  ;;  %v18582_v18 = vpop.f32.mrb[163].mxu1  ;;  %v21977_v16 = vld [vmem:[%s22348_s9] ss:$0 sm:$0xff] }
0x4987   :  { %v12875_v40 = vsel %vm3950_vm4, %v12874_v61, %v12873_v27 }
0x4988   :  { %18592 = vmatmul.mubr.msk.f32.vlgmr.msra.gmra.mrb[114].mxu0 %vm57_vm1, %v12875_v40 }
0x4989   :  { %19285 = vmatpush3.bf16.msra.mxu0 %v20823_v60  ;;  %18637 = vmatprep.mubr.msk.f32.mxu0 %vm19794_vm0, %v19795_v11 }
0x498a   :  { %19286 = vmatprep.subr.bf16.mxu0 %v19793_v3 }
0x498c   :  { %v13018_v38 = vpop.f32.mrb[164].mxu1 }
0x498d   :  { %v18604_v0 = vpop.f32.mrb[165].mxu1  ;;  %19288 = vmatpush3.bf16.msra.mxu0 %v20856_v48 }
0x498e   :  { %19289 = vmatprep.subr.bf16.mxu0 %v19793_v3 }
0x4991   :  { %19291 = vmatpush3.bf16.msra.mxu0 %v20862_v41 }
0x4992   :  { %19292 = vmatprep.subr.bf16.mxu0 %v19793_v3 }
0x4994   :  { %v13190_v59 = vpop.f32.mrb[166].mxu1 }
0x4995   :  { %v18650_v6 = vpop.f32.mrb[167].mxu1  ;;  %19294 = vmatpush3.bf16.msra.mxu0 %v20872_v44 }
0x4996   :  { %19295 = vmatprep.subr.bf16.mxu0 %v19793_v3 }
0x4999   :  { %19297 = vmatpush3.bf16.msra.mxu0 %v20882_v33 }
0x499a   :  { %19298 = vmatprep.subr.bf16.mxu0 %v19793_v3 }
0x499d   :  { %19300 = vmatpush3.bf16.msra.mxu0 %v20892_v26 }
0x499e   :  { %19301 = vmatprep.subr.bf16.mxu0 %v19793_v3 }
0x49a1   :  { %19303 = vmatpush3.bf16.msra.mxu0 %v20902_v53 }
0x49a2   :  { %19304 = vmatprep.subr.bf16.mxu0 %v19793_v3 }
0x49a5   :  { %19306 = vmatpush3.bf16.msra.mxu0 %v20912_v57 }
0x49a6   :  { %18682 = vmatprep.subr.mxu0 %v19795_v11 }
0x4a5b   :  { %v12944_v21 = vpop.f32.mrb[114].mxu0 }
0x4a5c   :  { %v13019_v19 = vadd.f32 %v13018_v38, %v12944_v21  ;;  %v18593_v23 = vpop.f32.mrb[115].mxu0 }
0x4a5e   :  { %v13022_v43 = vadd.f32 %v21747_v35, %v13019_v19 }
0x4a60   :  { %16826 = vst [vmem:[%s22351_s12 + $0x28] sm:$0xff] %v13022_v43  ;;  %13025 = vmax.xlane.f32.xlu0 %v13022_v43 }
0x4aed   :  { %v13026_v31 = vpop.xlane.xlu0 %13025 }
0x4aee   :  { %vm13027_vm5 = vcmp.eq.f32.partialorder %v13022_v43, %v13026_v31 }
0x4aef   :  { %v13028_v58 = vsel %vm13027_vm5, %v20844_v55, 128 }
0x4af0   :  { %v13030_v4 = vshra.s32 %v13028_v58, 16  ;;  %v13029_v42 = vand.u32 65535, %v13028_v58 }
0x4af2   :  { %v13032_v47 = vcvt.s32.f32 %v13030_v4  ;;  %v13031_v63 = vcvt.s32.f32 %v13029_v42 }
0x4af4   :  { %13033 = vmin.xlane.f32.xlu0 %v13032_v47 }
0x4b81   :  { %v13034_v10 = vpop.xlane.xlu0 %13033 }
0x4b82   :  { %vm13035_vm6 = vcmp.eq.f32.partialorder %v13032_v47, %v13034_v10  ;;  %v13040_v52 = vcvt.f32.s32 %v13034_v10 }
0x4b83   :  { %v13036_v15 = vsel %vm13035_vm6, %v13031_v63, inf }
0x4b84   :  { %13037 = vmin.xlane.f32.xlu0 %v13036_v15  ;;  %v13041_v34 = vshll.u32 %v13040_v52, 16 }
0x4c11   :  { %v13038_v35 = vpop.xlane.xlu0 %13037 }
0x4c12   :  { %v13039_v8 = vcvt.f32.s32 %v13038_v35 }
0x4c14   :  { %v13042_v50 = vadd.s32 %v13041_v34, %v13039_v8 }
0x4c16   :  { %vm13043_vm7 = vcmp.eq.s32.totalorder %v20844_v55, %v13042_v50 }
0x4c17   :  { %18638 = vmatmul.mubr.msk.f32.vlgmr.msra.gmra.mrb[116].mxu0 %vm13043_vm7, %v19799_v25 }
0x4c18   :  { %18683 = vmatpush3.xpose.msk.msra.mxu0 %vm57_vm1, %v20648_v56  ;;  %18684 = vmatprep.mubr.msk.f32.mxu0 %vm19794_vm0, %v19795_v11 }
0x4c19   :  { %18692 = vmatprep.subr.mxu0 %v19795_v11 }
0x4cea   :  { %v13112_v29 = vpop.f32.mrb[116].mxu0 }
0x4ceb   :  { %v13123_v7 = vsel %vm13122_vm8, %v16830_v22, %v13112_v29  ;;  %v18639_v62 = vpop.f32.mrb[117].mxu0 }
0x4cec   :  { %18660 = vmatmul.mubr.msk.f32.vlgmr.msra.gmra.mrb[168].mxu1 %vm57_vm1, %v13123_v7 }
0x4ced   :  { %18663 = vmatpush3.xpose.msk.msra.mxu1 %vm57_vm1, %v20602_v24  ;;  %18664 = vmatprep.mubr.msk.f32.mxu1 %vm19794_vm0, %v19795_v11 }
0x4cee   :  { %18667 = vmatprep.subr.mxu1 %v19795_v11 }
0x4dbf   :  { %v13263_v36 = vpop.f32.mrb[168].mxu1 }
0x4dc0   :  { %v13264_v49 = vadd.f32 %v13263_v36, %v13190_v59  ;;  %v18661_v27 = vpop.f32.mrb[169].mxu1 }
0x4dc2   :  { %v13267_v61 = vadd.f32 %v21977_v16, %v13264_v49 }
0x4dc4   :  { %19691 = vtanh.f32 %v13267_v61  ;;  %v16833_v40 = vmul.f32 -1.442695, %v13267_v61 }
0x4dc6   :  { %19693 = vpow2.f32 %v16833_v40 }
0x4dce   :  { %v19692_v18 = vpop.eup %19691 }
0x4dcf   :  { %13277 = vrot.lane.b32.xlu0 %v19692_v18, %s19796_s25 }
0x4dd0   :  { %v19694_v38 = vpop.eup %19693 }
0x4dd1   :  { %v13271_v0 = vadd.f32 1.0, %v19694_v38 }
0x4dd3   :  { %19695 = vrcp.f32 %v13271_v0 }
0x4ddd   :  { %v19696_v6 = vpop.eup %19695 }
0x4dde   :  { %v13275_v19 = vmul.f32 %v19696_v6, %v21774_v17 }
0x4e41   :  { %v13278_v21 = vpop.permute.xlu0 %13277 }
0x4e42   :  { %v13280_v59 = vmul.f32 %v19696_v6, %v13278_v21 }
0x4e44   :  { %13282 = vrot.lane.b32.xlu1 %v13280_v59, %s19797_s26 }
0x4eb6   :  { %v13283_v23 = vpop.permute.xlu1 %13282 }
0x4eb7   :  { %v21983_v43 = vadd.f32 %v13283_v23, %v13275_v19 }
0x4eb9   :  { %19697 = vtanh.f32 %v21983_v43 }
0x4ec3   :  { %v19698_v31 = vpop.eup %19697 }
0x4ec4   :  { %13288 = vrot.lane.b32.xlu1 %v19698_v31, %s19796_s25 }
0x4f36   :  { %v13289_v58 = vpop.permute.xlu1 %13288 }
0x4f37   :  { %v21987_v4 = vmul.f32 %v19696_v6, %v13289_v58 }
0x4f39   :  { %v13293_v47 = vcombine.high %v21987_v4, %v21987_v4  ;;  %v13300_v42 = vrot.slane %v21987_v4, %v19957_v39 }
0x4f3b   :  { %v13307_v63 = vrot.slane %v13293_v47, %v19957_v39  ;;  %v13308_v17 = vcombine.high %v13300_v42, %v13300_v42  ;;  %v13316_v10 = vrot.slane %v13300_v42, %v19957_v39 }
0x4f3d   :  { %v13309_v15 = vcombine.high %v13307_v63, %v13307_v63  ;;  %v13330_v52 = vrot.slane %v13308_v17, %v19957_v39  ;;  %v13345_v35 = vrot.slane %v13316_v10, %v19963_v46  ;;  %v13338_v2 = vcombine.high %v13316_v10, %v13316_v10 }
0x4f3e   :  { %v13323_v62 = vrot.slane %v13307_v63, %v19957_v39 }
0x4f3f   :  { %v13340_v34 = vcombine.high %v13330_v52, %v13330_v52  ;;  %13346 = vrot.lane.b32.xlu1 %v13345_v35, %s19797_s26  ;;  %v13337_v50 = vrot.slane %v13309_v15, %v19957_v39  ;;  %v13423_v22 = vrot.slane %v13330_v52, %v19963_v46  ;;  %v13501_v36 = vrot.slane %v13338_v2, %v19963_v46 }
0x4f40   :  { %v13657_v27 = vrot.slane %v13323_v62, %v19963_v46  ;;  %v13339_v61 = vcombine.high %v13323_v62, %v13323_v62 }
0x4f41   :  { %v13579_v8 = vrot.slane %v13340_v34, %v19963_v46  ;;  %v13735_v29 = vrot.slane %v13337_v50, %v19963_v46  ;;  %v13341_v7 = vcombine.high %v13337_v50, %v13337_v50 }
0x4f42   :  { %v13813_v18 = vrot.slane %v13339_v61, %v19963_v46 }
0x4f43   :  { %13580 = vrot.lane.b32.xlu0 %v13579_v8, %s19797_s26  ;;  %13424 = vrot.lane.b32.xlu1 %v13423_v22, %s19797_s26  ;;  %v13891_v49 = vrot.slane %v13341_v7, %v19963_v46 }
0x4f47   :  { %13736 = vrot.lane.b32.xlu0 %v13735_v29, %s19797_s26  ;;  %13502 = vrot.lane.b32.xlu1 %v13501_v36, %s19797_s26 }
0x4f4b   :  { %13892 = vrot.lane.b32.xlu0 %v13891_v49, %s19797_s26  ;;  %13658 = vrot.lane.b32.xlu1 %v13657_v27, %s19797_s26 }
0x4f4f   :  { %13814 = vrot.lane.b32.xlu1 %v13813_v18, %s19797_s26 }
0x4fb1   :  { %v13347_v40 = vpop.permute.xlu1 %13346 }
0x4fb2   :  { %18665 = vmatmul.mubr.msk.f32.vlgmr.msra.gmra.mrb[170].mxu1 %vm57_vm1, %v13347_v40 }
0x4fb3   :  { %18668 = vmatpush3.xpose.msk.msra.mxu1 %vm57_vm1, %v20618_v32  ;;  %18669 = vmatprep.mubr.msk.f32.mxu1 %vm19794_vm0, %v19795_v11 }
0x4fb4   :  { %18672 = vmatprep.subr.mxu1 %v19795_v11 }
0x4fb5   :  { %v13425_v38 = vpop.permute.xlu1 %13424  ;;  %v13581_v0 = vpop.permute.xlu0 %13580 }
0x4fb6   :  { %18670 = vmatmul.mubr.msk.f32.vlgmr.msra.gmra.mrb[172].mxu1 %vm57_vm1, %v13425_v38 }
0x4fb7   :  { %18673 = vmatpush3.xpose.msk.msra.mxu1 %vm57_vm1, %v20644_v45  ;;  %18674 = vmatprep.mubr.msk.f32.mxu1 %vm19794_vm0, %v19795_v11 }
0x4fb8   :  { %18677 = vmatprep.subr.mxu1 %v19795_v11 }
0x4fb9   :  { %v13503_v6 = vpop.permute.xlu1 %13502  ;;  %v13737_v59 = vpop.permute.xlu0 %13736 }
0x4fba   :  { %18675 = vmatmul.mubr.msk.f32.vlgmr.msra.gmra.mrb[174].mxu1 %vm57_vm1, %v13503_v6 }
0x4fbb   :  { %18678 = vmatpush3.xpose.msk.msra.mxu1 %vm57_vm1, %v20646_v54  ;;  %18679 = vmatprep.mubr.msk.f32.mxu1 %vm19794_vm0, %v19795_v11 }
0x4fbc   :  { %18687 = vmatprep.subr.mxu1 %v19795_v11 }
0x4fbd   :  { %v13659_v21 = vpop.permute.xlu1 %13658  ;;  %v13893_v23 = vpop.permute.xlu0 %13892 }
0x4fbe   :  { %18680 = vmatmul.mubr.msk.f32.vlgmr.msra.gmra.mrb[176].mxu1 %vm57_vm1, %v13581_v0  ;;  %18685 = vmatmul.mubr.msk.f32.vlgmr.msra.gmra.mrb[118].mxu0 %vm57_vm1, %v13659_v21 }
0x4fbf   :  { %18688 = vmatpush3.xpose.msk.msra.mxu1 %vm57_vm1, %v20650_v20  ;;  %18693 = vmatpush3.xpose.msk.msra.mxu0 %vm57_vm1, %v20652_v30 }
0x4fc0   :  { %18689 = vmatprep.mubr.msk.f32.mxu1 %vm19794_vm0, %v19795_v11  ;;  %18694 = vmatprep.mubr.msk.f32.mxu0 %vm19794_vm0, %v19795_v11 }
0x4fc1   :  { %18697 = vmatprep.subr.mxu1 %v19795_v11  ;;  %18702 = vmatprep.subr.mxu0 %v19795_v11  ;;  %v13815_v19 = vpop.permute.xlu1 %13814 }
0x4fc2   :  { %18690 = vmatmul.mubr.msk.f32.vlgmr.msra.gmra.mrb[178].mxu1 %vm57_vm1, %v13737_v59  ;;  %18695 = vmatmul.mubr.msk.f32.vlgmr.msra.gmra.mrb[120].mxu0 %vm57_vm1, %v13815_v19 }
0x4fc3   :  { %18698 = vmatpush3.xpose.msk.msra.mxu1 %vm57_vm1, %v20654_v12  ;;  %18703 = vmatpush3.msra.mxu0 %v20602_v24 }
0x4fc4   :  { %18699 = vmatprep.mubr.msk.f32.mxu1 %vm19794_vm0, %v19795_v11  ;;  %18707 = vmatprep.subr.mxu1 %v19795_v11 }
0x4fc5   :  { %18704 = vmatprep.mubr.msk.f32.mxu0 %vm19794_vm0, %v19795_v11  ;;  %18712 = vmatprep.subr.mxu0 %v19795_v11 }
0x4fc6   :  { %18700 = vmatmul.mubr.msk.f32.vlgmr.msra.gmra.mrb[180].mxu1 %vm57_vm1, %v13893_v23 }
0x4fc7   :  { %18708 = vmatpush3.msra.mxu1 %v20618_v32  ;;  %18709 = vmatprep.mubr.msk.f32.mxu1 %vm19794_vm0, %v19795_v11 }
0x4fc8   :  { %18717 = vmatprep.subr.mxu1 %v19795_v11 }
0x5085   :  { %v13416_v31 = vpop.f32.mrb[170].mxu1 }
0x5086   :  { %v18666_v58 = vpop.f32.mrb[171].mxu1  ;;  %v13966_v47 = vsel %vm3241_vm10, %v13416_v31, -inf }
0x5087   :  { %13967 = vmax.xlane.f32.xlu1 %v13966_v47 }
0x5089   :  { %v13494_v42 = vpop.f32.mrb[172].mxu1 }
0x508a   :  { %v18671_v63 = vpop.f32.mrb[173].mxu1  ;;  %v13969_v17 = vsel %vm3241_vm10, %v13494_v42, -inf }
0x508b   :  { %13970 = vmax.xlane.f32.xlu0 %v13969_v17 }
0x508d   :  { %v13572_v10 = vpop.f32.mrb[174].mxu1 }
0x508e   :  { %v18676_v15 = vpop.f32.mrb[175].mxu1  ;;  %v13972_v52 = vsel %vm3241_vm10, %v13572_v10, -inf }
0x508f   :  { %13973 = vmax.xlane.f32.xlu0 %v13972_v52 }
0x5091   :  { %v13650_v35 = vpop.f32.mrb[176].mxu1  ;;  %v13728_v34 = vpop.f32.mrb[118].mxu0 }
0x5092   :  { %v18681_v8 = vpop.f32.mrb[177].mxu1  ;;  %v18686_v50 = vpop.f32.mrb[119].mxu0  ;;  %v13978_v2 = vsel %vm3241_vm10, %v13728_v34, -inf  ;;  %v13975_v22 = vsel %vm3241_vm10, %v13650_v35, -inf }
0x5093   :  { %13979 = vmax.xlane.f32.xlu0 %v13978_v2  ;;  %13976 = vmax.xlane.f32.xlu1 %v13975_v22 }
0x5095   :  { %v13806_v29 = vpop.f32.mrb[178].mxu1  ;;  %v13884_v7 = vpop.f32.mrb[120].mxu0 }
0x5096   :  { %v18691_v62 = vpop.f32.mrb[179].mxu1  ;;  %v18696_v36 = vpop.f32.mrb[121].mxu0  ;;  %v13984_v49 = vsel %vm3241_vm10, %v13884_v7, -inf  ;;  %v13981_v27 = vsel %vm3241_vm10, %v13806_v29, -inf }
0x5097   :  { %13985 = vmax.xlane.f32.xlu0 %v13984_v49  ;;  %13982 = vmax.xlane.f32.xlu1 %v13981_v27 }
0x5099   :  { %v13962_v61 = vpop.f32.mrb[180].mxu1 }
0x509a   :  { %v18701_v18 = vpop.f32.mrb[181].mxu1  ;;  %v13987_v40 = vsel %vm3241_vm10, %v13962_v61, -inf }
0x509b   :  { %13988 = vmax.xlane.f32.xlu1 %v13987_v40 }
0x5114   :  { %v13968_v38 = vpop.xlane.xlu1 %13967 }
0x5115   :  { %v13990_v0 = vsub.f32 %v13416_v31, %v13968_v38 }
0x5117   :  { %v13998_v6 = vmul.f32 1.442695, %v13990_v0 }
0x5118   :  { %v13971_v21 = vpop.xlane.xlu0 %13970 }
0x5119   :  { %19699 = vpow2.f32 %v13998_v6  ;;  %v13991_v59 = vsub.f32 %v13494_v42, %v13971_v21 }
0x511b   :  { %v14000_v19 = vmul.f32 1.442695, %v13991_v59 }
0x511c   :  { %v13974_v23 = vpop.xlane.xlu0 %13973 }
0x511d   :  { %19701 = vpow2.f32 %v14000_v19  ;;  %v13992_v58 = vsub.f32 %v13572_v10, %v13974_v23 }
0x511f   :  { %v14002_v47 = vmul.f32 1.442695, %v13992_v58 }
0x5120   :  { %v13980_v63 = vpop.xlane.xlu0 %13979  ;;  %v13977_v17 = vpop.xlane.xlu1 %13976 }
0x5121   :  { %19703 = vpow2.f32 %v14002_v47  ;;  %v13994_v15 = vsub.f32 %v13728_v34, %v13980_v63  ;;  %v13993_v52 = vsub.f32 %v13650_v35, %v13977_v17 }
0x5123   :  { %v19700_v8 = vpop.eup %19699  ;;  %v14006_v50 = vmul.f32 1.442695, %v13994_v15  ;;  %v14004_v2 = vmul.f32 1.442695, %v13993_v52 }
0x5124   :  { %v13986_v22 = vpop.xlane.xlu0 %13985  ;;  %v13983_v62 = vpop.xlane.xlu1 %13982  ;;  %v14014_v31 = vsel %vm3241_vm10, %v19700_v8, 0.0 }
0x5125   :  { %19705 = vpow2.f32 %v14006_v50  ;;  %v13996_v36 = vsub.f32 %v13884_v7, %v13986_v22  ;;  %v13995_v42 = vsub.f32 %v13806_v29, %v13983_v62  ;;  %14015 = vadd.xlane.f32.xlu0 %v14014_v31 }
0x5126   :  { %19707 = vpow2.f32 %v14004_v2 }
0x5127   :  { %v19702_v49 = vpop.eup %19701  ;;  %v14010_v10 = vmul.f32 1.442695, %v13996_v36  ;;  %v14008_v27 = vmul.f32 1.442695, %v13995_v42 }
0x5128   :  { %v13989_v18 = vpop.xlane.xlu1 %13988  ;;  %v14017_v40 = vsel %vm3241_vm10, %v19702_v49, 0.0 }
0x5129   :  { %19709 = vpow2.f32 %v14010_v10  ;;  %v13997_v35 = vsub.f32 %v13962_v61, %v13989_v18  ;;  %14018 = vadd.xlane.f32.xlu1 %v14017_v40 }
0x512a   :  { %19711 = vpow2.f32 %v14008_v27 }
0x512b   :  { %v19704_v34 = vpop.eup %19703  ;;  %v14012_v38 = vmul.f32 1.442695, %v13997_v35 }
0x512c   :  { %v14020_v0 = vsel %vm3241_vm10, %v19704_v34, 0.0 }
0x512d   :  { %19713 = vpow2.f32 %v14012_v38  ;;  %14021 = vadd.xlane.f32.xlu0 %v14020_v0 }
0x512f   :  { %v19706_v7 = vpop.eup %19705 }
0x5130   :  { %v19708_v29 = vpop.eup %19707  ;;  %v14026_v6 = vsel %vm3241_vm10, %v19706_v7, 0.0 }
0x5131   :  { %14027 = vadd.xlane.f32.xlu0 %v14026_v6  ;;  %v14023_v21 = vsel %vm3241_vm10, %v19708_v29, 0.0 }
0x5132   :  { %14024 = vadd.xlane.f32.xlu1 %v14023_v21 }
0x5133   :  { %v19710_v59 = vpop.eup %19709 }
0x5134   :  { %v19712_v19 = vpop.eup %19711  ;;  %v14032_v61 = vsel %vm3241_vm10, %v19710_v59, 0.0 }
0x5135   :  { %14033 = vadd.xlane.f32.xlu0 %v14032_v61  ;;  %v14029_v23 = vsel %vm3241_vm10, %v19712_v19, 0.0 }
0x5136   :  { %14030 = vadd.xlane.f32.xlu1 %v14029_v23 }
0x5137   :  { %v19714_v58 = vpop.eup %19713 }
0x5138   :  { %v14035_v47 = vsel %vm3241_vm10, %v19714_v58, 0.0 }
0x513a   :  { %14036 = vadd.xlane.f32.xlu1 %v14035_v47 }
0x514b   :  { %14732 = vrot.lane.b32.xlu0 %v21987_v4, %s19797_s26 }
0x51b2   :  { %v14016_v63 = vpop.xlane.xlu0 %14015 }
0x51b3   :  { %19715 = vrcp.f32 %v14016_v63 }
0x51b6   :  { %v14019_v17 = vpop.xlane.xlu1 %14018 }
0x51b7   :  { %19717 = vrcp.f32 %v14019_v17 }
0x51ba   :  { %v14022_v15 = vpop.xlane.xlu0 %14021 }
0x51bb   :  { %19719 = vrcp.f32 %v14022_v15 }
0x51bd   :  { %v19716_v52 = vpop.eup %19715 }
0x51be   :  { %v14039_v50 = vmul.f32 %v19716_v52, %v19700_v8  ;;  %v14028_v2 = vpop.xlane.xlu0 %14027 }
0x51bf   :  { %19721 = vrcp.f32 %v14028_v2  ;;  %v14025_v22 = vpop.xlane.xlu1 %14024 }
0x51c0   :  { %19723 = vrcp.f32 %v14025_v22  ;;  %18705 = vmatmul.mubr.msk.f32.vlgmr.msra.gmra.mrb[122].mxu0 %vm3331_vm11, %v14039_v50 }
0x51c1   :  { %v19718_v62 = vpop.eup %19717  ;;  %18713 = vmatpush3.msra.mxu0 %v20644_v45  ;;  %18714 = vmatprep.mubr.msk.f32.mxu0 %vm19794_vm0, %v19795_v11 }
0x51c2   :  { %v14041_v4 = vmul.f32 %v19718_v62, %v19702_v49  ;;  %v14034_v31 = vpop.xlane.xlu0 %14033  ;;  %18722 = vmatprep.subr.mxu0 %v19795_v11 }
0x51c3   :  { %19725 = vrcp.f32 %v14034_v31  ;;  %v14031_v36 = vpop.xlane.xlu1 %14030 }
0x51c4   :  { %19727 = vrcp.f32 %v14031_v36  ;;  %18710 = vmatmul.mubr.msk.f32.vlgmr.msra.gmra.mrb[182].mxu1 %vm3331_vm11, %v14041_v4 }
0x51c5   :  { %v19720_v8 = vpop.eup %19719  ;;  %18718 = vmatpush3.msra.mxu1 %v20646_v54  ;;  %18719 = vmatprep.mubr.msk.f32.mxu1 %vm19794_vm0, %v19795_v11 }
0x51c6   :  { %v14043_v42 = vmul.f32 %v19720_v8, %v19704_v34  ;;  %18727 = vmatprep.subr.mxu1 %v19795_v11  ;;  %v14733_v6 = vpop.permute.xlu0 %14732 }
0x51c7   :  { %v14037_v10 = vpop.xlane.xlu1 %14036 }
0x51c8   :  { %19729 = vrcp.f32 %v14037_v10  ;;  %18715 = vmatmul.mubr.msk.f32.vlgmr.msra.gmra.mrb[124].mxu0 %vm3331_vm11, %v14043_v42 }
0x51c9   :  { %v19722_v49 = vpop.eup %19721  ;;  %18723 = vmatpush3.msra.mxu0 %v20648_v56  ;;  %18724 = vmatprep.mubr.msk.f32.mxu0 %vm19794_vm0, %v19795_v11 }
0x51ca   :  { %v19724_v27 = vpop.eup %19723  ;;  %v14047_v18 = vmul.f32 %v19722_v49, %v19706_v7  ;;  %18732 = vmatprep.subr.mxu0 %v19795_v11 }
0x51cb   :  { %v14045_v40 = vmul.f32 %v19724_v27, %v19708_v29 }
0x51cc   :  { %18725 = vmatmul.mubr.msk.f32.vlgmr.msra.gmra.mrb[126].mxu0 %vm3331_vm11, %v14047_v18 }
0x51cd   :  { %v19726_v35 = vpop.eup %19725  ;;  %18720 = vmatmul.mubr.msk.f32.vlgmr.msra.gmra.mrb[184].mxu1 %vm3331_vm11, %v14045_v40  ;;  %18733 = vmatpush3.msra.mxu0 %v20652_v30 }
0x51ce   :  { %v19728_v34 = vpop.eup %19727  ;;  %v14051_v38 = vmul.f32 %v19726_v35, %v19710_v59  ;;  %18728 = vmatpush3.msra.mxu1 %v20650_v20  ;;  %18729 = vmatprep.mubr.msk.f32.mxu1 %vm19794_vm0, %v19795_v11 }
0x51cf   :  { %v14049_v0 = vmul.f32 %v19728_v34, %v19712_v19  ;;  %18734 = vmatprep.mubr.msk.f32.mxu0 %vm19794_vm0, %v19795_v11  ;;  %18737 = vmatprep.subr.mxu1 %v19795_v11 }
0x51d0   :  { %18735 = vmatmul.mubr.msk.f32.vlgmr.msra.gmra.mrb[128].mxu0 %vm3331_vm11, %v14051_v38  ;;  %19319 = vmatprep.subr.bf16.mxu0 %v19793_v3 }
0x51d1   :  { %18730 = vmatmul.mubr.msk.f32.vlgmr.msra.gmra.mrb[186].mxu1 %vm3331_vm11, %v14049_v0  ;;  %19321 = vmatpush3.bf16.msra.mxu0 %v20800_v28 }
0x51d2   :  { %v19730_v7 = vpop.eup %19729  ;;  %18738 = vmatpush3.msra.mxu1 %v20654_v12  ;;  %18739 = vmatprep.mubr.msk.f32.mxu1 %vm19794_vm0, %v19795_v11 }
0x51d3   :  { %v14053_v29 = vmul.f32 %v19730_v7, %v19714_v58  ;;  %19325 = vmatprep.subr.bf16.mxu1 %v19793_v3  ;;  %19322 = vmatprep.subr.bf16.mxu0 %v19793_v3 }
0x51d4   :  { %18750 = vmatprep.mubr.msk.f32.mxu0 %vm19794_vm0, %v19795_v11 }
0x51d5   :  { %18740 = vmatmul.mubr.msk.f32.vlgmr.msra.gmra.mrb[188].mxu1 %vm3331_vm11, %v14053_v29  ;;  %19324 = vmatpush3.bf16.msra.mxu0 %v20810_v51 }
0x51d6   :  { %19327 = vmatpush3.bf16.msra.mxu1 %v20755_v37  ;;  %18761 = vmatprep.mubr.msk.f32.mxu1 %vm19794_vm0, %v19795_v11 }
0x51d7   :  { %19328 = vmatprep.subr.bf16.mxu1 %v19793_v3  ;;  %19331 = vmatprep.subr.bf16.mxu0 %v19793_v3 }
0x51da   :  { %19330 = vmatpush3.bf16.msra.mxu1 %v20773_v9 }
0x51db   :  { %19355 = vmatprep.subr.bf16.mxu1 %v19793_v3 }
0x51dd   :  { %18762 = vmatmul.mubr.msk.f32.vlgmr.msra.gmra.mrb[190].mxu1 %vm57_vm1, %v14733_v6 }
0x51de   :  { %19357 = vmatpush3.bf16.msra.mxu1 %v20512_v5  ;;  %18807 = vmatprep.mubr.msk.f32.mxu1 %vm19794_vm0, %v19795_v11 }
0x51df   :  { %19358 = vmatprep.subr.bf16.mxu1 %v19793_v3 }
0x51e2   :  { %19360 = vmatpush3.bf16.msra.mxu1 %v20530_v14 }
0x51e3   :  { %19361 = vmatprep.subr.bf16.mxu1 %v19793_v3 }
0x51e5   :  { %18808 = vmatmul.mubr.msk.f32.vlgmr.msra.gmra.mrb[192].mxu1 %vm57_vm1, %v14733_v6 }
0x51e6   :  { %19363 = vmatpush3.bf16.msra.mxu1 %v20501_v1  ;;  %18818 = vmatprep.mubr.msk.f32.mxu1 %vm19794_vm0, %v19795_v11 }
0x51e7   :  { %19364 = vmatprep.subr.bf16.mxu1 %v19793_v3 }
0x51ea   :  { %19366 = vmatpush3.bf16.msra.mxu1 %v20521_v13 }
0x51eb   :  { %18821 = vmatprep.subr.mxu1 %v19795_v11 }
0x5293   :  { %v14123_v5 = vpop.f32.mrb[122].mxu0 }
0x5294   :  { %v18706_v21 = vpop.f32.mrb[123].mxu0 }
0x5297   :  { %v14196_v59 = vpop.f32.mrb[182].mxu1 }
0x5298   :  { %v14646_v19 = vrot.slane %v14196_v59, 7  ;;  %v18711_v14 = vpop.f32.mrb[183].mxu1 }
0x529a   :  { %v14647_v61 = vsel %vm3932_vm12, %v14646_v19, %v14123_v5 }
0x529b   :  { %v14269_v23 = vpop.f32.mrb[124].mxu0 }
0x529c   :  { %v14648_v58 = vrot.slane %v14269_v23, 6  ;;  %v18716_v47 = vpop.f32.mrb[125].mxu0 }
0x529e   :  { %v14649_v1 = vsel %vm3935_vm13, %v14648_v58, %v14647_v61 }
0x529f   :  { %v14415_v63 = vpop.f32.mrb[126].mxu0 }
0x52a0   :  { %v14342_v17 = vpop.f32.mrb[184].mxu1  ;;  %v14652_v15 = vrot.slane %v14415_v63, 4  ;;  %v18726_v52 = vpop.f32.mrb[127].mxu0 }
0x52a1   :  { %v14650_v50 = vrot.slane %v14342_v17, 5  ;;  %v18721_v13 = vpop.f32.mrb[185].mxu1 }
0x52a3   :  { %v14651_v2 = vsel %vm3938_vm14, %v14650_v50, %v14649_v1  ;;  %v14561_v22 = vpop.f32.mrb[128].mxu0  ;;  %v16864_v1 = vld [vmem:[%s22341_s2 + $0x30] sm:$0xff] }
0x52a4   :  { %v14653_v62 = vsel %vm3941_vm15, %v14652_v15, %v14651_v2  ;;  %v14488_v4 = vpop.f32.mrb[186].mxu1  ;;  %v14656_v31 = vrot.slane %v14561_v22, 2  ;;  %v18736_v36 = vpop.f32.mrb[129].mxu0 }
0x52a5   :  { %v14654_v8 = vrot.slane %v14488_v4, 3  ;;  %v18731_v42 = vpop.f32.mrb[187].mxu1 }
0x52a7   :  { %v14655_v10 = vsel %vm3944_vm2, %v14654_v8, %v14653_v62 }
0x52a8   :  { %v14657_v49 = vsel %vm3947_vm3, %v14656_v31, %v14655_v10  ;;  %v14634_v27 = vpop.f32.mrb[188].mxu1 }
0x52a9   :  { %v14658_v18 = vrot.slane %v14634_v27, 1  ;;  %v18741_v40 = vpop.f32.mrb[189].mxu1 }
0x52ab   :  { %v14659_v35 = vsel %vm3950_vm4, %v14658_v18, %v14657_v49 }
0x52ac   :  { %18751 = vmatmul.mubr.msk.f32.vlgmr.msra.gmra.mrb[130].mxu0 %vm57_vm1, %v14659_v35 }
0x52ad   :  { %19333 = vmatpush3.bf16.msra.mxu0 %v20823_v60  ;;  %18796 = vmatprep.mubr.msk.f32.mxu0 %vm19794_vm0, %v19795_v11 }
0x52ae   :  { %19334 = vmatprep.subr.bf16.mxu0 %v19793_v3 }
0x52b0   :  { %v14802_v34 = vpop.f32.mrb[190].mxu1 }
0x52b1   :  { %v18763_v38 = vpop.f32.mrb[191].mxu1  ;;  %19336 = vmatpush3.bf16.msra.mxu0 %v20856_v48 }
0x52b2   :  { %19337 = vmatprep.subr.bf16.mxu0 %v19793_v3 }
0x52b5   :  { %19339 = vmatpush3.bf16.msra.mxu0 %v20862_v41 }
0x52b6   :  { %19340 = vmatprep.subr.bf16.mxu0 %v19793_v3 }
0x52b8   :  { %v14974_v0 = vpop.f32.mrb[192].mxu1 }
0x52b9   :  { %v18809_v7 = vpop.f32.mrb[193].mxu1  ;;  %19342 = vmatpush3.bf16.msra.mxu0 %v20872_v44  ;;  %v22165_v44 = vld [vmem:[%s22350_s11] ss:$0 sm:$0xff]  ;;  %s16863_s11 = sld [smem:[#allocation3 + $0x6]] }
0x52ba   :  { %19343 = vmatprep.subr.bf16.mxu0 %v19793_v3 }
0x52bd   :  { %19345 = vmatpush3.bf16.msra.mxu0 %v20882_v33 }
0x52be   :  { %19346 = vmatprep.subr.bf16.mxu0 %v19793_v3 }
0x52bf   :  { %p14901_p11 = scmp.eq.s32.totalorder %s16863_s11, 1 }
0x52c1   :  { %19348 = vmatpush3.bf16.msra.mxu0 %v20892_v26  ;;  %s14904_s8 = scalar_select %p14901_p11, 1, 0 }
0x52c2   :  { %19349 = vmatprep.subr.bf16.mxu0 %v19793_v3 }
0x52c3   :  { %v14905_v47 = vstv %s14904_s8 }
0x52c4   :  { %vm14906_vm7 = vcmp.eq.s32.totalorder %v14905_v47, 1 }
0x52c5   :  { %19351 = vmatpush3.bf16.msra.mxu0 %v20902_v53 }
0x52c6   :  { %19352 = vmatprep.subr.bf16.mxu0 %v19793_v3 }
0x52c9   :  { %19354 = vmatpush3.bf16.msra.mxu0 %v20912_v57 }
0x52ca   :  { %18841 = vmatprep.subr.mxu0 %v19795_v11 }
0x537f   :  { %v14728_v60 = vpop.f32.mrb[130].mxu0 }
0x5380   :  { %v14803_v48 = vadd.f32 %v14802_v34, %v14728_v60  ;;  %v18752_v41 = vpop.f32.mrb[131].mxu0 }
0x5382   :  { %v14806_v33 = vadd.f32 %v22165_v44, %v14803_v48 }
0x5384   :  { %16860 = vst [vmem:[%s22351_s12 + $0x30] sm:$0xff] %v14806_v33  ;;  %14809 = vmax.xlane.f32.xlu1 %v14806_v33 }
0x5411   :  { %v14810_v26 = vpop.xlane.xlu1 %14809 }
0x5412   :  { %vm14811_vm9 = vcmp.eq.f32.partialorder %v14806_v33, %v14810_v26 }
0x5413   :  { %v14812_v53 = vsel %vm14811_vm9, %v20844_v55, 128 }
0x5414   :  { %v14814_v57 = vshra.s32 %v14812_v53, 16  ;;  %v14813_v6 = vand.u32 65535, %v14812_v53 }
0x5416   :  { %v14816_v29 = vcvt.s32.f32 %v14814_v57  ;;  %v14815_v5 = vcvt.s32.f32 %v14813_v6 }
0x5418   :  { %14817 = vmin.xlane.f32.xlu1 %v14816_v29 }
0x54a5   :  { %v14818_v21 = vpop.xlane.xlu1 %14817 }
0x54a6   :  { %vm14819_vm5 = vcmp.eq.f32.partialorder %v14816_v29, %v14818_v21  ;;  %v14824_v19 = vcvt.f32.s32 %v14818_v21 }
0x54a7   :  { %v14820_v59 = vsel %vm14819_vm5, %v14815_v5, inf }
0x54a8   :  { %14821 = vmin.xlane.f32.xlu1 %v14820_v59  ;;  %v14825_v61 = vshll.u32 %v14824_v19, 16 }
0x5535   :  { %v14822_v14 = vpop.xlane.xlu1 %14821 }
0x5536   :  { %v14823_v23 = vcvt.f32.s32 %v14822_v14 }
0x5538   :  { %v14826_v58 = vadd.s32 %v14825_v61, %v14823_v23 }
0x553a   :  { %vm14827_vm6 = vcmp.eq.s32.totalorder %v20844_v55, %v14826_v58 }
0x553b   :  { %18797 = vmatmul.mubr.msk.f32.vlgmr.msra.gmra.mrb[132].mxu0 %vm14827_vm6, %v19799_v25 }
0x553c   :  { %18842 = vmatpush3.xpose.msk.msra.mxu0 %vm57_vm1, %v20648_v56  ;;  %18843 = vmatprep.mubr.msk.f32.mxu0 %vm19794_vm0, %v19795_v11 }
0x553d   :  { %18851 = vmatprep.subr.mxu0 %v19795_v11 }
0x560e   :  { %v14896_v55 = vpop.f32.mrb[132].mxu0 }
0x560f   :  { %v14907_v63 = vsel %vm14906_vm7, %v16864_v1, %v14896_v55  ;;  %v18798_v25 = vpop.f32.mrb[133].mxu0 }
0x5610   :  { %18819 = vmatmul.mubr.msk.f32.vlgmr.msra.gmra.mrb[194].mxu1 %vm57_vm1, %v14907_v63 }
0x5611   :  { %18822 = vmatpush3.xpose.msk.msra.mxu1 %vm57_vm1, %v20602_v24  ;;  %18823 = vmatprep.mubr.msk.f32.mxu1 %vm19794_vm0, %v19795_v11 }
0x5612   :  { %18826 = vmatprep.subr.mxu1 %v19795_v11 }
0x56e3   :  { %v15047_v17 = vpop.f32.mrb[194].mxu1 }
0x56e4   :  { %v15048_v15 = vadd.f32 %v15047_v17, %v14974_v0  ;;  %v18820_v52 = vpop.f32.mrb[195].mxu1 }
0x56e6   :  { %v15051_v50 = vadd.f32 %v21977_v16, %v15048_v15 }
0x56e8   :  { %19731 = vtanh.f32 %v15051_v50  ;;  %v16867_v2 = vmul.f32 -1.442695, %v15051_v50 }
0x56ea   :  { %19733 = vpow2.f32 %v16867_v2 }
0x56f2   :  { %v19732_v13 = vpop.eup %19731 }
0x56f3   :  { %15061 = vrot.lane.b32.xlu1 %v19732_v13, %s19796_s25 }
0x56f4   :  { %v19734_v22 = vpop.eup %19733 }
0x56f5   :  { %v15055_v62 = vadd.f32 1.0, %v19734_v22 }
0x56f7   :  { %19735 = vrcp.f32 %v15055_v62 }
0x5701   :  { %v19736_v4 = vpop.eup %19735 }
0x5702   :  { %v15059_v8 = vmul.f32 %v19736_v4, %v21983_v43 }
0x5765   :  { %v15062_v31 = vpop.permute.xlu1 %15061 }
0x5766   :  { %v15064_v36 = vmul.f32 %v19736_v4, %v15062_v31 }
0x5768   :  { %15066 = vrot.lane.b32.xlu0 %v15064_v36, %s19797_s26 }
0x57da   :  { %v15067_v42 = vpop.permute.xlu0 %15066 }
0x57db   :  { %v15069_v10 = vadd.f32 %v15067_v42, %v15059_v8 }
0x57dd   :  { %19737 = vtanh.f32 %v15069_v10 }
0x57e7   :  { %v19738_v16 = vpop.eup %19737 }
0x57e8   :  { %15072 = vrot.lane.b32.xlu0 %v19738_v16, %s19796_s25 }
0x585a   :  { %v15073_v49 = vpop.permute.xlu0 %15072 }
0x585b   :  { %v22193_v27 = vmul.f32 %v19736_v4, %v15073_v49 }
0x585d   :  { %v15077_v18 = vcombine.high %v22193_v27, %v22193_v27  ;;  %v15084_v40 = vrot.slane %v22193_v27, %v19957_v39 }
0x585f   :  { %v15091_v35 = vrot.slane %v15077_v18, %v19957_v39  ;;  %v15092_v34 = vcombine.high %v15084_v40, %v15084_v40  ;;  %v15100_v43 = vrot.slane %v15084_v40, %v19957_v39 }
0x5861   :  { %v15114_v38 = vrot.slane %v15092_v34, %v19957_v39  ;;  %v15122_v0 = vcombine.high %v15100_v43, %v15100_v43  ;;  %v15129_v7 = vrot.slane %v15100_v43, %v19963_v46  ;;  %v15093_v60 = vcombine.high %v15091_v35, %v15091_v35 }
0x5862   :  { %v15107_v33 = vrot.slane %v15091_v35, %v19957_v39 }
0x5863   :  { %v15207_v48 = vrot.slane %v15114_v38, %v19963_v46  ;;  %v15124_v41 = vcombine.high %v15114_v38, %v15114_v38  ;;  %15130 = vrot.lane.b32.xlu0 %v15129_v7, %s19797_s26  ;;  %v15285_v26 = vrot.slane %v15122_v0, %v19963_v46  ;;  %v15121_v57 = vrot.slane %v15093_v60, %v19957_v39 }
0x5864   :  { %v15441_v29 = vrot.slane %v15107_v33, %v19963_v46  ;;  %v15123_v6 = vcombine.high %v15107_v33, %v15107_v33 }
0x5865   :  { %15208 = vrot.lane.b32.xlu1 %v15207_v48, %s19797_s26  ;;  %v15363_v53 = vrot.slane %v15124_v41, %v19963_v46  ;;  %v15519_v5 = vrot.slane %v15121_v57, %v19963_v46  ;;  %v15125_v21 = vcombine.high %v15121_v57, %v15121_v57 }
0x5866   :  { %v15597_v59 = vrot.slane %v15123_v6, %v19963_v46 }
0x5867   :  { %15286 = vrot.lane.b32.xlu0 %v15285_v26, %s19797_s26  ;;  %v15675_v19 = vrot.slane %v15125_v21, %v19963_v46 }
0x5869   :  { %15364 = vrot.lane.b32.xlu1 %v15363_v53, %s19797_s26 }
0x586b   :  { %15442 = vrot.lane.b32.xlu0 %v15441_v29, %s19797_s26 }
0x586d   :  { %15520 = vrot.lane.b32.xlu1 %v15519_v5, %s19797_s26 }
0x586f   :  { %15598 = vrot.lane.b32.xlu0 %v15597_v59, %s19797_s26 }
0x5871   :  { %15676 = vrot.lane.b32.xlu1 %v15675_v19, %s19797_s26 }
0x58d5   :  { %v15131_v39 = vpop.permute.xlu0 %15130 }
0x58d6   :  { %18824 = vmatmul.mubr.msk.f32.vlgmr.msra.gmra.mrb[196].mxu1 %vm57_vm1, %v15131_v39 }
0x58d7   :  { %18827 = vmatpush3.xpose.msk.msra.mxu1 %vm57_vm1, %v20618_v32  ;;  %v15209_v14 = vpop.permute.xlu1 %15208  ;;  %18828 = vmatprep.mubr.msk.f32.mxu1 %vm19794_vm0, %v19795_v11 }
0x58d8   :  { %18831 = vmatprep.subr.mxu1 %v19795_v11 }
0x58d9   :  { %v15287_v61 = vpop.permute.xlu0 %15286 }
0x58da   :  { %18829 = vmatmul.mubr.msk.f32.vlgmr.msra.gmra.mrb[198].mxu1 %vm57_vm1, %v15209_v14 }
0x58db   :  { %18832 = vmatpush3.xpose.msk.msra.mxu1 %vm57_vm1, %v20644_v45  ;;  %18833 = vmatprep.mubr.msk.f32.mxu1 %vm19794_vm0, %v19795_v11  ;;  %v15365_v46 = vpop.permute.xlu1 %15364 }
0x58dc   :  { %18836 = vmatprep.subr.mxu1 %v19795_v11 }
0x58dd   :  { %v15443_v23 = vpop.permute.xlu0 %15442 }
0x58de   :  { %18834 = vmatmul.mubr.msk.f32.vlgmr.msra.gmra.mrb[200].mxu1 %vm57_vm1, %v15287_v61  ;;  %18844 = vmatmul.mubr.msk.f32.vlgmr.msra.gmra.mrb[134].mxu0 %vm57_vm1, %v15443_v23 }
0x58df   :  { %18837 = vmatpush3.xpose.msk.msra.mxu1 %vm57_vm1, %v20646_v54  ;;  %18852 = vmatpush3.xpose.msk.msra.mxu0 %vm57_vm1, %v20652_v30  ;;  %v15521_v47 = vpop.permute.xlu1 %15520 }
0x58e0   :  { %18838 = vmatprep.mubr.msk.f32.mxu1 %vm19794_vm0, %v19795_v11  ;;  %18846 = vmatprep.subr.mxu1 %v19795_v11 }
0x58e1   :  { %18853 = vmatprep.mubr.msk.f32.mxu0 %vm19794_vm0, %v19795_v11  ;;  %18861 = vmatprep.subr.mxu0 %v19795_v11  ;;  %v15599_v58 = vpop.permute.xlu0 %15598 }
0x58e2   :  { %18839 = vmatmul.mubr.msk.f32.vlgmr.msra.gmra.mrb[202].mxu1 %vm57_vm1, %v15365_v46  ;;  %18854 = vmatmul.mubr.msk.f32.vlgmr.msra.gmra.mrb[136].mxu0 %vm57_vm1, %v15599_v58 }
0x58e3   :  { %18847 = vmatpush3.xpose.msk.msra.mxu1 %vm57_vm1, %v20650_v20  ;;  %18862 = vmatpush3.msra.mxu0 %v20602_v24  ;;  %v15677_v24 = vpop.permute.xlu1 %15676 }
0x58e4   :  { %18848 = vmatprep.mubr.msk.f32.mxu1 %vm19794_vm0, %v19795_v11  ;;  %18856 = vmatprep.subr.mxu1 %v19795_v11 }
0x58e5   :  { %18863 = vmatprep.mubr.msk.f32.mxu0 %vm19794_vm0, %v19795_v11  ;;  %18871 = vmatprep.subr.mxu0 %v19795_v11 }
0x58e6   :  { %18849 = vmatmul.mubr.msk.f32.vlgmr.msra.gmra.mrb[204].mxu1 %vm57_vm1, %v15521_v47 }
0x58e7   :  { %18857 = vmatpush3.xpose.msk.msra.mxu1 %vm57_vm1, %v20654_v12  ;;  %18858 = vmatprep.mubr.msk.f32.mxu1 %vm19794_vm0, %v19795_v11 }
0x58e8   :  { %18866 = vmatprep.subr.mxu1 %v19795_v11 }
0x58ea   :  { %18859 = vmatmul.mubr.msk.f32.vlgmr.msra.gmra.mrb[206].mxu1 %vm57_vm1, %v15677_v24 }
0x58eb   :  { %18867 = vmatpush3.msra.mxu1 %v20618_v32  ;;  %18868 = vmatprep.mubr.msk.f32.mxu1 %vm19794_vm0, %v19795_v11 }
0x58ec   :  { %18876 = vmatprep.subr.mxu1 %v19795_v11 }
0x59a9   :  { %v15200_v1 = vpop.f32.mrb[196].mxu1 }
0x59aa   :  { %v18825_v55 = vpop.f32.mrb[197].mxu1  ;;  %v15750_v63 = vsel %vm3241_vm10, %v15200_v1, -inf }
0x59ab   :  { %15751 = vmax.xlane.f32.xlu0 %v15750_v63 }
0x59ad   :  { %v15278_v25 = vpop.f32.mrb[198].mxu1 }
0x59ae   :  { %v18830_v17 = vpop.f32.mrb[199].mxu1  ;;  %v15753_v15 = vsel %vm3241_vm10, %v15278_v25, -inf }
0x59af   :  { %15754 = vmax.xlane.f32.xlu1 %v15753_v15 }
0x59b1   :  { %v15356_v52 = vpop.f32.mrb[200].mxu1  ;;  %v15512_v50 = vpop.f32.mrb[134].mxu0 }
0x59b2   :  { %v18835_v13 = vpop.f32.mrb[201].mxu1  ;;  %v18845_v2 = vpop.f32.mrb[135].mxu0  ;;  %v15762_v32 = vsel %vm3241_vm10, %v15512_v50, -inf  ;;  %v15756_v22 = vsel %vm3241_vm10, %v15356_v52, -inf }
0x59b3   :  { %15763 = vmax.xlane.f32.xlu1 %v15762_v32  ;;  %15757 = vmax.xlane.f32.xlu0 %v15756_v22 }
0x59b5   :  { %v15434_v62 = vpop.f32.mrb[202].mxu1  ;;  %v15668_v4 = vpop.f32.mrb[136].mxu0 }
0x59b6   :  { %v18840_v31 = vpop.f32.mrb[203].mxu1  ;;  %v18855_v36 = vpop.f32.mrb[137].mxu0  ;;  %v15768_v8 = vsel %vm3241_vm10, %v15668_v4, -inf  ;;  %v15759_v42 = vsel %vm3241_vm10, %v15434_v62, -inf }
0x59b7   :  { %15769 = vmax.xlane.f32.xlu1 %v15768_v8  ;;  %15760 = vmax.xlane.f32.xlu0 %v15759_v42 }
0x59b9   :  { %v15590_v10 = vpop.f32.mrb[204].mxu1 }
0x59ba   :  { %v18850_v16 = vpop.f32.mrb[205].mxu1  ;;  %v15765_v49 = vsel %vm3241_vm10, %v15590_v10, -inf }
0x59bb   :  { %15766 = vmax.xlane.f32.xlu0 %v15765_v49 }
0x59bd   :  { %v15746_v18 = vpop.f32.mrb[206].mxu1 }
0x59be   :  { %v18860_v40 = vpop.f32.mrb[207].mxu1  ;;  %v15771_v35 = vsel %vm3241_vm10, %v15746_v18, -inf }
0x59bf   :  { %15772 = vmax.xlane.f32.xlu0 %v15771_v35 }
0x5a38   :  { %v15752_v34 = vpop.xlane.xlu0 %15751 }
0x5a39   :  { %v15774_v43 = vsub.f32 %v15200_v1, %v15752_v34 }
0x5a3b   :  { %v15782_v38 = vmul.f32 1.442695, %v15774_v43 }
0x5a3c   :  { %v15755_v0 = vpop.xlane.xlu1 %15754 }
0x5a3d   :  { %19739 = vpow2.f32 %v15782_v38  ;;  %v15775_v7 = vsub.f32 %v15278_v25, %v15755_v0 }
0x5a3f   :  { %v15784_v60 = vmul.f32 1.442695, %v15775_v7 }
0x5a40   :  { %v15764_v48 = vpop.xlane.xlu1 %15763  ;;  %v15758_v41 = vpop.xlane.xlu0 %15757 }
0x5a41   :  { %19741 = vpow2.f32 %v15784_v60  ;;  %v15778_v33 = vsub.f32 %v15512_v50, %v15764_v48  ;;  %v15776_v26 = vsub.f32 %v15356_v52, %v15758_v41 }
0x5a43   :  { %v15786_v53 = vmul.f32 1.442695, %v15776_v26  ;;  %v15790_v57 = vmul.f32 1.442695, %v15778_v33 }
0x5a44   :  { %v15770_v29 = vpop.xlane.xlu1 %15769  ;;  %v15761_v6 = vpop.xlane.xlu0 %15760 }
0x5a45   :  { %v15780_v5 = vsub.f32 %v15668_v4, %v15770_v29  ;;  %v15777_v21 = vsub.f32 %v15434_v62, %v15761_v6  ;;  %19743 = vpow2.f32 %v15786_v53 }
0x5a46   :  { %19745 = vpow2.f32 %v15790_v57 }
0x5a47   :  { %v19740_v59 = vpop.eup %19739  ;;  %v15788_v19 = vmul.f32 1.442695, %v15777_v21  ;;  %v15794_v39 = vmul.f32 1.442695, %v15780_v5 }
0x5a48   :  { %v15767_v14 = vpop.xlane.xlu0 %15766  ;;  %v15798_v61 = vsel %vm3241_vm10, %v19740_v59, 0.0 }
0x5a49   :  { %v15779_v46 = vsub.f32 %v15590_v10, %v15767_v14  ;;  %15799 = vadd.xlane.f32.xlu1 %v15798_v61  ;;  %19747 = vpow2.f32 %v15788_v19 }
0x5a4a   :  { %19749 = vpow2.f32 %v15794_v39 }
0x5a4b   :  { %v19742_v23 = vpop.eup %19741  ;;  %v15792_v58 = vmul.f32 1.442695, %v15779_v46 }
0x5a4c   :  { %v15773_v47 = vpop.xlane.xlu0 %15772  ;;  %v15801_v24 = vsel %vm3241_vm10, %v19742_v23, 0.0 }
0x5a4d   :  { %19751 = vpow2.f32 %v15792_v58  ;;  %v15781_v1 = vsub.f32 %v15746_v18, %v15773_v47  ;;  %15802 = vadd.xlane.f32.xlu0 %v15801_v24 }
0x5a4f   :  { %v15796_v55 = vmul.f32 1.442695, %v15781_v1  ;;  %v19744_v63 = vpop.eup %19743 }
0x5a50   :  { %v15804_v25 = vsel %vm3241_vm10, %v19744_v63, 0.0  ;;  %v19746_v17 = vpop.eup %19745 }
0x5a51   :  { %19753 = vpow2.f32 %v15796_v55  ;;  %15805 = vadd.xlane.f32.xlu1 %v15804_v25  ;;  %v15810_v52 = vsel %vm3241_vm10, %v19746_v17, 0.0 }
0x5a53   :  { %v19748_v15 = vpop.eup %19747 }
0x5a54   :  { %v15807_v50 = vsel %vm3241_vm10, %v19748_v15, 0.0  ;;  %v19750_v13 = vpop.eup %19749 }
0x5a55   :  { %15811 = vadd.xlane.f32.xlu1 %v15810_v52  ;;  %15808 = vadd.xlane.f32.xlu0 %v15807_v50  ;;  %v15816_v22 = vsel %vm3241_vm10, %v19750_v13, 0.0 }
0x5a57   :  { %v19752_v2 = vpop.eup %19751 }
0x5a58   :  { %v15813_v32 = vsel %vm3241_vm10, %v19752_v2, 0.0 }
0x5a59   :  { %15817 = vadd.xlane.f32.xlu1 %v15816_v22  ;;  %15814 = vadd.xlane.f32.xlu0 %v15813_v32 }
0x5a5b   :  { %v19754_v62 = vpop.eup %19753 }
0x5a5c   :  { %v15819_v4 = vsel %vm3241_vm10, %v19754_v62, 0.0 }
0x5a5d   :  { %15820 = vadd.xlane.f32.xlu0 %v15819_v4 }
0x5a6a   :  { %16516 = vrot.lane.b32.xlu1 %v22193_v27, %s19797_s26 }
0x5ad6   :  { %v15800_v31 = vpop.xlane.xlu1 %15799 }
0x5ad7   :  { %19755 = vrcp.f32 %v15800_v31 }
0x5ada   :  { %v15803_v36 = vpop.xlane.xlu0 %15802 }
0x5adb   :  { %19757 = vrcp.f32 %v15803_v36 }
0x5ade   :  { %v15806_v8 = vpop.xlane.xlu1 %15805 }
0x5adf   :  { %19759 = vrcp.f32 %v15806_v8 }
0x5ae1   :  { %v19756_v42 = vpop.eup %19755 }
0x5ae2   :  { %v15823_v10 = vmul.f32 %v19756_v42, %v19740_v59  ;;  %v15812_v16 = vpop.xlane.xlu1 %15811  ;;  %v15809_v49 = vpop.xlane.xlu0 %15808 }
0x5ae3   :  { %19761 = vrcp.f32 %v15812_v16 }
0x5ae4   :  { %18864 = vmatmul.mubr.msk.f32.vlgmr.msra.gmra.mrb[138].mxu0 %vm3331_vm11, %v15823_v10  ;;  %19763 = vrcp.f32 %v15809_v49 }
0x5ae5   :  { %v19758_v18 = vpop.eup %19757  ;;  %18872 = vmatpush3.msra.mxu0 %v20644_v45  ;;  %18873 = vmatprep.mubr.msk.f32.mxu0 %vm19794_vm0, %v19795_v11 }
0x5ae6   :  { %v15825_v27 = vmul.f32 %v19758_v18, %v19742_v23  ;;  %18881 = vmatprep.subr.mxu0 %v19795_v11  ;;  %v15818_v40 = vpop.xlane.xlu1 %15817  ;;  %v15815_v35 = vpop.xlane.xlu0 %15814 }
0x5ae7   :  { %19765 = vrcp.f32 %v15818_v40 }
0x5ae8   :  { %18869 = vmatmul.mubr.msk.f32.vlgmr.msra.gmra.mrb[208].mxu1 %vm3331_vm11, %v15825_v27  ;;  %19767 = vrcp.f32 %v15815_v35 }
0x5ae9   :  { %18877 = vmatpush3.msra.mxu1 %v20646_v54  ;;  %18878 = vmatprep.mubr.msk.f32.mxu1 %vm19794_vm0, %v19795_v11  ;;  %v19760_v34 = vpop.eup %19759 }
0x5aea   :  { %18886 = vmatprep.subr.mxu1 %v19795_v11  ;;  %v15827_v45 = vmul.f32 %v19760_v34, %v19744_v63  ;;  %v15821_v43 = vpop.xlane.xlu0 %15820 }
0x5aeb   :  { %19769 = vrcp.f32 %v15821_v43 }
0x5aec   :  { %18874 = vmatmul.mubr.msk.f32.vlgmr.msra.gmra.mrb[140].mxu0 %vm3331_vm11, %v15827_v45 }
0x5aed   :  { %v19762_v38 = vpop.eup %19761  ;;  %18882 = vmatpush3.msra.mxu0 %v20648_v56  ;;  %18883 = vmatprep.mubr.msk.f32.mxu0 %vm19794_vm0, %v19795_v11 }
0x5aee   :  { %v19764_v0 = vpop.eup %19763  ;;  %v15831_v7 = vmul.f32 %v19762_v38, %v19746_v17  ;;  %18891 = vmatprep.subr.mxu0 %v19795_v11 }
0x5aef   :  { %v15829_v54 = vmul.f32 %v19764_v0, %v19748_v15 }
0x5af0   :  { %18884 = vmatmul.mubr.msk.f32.vlgmr.msra.gmra.mrb[142].mxu0 %vm3331_vm11, %v15831_v7 }
0x5af1   :  { %v19766_v60 = vpop.eup %19765  ;;  %18879 = vmatmul.mubr.msk.f32.vlgmr.msra.gmra.mrb[210].mxu1 %vm3331_vm11, %v15829_v54  ;;  %18892 = vmatpush3.msra.mxu0 %v20652_v30 }
0x5af2   :  { %v19768_v48 = vpop.eup %19767  ;;  %v15835_v41 = vmul.f32 %v19766_v60, %v19750_v13  ;;  %18887 = vmatpush3.msra.mxu1 %v20650_v20  ;;  %18888 = vmatprep.mubr.msk.f32.mxu1 %vm19794_vm0, %v19795_v11  ;;  %v16517_v20 = vpop.permute.xlu1 %16516 }
0x5af3   :  { %v15833_v56 = vmul.f32 %v19768_v48, %v19752_v2  ;;  %18893 = vmatprep.mubr.msk.f32.mxu0 %vm19794_vm0, %v19795_v11  ;;  %18896 = vmatprep.subr.mxu1 %v19795_v11 }
0x5af4   :  { %18894 = vmatmul.mubr.msk.f32.vlgmr.msra.gmra.mrb[144].mxu0 %vm3331_vm11, %v15835_v41  ;;  %19367 = vmatprep.subr.bf16.mxu0 %v19793_v3 }
0x5af5   :  { %v19770_v33 = vpop.eup %19769  ;;  %18889 = vmatmul.mubr.msk.f32.vlgmr.msra.gmra.mrb[212].mxu1 %vm3331_vm11, %v15833_v56  ;;  %19369 = vmatpush3.bf16.msra.mxu0 %v20800_v28 }
0x5af6   :  { %v15837_v30 = vmul.f32 %v19770_v33, %v19754_v62  ;;  %18897 = vmatpush3.msra.mxu1 %v20654_v12  ;;  %18898 = vmatprep.mubr.msk.f32.mxu1 %vm19794_vm0, %v19795_v11 }
0x5af7   :  { %19373 = vmatprep.subr.bf16.mxu1 %v19793_v3  ;;  %19370 = vmatprep.subr.bf16.mxu0 %v19793_v3 }
0x5af8   :  { %18909 = vmatprep.mubr.msk.f32.mxu0 %vm19794_vm0, %v19795_v11 }
0x5af9   :  { %18899 = vmatmul.mubr.msk.f32.vlgmr.msra.gmra.mrb[214].mxu1 %vm3331_vm11, %v15837_v30  ;;  %19372 = vmatpush3.bf16.msra.mxu0 %v20810_v51 }
0x5afa   :  { %19375 = vmatpush3.bf16.msra.mxu1 %v20755_v37  ;;  %18920 = vmatprep.mubr.msk.f32.mxu1 %vm19794_vm0, %v19795_v11 }
0x5afb   :  { %19376 = vmatprep.subr.bf16.mxu1 %v19793_v3 }
0x5afe   :  { %19378 = vmatpush3.bf16.msra.mxu1 %v20773_v9 }
0x5b01   :  { %18921 = vmatmul.mubr.msk.f32.vlgmr.msra.gmra.mrb[216].mxu1 %vm57_vm1, %v16517_v20 }
0x5bb7   :  { %v15907_v12 = vpop.f32.mrb[138].mxu0 }
0x5bb8   :  { %v18865_v28 = vpop.f32.mrb[139].mxu0 }
0x5bbb   :  { %v15980_v26 = vpop.f32.mrb[208].mxu1 }
0x5bbc   :  { %v16430_v53 = vrot.slane %v15980_v26, 7  ;;  %v18870_v57 = vpop.f32.mrb[209].mxu1 }
0x5bbe   :  { %v16431_v29 = vsel %vm3932_vm12, %v16430_v53, %v15907_v12 }
0x5bbf   :  { %v16053_v51 = vpop.f32.mrb[140].mxu0 }
0x5bc0   :  { %v16432_v6 = vrot.slane %v16053_v51, 6  ;;  %v18875_v37 = vpop.f32.mrb[141].mxu0 }
0x5bc2   :  { %v16433_v5 = vsel %vm3935_vm13, %v16432_v6, %v16431_v29 }
0x5bc3   :  { %v16199_v11 = vpop.f32.mrb[142].mxu0 }
0x5bc4   :  { %v16126_v21 = vpop.f32.mrb[210].mxu1  ;;  %v16436_v3 = vrot.slane %v16199_v11, 4  ;;  %v18885_v59 = vpop.f32.mrb[143].mxu0 }
0x5bc5   :  { %v16434_v9 = vrot.slane %v16126_v21, 5  ;;  %v18880_v19 = vpop.f32.mrb[211].mxu1 }
0x5bc7   :  { %v16435_v39 = vsel %vm3938_vm14, %v16434_v9, %v16433_v5  ;;  %v16345_v14 = vpop.f32.mrb[144].mxu0 }
0x5bc8   :  { %v16437_v61 = vsel %vm3941_vm15, %v16436_v3, %v16435_v39  ;;  %v16272_v46 = vpop.f32.mrb[212].mxu1  ;;  %v16440_v23 = vrot.slane %v16345_v14, 2  ;;  %v18895_v58 = vpop.f32.mrb[145].mxu0 }
0x5bc9   :  { %v16438_v47 = vrot.slane %v16272_v46, 3  ;;  %v18890_v24 = vpop.f32.mrb[213].mxu1 }
0x5bcb   :  { %v16439_v1 = vsel %vm3944_vm2, %v16438_v47, %v16437_v61 }
0x5bcc   :  { %v16441_v55 = vsel %vm3947_vm3, %v16440_v23, %v16439_v1  ;;  %v16418_v63 = vpop.f32.mrb[214].mxu1 }
0x5bcd   :  { %v16442_v25 = vrot.slane %v16418_v63, 1  ;;  %v18900_v17 = vpop.f32.mrb[215].mxu1 }
0x5bcf   :  { %v16443_v15 = vsel %vm3950_vm4, %v16442_v25, %v16441_v55 }
0x5bd0   :  { %18910 = vmatmul.mubr.msk.f32.vlgmr.msra.gmra.mrb[146].mxu0 %vm57_vm1, %v16443_v15 }
0x5bd4   :  { %v16586_v52 = vpop.f32.mrb[216].mxu1 }
0x5bd5   :  { %v18922_v50 = vpop.f32.mrb[217].mxu1 }
0x5ca3   :  { %v16512_v13 = vpop.f32.mrb[146].mxu0 }
0x5ca4   :  { %v16587_v2 = vadd.f32 %v16586_v52, %v16512_v13  ;;  %v18911_v32 = vpop.f32.mrb[147].mxu0 }
0x5ca6   :  { %v16590_v22 = vadd.f32 %v22165_v44, %v16587_v2 }
0x5ca8   :  { %16894 = vst [vmem:[%s22351_s12 + $0x38] sm:$0xff] %v16590_v22 }

</bundles_post_ra>
